<compile_context>
chip_gen: v7x
topology: tpu7x:2x2x1
jax: 0.10.0
libtpu: 0.0.40
codegen_flags: <defaults>
</compile_context>

<pallas_src>
import math

import jax
import jax.numpy as jnp
import numpy as np
from jax.experimental import pallas as pl
from jax.experimental.pallas import tpu as pltpu

EPS = 1e-5
F32 = jnp.float32
BF16 = jnp.bfloat16


def _elementwise_dtype():
    """bf16 BN/ReLU on chips with a bf16 VPU (v6e/v7x); f32 on v5e and older."""
    try:
        kind = jax.devices()[0].device_kind.lower()
    except Exception:
        return F32
    if any(old in kind for old in ("v2", "v3", "v4", "v5")):
        return F32
    return BF16


EW = _elementwise_dtype()


# --------------------------------------------------------------------------
# Fused kernel: BN1+ReLU -> conv1 (3x3 SAME) -> BN2+ReLU -> conv2 (3x3 SAME)
#               -> residual add, all resident in VMEM.
# --------------------------------------------------------------------------
def _make_kernel(N, H, W, C):
    def kernel(x_ref, w1_ref, w2_ref, s1_ref, h1_ref, s2_ref, h2_ref,
               out_ref, pad_ref):
        # x_ref / out_ref : (N, H, W, C) f32  (NHWC, channels on lanes)
        # w1_ref / w2_ref : (9*C, C)     bf16 im2col weight matrices
        # s1/h1           : (1, 1, 1, C) folded BN1 scale/shift (EW dtype)
        # s2/h2           : (1, C)       folded BN2 scale/shift (EW dtype)
        # pad_ref         : (N, H+2, W_pad, C) bf16 zero-padded activation
        #                   scratch; W_pad is a multiple of 8 (sublane align)

        # Zero the padded scratch once.  The interior is overwritten before
        # each conv; the zero border (and the alignment columns past W+2,
        # which are never read) is shared by both convs.
        pad_ref[...] = jnp.zeros(pad_ref.shape, dtype=pad_ref.dtype)

        def conv3x3(w_ref):
            # im2col: 9 shifted (N, H, W, C) windows of the padded scratch,
            # concatenated along channels (lanes) -> ONE (N*H*W, 9C) x (9C, C)
            # MXU matmul in bf16 with f32 accumulation.
            cols = [pad_ref[:, dy:dy + H, dx:dx + W, :]
                    for dy in range(3) for dx in range(3)]
            patches = jnp.concatenate(cols, axis=-1)          # (N,H,W,9C) bf16
            patches = patches.reshape(N * H * W, 9 * C)       # minor dim kept
            return jnp.dot(patches, w_ref[...],
                           preferred_element_type=F32)        # (N*H*W, C) f32

        x = x_ref[...]                                         # (N,H,W,C) f32

        # ---- BN1 + ReLU (EW dtype) -> bf16 -> padded scratch interior ----
        a1 = jnp.maximum(x.astype(EW) * s1_ref[...] + h1_ref[...], 0.0)
        pad_ref[:, 1:H + 1, 1:W + 1, :] = a1.astype(BF16)

        # ---- conv1 (3x3 SAME) ----
        u = conv3x3(w1_ref)                                    # (N*H*W, C) f32

        # ---- BN2 + ReLU (EW dtype) -> bf16 -> padded scratch interior ----
        a2 = jnp.maximum(u.astype(EW) * s2_ref[...] + h2_ref[...], 0.0)
        pad_ref[:, 1:H + 1, 1:W + 1, :] = a2.astype(BF16).reshape(N, H, W, C)

        # ---- conv2 (3x3 SAME) + residual add ----
        v = conv3x3(w2_ref)                                    # (N*H*W, C) f32
        out_ref[...] = x + v.reshape(N, H, W, C)

    return kernel


# --------------------------------------------------------------------------
# Wrapper / parameter handling
# --------------------------------------------------------------------------
def fold_bn(bn):
    scale = bn["gamma"] * jax.lax.rsqrt(bn["var"] + EPS)
    shift = bn["beta"] - bn["mean"] * scale
    return scale, shift


@jax.jit
def simple_block_forward(x_nchw, params):
    N, C, H, W = x_nchw.shape
    # PyTorch NCHW -> NHWC (channels on the lane dim, which is what the conv
    # matmul needs); this layout is kept end-to-end inside the kernel.
    x = jnp.transpose(x_nchw, (0, 2, 3, 1))

    s1, h1 = fold_bn(params["bn1"])
    s2, h2 = fold_bn(params["bn2"])

    # PyTorch OIHW -> HWIO -> flattened (9*Cin, Cout) bf16 im2col matrix.
    def wmat(w_oihw):
        return jnp.transpose(w_oihw, (2, 3, 1, 0)).reshape(9 * C, C).astype(BF16)

    W_pad = ((W + 2 + 7) // 8) * 8            # sublane-aligned padded width

    inputs = [x, wmat(params["w1"]), wmat(params["w2"]),
              s1.reshape(1, 1, 1, C).astype(EW), h1.reshape(1, 1, 1, C).astype(EW),
              s2.reshape(1, C).astype(EW), h2.reshape(1, C).astype(EW)]

    out = pl.pallas_call(
        _make_kernel(N, H, W, C),
        out_shape=jax.ShapeDtypeStruct((N, H, W, C), F32),
        in_specs=[pl.BlockSpec(memory_space=pltpu.MemorySpace.VMEM)] * len(inputs),
        out_specs=pl.BlockSpec(memory_space=pltpu.MemorySpace.VMEM),
        scratch_shapes=[pltpu.VMEM((N, H + 2, W_pad, C), BF16)],
    )(*inputs)

    return jnp.transpose(out, (0, 3, 1, 2))    # back to NCHW


def init_params(key, filters=64):
    ks = jax.random.split(key, 10)

    def conv_w(k):
        # PyTorch Conv2d weight layout: (out, in, kh, kw)
        return jax.random.normal(k, (filters, filters, 3, 3), F32) / math.sqrt(
            9 * filters)

    def bn(k1, k2, k3, k4):
        return dict(gamma=1.0 + 0.1 * jax.random.normal(k1, (filters,), F32),
                    beta=0.1 * jax.random.normal(k2, (filters,), F32),
                    mean=0.1 * jax.random.normal(k3, (filters,), F32),
                    var=0.5 + jax.random.uniform(k4, (filters,), F32))

    return dict(w1=conv_w(ks[0]), w2=conv_w(ks[1]),
                bn1=bn(ks[2], ks[3], ks[4], ks[5]),
                bn2=bn(ks[6], ks[7], ks[8], ks[9]))


# Pure-JAX reference (for correctness check).  It uses the same elementwise
# dtype (EW) and bf16 conv operands with f32 accumulation as the kernel, so a
# tight tolerance is meaningful (residual differences come only from matmul
# accumulation order / rare bf16 ulp flips).
def ref_forward(x_nchw, p):
    x = jnp.transpose(x_nchw, (0, 2, 3, 1))

    def conv(inp, w_oihw):
        w = jnp.transpose(w_oihw, (2, 3, 1, 0))      # HWIO
        return jax.lax.conv_general_dilated(
            inp.astype(BF16), w.astype(BF16), (1, 1), "SAME",
            dimension_numbers=("NHWC", "HWIO", "NHWC"),
            preferred_element_type=F32)

    def bnrelu(inp, bn):
        s, b = fold_bn(bn)
        return jnp.maximum(inp.astype(EW) * s.astype(EW) + b.astype(EW), 0.0)

    t = conv(bnrelu(x, p["bn1"]), p["w1"])
    t = conv(bnrelu(t, p["bn2"]), p["w2"])
    return jnp.transpose(x + t, (0, 3, 1, 2))


if __name__ == "__main__":
    key = jax.random.PRNGKey(0)
    kx, kp = jax.random.split(key)

    filters, N, H, W = 64, 2, 16, 16                 # module default filters=64
    x = jax.random.normal(kx, (N, filters, H, W), F32)   # NCHW
    params = init_params(kp, filters)

    out = jax.block_until_ready(simple_block_forward(x, params))
    ref = jax.block_until_ready(ref_forward(x, params))

    assert out.shape == x.shape
    np.testing.assert_allclose(np.asarray(out), np.asarray(ref),
                               rtol=5e-3, atol=5e-3)
    print("KERNEL_OK")
</pallas_src>

<mosaic_0001>
module attributes {stable_mosaic.version = 11 : i64} {
  func.func @kernel(%arg0: memref<2x16x16x64xf32, #tpu.memory_space<vmem>>, %arg1: memref<576x64xbf16, #tpu.memory_space<vmem>>, %arg2: memref<576x64xbf16, #tpu.memory_space<vmem>>, %arg3: memref<1x1x1x64xbf16, #tpu.memory_space<vmem>>, %arg4: memref<1x1x1x64xbf16, #tpu.memory_space<vmem>>, %arg5: memref<1x64xbf16, #tpu.memory_space<vmem>>, %arg6: memref<1x64xbf16, #tpu.memory_space<vmem>>, %arg7: memref<2x16x16x64xf32, #tpu.memory_space<vmem>>, %arg8: memref<2x18x24x64xbf16, #tpu.memory_space<vmem>>) attributes {dimension_semantics = [], scalar_prefetch = 0 : i64, scratch_operands = 1 : i64, tpu.core_type = #tpu.core_type<tc>} {
    %cst = arith.constant 0.000000e+00 : bf16
    %0 = vector.broadcast %cst : bf16 to vector<2x18x24x64xbf16>
    %c0 = arith.constant 0 : index
    %c0_0 = arith.constant 0 : index
    %c0_1 = arith.constant 0 : index
    %c0_2 = arith.constant 0 : index
    %1 = vector.load %arg8[%c0, %c0_0, %c0_1, %c0_2] : memref<2x18x24x64xbf16, #tpu.memory_space<vmem>>, vector<2x18x24x64xbf16>
    tpu.vector_store %arg8[%c0, %c0_0, %c0_1, %c0_2], %0 {strides = array<i32>} : memref<2x18x24x64xbf16, #tpu.memory_space<vmem>>, vector<2x18x24x64xbf16>,
    %c0_3 = arith.constant 0 : index
    %c0_4 = arith.constant 0 : index
    %c0_5 = arith.constant 0 : index
    %c0_6 = arith.constant 0 : index
    %2 = vector.load %arg0[%c0_3, %c0_4, %c0_5, %c0_6] : memref<2x16x16x64xf32, #tpu.memory_space<vmem>>, vector<2x16x16x64xf32>
    %3 = arith.truncf %2 : vector<2x16x16x64xf32> to vector<2x16x16x64xbf16>
    %c0_7 = arith.constant 0 : index
    %c0_8 = arith.constant 0 : index
    %c0_9 = arith.constant 0 : index
    %c0_10 = arith.constant 0 : index
    %4 = vector.load %arg3[%c0_7, %c0_8, %c0_9, %c0_10] : memref<1x1x1x64xbf16, #tpu.memory_space<vmem>>, vector<1x1x1x64xbf16>
    %5 = vector.broadcast %4 : vector<1x1x1x64xbf16> to vector<2x16x16x64xbf16>
    %6 = arith.mulf %3, %5 : vector<2x16x16x64xbf16>
    %c0_11 = arith.constant 0 : index
    %c0_12 = arith.constant 0 : index
    %c0_13 = arith.constant 0 : index
    %c0_14 = arith.constant 0 : index
    %7 = vector.load %arg4[%c0_11, %c0_12, %c0_13, %c0_14] : memref<1x1x1x64xbf16, #tpu.memory_space<vmem>>, vector<1x1x1x64xbf16>
    %8 = vector.broadcast %7 : vector<1x1x1x64xbf16> to vector<2x16x16x64xbf16>
    %9 = arith.addf %6, %8 : vector<2x16x16x64xbf16>
    %cst_15 = arith.constant 0.000000e+00 : bf16
    %10 = vector.broadcast %cst_15 : bf16 to vector<2x16x16x64xbf16>
    %11 = arith.maximumf %9, %10 : vector<2x16x16x64xbf16>
    %c0_16 = arith.constant 0 : index
    %c1 = arith.constant 1 : index
    %c1_17 = arith.constant 1 : index
    %c0_18 = arith.constant 0 : index
    %12 = vector.load %arg8[%c0_16, %c1, %c1_17, %c0_18] : memref<2x18x24x64xbf16, #tpu.memory_space<vmem>>, vector<2x16x16x64xbf16>
    tpu.vector_store %arg8[%c0_16, %c1, %c1_17, %c0_18], %11 {strides = array<i32>} : memref<2x18x24x64xbf16, #tpu.memory_space<vmem>>, vector<2x16x16x64xbf16>,
    %c0_19 = arith.constant 0 : index
    %c0_20 = arith.constant 0 : index
    %c0_21 = arith.constant 0 : index
    %c0_22 = arith.constant 0 : index
    %13 = vector.load %arg8[%c0_19, %c0_20, %c0_21, %c0_22] : memref<2x18x24x64xbf16, #tpu.memory_space<vmem>>, vector<2x16x16x64xbf16>
    %c0_23 = arith.constant 0 : index
    %c0_24 = arith.constant 0 : index
    %c1_25 = arith.constant 1 : index
    %c0_26 = arith.constant 0 : index
    %14 = vector.load %arg8[%c0_23, %c0_24, %c1_25, %c0_26] : memref<2x18x24x64xbf16, #tpu.memory_space<vmem>>, vector<2x16x16x64xbf16>
    %c0_27 = arith.constant 0 : index
    %c0_28 = arith.constant 0 : index
    %c2 = arith.constant 2 : index
    %c0_29 = arith.constant 0 : index
    %15 = vector.load %arg8[%c0_27, %c0_28, %c2, %c0_29] : memref<2x18x24x64xbf16, #tpu.memory_space<vmem>>, vector<2x16x16x64xbf16>
    %c0_30 = arith.constant 0 : index
    %c1_31 = arith.constant 1 : index
    %c0_32 = arith.constant 0 : index
    %c0_33 = arith.constant 0 : index
    %16 = vector.load %arg8[%c0_30, %c1_31, %c0_32, %c0_33] : memref<2x18x24x64xbf16, #tpu.memory_space<vmem>>, vector<2x16x16x64xbf16>
    %c0_34 = arith.constant 0 : index
    %c1_35 = arith.constant 1 : index
    %c1_36 = arith.constant 1 : index
    %c0_37 = arith.constant 0 : index
    %17 = vector.load %arg8[%c0_34, %c1_35, %c1_36, %c0_37] : memref<2x18x24x64xbf16, #tpu.memory_space<vmem>>, vector<2x16x16x64xbf16>
    %c0_38 = arith.constant 0 : index
    %c1_39 = arith.constant 1 : index
    %c2_40 = arith.constant 2 : index
    %c0_41 = arith.constant 0 : index
    %18 = vector.load %arg8[%c0_38, %c1_39, %c2_40, %c0_41] : memref<2x18x24x64xbf16, #tpu.memory_space<vmem>>, vector<2x16x16x64xbf16>
    %c0_42 = arith.constant 0 : index
    %c2_43 = arith.constant 2 : index
    %c0_44 = arith.constant 0 : index
    %c0_45 = arith.constant 0 : index
    %19 = vector.load %arg8[%c0_42, %c2_43, %c0_44, %c0_45] : memref<2x18x24x64xbf16, #tpu.memory_space<vmem>>, vector<2x16x16x64xbf16>
    %c0_46 = arith.constant 0 : index
    %c2_47 = arith.constant 2 : index
    %c1_48 = arith.constant 1 : index
    %c0_49 = arith.constant 0 : index
    %20 = vector.load %arg8[%c0_46, %c2_47, %c1_48, %c0_49] : memref<2x18x24x64xbf16, #tpu.memory_space<vmem>>, vector<2x16x16x64xbf16>
    %c0_50 = arith.constant 0 : index
    %c2_51 = arith.constant 2 : index
    %c2_52 = arith.constant 2 : index
    %c0_53 = arith.constant 0 : index
    %21 = vector.load %arg8[%c0_50, %c2_51, %c2_52, %c0_53] : memref<2x18x24x64xbf16, #tpu.memory_space<vmem>>, vector<2x16x16x64xbf16>
    %22 = tpu.concatenate %13, %14, %15, %16, %17, %18, %19, %20, %21 in 3 : vector<2x16x16x64xbf16>, vector<2x16x16x64xbf16>, vector<2x16x16x64xbf16>, vector<2x16x16x64xbf16>, vector<2x16x16x64xbf16>, vector<2x16x16x64xbf16>, vector<2x16x16x64xbf16>, vector<2x16x16x64xbf16>, vector<2x16x16x64xbf16> -> vector<2x16x16x576xbf16>
    %23 = vector.shape_cast %22 : vector<2x16x16x576xbf16> to vector<512x576xbf16>
    %c0_54 = arith.constant 0 : index
    %c0_55 = arith.constant 0 : index
    %24 = vector.load %arg1[%c0_54, %c0_55] : memref<576x64xbf16, #tpu.memory_space<vmem>>, vector<576x64xbf16>
    %cst_56 = arith.constant dense<0.000000e+00> : vector<512x64xf32>
    %25 = tpu.matmul %23, %24, %cst_56 {dimension_numbers = #tpu.dot_dimension_numbers<[1], [0], [0], [1], [0, 0, 1, 1], [], []>} : vector<512x576xbf16>, vector<576x64xbf16>, vector<512x64xf32> -> vector<512x64xf32>
    %26 = arith.truncf %25 : vector<512x64xf32> to vector<512x64xbf16>
    %c0_57 = arith.constant 0 : index
    %c0_58 = arith.constant 0 : index
    %27 = vector.load %arg5[%c0_57, %c0_58] : memref<1x64xbf16, #tpu.memory_space<vmem>>, vector<1x64xbf16>
    %28 = vector.broadcast %27 : vector<1x64xbf16> to vector<512x64xbf16>
    %29 = arith.mulf %26, %28 : vector<512x64xbf16>
    %c0_59 = arith.constant 0 : index
    %c0_60 = arith.constant 0 : index
    %30 = vector.load %arg6[%c0_59, %c0_60] : memref<1x64xbf16, #tpu.memory_space<vmem>>, vector<1x64xbf16>
    %31 = vector.broadcast %30 : vector<1x64xbf16> to vector<512x64xbf16>
    %32 = arith.addf %29, %31 : vector<512x64xbf16>
    %cst_61 = arith.constant 0.000000e+00 : bf16
    %33 = vector.broadcast %cst_61 : bf16 to vector<512x64xbf16>
    %34 = arith.maximumf %32, %33 : vector<512x64xbf16>
    %35 = vector.shape_cast %34 : vector<512x64xbf16> to vector<2x16x16x64xbf16>
    %c0_62 = arith.constant 0 : index
    %c1_63 = arith.constant 1 : index
    %c1_64 = arith.constant 1 : index
    %c0_65 = arith.constant 0 : index
    %36 = vector.load %arg8[%c0_62, %c1_63, %c1_64, %c0_65] : memref<2x18x24x64xbf16, #tpu.memory_space<vmem>>, vector<2x16x16x64xbf16>
    tpu.vector_store %arg8[%c0_62, %c1_63, %c1_64, %c0_65], %35 {strides = array<i32>} : memref<2x18x24x64xbf16, #tpu.memory_space<vmem>>, vector<2x16x16x64xbf16>,
    %c0_66 = arith.constant 0 : index
    %c0_67 = arith.constant 0 : index
    %c0_68 = arith.constant 0 : index
    %c0_69 = arith.constant 0 : index
    %37 = vector.load %arg8[%c0_66, %c0_67, %c0_68, %c0_69] : memref<2x18x24x64xbf16, #tpu.memory_space<vmem>>, vector<2x16x16x64xbf16>
    %c0_70 = arith.constant 0 : index
    %c0_71 = arith.constant 0 : index
    %c1_72 = arith.constant 1 : index
    %c0_73 = arith.constant 0 : index
    %38 = vector.load %arg8[%c0_70, %c0_71, %c1_72, %c0_73] : memref<2x18x24x64xbf16, #tpu.memory_space<vmem>>, vector<2x16x16x64xbf16>
    %c0_74 = arith.constant 0 : index
    %c0_75 = arith.constant 0 : index
    %c2_76 = arith.constant 2 : index
    %c0_77 = arith.constant 0 : index
    %39 = vector.load %arg8[%c0_74, %c0_75, %c2_76, %c0_77] : memref<2x18x24x64xbf16, #tpu.memory_space<vmem>>, vector<2x16x16x64xbf16>
    %c0_78 = arith.constant 0 : index
    %c1_79 = arith.constant 1 : index
    %c0_80 = arith.constant 0 : index
    %c0_81 = arith.constant 0 : index
    %40 = vector.load %arg8[%c0_78, %c1_79, %c0_80, %c0_81] : memref<2x18x24x64xbf16, #tpu.memory_space<vmem>>, vector<2x16x16x64xbf16>
    %c0_82 = arith.constant 0 : index
    %c1_83 = arith.constant 1 : index
    %c1_84 = arith.constant 1 : index
    %c0_85 = arith.constant 0 : index
    %41 = vector.load %arg8[%c0_82, %c1_83, %c1_84, %c0_85] : memref<2x18x24x64xbf16, #tpu.memory_space<vmem>>, vector<2x16x16x64xbf16>
    %c0_86 = arith.constant 0 : index
    %c1_87 = arith.constant 1 : index
    %c2_88 = arith.constant 2 : index
    %c0_89 = arith.constant 0 : index
    %42 = vector.load %arg8[%c0_86, %c1_87, %c2_88, %c0_89] : memref<2x18x24x64xbf16, #tpu.memory_space<vmem>>, vector<2x16x16x64xbf16>
    %c0_90 = arith.constant 0 : index
    %c2_91 = arith.constant 2 : index
    %c0_92 = arith.constant 0 : index
    %c0_93 = arith.constant 0 : index
    %43 = vector.load %arg8[%c0_90, %c2_91, %c0_92, %c0_93] : memref<2x18x24x64xbf16, #tpu.memory_space<vmem>>, vector<2x16x16x64xbf16>
    %c0_94 = arith.constant 0 : index
    %c2_95 = arith.constant 2 : index
    %c1_96 = arith.constant 1 : index
    %c0_97 = arith.constant 0 : index
    %44 = vector.load %arg8[%c0_94, %c2_95, %c1_96, %c0_97] : memref<2x18x24x64xbf16, #tpu.memory_space<vmem>>, vector<2x16x16x64xbf16>
    %c0_98 = arith.constant 0 : index
    %c2_99 = arith.constant 2 : index
    %c2_100 = arith.constant 2 : index
    %c0_101 = arith.constant 0 : index
    %45 = vector.load %arg8[%c0_98, %c2_99, %c2_100, %c0_101] : memref<2x18x24x64xbf16, #tpu.memory_space<vmem>>, vector<2x16x16x64xbf16>
    %46 = tpu.concatenate %37, %38, %39, %40, %41, %42, %43, %44, %45 in 3 : vector<2x16x16x64xbf16>, vector<2x16x16x64xbf16>, vector<2x16x16x64xbf16>, vector<2x16x16x64xbf16>, vector<2x16x16x64xbf16>, vector<2x16x16x64xbf16>, vector<2x16x16x64xbf16>, vector<2x16x16x64xbf16>, vector<2x16x16x64xbf16> -> vector<2x16x16x576xbf16>
    %47 = vector.shape_cast %46 : vector<2x16x16x576xbf16> to vector<512x576xbf16>
    %c0_102 = arith.constant 0 : index
    %c0_103 = arith.constant 0 : index
    %48 = vector.load %arg2[%c0_102, %c0_103] : memref<576x64xbf16, #tpu.memory_space<vmem>>, vector<576x64xbf16>
    %cst_104 = arith.constant dense<0.000000e+00> : vector<512x64xf32>
    %49 = tpu.matmul %47, %48, %cst_104 {dimension_numbers = #tpu.dot_dimension_numbers<[1], [0], [0], [1], [0, 0, 1, 1], [], []>} : vector<512x576xbf16>, vector<576x64xbf16>, vector<512x64xf32> -> vector<512x64xf32>
    %50 = vector.shape_cast %49 : vector<512x64xf32> to vector<2x16x16x64xf32>
    %51 = arith.addf %2, %50 : vector<2x16x16x64xf32>
    %c0_105 = arith.constant 0 : index
    %c0_106 = arith.constant 0 : index
    %c0_107 = arith.constant 0 : index
    %c0_108 = arith.constant 0 : index
    %52 = vector.load %arg7[%c0_105, %c0_106, %c0_107, %c0_108] : memref<2x16x16x64xf32, #tpu.memory_space<vmem>>, vector<2x16x16x64xf32>
    tpu.vector_store %arg7[%c0_105, %c0_106, %c0_107, %c0_108], %51 {strides = array<i32>} : memref<2x16x16x64xf32, #tpu.memory_space<vmem>>, vector<2x16x16x64xf32>,
    return
  }
}

</mosaic_0001>

<bundles_post_ra>
// kernel: simple_block_forward.1
= control target key start
LH: loop header
LB: loop body
LE: loop exit
PB: predicated region body
PF: predicated region fallthrough
CT: control target
= control target key end

     0   :  { %vm28_vm0 = vcmask 519168   ;;  %v237_v1 = vlaneseq  ;;  %v19198_v2 = vmov 0   ;;  %vm505_vm1 = vsmask.f32 256  ;;  %s14631_s18 = smov 64   ;;  %s19190_s0 = inlined_call_operand.vmem [shape: f32[2,16,16,64], index: 0, kind: input, shape index: {}]   ;;  %s19191_s1 = inlined_call_operand.vmem [shape: bf16[576,64], index: 1, kind: input, shape index: {}]   ;;  %s19192_s2 = inlined_call_operand.vmem [shape: bf16[576,64], index: 2, kind: input, shape index: {}]   ;;  %s19193_s3 = inlined_call_operand.vmem [shape: bf16[1,1,1,64], index: 3, kind: input, shape index: {}]   ;;  %s19194_s4 = inlined_call_operand.vmem [shape: bf16[1,1,1,64], index: 4, kind: input, shape index: {}]   ;;  %s19195_s5 = inlined_call_operand.vmem [shape: bf16[1,64], index: 5, kind: input, shape index: {}]   ;;  %s19196_s6 = inlined_call_operand.vmem [shape: bf16[1,64], index: 6, kind: input, shape index: {}]   ;;  %s19197_s7 = inlined_call_operand.hbm [shape: f32[2,16,16,64], index: 7, kind: output, shape index: {}]  }
   0x1   :  { %v14678_v0 = vld [vmem:[%s19193_s3] sm:$0x1]  ;;  %32 = vst.msk [vmem:[#allocation2 + $0xc] sm:$0xf] %vm28_vm0, %v19198_v2  ;;  %33 = vst.msk [vmem:[#allocation2 + $0x10] sm:$0xf] %vm28_vm0, %v19198_v2  ;;  %5350 = vmatprep.subr.bf16.mxu0 %v19198_v2 }
   0x2   :  { %v14687_v3 = vld [vmem:[%s19190_s0] sm:$0xff]  ;;  %v14692_v4 = vld [vmem:[%s19190_s0 + $0x8] sm:$0xff]  ;;  %29 = vst.msk [vmem:[#allocation2] sm:$0xf] %vm28_vm0, %v19198_v2  ;;  %30 = vst.msk [vmem:[#allocation2 + $0x4] sm:$0xf] %vm28_vm0, %v19198_v2  ;;  %v235_v6 = vpack.i.b16 %v14678_v0, %v14678_v0 }
   0x3   :  { %v14697_v5 = vld [vmem:[%s19194_s4] sm:$0x1]  ;;  %31 = vst.msk [vmem:[#allocation2 + $0x8] sm:$0xf] %vm28_vm0, %v19198_v2  ;;  %34 = vst.msk [vmem:[#allocation2 + $0x14] sm:$0xf] %vm28_vm0, %v19198_v2  ;;  %v201_v12 = vpack.c.bf16 %v14692_v4, %v14687_v3 }
   0x4   :  { %35 = vst.msk [vmem:[#allocation2 + $0x18] sm:$0xf] %vm28_vm0, %v19198_v2  ;;  %36 = vst.msk [vmem:[#allocation2 + $0x1c] sm:$0xf] %vm28_vm0, %v19198_v2  ;;  %v238_v7 = vshrl.u32 %v237_v1, 7  ;;  %v275_v8 = vpack.i.b16 %v14697_v5, %v14697_v5  ;;  %v139_v9 = vld [vmem:[%s19190_s0 + $0x10] sm:$0xff] }
   0x5   :  { %37 = vst.msk [vmem:[#allocation2 + $0x20] sm:$0xf] %vm28_vm0, %v19198_v2  ;;  %38 = vst.msk [vmem:[#allocation2 + $0x24] sm:$0xf] %vm28_vm0, %v19198_v2  ;;  %v140_v10 = vld [vmem:[%s19190_s0 + $0x18] sm:$0xff]  ;;  %v141_v11 = vld [vmem:[%s19190_s0 + $0x20] sm:$0xff] }
   0x6   :  { %39 = vst.msk [vmem:[#allocation2 + $0x28] sm:$0xf] %vm28_vm0, %v19198_v2  ;;  %40 = vst.msk [vmem:[#allocation2 + $0x2c] sm:$0xf] %vm28_vm0, %v19198_v2  ;;  %v14928_v13 = vsub.s32 0, %v238_v7  ;;  %v202_v14 = vpack.c.bf16 %v140_v10, %v139_v9  ;;  %v142_v15 = vld [vmem:[%s19190_s0 + $0x28] sm:$0xff] }
   0x7   :  { %41 = vst.msk [vmem:[#allocation2 + $0x30] sm:$0xf] %vm28_vm0, %v19198_v2  ;;  %42 = vst.msk [vmem:[#allocation2 + $0x34] sm:$0xf] %vm28_vm0, %v19198_v2  ;;  %v143_v16 = vld [vmem:[%s19190_s0 + $0x30] sm:$0xff]  ;;  %v203_v17 = vpack.c.bf16 %v142_v15, %v141_v11  ;;  %v144_v18 = vld [vmem:[%s19190_s0 + $0x38] sm:$0xff] }
   0x8   :  { %43 = vst.msk [vmem:[#allocation2 + $0x38] sm:$0xf] %vm28_vm0, %v19198_v2  ;;  %44 = vst.msk [vmem:[#allocation2 + $0x3c] sm:$0xf] %vm28_vm0, %v19198_v2  ;;  %v145_v19 = vld [vmem:[%s19190_s0 + $0x40] sm:$0xff]  ;;  %v146_v20 = vld [vmem:[%s19190_s0 + $0x48] sm:$0xff]  ;;  %v14946_v21 = vrot.slane %v235_v6, %v14928_v13  ;;  %v14949_v22 = vrot.slane %v275_v8, %v14928_v13  ;;  %v204_v23 = vpack.c.bf16 %v144_v18, %v143_v16 }
   0x9   :  { %45 = vst.msk [vmem:[#allocation2 + $0x40] sm:$0xf] %vm28_vm0, %v19198_v2  ;;  %46 = vst.msk [vmem:[#allocation2 + $0x44] sm:$0xf] %vm28_vm0, %v19198_v2  ;;  %v205_v24 = vpack.c.bf16 %v146_v20, %v145_v19  ;;  %v1378_v26 = vld [vmem:[#allocation2] sm:$0xf] }
   0xa   :  { %47 = vst.msk [vmem:[#allocation2 + $0x48] sm:$0xf] %vm28_vm0, %v19198_v2  ;;  %48 = vst.msk [vmem:[#allocation2 + $0x4c] sm:$0xf] %vm28_vm0, %v19198_v2  ;;  %v241_v25 = vmul.bf16 %v14946_v21, %v201_v12  ;;  %v1379_v27 = vld [vmem:[#allocation2 + $0x4] sm:$0xf]  ;;  %v242_v28 = vmul.bf16 %v14946_v21, %v202_v14  ;;  %v243_v29 = vmul.bf16 %v14946_v21, %v203_v17 }
   0xb   :  { %49 = vst.msk [vmem:[#allocation2 + $0x50] sm:$0xf] %vm28_vm0, %v19198_v2  ;;  %50 = vst.msk [vmem:[#allocation2 + $0x54] sm:$0xf] %vm28_vm0, %v19198_v2  ;;  %v244_v30 = vmul.bf16 %v14946_v21, %v204_v23  ;;  %v14955_v31 = vcombine.low %v1378_v26, %v1379_v27  ;;  %v245_v33 = vmul.bf16 %v14946_v21, %v205_v24  ;;  %v13709_v34 = vld [vmem:[%s19191_s1] sm:$0xff]   ;;  %v14970_v39 = vld [vmem:[%s19190_s0 + $0x50] sm:$0xff] }
   0xc   :  { %51 = vst.msk [vmem:[#allocation2 + $0x58] sm:$0xf] %vm28_vm0, %v19198_v2  ;;  %52 = vst.msk [vmem:[#allocation2 + $0x5c] sm:$0xf] %vm28_vm0, %v19198_v2  ;;  %v281_v35 = vadd.bf16 %v14949_v22, %v241_v25  ;;  %v282_v36 = vadd.bf16 %v14949_v22, %v242_v28  ;;  %v283_v37 = vadd.bf16 %v14949_v22, %v243_v29  ;;  %v14975_v40 = vld [vmem:[%s19190_s0 + $0x58] sm:$0xff]  ;;  %5351 = vmatpush1.bf16.msra.mxu0 %v13709_v34  ;;  %vm1156_vm4 = vcmask 516096  }
   0xd   :  { %53 = vst.msk [vmem:[#allocation2 + $0x60] sm:$0xf] %vm28_vm0, %v19198_v2  ;;  %54 = vst.msk [vmem:[#allocation2 + $0x64] sm:$0xf] %vm28_vm0, %v19198_v2  ;;  %v284_v38 = vadd.bf16 %v14949_v22, %v244_v30  ;;  %vm506_vm2 = vsmask.f32 4368  ;;  %v285_v42 = vadd.bf16 %v14949_v22, %v245_v33  ;;  %5352 = vmatprep.subr.bf16.mxu0 %v19198_v2  ;;  %v206_v49 = vpack.c.bf16 %v14975_v40, %v14970_v39 }
   0xe   :  { %55 = vst.msk [vmem:[#allocation2 + $0x68] sm:$0xf] %vm28_vm0, %v19198_v2  ;;  %56 = vst.msk [vmem:[#allocation2 + $0x6c] sm:$0xf] %vm28_vm0, %v19198_v2  ;;  %vm1150_vm3 = vsmask.f32 7938  ;;  %v313_v43 = vmax.bf16 %v19198_v2, %v281_v35  ;;  %v314_v44 = vmax.bf16 %v19198_v2, %v282_v36  ;;  %v315_v45 = vmax.bf16 %v19198_v2, %v283_v37 }
   0xf   :  { %57 = vst.msk [vmem:[#allocation2 + $0x70] sm:$0xf] %vm28_vm0, %v19198_v2  ;;  %58 = vst.msk [vmem:[#allocation2 + $0x74] sm:$0xf] %vm28_vm0, %v19198_v2  ;;  %v2023_v41 = vshll.u32 %v14955_v31, 16  ;;  %v2021_v46 = vshrl.u32 %v14955_v31, 16  ;;  %v14986_v48 = vmax.bf16 %v19198_v2, %v284_v38  ;;  %v14995_v57 = vmax.bf16 %v19198_v2, %v285_v42 }
  0x10   :  { %59 = vst.msk [vmem:[#allocation2 + $0x78] sm:$0xf] %vm28_vm0, %v19198_v2  ;;  %60 = vst.msk [vmem:[#allocation2 + $0x7c] sm:$0xf] %vm28_vm0, %v19198_v2  ;;  %v12363_v50 = vcombine.low %v313_v43, %v313_v43  ;;  %v12364_v51 = vcombine.high %v313_v43, %v313_v43  ;;  %v12365_v52 = vcombine.low %v314_v44, %v314_v44  ;;  %v19378_v62 = vmov 0  ;;  %v13711_v6 = vld [vmem:[%s19191_s1 + $0x8] sm:$0xff]  }
  0x11   :  { %61 = vst.msk [vmem:[#allocation2 + $0x80] sm:$0xf] %vm28_vm0, %v19198_v2  ;;  %62 = vst.msk [vmem:[#allocation2 + $0x84] sm:$0xf] %vm28_vm0, %v19198_v2  ;;  %v12366_v53 = vcombine.high %v314_v44, %v314_v44  ;;  %v14990_v54 = vrot.slane %v2023_v41, 1  ;;  %v12367_v55 = vcombine.low %v315_v45, %v315_v45  ;;  %v14992_v56 = vcombine.high %v315_v45, %v315_v45  ;;  %v13714_v25 = vld [vmem:[%s19191_s1 + $0x10] sm:$0xff]  }
  0x12   :  { %63 = vst.msk [vmem:[#allocation2 + $0x88] sm:$0xf] %vm28_vm0, %v19198_v2  ;;  %64 = vst.msk [vmem:[#allocation2 + $0x8c] sm:$0xf] %vm28_vm0, %v19198_v2  ;;  %v509_v58 = vshrl.u32 %v12363_v50, 16  ;;  %v512_v59 = vshll.u32 %v12363_v50, 16  ;;  %v15005_v5 = vcombine.low %v14986_v48, %v14986_v48  ;;  %5353 = vmatpush1.bf16.msra.mxu0 %v13711_v6  ;;  %v246_v6 = vmul.bf16 %v14946_v21, %v206_v49 }
  0x13   :  { %65 = vst.msk [vmem:[#allocation2 + $0x90] sm:$0xf] %vm28_vm0, %v19198_v2  ;;  %66 = vst.msk [vmem:[#allocation2 + $0x94] sm:$0xf] %vm28_vm0, %v19198_v2  ;;  %v517_v60 = vshrl.u32 %v12364_v51, 16  ;;  %v520_v61 = vshll.u32 %v12364_v51, 16  ;;  %5354 = vmatprep.subr.bf16.mxu0 %v19198_v2  ;;  %v12370_v51 = vcombine.high %v14986_v48, %v14986_v48  ;;  %v15079_v40 = vcombine.high %v14995_v57, %v14995_v57 }
  0x14   :  { %67 = vst.msk [vmem:[#allocation2 + $0x98] sm:$0xf] %vm28_vm0, %v19198_v2  ;;  %68 = vst.msk [vmem:[#allocation2 + $0x9c] sm:$0xf] %vm28_vm0, %v19198_v2  ;;  %v1152_v63 = vld [vmem:[#allocation2 + $0xc] sm:$0xf] }
  0x15   :  { %69 = vst.msk [vmem:[#allocation2 + $0xa0] sm:$0xf] %vm28_vm0, %v19198_v2  ;;  %70 = vst.msk [vmem:[#allocation2 + $0xa4] sm:$0xf] %vm28_vm0, %v19198_v2  ;;  %v526_v0 = vshrl.u32 %v12365_v52, 16  ;;  %v529_v1 = vshll.u32 %v12365_v52, 16 }
  0x16   :  { %71 = vst.msk [vmem:[#allocation2 + $0xa8] sm:$0xf] %vm28_vm0, %v19198_v2  ;;  %72 = vst.msk [vmem:[#allocation2 + $0xac] sm:$0xf] %vm28_vm0, %v19198_v2  ;;  %v534_v3 = vshrl.u32 %v12366_v53, 16  ;;  %v511_v7 = vrot.slane %v509_v58, 7  ;;  %5355 = vmatpush1.bf16.msra.mxu0 %v13714_v25 }
  0x17   :  { %73 = vst.msk [vmem:[#allocation2 + $0xb0] sm:$0xf] %vm28_vm0, %v19198_v2  ;;  %74 = vst.msk [vmem:[#allocation2 + $0xb4] sm:$0xf] %vm28_vm0, %v19198_v2  ;;  %v1158_v4 = vld [vmem:[#allocation2 + $0x14] sm:$0x1]  ;;  %5356 = vmatprep.subr.bf16.mxu0 %v19198_v2 }
  0x18   :  { %75 = vst.msk [vmem:[#allocation2 + $0xb8] sm:$0xf] %vm28_vm0, %v19198_v2  ;;  %76 = vst.msk [vmem:[#allocation2 + $0xbc] sm:$0xf] %vm28_vm0, %v19198_v2  ;;  %v519_v8 = vrot.slane %v517_v60, 7  ;;  %v19381_v9 = vmov 0  ;;  %v514_v18 = vor.u32 %v512_v59, %v511_v7 }
  0x19   :  { %77 = vst.msk [vmem:[#allocation2 + $0xc0] sm:$0xf] %vm28_vm0, %v19198_v2  ;;  %78 = vst.msk [vmem:[#allocation2 + $0xc4] sm:$0xf] %vm28_vm0, %v19198_v2  ;;  %v537_v10 = vshll.u32 %v12366_v53, 16  ;;  %v543_v11 = vshrl.u32 %v12367_v55, 16 }
  0x1a   :  { %79 = vst.msk [vmem:[#allocation2 + $0xc8] sm:$0xf] %vm28_vm0, %v19198_v2  ;;  %80 = vst.msk [vmem:[#allocation2 + $0xcc] sm:$0xf] %vm28_vm0, %v19198_v2  ;;  %v19384_v12 = vmov 0  ;;  %v528_v14 = vrot.slane %v526_v0, 7  ;;  %v522_v20 = vor.u32 %v520_v61, %v519_v8  ;;  %v12371_v61 = vcombine.low %v14995_v57, %v14995_v57 }
  0x1b   :  { %81 = vst.msk [vmem:[#allocation2 + $0xd0] sm:$0xf] %vm28_vm0, %v19198_v2  ;;  %82 = vst.msk [vmem:[#allocation2 + $0xd4] sm:$0xf] %vm28_vm0, %v19198_v2  ;;  %v536_v15 = vrot.slane %v534_v3, 7  ;;  %v546_v16 = vshll.u32 %v12367_v55, 16 }
  0x1c   :  { %83 = vst.msk [vmem:[#allocation2 + $0xd8] sm:$0xf] %vm28_vm0, %v19198_v2  ;;  %84 = vst.msk [vmem:[#allocation2 + $0xdc] sm:$0xf] %vm28_vm0, %v19198_v2  ;;  %v551_v17 = vshrl.u32 %v14992_v56, 16  ;;  %v515_v19 = vrot.slane %v511_v7, 4  ;;  %v531_v26 = vor.u32 %v529_v1, %v528_v14 }
  0x1d   :  { %85 = vst.msk [vmem:[#allocation2 + $0xe0] sm:$0xf] %vm28_vm0, %v19198_v2  ;;  %86 = vst.msk [vmem:[#allocation2 + $0xe4] sm:$0xf] %vm28_vm0, %v19198_v2  ;;  %v1161_v23 = vld [vmem:[#allocation2 + $0x18] sm:$0xf]  ;;  %v539_v28 = vor.u32 %v537_v10, %v536_v15 }
  0x1e   :  { %87 = vst.msk [vmem:[#allocation2 + $0xe8] sm:$0xf] %vm28_vm0, %v19198_v2  ;;  %88 = vst.msk [vmem:[#allocation2 + $0xec] sm:$0xf] %vm28_vm0, %v19198_v2  ;;  %v524_v24 = vrot.slane %v519_v8, 4  ;;  %v532_v27 = vrot.slane %v528_v14, 4 }
  0x1f   :  { %89 = vst.msk [vmem:[#allocation2 + $0xf0] sm:$0xf] %vm28_vm0, %v19198_v2  ;;  %90 = vst.msk [vmem:[#allocation2 + $0xf4] sm:$0xf] %vm28_vm0, %v19198_v2  ;;  %v545_v29 = vrot.slane %v543_v11, 7  ;;  %v553_v36 = vrot.slane %v551_v17, 7 }
  0x20   :  { %91 = vst.msk [vmem:[#allocation2 + $0xf8] sm:$0xf] %vm28_vm0, %v19198_v2  ;;  %92 = vst.msk [vmem:[#allocation2 + $0xfc] sm:$0xf] %vm28_vm0, %v19198_v2  ;;  %v1168_v30 = vld [vmem:[#allocation2 + $0x24] sm:$0xf] }
  0x21   :  { %93 = vst.msk [vmem:[#allocation2 + $0x100] sm:$0xf] %vm28_vm0, %v19198_v2  ;;  %94 = vst.msk [vmem:[#allocation2 + $0x104] sm:$0xf] %vm28_vm0, %v19198_v2  ;;  %v1165_v37 = vld [vmem:[#allocation2 + $0x20] sm:$0x1]  ;;  %v548_v42 = vor.u32 %v546_v16, %v545_v29 }
  0x22   :  { %95 = vst.msk [vmem:[#allocation2 + $0x108] sm:$0xf] %vm28_vm0, %v19198_v2  ;;  %96 = vst.msk [vmem:[#allocation2 + $0x10c] sm:$0xf] %vm28_vm0, %v19198_v2  ;;  %vm2019_vm8 = vsmask.f32 7424 }
  0x23   :  { %97 = vst.msk [vmem:[#allocation2 + $0x110] sm:$0xf] %vm28_vm0, %v19198_v2  ;;  %98 = vst.msk [vmem:[#allocation2 + $0x114] sm:$0xf] %vm28_vm0, %v19198_v2  ;;  %v549_v43 = vrot.slane %v545_v29, 4  ;;  %v13716_v44 = vld [vmem:[%s19191_s1 + $0x18] sm:$0xff]   ;;  %v286_v29 = vadd.bf16 %v14949_v22, %v246_v6 }
  0x24   :  { %99 = vst.msk [vmem:[#allocation2 + $0x118] sm:$0xf] %vm28_vm0, %v19198_v2  ;;  %100 = vst.msk [vmem:[#allocation2 + $0x11c] sm:$0xf] %vm28_vm0, %v19198_v2  ;;  %v554_v45 = vshll.u32 %v14992_v56, 16  ;;  %v541_v50 = vrot.slane %v536_v15, 4  ;;  %5357 = vmatpush1.bf16.msra.mxu0 %v13716_v44 }
  0x25   :  { %101 = vst.msk [vmem:[#allocation2 + $0x120] sm:$0xf] %vm28_vm0, %v19198_v2  ;;  %102 = vst.msk [vmem:[#allocation2 + $0x124] sm:$0xf] %vm28_vm0, %v19198_v2  ;;  %v560_v52 = vshrl.u32 %v15005_v5, 16  ;;  %v563_v58 = vshll.u32 %v15005_v5, 16  ;;  %5358 = vmatprep.subr.bf16.mxu0 %v19198_v2 }
  0x26   :  { %103 = vst.msk [vmem:[#allocation2 + $0x128] sm:$0xf] %vm28_vm0, %v19198_v2  ;;  %104 = vst.msk [vmem:[#allocation2 + $0x12c] sm:$0xf] %vm28_vm0, %v19198_v2  ;;  %v1172_v53 = vld [vmem:[#allocation2 + $0x2c] sm:$0x1]  ;;  %v556_v56 = vor.u32 %v554_v45, %v553_v36 }
  0x27   :  { %105 = vst.msk [vmem:[#allocation2 + $0x130] sm:$0xf] %vm28_vm0, %v19198_v2  ;;  %106 = vst.msk [vmem:[#allocation2 + $0x134] sm:$0xf] %vm28_vm0, %v19198_v2  ;;  %v1175_v59 = vld [vmem:[#allocation2 + $0x30] sm:$0xf] }
  0x28   :  { %107 = vst.msk [vmem:[#allocation2 + $0x138] sm:$0xf] %vm28_vm0, %v19198_v2  ;;  %108 = vst.msk [vmem:[#allocation2 + $0x13c] sm:$0xf] %vm28_vm0, %v19198_v2  ;;  %v558_v60 = vrot.slane %v553_v36, 4  ;;  %v568_v0 = vshrl.u32 %v12370_v51, 16 }
  0x29   :  { %109 = vst.msk [vmem:[#allocation2 + $0x140] sm:$0xf] %vm28_vm0, %v19198_v2  ;;  %110 = vst.msk [vmem:[#allocation2 + $0x144] sm:$0xf] %vm28_vm0, %v19198_v2  ;;  %v13719_v1 = vld [vmem:[%s19191_s1 + $0x20] sm:$0xff]   ;;  %v571_v3 = vshll.u32 %v12370_v51, 16 }
  0x2a   :  { %111 = vst.msk [vmem:[#allocation2 + $0x148] sm:$0xf] %vm28_vm0, %v19198_v2  ;;  %112 = vst.msk [vmem:[#allocation2 + $0x14c] sm:$0xf] %vm28_vm0, %v19198_v2  ;;  %v577_v5 = vshrl.u32 %v12371_v61, 16  ;;  %v15065_v11 = vrot.slane %v568_v0, 7  ;;  %5359 = vmatpush1.bf16.msra.mxu0 %v13719_v1 }
  0x2b   :  { %113 = vst.msk [vmem:[#allocation2 + $0x150] sm:$0xf] %vm28_vm0, %v19198_v2  ;;  %114 = vst.msk [vmem:[#allocation2 + $0x154] sm:$0xf] %vm28_vm0, %v19198_v2  ;;  %v149_v14 = vld [vmem:[%s19190_s0 + $0x60] sm:$0xff]  ;;  %v150_v15 = vld [vmem:[%s19190_s0 + $0x68] sm:$0xff]  ;;  %5360 = vmatprep.subr.bf16.mxu0 %v19198_v2 }
  0x2c   :  { %115 = vst.msk [vmem:[#allocation2 + $0x158] sm:$0xf] %vm28_vm0, %v19198_v2  ;;  %116 = vst.msk [vmem:[#allocation2 + $0x15c] sm:$0xf] %vm28_vm0, %v19198_v2  ;;  %v15081_v49 = vrot.slane %v577_v5, 7  ;;  %v580_v16 = vshll.u32 %v12371_v61, 16 }
  0x2d   :  { %117 = vst.msk [vmem:[#allocation2 + $0x160] sm:$0xf] %vm28_vm0, %v19198_v2  ;;  %118 = vst.msk [vmem:[#allocation2 + $0x164] sm:$0xf] %vm28_vm0, %v19198_v2  ;;  %v1182_v17 = vld [vmem:[#allocation2 + $0x3c] sm:$0xf] }
  0x2e   :  { %119 = vst.msk [vmem:[#allocation2 + $0x168] sm:$0xf] %vm28_vm0, %v19198_v2  ;;  %120 = vst.msk [vmem:[#allocation2 + $0x16c] sm:$0xf] %vm28_vm0, %v19198_v2  ;;  %v585_v36 = vshrl.u32 %v15079_v40, 16  ;;  %v152_v51 = vld [vmem:[%s19190_s0 + $0x78] sm:$0xff] }
  0x2f   :  { %121 = vst.msk [vmem:[#allocation2 + $0x170] sm:$0xf] %vm28_vm0, %v19198_v2  ;;  %122 = vst.msk [vmem:[#allocation2 + $0x174] sm:$0xf] %vm28_vm0, %v19198_v2  ;;  %vm2564_vm9 = vcmask 1046528   ;;  %vm4517_vm10 = vcmask 523264  }
  0x30   :  { %123 = vst.msk [vmem:[#allocation2 + $0x178] sm:$0xf] %vm28_vm0, %v19198_v2  ;;  %124 = vst.msk [vmem:[#allocation2 + $0x17c] sm:$0xf] %vm28_vm0, %v19198_v2 }
  0x31   :  { %125 = vst.msk [vmem:[#allocation2 + $0x180] sm:$0xf] %vm28_vm0, %v19198_v2  ;;  %126 = vst.msk [vmem:[#allocation2 + $0x184] sm:$0xf] %vm28_vm0, %v19198_v2 }
  0x32   :  { %127 = vst.msk [vmem:[#allocation2 + $0x188] sm:$0xf] %vm28_vm0, %v19198_v2  ;;  %128 = vst.msk [vmem:[#allocation2 + $0x18c] sm:$0xf] %vm28_vm0, %v19198_v2 }
  0x33   :  { %129 = vst.msk [vmem:[#allocation2 + $0x190] sm:$0xf] %vm28_vm0, %v19198_v2  ;;  %130 = vst.msk [vmem:[#allocation2 + $0x194] sm:$0xf] %vm28_vm0, %v19198_v2 }
  0x34   :  { %131 = vst.msk [vmem:[#allocation2 + $0x198] sm:$0xf] %vm28_vm0, %v19198_v2  ;;  %132 = vst.msk [vmem:[#allocation2 + $0x19c] sm:$0xf] %vm28_vm0, %v19198_v2 }
  0x35   :  { %133 = vst.msk [vmem:[#allocation2 + $0x1a0] sm:$0xf] %vm28_vm0, %v19198_v2  ;;  %134 = vst.msk [vmem:[#allocation2 + $0x1a4] sm:$0xf] %vm28_vm0, %v19198_v2 }
  0x36   :  { %135 = vst.msk [vmem:[#allocation2 + $0x1a8] sm:$0xf] %vm28_vm0, %v19198_v2  ;;  %136 = vst.msk [vmem:[#allocation2 + $0x1ac] sm:$0xf] %vm28_vm0, %v19198_v2 }
  0x37   :  { %19377 = vst [vmem:[#allocation6_spill] sm:$0xff] %v14928_v13  ;;  %v14957_v32 = vld [vmem:[#allocation2 + $0x8] ss:$0 sps:$4 sm:$0x11]   ;;  %vm14999_vm5 = vmor %vm505_vm1, %vm506_vm2 }
  0x38   :  { %v2028_v47 = vshll.u32 %v14957_v32, 16  ;;  %v19379_v62 = vsel %vm14999_vm5, 4294967295, %v19378_v62  ;;  %vm15012_vm6 = vmand %vm28_vm0, %vm1150_vm3  ;;  %v523_v33 = vsel %vm14999_vm5, %v515_v19, %v522_v20  ;;  %v540_v38 = vsel %vm14999_vm5, %v532_v27, %v539_v28 }
  0x39   :  { %19380 = vst [vmem:[#allocation7_spill] sm:$0xff] %v19379_v62  ;;  %v19382_v9 = vsel %vm15012_vm6, 4294967295, %v19381_v9  ;;  %vm15018_vm7 = vmand %vm1156_vm4, %vm505_vm1  ;;  %v1153_v34 = vsel %vm15012_vm6, %v514_v18, %v1152_v63  ;;  %v1162_v41 = vsel %vm15012_vm6, %v531_v26, %v1161_v23  ;;  %v1169_v55 = vsel %vm15012_vm6, %v548_v42, %v1168_v30  ;;  %v13721_v18 = vld [vmem:[%s19191_s1 + $0x28] sm:$0xff]  }
  0x3a   :  { %19383 = vst [vmem:[#allocation8_spill] sm:$0xff] %v19382_v9  ;;  %v19385_v12 = vsel %vm15018_vm7, 4294967295, %v19384_v12  ;;  %v1159_v35 = vsel %vm15018_vm7, %v524_v24, %v1158_v4  ;;  %1154 = vst [vmem:[#allocation2 + $0xc] sm:$0xf] %v1153_v34  ;;  %v1166_v48 = vsel %vm15018_vm7, %v541_v50, %v1165_v37  ;;  %v562_v63 = vrot.slane %v560_v52, 7  ;;  %v151_v50 = vld [vmem:[%s19190_s0 + $0x70] sm:$0xff]  ;;  %5361 = vmatpush1.bf16.msra.mxu0 %v13721_v18 }
  0x3b   :  { %19386 = vst [vmem:[#allocation9_spill] sm:$0xff] %v19385_v12  ;;  %1155 = vst.msk [vmem:[#allocation2 + $0x10] sm:$0xf] %vm28_vm0, %v523_v33  ;;  %v1173_v4 = vsel %vm15018_vm7, %v558_v60, %v1172_v53  ;;  %v557_v7 = vsel %vm14999_vm5, %v549_v43, %v556_v56  ;;  %v2030_v39 = vrot.slane %v2028_v47, 1  ;;  %v2026_v32 = vor.u32 %v14990_v54, %v2021_v46 }
  0x3c   :  { %1160 = vst [vmem:[#allocation2 + $0x14] sm:$0x1] %v1159_v35  ;;  %1163 = vst [vmem:[#allocation2 + $0x18] sm:$0xf] %v1162_v41  ;;  %v565_v8 = vor.u32 %v563_v58, %v562_v63  ;;  %v566_v10 = vrot.slane %v562_v63, 4  ;;  %v573_v23 = vor.u32 %v571_v3, %v15065_v11  ;;  %v582_v28 = vor.u32 %v580_v16, %v15081_v49 }
  0x3d   :  { %1164 = vst.msk [vmem:[#allocation2 + $0x1c] sm:$0xf] %vm28_vm0, %v540_v38  ;;  %1170 = vst [vmem:[#allocation2 + $0x24] sm:$0xf] %v1169_v55  ;;  %v207_v34 = vpack.c.bf16 %v150_v15, %v149_v14  ;;  %v13724_v38 = vld [vmem:[%s19191_s1 + $0x30] sm:$0xff]   ;;  %v2031_v41 = vsel %vm2019_vm8, %v2026_v32, %v2030_v39  ;;  %v588_v58 = vshll.u32 %v15079_v40, 16  ;;  %v318_v60 = vmax.bf16 %v19198_v2, %v286_v29 }
  0x3e   :  { %1167 = vst [vmem:[#allocation2 + $0x20] sm:$0x1] %v1166_v48  ;;  %1174 = vst [vmem:[#allocation2 + $0x2c] sm:$0x1] %v1173_v4  ;;  %v1176_v57 = vsel %vm15012_vm6, %v565_v8, %v1175_v59  ;;  %v574_v33 = vsel %vm14999_vm5, %v566_v10, %v573_v23  ;;  %v1183_v37 = vsel %vm15012_vm6, %v582_v28, %v1182_v17  ;;  %v1179_v59 = vld [vmem:[#allocation2 + $0x38] sm:$0x1]  ;;  %5362 = vmatprep.subr.bf16.mxu0 %v19198_v2 }
  0x3f   :  { %1171 = vst.msk [vmem:[#allocation2 + $0x28] sm:$0xf] %vm28_vm0, %v557_v7  ;;  %1177 = vst [vmem:[#allocation2 + $0x30] sm:$0xf] %v1176_v57  ;;  %v583_v63 = vrot.slane %v15081_v49, 4  ;;  %v15129_v0 = vmul.bf16 %v14946_v21, %v207_v34  ;;  %v15139_v14 = vrot.slane %v585_v36, 7  ;;  %v12373_v16 = vcombine.low %v318_v60, %v318_v60  ;;  %5363 = vmatpush1.bf16.msra.mxu0 %v13724_v38 }
  0x40   :  { %1178 = vst.msk [vmem:[#allocation2 + $0x34] sm:$0xf] %vm28_vm0, %v574_v33  ;;  %1184 = vst [vmem:[#allocation2 + $0x3c] sm:$0xf] %v1183_v37  ;;  %v575_v15 = vrot.slane %v15065_v11, 4  ;;  %v208_v17 = vpack.c.bf16 %v152_v51, %v151_v50  ;;  %v12374_v23 = vcombine.high %v318_v60, %v318_v60  ;;  %5364 = vmatprep.subr.bf16.mxu0 %v19198_v2  ;;  %v153_v34 = vld [vmem:[%s19190_s0 + $0x80] sm:$0xff] }
  0x41   :  { %v1506_v19 = vld [vmem:[#allocation2 + $0xc] sm:$0xf]  ;;  %v590_v32 = vor.u32 %v588_v58, %v15139_v14  ;;  %v594_v37 = vshrl.u32 %v12373_v16, 16  ;;  %v287_v38 = vadd.bf16 %v14949_v22, %v15129_v0  ;;  %v1189_v51 = vld [vmem:[#allocation2 + $0x48] sm:$0xf]  ;;  %v597_v58 = vshll.u32 %v12373_v16, 16 }
  0x42   :  { %v1507_v20 = vld [vmem:[#allocation2 + $0x10] sm:$0xf]  ;;  %v1380_v47 = vld [vmem:[#allocation2 + $0xc] sm:$0xf]  ;;  %v13729_v0 = vld [vmem:[%s19191_s1 + $0x40] sm:$0xff]  }
  0x43   :  { %v15092_v24 = vcombine.low %v1506_v19, %v1507_v20  ;;  %v1508_v25 = vld [vmem:[#allocation2 + $0x18] sm:$0xf]  ;;  %v1381_v27 = vld [vmem:[#allocation2 + $0x10] sm:$0xf] }
  0x44   :  { %v1509_v26 = vld [vmem:[#allocation2 + $0x1c] sm:$0xf]  ;;  %v15098_v46 = vcombine.low %v1380_v47, %v1381_v27  ;;  %v13693_v54 = vld [vmem:[#allocation2 + $0x14] ss:$0 sps:$4 sm:$0x11]   ;;  %v1180_v47 = vsel %vm15018_vm7, %v575_v15, %v1179_v59  ;;  %v602_v59 = vshrl.u32 %v12374_v23, 16 }
  0x45   :  { %19387 = vst [vmem:[#allocation10_spill] sm:$0xff] %v15092_v24  ;;  %v15096_v30 = vcombine.low %v1508_v25, %v1509_v26  ;;  %2821 = vrot.lane.b32.xlu0 %v15092_v24, %s14631_s18  ;;  %v1382_v35 = vld [vmem:[#allocation2 + $0x18] sm:$0xf]  ;;  %v1510_v44 = vld [vmem:[#allocation2 + $0x24] sm:$0xf]  ;;  %v2040_v52 = vshll.u32 %v13693_v54, 16  ;;  %v591_v54 = vsel %vm14999_vm5, %v583_v63, %v590_v32 }
  0x46   :  { %v2033_v42 = vshrl.u32 %v15098_v46, 16  ;;  %v2035_v43 = vshll.u32 %v15098_v46, 16  ;;  %v1383_v45 = vld [vmem:[#allocation2 + $0x1c] sm:$0xf]  ;;  %v1384_v55 = vld [vmem:[#allocation2 + $0x24] sm:$0xf] }
  0x47   :  { %19388 = vst [vmem:[#allocation11_spill] sm:$0xff] %v15096_v30  ;;  %2823 = vrot.lane.b32.xlu1 %v15096_v30, %s14631_s18  ;;  %v15123_v53 = vcombine.low %v1382_v35, %v1383_v45  ;;  %v1511_v56 = vld [vmem:[#allocation2 + $0x28] sm:$0xf]  ;;  %v2042_v1 = vrot.slane %v2040_v52, 1  ;;  %v1512_v8 = vld [vmem:[#allocation2 + $0x30] sm:$0xf] }
  0x48   :  { %v2037_v61 = vrot.slane %v2035_v43, 1  ;;  %v1385_v48 = vld [vmem:[#allocation2 + $0x28] sm:$0xf]  ;;  %v15133_v3 = vcombine.low %v1510_v44, %v1511_v56  ;;  %v13696_v4 = vld [vmem:[#allocation2 + $0x20] ss:$0 sps:$4 sm:$0x11]  }
  0x49   :  { %2404 = vrot.lane.b32.xlu0 %v2031_v41, %s14631_s18  ;;  %v2045_v5 = vshrl.u32 %v15123_v53, 16  ;;  %v2047_v6 = vshll.u32 %v15123_v53, 16  ;;  %v15137_v10 = vcombine.low %v1384_v55, %v1385_v48  ;;  %v2052_v40 = vshll.u32 %v13696_v4, 16  ;;  %v1386_v49 = vld [vmem:[#allocation2 + $0x30] sm:$0xf]  ;;  %v154_v35 = vld [vmem:[%s19190_s0 + $0x88] sm:$0xff] }
  0x4a   :  { %v2038_v7 = vor.u32 %v2037_v61, %v2033_v42  ;;  %v1513_v19 = vld [vmem:[#allocation2 + $0x34] sm:$0xf]  ;;  %v13699_v20 = vld [vmem:[#allocation2 + $0x2c] ss:$0 sps:$4 sm:$0x11]   ;;  %v248_v41 = vmul.bf16 %v14946_v21, %v208_v17  ;;  %v13726_v42 = vld [vmem:[%s19191_s1 + $0x38] sm:$0xff]   ;;  %v209_v60 = vpack.c.bf16 %v154_v35, %v153_v34 }
  0x4b   :  { %v2049_v39 = vrot.slane %v2047_v6, 1  ;;  %v2054_v57 = vrot.slane %v2052_v40, 1  ;;  %v15150_v25 = vcombine.low %v1512_v8, %v1513_v19  ;;  %v2057_v26 = vshrl.u32 %v15137_v10, 16  ;;  %1181 = vst [vmem:[#allocation2 + $0x38] sm:$0x1] %v1180_v47  ;;  %5365 = vmatpush1.bf16.msra.mxu0 %v13726_v42  ;;  %v13731_v32 = vld [vmem:[%s19191_s1 + $0x48] sm:$0xff]  }
  0x4c   :  { %v2043_v18 = vsel %vm2019_vm8, %v2038_v7, %v2042_v1  ;;  %v1387_v27 = vld [vmem:[#allocation2 + $0x34] sm:$0xf]  ;;  %v2059_v28 = vshll.u32 %v15137_v10, 16  ;;  %v2064_v29 = vshll.u32 %v13699_v20, 16  ;;  %1185 = vst.msk [vmem:[#allocation2 + $0x40] sm:$0xf] %vm28_vm0, %v591_v54  ;;  %v319_v8 = vmax.bf16 %v19198_v2, %v287_v38  ;;  %5366 = vmatprep.subr.bf16.mxu0 %v19198_v2 }
  0x4d   :  { %2406 = vrot.lane.b32.xlu1 %v2043_v18, %s14631_s18  ;;  %2825 = vrot.lane.b32.xlu0 %v15133_v3, %s14631_s18  ;;  %v2050_v11 = vor.u32 %v2049_v39, %v2045_v5  ;;  %v15156_v33 = vcombine.low %v1386_v49, %v1387_v27  ;;  %v1186_v52 = vld [vmem:[#allocation2 + $0x44] sm:$0x1]  ;;  %v596_v55 = vrot.slane %v594_v37, 7  ;;  %v605_v48 = vshll.u32 %v12374_v23, 16  ;;  %v1514_v1 = vld [vmem:[#allocation2 + $0x3c] sm:$0xf] }
  0x4e   :  { %v2061_v43 = vrot.slane %v2059_v28, 1  ;;  %v2066_v44 = vrot.slane %v2064_v29, 1  ;;  %v592_v63 = vrot.slane %v15139_v14, 4  ;;  %v604_v6 = vrot.slane %v602_v59, 7  ;;  %v1388_v7 = vld [vmem:[#allocation2 + $0x3c] sm:$0xf] }
  0x4f   :  { %v2055_v36 = vsel %vm2019_vm8, %v2050_v11, %v2054_v57  ;;  %v2069_v45 = vshrl.u32 %v15156_v33, 16  ;;  %v2071_v50 = vshll.u32 %v15156_v33, 16  ;;  %v599_v4 = vor.u32 %v597_v58, %v596_v55  ;;  %v1193_v20 = vld [vmem:[#allocation2 + $0x50] sm:$0x1]  ;;  %5367 = vmatpush1.bf16.msra.mxu0 %v13729_v0  ;;  %v1196_v59 = vld [vmem:[#allocation2 + $0x54] sm:$0xf] }
  0x50   :  { %v2062_v61 = vor.u32 %v2061_v43, %v2057_v26  ;;  %v600_v5 = vrot.slane %v596_v55, 4  ;;  %v1187_v14 = vsel %vm15018_vm7, %v592_v63, %v1186_v52  ;;  %v288_v49 = vadd.bf16 %v14949_v22, %v248_v41  ;;  %5368 = vmatprep.subr.bf16.mxu0 %v19198_v2  ;;  %v155_v43 = vld [vmem:[%s19190_s0 + $0x90] sm:$0xff]  ;;  %v13815_v62 = vld [vmem:[#allocation2 + $0x20] ss:$0 sps:$4 sm:$0x11]  }
  0x51   :  { %2408 = vrot.lane.b32.xlu1 %v2055_v36, %s14631_s18  ;;  %2827 = vrot.lane.b32.xlu0 %v15150_v25, %s14631_s18  ;;  %v2073_v56 = vrot.slane %v2071_v50, 1  ;;  %v607_v16 = vor.u32 %v605_v48, %v604_v6  ;;  %v1190_v17 = vsel %vm15012_vm6, %v599_v4, %v1189_v51  ;;  %1188 = vst [vmem:[#allocation2 + $0x44] sm:$0x1] %v1187_v14  ;;  %v609_v57 = vrot.slane %v604_v6, 4  ;;  %v13736_v4 = vld [vmem:[%s19191_s1 + $0x58] sm:$0xff]  }
  0x52   :  { %v2067_v15 = vsel %vm2019_vm8, %v2062_v61, %v2066_v44  ;;  %v13702_v39 = vld [vmem:[#allocation2 + $0x38] ss:$0 sps:$4 sm:$0x11]   ;;  %v12375_v18 = vcombine.low %v319_v8, %v319_v8  ;;  %v12376_v19 = vcombine.high %v319_v8, %v319_v8  ;;  %1191 = vst [vmem:[#allocation2 + $0x48] sm:$0xf] %v1190_v17  ;;  %v320_v26 = vmax.bf16 %v19198_v2, %v288_v49 }
  0x53   :  { %v2074_v40 = vor.u32 %v2073_v56, %v2069_v45  ;;  %v1515_v47 = vld [vmem:[#allocation2 + $0x40] sm:$0xf]  ;;  %v2076_v23 = vshll.u32 %v13702_v39, 16  ;;  %v249_v27 = vmul.bf16 %v14946_v21, %v209_v60  ;;  %v608_v29 = vsel %vm14999_vm5, %v600_v5, %v607_v16  ;;  %v156_v44 = vld [vmem:[%s19190_s0 + $0x98] sm:$0xff]  ;;  %v13734_v45 = vld [vmem:[%s19191_s1 + $0x50] sm:$0xff]   ;;  %5369 = vmatpush1.bf16.msra.mxu0 %v13731_v32 }
  0x54   :  { %v1389_v11 = vld [vmem:[#allocation2 + $0x40] sm:$0xf]  ;;  %v15195_v28 = vcombine.low %v1514_v1, %v1515_v47  ;;  %v611_v34 = vshrl.u32 %v12375_v18, 16  ;;  %1192 = vst.msk [vmem:[#allocation2 + $0x4c] sm:$0xf] %vm28_vm0, %v608_v29  ;;  %v614_v36 = vshll.u32 %v12375_v18, 16  ;;  %v1194_v55 = vsel %vm15018_vm7, %v609_v57, %v1193_v20  ;;  %5370 = vmatprep.subr.bf16.mxu0 %v19198_v2 }
  0x55   :  { %2410 = vrot.lane.b32.xlu1 %v2067_v15, %s14631_s18  ;;  %v15199_v54 = vcombine.low %v1388_v7, %v1389_v11  ;;  %v2078_v35 = vrot.slane %v2076_v23, 1  ;;  %v619_v37 = vshrl.u32 %v12376_v19, 16  ;;  %v622_v38 = vshll.u32 %v12376_v19, 16  ;;  %1195 = vst [vmem:[#allocation2 + $0x50] sm:$0x1] %v1194_v55  ;;  %v158_v55 = vld [vmem:[%s19190_s0 + $0xa8] sm:$0xff] }
  0x56   :  { %19389 = vst [vmem:[#allocation12_spill] sm:$0xff] %v15195_v28  ;;  %2829 = vrot.lane.b32.xlu0 %v15195_v28, %s14631_s18  ;;  %v613_v51 = vrot.slane %v611_v34, 7  ;;  %v12377_v60 = vcombine.low %v320_v26, %v320_v26  ;;  %v12378_v61 = vcombine.high %v320_v26, %v320_v26  ;;  %v289_v1 = vadd.bf16 %v14949_v22, %v249_v27  ;;  %v1203_v26 = vld [vmem:[#allocation2 + $0x60] sm:$0xf]  ;;  %v1200_v27 = vld [vmem:[#allocation2 + $0x5c] sm:$0x1] }
  0x57   :  { %v2081_v41 = vshrl.u32 %v15199_v54, 16  ;;  %v2083_v42 = vshll.u32 %v15199_v54, 16  ;;  %v2079_v50 = vsel %vm2019_vm8, %v2074_v40, %v2078_v35  ;;  %v621_v52 = vrot.slane %v619_v37, 7  ;;  %5371 = vmatpush1.bf16.msra.mxu0 %v13734_v45 }
  0x58   :  { %v13705_v56 = vld [vmem:[#allocation2 + $0x44] ss:$0 sps:$4 sm:$0x11]   ;;  %v616_v48 = vor.u32 %v614_v36, %v613_v51  ;;  %v617_v63 = vrot.slane %v613_v51, 4  ;;  %v628_v8 = vshrl.u32 %v12377_v60, 16  ;;  %v631_v15 = vshll.u32 %v12377_v60, 16  ;;  %5372 = vmatprep.subr.bf16.mxu0 %v19198_v2 }
  0x59   :  { %2412 = vrot.lane.b32.xlu1 %v2079_v50, %s14631_s18  ;;  %v2085_v58 = vrot.slane %v2083_v42, 1  ;;  %v624_v0 = vor.u32 %v622_v38, %v621_v52  ;;  %v1516_v5 = vld [vmem:[#allocation2 + $0x48] sm:$0xf]  ;;  %v210_v39 = vpack.c.bf16 %v156_v44, %v155_v43  ;;  %v2088_v40 = vshll.u32 %v13705_v56, 16  ;;  %v13739_v42 = vld [vmem:[%s19191_s1 + $0x60] sm:$0xff]  }
  0x5a   :  { %v1390_v7 = vld [vmem:[#allocation2 + $0x48] sm:$0xf]  ;;  %v1197_v49 = vsel %vm15012_vm6, %v616_v48, %v1196_v59  ;;  %v636_v16 = vshrl.u32 %v12378_v61, 16  ;;  %v630_v19 = vrot.slane %v628_v8, 7  ;;  %v639_v20 = vshll.u32 %v12378_v61, 16 }
  0x5b   :  { %v2086_v6 = vor.u32 %v2085_v58, %v2081_v41  ;;  %v625_v14 = vsel %vm14999_vm5, %v617_v63, %v624_v0  ;;  %v1517_v17 = vld [vmem:[#allocation2 + $0x4c] sm:$0xf]  ;;  %1198 = vst [vmem:[#allocation2 + $0x54] sm:$0xf] %v1197_v49  ;;  %v321_v32 = vmax.bf16 %v19198_v2, %v289_v1  ;;  %v2090_v23 = vrot.slane %v2088_v40, 1  ;;  %5373 = vmatpush1.bf16.msra.mxu0 %v13736_v4 }
  0x5c   :  { %1199 = vst.msk [vmem:[#allocation2 + $0x58] sm:$0xf] %vm28_vm0, %v625_v14  ;;  %v1391_v18 = vld [vmem:[#allocation2 + $0x4c] sm:$0xf]  ;;  %v15232_v47 = vcombine.low %v1516_v5, %v1517_v17  ;;  %v638_v57 = vrot.slane %v636_v16, 7  ;;  %v633_v29 = vor.u32 %v631_v15, %v630_v19  ;;  %v634_v34 = vrot.slane %v630_v19, 4  ;;  %5374 = vmatprep.subr.bf16.mxu0 %v19198_v2 }
  0x5d   :  { %v15234_v11 = vcombine.low %v1390_v7, %v1391_v18  ;;  %v626_v35 = vrot.slane %v621_v52, 4  ;;  %v12379_v36 = vcombine.low %v321_v32, %v321_v32  ;;  %v2091_v37 = vsel %vm2019_vm8, %v2086_v6, %v2090_v23  ;;  %v13708_v43 = vld [vmem:[#allocation2 + $0x50] ss:$0 sps:$4 sm:$0x11]   ;;  %v157_v52 = vld [vmem:[%s19190_s0 + $0xa0] sm:$0xff]  ;;  %v13741_v1 = vld [vmem:[%s19191_s1 + $0x68] sm:$0xff]  }
  0x5e   :  { %19390 = vst [vmem:[#allocation13_spill] sm:$0xff] %v15232_v47  ;;  %2831 = vrot.lane.b32.xlu0 %v15232_v47, %s14631_s18  ;;  %v250_v41 = vmul.bf16 %v14946_v21, %v210_v39  ;;  %2414 = vrot.lane.b32.xlu1 %v2091_v37, %s14631_s18  ;;  %v641_v45 = vor.u32 %v639_v20, %v638_v57  ;;  %v1207_v61 = vld [vmem:[#allocation2 + $0x68] sm:$0x1]  ;;  %v2100_v48 = vshll.u32 %v13708_v43, 16  ;;  %v643_v0 = vrot.slane %v638_v57, 4  ;;  %v160_v23 = vld [vmem:[%s19190_s0 + $0xb8] sm:$0xff] }
  0x5f   :  { %v2093_v38 = vshrl.u32 %v15234_v11, 16  ;;  %v2095_v44 = vshll.u32 %v15234_v11, 16  ;;  %v1204_v50 = vsel %vm15012_vm6, %v633_v29, %v1203_v26  ;;  %v1201_v51 = vsel %vm15018_vm7, %v626_v35, %v1200_v27  ;;  %5375 = vmatpush1.bf16.msra.mxu0 %v13739_v42  ;;  %v1210_v16 = vld [vmem:[#allocation2 + $0x6c] sm:$0xf]  ;;  %v161_v27 = vld [vmem:[%s19190_s0 + $0xc0] sm:$0xff] }
  0x60   :  { %1205 = vst [vmem:[#allocation2 + $0x60] sm:$0xf] %v1204_v50  ;;  %1202 = vst [vmem:[#allocation2 + $0x5c] sm:$0x1] %v1201_v51  ;;  %v12380_v58 = vcombine.high %v321_v32, %v321_v32  ;;  %v645_v59 = vshrl.u32 %v12379_v36, 16  ;;  %v648_v60 = vshll.u32 %v12379_v36, 16  ;;  %v642_v63 = vsel %vm14999_vm5, %v634_v34, %v641_v45  ;;  %5376 = vmatprep.subr.bf16.mxu0 %v19198_v2 }
  0x61   :  { %v2097_v56 = vrot.slane %v2095_v44, 1  ;;  %1206 = vst.msk [vmem:[#allocation2 + $0x64] sm:$0xf] %vm28_vm0, %v642_v63  ;;  %v290_v7 = vadd.bf16 %v14949_v22, %v250_v41  ;;  %v211_v8 = vpack.c.bf16 %v158_v55, %v157_v52  ;;  %v2102_v40 = vrot.slane %v2100_v48, 1  ;;  %v159_v32 = vld [vmem:[%s19190_s0 + $0xb0] sm:$0xff]  ;;  %v162_v29 = vld [vmem:[%s19190_s0 + $0xc8] sm:$0xff] }
  0x62   :  { %v1518_v4 = vld [vmem:[#allocation2 + $0x54] sm:$0xf]  ;;  %v647_v49 = vrot.slane %v645_v59, 7  ;;  %v653_v18 = vshrl.u32 %v12380_v58, 16  ;;  %v656_v19 = vshll.u32 %v12380_v58, 16  ;;  %v1208_v20 = vsel %vm15018_vm7, %v643_v0, %v1207_v61 }
  0x63   :  { %v1519_v5 = vld [vmem:[#allocation2 + $0x58] sm:$0xf]  ;;  %v1392_v6 = vld [vmem:[#allocation2 + $0x54] sm:$0xf]  ;;  %v2098_v39 = vor.u32 %v2097_v56, %v2093_v38  ;;  %1209 = vst [vmem:[#allocation2 + $0x68] sm:$0x1] %v1208_v20  ;;  %5377 = vmatpush1.bf16.msra.mxu0 %v13741_v1  ;;  %v322_v43 = vmax.bf16 %v19198_v2, %v290_v7  ;;  %v251_v44 = vmul.bf16 %v14946_v21, %v211_v8 }
  0x64   :  { %v15264_v15 = vcombine.low %v1518_v4, %v1519_v5  ;;  %v1393_v14 = vld [vmem:[#allocation2 + $0x58] sm:$0xf]  ;;  %v650_v26 = vor.u32 %v648_v60, %v647_v49  ;;  %v651_v36 = vrot.slane %v647_v49, 4  ;;  %v655_v37 = vrot.slane %v653_v18, 7  ;;  %v13744_v38 = vld [vmem:[%s19191_s1 + $0x70] sm:$0xff]   ;;  %5378 = vmatprep.subr.bf16.mxu0 %v19198_v2 }
  0x65   :  { %v15267_v17 = vcombine.low %v1392_v6, %v1393_v14  ;;  %v2103_v57 = vsel %vm2019_vm8, %v2098_v39, %v2102_v40  ;;  %v1214_v55 = vld [vmem:[#allocation2 + $0x74] sm:$0x1]  ;;  %v212_v58 = vpack.c.bf16 %v160_v23, %v159_v32  ;;  %v213_v59 = vpack.c.bf16 %v162_v29, %v161_v27  ;;  %v13746_v7 = vld [vmem:[%s19191_s1 + $0x78] sm:$0xff]  }
  0x66   :  { %19391 = vst [vmem:[#allocation14_spill] sm:$0xff] %v15264_v15  ;;  %2833 = vrot.lane.b32.xlu0 %v15264_v15, %s14631_s18  ;;  %2416 = vrot.lane.b32.xlu1 %v2103_v57, %s14631_s18  ;;  %v1211_v42 = vsel %vm15012_vm6, %v650_v26, %v1210_v16  ;;  %v658_v51 = vor.u32 %v656_v19, %v655_v37  ;;  %v660_v63 = vrot.slane %v655_v37, 4  ;;  %v1217_v29 = vld [vmem:[#allocation2 + $0x78] sm:$0xf] }
  0x67   :  { %v2105_v34 = vshrl.u32 %v15267_v17, 16  ;;  %v2107_v35 = vshll.u32 %v15267_v17, 16  ;;  %v1520_v41 = vld [vmem:[#allocation2 + $0x60] sm:$0xf]  ;;  %1212 = vst [vmem:[#allocation2 + $0x6c] sm:$0xf] %v1211_v42  ;;  %v12381_v56 = vcombine.low %v322_v43, %v322_v43  ;;  %v12382_v48 = vcombine.high %v322_v43, %v322_v43  ;;  %5379 = vmatpush1.bf16.msra.mxu0 %v13744_v38 }
  0x68   :  { %v13713_v45 = vld [vmem:[#allocation2 + $0x5c] ss:$0 sps:$4 sm:$0x11]   ;;  %v1394_v52 = vld [vmem:[#allocation2 + $0x60] sm:$0xf]  ;;  %v291_v0 = vadd.bf16 %v14949_v22, %v251_v44  ;;  %v659_v6 = vsel %vm14999_vm5, %v651_v36, %v658_v51  ;;  %5380 = vmatprep.subr.bf16.mxu0 %v19198_v2  ;;  %v252_v18 = vmul.bf16 %v14946_v21, %v212_v58  ;;  %v1215_v57 = vsel %vm15018_vm7, %v660_v63, %v1214_v55 }
  0x69   :  { %v2109_v50 = vrot.slane %v2107_v35, 1  ;;  %v1521_v60 = vld [vmem:[#allocation2 + $0x64] sm:$0xf]  ;;  %v2112_v5 = vshll.u32 %v13713_v45, 16  ;;  %1213 = vst.msk [vmem:[#allocation2 + $0x70] sm:$0xf] %vm28_vm0, %v659_v6  ;;  %v253_v35 = vmul.bf16 %v14946_v21, %v213_v59 }
  0x6a   :  { %v1395_v61 = vld [vmem:[#allocation2 + $0x64] sm:$0xf]  ;;  %v15298_v1 = vcombine.low %v1520_v41, %v1521_v60  ;;  %v662_v39 = vshrl.u32 %v12381_v56, 16  ;;  %v665_v40 = vshll.u32 %v12381_v56, 16  ;;  %v670_v14 = vshrl.u32 %v12382_v48, 16 }
  0x6b   :  { %v2110_v4 = vor.u32 %v2109_v50, %v2105_v34  ;;  %v15306_v8 = vcombine.low %v1394_v52, %v1395_v61  ;;  %v2114_v49 = vrot.slane %v2112_v5, 1  ;;  %v673_v16 = vshll.u32 %v12382_v48, 16  ;;  %v13718_v19 = vld [vmem:[#allocation2 + $0x68] ss:$0 sps:$4 sm:$0x11]   ;;  %5381 = vmatpush1.bf16.msra.mxu0 %v13746_v7 }
  0x6c   :  { %19392 = vst [vmem:[#allocation15_spill] sm:$0xff] %v15298_v1  ;;  %2835 = vrot.lane.b32.xlu0 %v15298_v1, %s14631_s18  ;;  %v664_v23 = vrot.slane %v662_v39, 7  ;;  %v672_v27 = vrot.slane %v670_v14, 7  ;;  %1216 = vst [vmem:[#allocation2 + $0x74] sm:$0x1] %v1215_v57  ;;  %v323_v34 = vmax.bf16 %v19198_v2, %v291_v0  ;;  %v2124_v37 = vshll.u32 %v13718_v19, 16  ;;  %5639 = vmatprep.subr.bf16.mxu0 %v19198_v2 }
  0x6d   :  { %v2117_v20 = vshrl.u32 %v15306_v8, 16  ;;  %v2119_v32 = vshll.u32 %v15306_v8, 16  ;;  %v2115_v26 = vsel %vm2019_vm8, %v2110_v4, %v2114_v49  ;;  %v1221_v42 = vld [vmem:[#allocation2 + $0x80] sm:$0x1]  ;;  %v292_v60 = vadd.bf16 %v14949_v22, %v252_v18  ;;  %v1478_v1 = vld [vmem:[#allocation2 + $0x30] sm:$0xe] }
  0x6e   :  { %2418 = vrot.lane.b32.xlu1 %v2115_v26, %s14631_s18  ;;  %v667_v38 = vor.u32 %v665_v40, %v664_v23  ;;  %v668_v41 = vrot.slane %v664_v23, 4  ;;  %v1522_v43 = vld [vmem:[#allocation2 + $0x6c] sm:$0xf]  ;;  %v675_v44 = vor.u32 %v673_v16, %v672_v27  ;;  %v12383_v50 = vcombine.low %v323_v34, %v323_v34 }
  0x6f   :  { %v2121_v36 = vrot.slane %v2119_v32, 1  ;;  %v1396_v45 = vld [vmem:[#allocation2 + $0x6c] sm:$0xf]  ;;  %v12384_v51 = vcombine.high %v323_v34, %v323_v34  ;;  %v677_v52 = vrot.slane %v672_v27, 4  ;;  %v2126_v58 = vrot.slane %v2124_v37, 1 }
  0x70   :  { %v1218_v59 = vsel %vm15012_vm6, %v667_v38, %v1217_v29  ;;  %v1523_v61 = vld [vmem:[#allocation2 + $0x70] sm:$0xf]  ;;  %v676_v56 = vsel %vm14999_vm5, %v668_v41, %v675_v44  ;;  %v679_v63 = vshrl.u32 %v12383_v50, 16  ;;  %v682_v0 = vshll.u32 %v12383_v50, 16 }
  0x71   :  { %v2122_v55 = vor.u32 %v2121_v36, %v2117_v20  ;;  %1219 = vst [vmem:[#allocation2 + $0x78] sm:$0xf] %v1218_v59  ;;  %v1397_v48 = vld [vmem:[#allocation2 + $0x70] sm:$0xf]  ;;  %v1222_v4 = vsel %vm15018_vm7, %v677_v52, %v1221_v42  ;;  %v15328_v5 = vcombine.low %v1522_v43, %v1523_v61  ;;  %1220 = vst.msk [vmem:[#allocation2 + $0x7c] sm:$0xf] %vm28_vm0, %v676_v56 }
  0x72   :  { %v15332_v7 = vcombine.low %v1396_v45, %v1397_v48  ;;  %v687_v39 = vshrl.u32 %v12384_v51, 16  ;;  %1223 = vst [vmem:[#allocation2 + $0x80] sm:$0x1] %v1222_v4  ;;  %v681_v40 = vrot.slane %v679_v63, 7  ;;  %v690_v14 = vshll.u32 %v12384_v51, 16  ;;  %v163_v42 = vld [vmem:[%s19190_s0 + $0xd0] sm:$0xff] }
  0x73   :  { %19393 = vst [vmem:[#allocation16_spill] sm:$0xff] %v15328_v5  ;;  %v2127_v6 = vsel %vm2019_vm8, %v2122_v55, %v2126_v58  ;;  %v324_v49 = vmax.bf16 %v19198_v2, %v292_v60  ;;  %v293_v16 = vadd.bf16 %v14949_v22, %v253_v35  ;;  %2837 = vrot.lane.b32.xlu0 %v15328_v5, %s14631_s18  ;;  %v1224_v20 = vld [vmem:[#allocation2 + $0x84] sm:$0xf]  ;;  %v13723_v32 = vld [vmem:[#allocation2 + $0x74] ss:$0 sps:$4 sm:$0x11]  }
  0x74   :  { %2420 = vrot.lane.b32.xlu1 %v2127_v6, %s14631_s18  ;;  %v2129_v18 = vshrl.u32 %v15332_v7, 16  ;;  %v2131_v19 = vshll.u32 %v15332_v7, 16  ;;  %v684_v23 = vor.u32 %v682_v0, %v681_v40  ;;  %v685_v57 = vrot.slane %v681_v40, 4  ;;  %v164_v43 = vld [vmem:[%s19190_s0 + $0xd8] sm:$0xff]  ;;  %v1231_v55 = vld [vmem:[#allocation2 + $0x90] sm:$0xf] }
  0x75   :  { %v689_v26 = vrot.slane %v687_v39, 7  ;;  %v12385_v27 = vcombine.low %v324_v49, %v324_v49  ;;  %v12386_v34 = vcombine.high %v324_v49, %v324_v49  ;;  %v325_v36 = vmax.bf16 %v19198_v2, %v293_v16 }
  0x76   :  { %v2133_v29 = vrot.slane %v2131_v19, 1  ;;  %v2136_v37 = vshll.u32 %v13723_v32, 16  ;;  %v1225_v35 = vsel %vm15012_vm6, %v684_v23, %v1224_v20  ;;  %v1228_v20 = vld [vmem:[#allocation2 + $0x8c] sm:$0x1]  ;;  %v214_v32 = vpack.c.bf16 %v164_v43, %v163_v42 }
  0x77   :  { %v692_v38 = vor.u32 %v690_v14, %v689_v26  ;;  %v696_v41 = vshrl.u32 %v12385_v27, 16  ;;  %1226 = vst [vmem:[#allocation2 + $0x84] sm:$0xf] %v1225_v35  ;;  %v699_v51 = vshll.u32 %v12385_v27, 16  ;;  %v704_v52 = vshrl.u32 %v12386_v34, 16  ;;  %v166_v35 = vld [vmem:[%s19190_s0 + $0xe8] sm:$0xff] }
  0x78   :  { %v1524_v44 = vld [vmem:[#allocation2 + $0x78] sm:$0xf]  ;;  %v2134_v45 = vor.u32 %v2133_v29, %v2129_v18  ;;  %v1525_v58 = vld [vmem:[#allocation2 + $0x7c] sm:$0xf]  ;;  %v2138_v59 = vrot.slane %v2136_v37, 1  ;;  %v12387_v48 = vcombine.low %v325_v36, %v325_v36  ;;  %v12388_v39 = vcombine.high %v325_v36, %v325_v36 }
  0x79   :  { %v1398_v50 = vld [vmem:[#allocation2 + $0x78] sm:$0xf]  ;;  %v693_v60 = vsel %vm14999_vm5, %v685_v57, %v692_v38  ;;  %v1399_v61 = vld [vmem:[#allocation2 + $0x7c] sm:$0xf]  ;;  %v698_v56 = vrot.slane %v696_v41, 7  ;;  %v15352_v63 = vcombine.low %v1524_v44, %v1525_v58  ;;  %v706_v6 = vrot.slane %v704_v52, 7 }
  0x7a   :  { %1227 = vst.msk [vmem:[#allocation2 + $0x88] sm:$0xf] %vm28_vm0, %v693_v60  ;;  %v15355_v0 = vcombine.low %v1398_v50, %v1399_v61  ;;  %v13728_v4 = vld [vmem:[#allocation2 + $0x80] ss:$0 sps:$4 sm:$0x11]   ;;  %v2139_v40 = vsel %vm2019_vm8, %v2134_v45, %v2138_v59  ;;  %v707_v16 = vshll.u32 %v12386_v34, 16 }
  0x7b   :  { %19394 = vst [vmem:[#allocation17_spill] sm:$0xff] %v15352_v63  ;;  %v701_v14 = vor.u32 %v699_v51, %v698_v56  ;;  %v702_v49 = vrot.slane %v698_v56, 4  ;;  %2839 = vrot.lane.b32.xlu0 %v15352_v63, %s14631_s18  ;;  %2422 = vrot.lane.b32.xlu1 %v2139_v40, %s14631_s18  ;;  %v2148_v23 = vshll.u32 %v13728_v4, 16  ;;  %v694_v29 = vrot.slane %v689_v26, 4  ;;  %v165_v34 = vld [vmem:[%s19190_s0 + $0xe0] sm:$0xff] }
  0x7c   :  { %v2141_v18 = vshrl.u32 %v15355_v0, 16  ;;  %v2143_v19 = vshll.u32 %v15355_v0, 16  ;;  %v709_v57 = vor.u32 %v707_v16, %v706_v6  ;;  %v713_v37 = vshrl.u32 %v12387_v48, 16  ;;  %v1235_v58 = vld [vmem:[#allocation2 + $0x98] sm:$0x1] }
  0x7d   :  { %v1232_v27 = vsel %vm15012_vm6, %v701_v14, %v1231_v55  ;;  %v716_v38 = vshll.u32 %v12387_v48, 16  ;;  %v2150_v42 = vrot.slane %v2148_v23, 1  ;;  %v1229_v26 = vsel %vm15018_vm7, %v694_v29, %v1228_v20  ;;  %v1238_v16 = vld [vmem:[#allocation2 + $0x9c] sm:$0xf]  ;;  %v1242_v23 = vld [vmem:[#allocation2 + $0xa4] sm:$0x1] }
  0x7e   :  { %v2145_v36 = vrot.slane %v2143_v19, 1  ;;  %1233 = vst [vmem:[#allocation2 + $0x90] sm:$0xf] %v1232_v27  ;;  %v1526_v41 = vld [vmem:[#allocation2 + $0x84] sm:$0xf]  ;;  %v710_v43 = vsel %vm14999_vm5, %v702_v49, %v709_v57  ;;  %v721_v45 = vshrl.u32 %v12388_v39, 16  ;;  %v254_v56 = vmul.bf16 %v14946_v21, %v214_v32 }
  0x7f   :  { %v1400_v44 = vld [vmem:[#allocation2 + $0x84] sm:$0xf]  ;;  %1234 = vst.msk [vmem:[#allocation2 + $0x94] sm:$0xf] %vm28_vm0, %v710_v43  ;;  %1230 = vst [vmem:[#allocation2 + $0x8c] sm:$0x1] %v1229_v26  ;;  %v215_v48 = vpack.c.bf16 %v166_v35, %v165_v34 }
  0x80   :  { %v2146_v50 = vor.u32 %v2145_v36, %v2141_v18  ;;  %v715_v51 = vrot.slane %v713_v37, 7  ;;  %v724_v52 = vshll.u32 %v12388_v39, 16  ;;  %v711_v55 = vrot.slane %v706_v6, 4 }
  0x81   :  { %v1527_v59 = vld [vmem:[#allocation2 + $0x88] sm:$0xf]  ;;  %v723_v61 = vrot.slane %v721_v45, 7  ;;  %v294_v19 = vadd.bf16 %v14949_v22, %v254_v56  ;;  %v255_v35 = vmul.bf16 %v14946_v21, %v215_v48 }
  0x82   :  { %v1401_v60 = vld [vmem:[#allocation2 + $0x88] sm:$0xf]  ;;  %v15377_v4 = vcombine.low %v1526_v41, %v1527_v59  ;;  %v2151_v40 = vsel %vm2019_vm8, %v2146_v50, %v2150_v42  ;;  %v718_v49 = vor.u32 %v716_v38, %v715_v51  ;;  %v719_v18 = vrot.slane %v715_v51, 4 }
  0x83   :  { %v15380_v14 = vcombine.low %v1400_v44, %v1401_v60  ;;  %2424 = vrot.lane.b32.xlu1 %v2151_v40, %s14631_s18  ;;  %v726_v39 = vor.u32 %v724_v52, %v723_v61  ;;  %v1236_v6 = vsel %vm15018_vm7, %v711_v55, %v1235_v58  ;;  %v326_v36 = vmax.bf16 %v19198_v2, %v294_v19  ;;  %v167_v60 = vld [vmem:[%s19190_s0 + $0xf0] sm:$0xff] }
  0x84   :  { %19395 = vst [vmem:[#allocation18_spill] sm:$0xff] %v15377_v4  ;;  %2841 = vrot.lane.b32.xlu0 %v15377_v4, %s14631_s18  ;;  %1237 = vst [vmem:[#allocation2 + $0x98] sm:$0x1] %v1236_v6  ;;  %v1239_v29 = vsel %vm15012_vm6, %v718_v49, %v1238_v16  ;;  %v728_v37 = vrot.slane %v723_v61, 4  ;;  %v295_v52 = vadd.bf16 %v14949_v22, %v255_v35  ;;  %v168_v61 = vld [vmem:[%s19190_s0 + $0xf8] sm:$0xff] }
  0x85   :  { %v2153_v20 = vshrl.u32 %v15380_v14, 16  ;;  %v2155_v32 = vshll.u32 %v15380_v14, 16  ;;  %v1528_v57 = vld [vmem:[#allocation2 + $0x90] sm:$0xf]  ;;  %v727_v27 = vsel %vm14999_vm5, %v719_v18, %v726_v39  ;;  %1240 = vst [vmem:[#allocation2 + $0x9c] sm:$0xf] %v1239_v29  ;;  %v12389_v43 = vcombine.low %v326_v36, %v326_v36 }
  0x86   :  { %v1402_v34 = vld [vmem:[#allocation2 + $0x90] sm:$0xf]  ;;  %1241 = vst.msk [vmem:[#allocation2 + $0xa0] sm:$0xf] %vm28_vm0, %v727_v27  ;;  %v1529_v41 = vld [vmem:[#allocation2 + $0x94] sm:$0xf]  ;;  %v12390_v26 = vcombine.high %v326_v36, %v326_v36  ;;  %v1243_v44 = vsel %vm15018_vm7, %v728_v37, %v1242_v23  ;;  %v327_v39 = vmax.bf16 %v19198_v2, %v295_v52  ;;  %v216_v23 = vpack.c.bf16 %v168_v61, %v167_v60 }
  0x87   :  { %v2157_v38 = vrot.slane %v2155_v32, 1  ;;  %v1403_v42 = vld [vmem:[#allocation2 + $0x94] sm:$0xf]  ;;  %v15399_v45 = vcombine.low %v1528_v57, %v1529_v41  ;;  %v13733_v50 = vld [vmem:[#allocation2 + $0x8c] ss:$0 sps:$4 sm:$0x11]  }
  0x88   :  { %v15401_v51 = vcombine.low %v1402_v34, %v1403_v42  ;;  %1244 = vst [vmem:[#allocation2 + $0xa4] sm:$0x1] %v1243_v44  ;;  %v730_v58 = vshrl.u32 %v12389_v43, 16  ;;  %v738_v59 = vshrl.u32 %v12390_v26, 16  ;;  %v2160_v56 = vshll.u32 %v13733_v50, 16 }
  0x89   :  { %19396 = vst [vmem:[#allocation19_spill] sm:$0xff] %v15399_v45  ;;  %v2158_v55 = vor.u32 %v2157_v38, %v2153_v20  ;;  %2843 = vrot.lane.b32.xlu0 %v15399_v45, %s14631_s18  ;;  %v733_v40 = vshll.u32 %v12389_v43, 16  ;;  %v741_v49 = vshll.u32 %v12390_v26, 16  ;;  %v1245_v32 = vld [vmem:[#allocation2 + $0xa8] sm:$0xf]  ;;  %v12391_v36 = vcombine.low %v327_v39, %v327_v39 }
  0x8a   :  { %v2165_v48 = vshrl.u32 %v15401_v51, 16  ;;  %v2167_v18 = vshll.u32 %v15401_v51, 16  ;;  %v2162_v6 = vrot.slane %v2160_v56, 1  ;;  %v732_v19 = vrot.slane %v730_v58, 7 }
  0x8b   :  { %v13738_v16 = vld [vmem:[#allocation2 + $0x98] ss:$0 sps:$4 sm:$0x11]   ;;  %v740_v20 = vrot.slane %v738_v59, 7  ;;  %v12392_v37 = vcombine.high %v327_v39, %v327_v39  ;;  %v747_v60 = vshrl.u32 %v12391_v36, 16 }
  0x8c   :  { %v1530_v57 = vld [vmem:[#allocation2 + $0x9c] sm:$0xf]  ;;  %v2169_v29 = vrot.slane %v2167_v18, 1  ;;  %v2172_v34 = vshll.u32 %v13738_v16, 16  ;;  %v2163_v38 = vsel %vm2019_vm8, %v2158_v55, %v2162_v6  ;;  %v735_v41 = vor.u32 %v733_v40, %v732_v19  ;;  %v1249_v16 = vld [vmem:[#allocation2 + $0xb0] sm:$0x1] }
  0x8d   :  { %v1531_v27 = vld [vmem:[#allocation2 + $0xa0] sm:$0xf]  ;;  %v736_v42 = vrot.slane %v732_v19, 4  ;;  %v1404_v43 = vld [vmem:[#allocation2 + $0x9c] sm:$0xf]  ;;  %2426 = vrot.lane.b32.xlu1 %v2163_v38, %s14631_s18  ;;  %v743_v52 = vor.u32 %v741_v49, %v740_v20  ;;  %v749_v39 = vrot.slane %v747_v60, 7  ;;  %v256_v19 = vmul.bf16 %v14946_v21, %v216_v23 }
  0x8e   :  { %v15416_v35 = vcombine.low %v1530_v57, %v1531_v27  ;;  %v1405_v26 = vld [vmem:[#allocation2 + $0xa0] sm:$0xf]  ;;  %v2170_v44 = vor.u32 %v2169_v29, %v2165_v48  ;;  %v2174_v50 = vrot.slane %v2172_v34, 1  ;;  %v1246_v55 = vsel %vm15012_vm6, %v735_v41, %v1245_v32  ;;  %v1252_v49 = vld [vmem:[#allocation2 + $0xb4] sm:$0xf]  ;;  %v170_v23 = vld [vmem:[%s19190_s0 + $0x108] sm:$0xff] }
  0x8f   :  { %v15419_v58 = vcombine.low %v1404_v43, %v1405_v26  ;;  %v13743_v59 = vld [vmem:[#allocation2 + $0xa4] ss:$0 sps:$4 sm:$0x11]   ;;  %v744_v56 = vsel %vm14999_vm5, %v736_v42, %v743_v52  ;;  %1247 = vst [vmem:[#allocation2 + $0xa8] sm:$0xf] %v1246_v55  ;;  %v750_v6 = vshll.u32 %v12391_v36, 16 }
  0x90   :  { %19397 = vst [vmem:[#allocation20_spill] sm:$0xff] %v15416_v35  ;;  %2845 = vrot.lane.b32.xlu0 %v15416_v35, %s14631_s18  ;;  %v2175_v61 = vsel %vm2019_vm8, %v2170_v44, %v2174_v50  ;;  %1248 = vst.msk [vmem:[#allocation2 + $0xac] sm:$0xf] %vm28_vm0, %v744_v56  ;;  %v2184_v18 = vshll.u32 %v13743_v59, 16  ;;  %v755_v57 = vshrl.u32 %v12392_v37, 16  ;;  %v758_v27 = vshll.u32 %v12392_v37, 16 }
  0x91   :  { %v2177_v48 = vshrl.u32 %v15419_v58, 16  ;;  %v2179_v40 = vshll.u32 %v15419_v58, 16  ;;  %2428 = vrot.lane.b32.xlu1 %v2175_v61, %s14631_s18  ;;  %v745_v29 = vrot.slane %v740_v20, 4  ;;  %v752_v38 = vor.u32 %v750_v6, %v749_v39  ;;  %v169_v36 = vld [vmem:[%s19190_s0 + $0x100] sm:$0xff]  ;;  %v1256_v44 = vld [vmem:[#allocation2 + $0xbc] sm:$0x1] }
  0x92   :  { %v2186_v34 = vrot.slane %v2184_v18, 1  ;;  %v753_v42 = vrot.slane %v749_v39, 4  ;;  %v757_v43 = vrot.slane %v755_v57, 7  ;;  %v296_v20 = vadd.bf16 %v14949_v22, %v256_v19  ;;  %v1411_v6 = vld [vmem:[#allocation2 + $0xdc] sm:$0xf] }
  0x93   :  { %v2181_v32 = vrot.slane %v2179_v40, 1  ;;  %v1250_v26 = vsel %vm15018_vm7, %v745_v29, %v1249_v16  ;;  %v1253_v37 = vsel %vm15012_vm6, %v752_v38, %v1252_v49  ;;  %v217_v56 = vpack.c.bf16 %v170_v23, %v169_v36  ;;  %v15447_v40 = vld [vmem:[#allocation2 + $0xe0] ss:$0 sps:$4 sm:$0x11]   ;;  %v15458_v57 = vld [vmem:[#allocation2] sm:$0xe] }
  0x94   :  { %1251 = vst [vmem:[#allocation2 + $0xb0] sm:$0x1] %v1250_v26  ;;  %v760_v52 = vor.u32 %v758_v27, %v757_v43  ;;  %1254 = vst [vmem:[#allocation2 + $0xb4] sm:$0xf] %v1253_v37  ;;  %v762_v59 = vrot.slane %v757_v43, 4  ;;  %v328_v61 = vmax.bf16 %v19198_v2, %v296_v20 }
  0x95   :  { %v2182_v41 = vor.u32 %v2181_v32, %v2177_v48  ;;  %v1410_v48 = vld [vmem:[#allocation2 + $0xd8] sm:$0xf]  ;;  %v14207_v26 = vld [vmem:[#allocation2 + $0x4] sm:$0xf] }
  0x96   :  { %v1532_v55 = vld [vmem:[#allocation2 + $0xa8] sm:$0xf]  ;;  %v761_v16 = vsel %vm14999_vm5, %v753_v42, %v760_v52  ;;  %v1257_v39 = vsel %vm15018_vm7, %v762_v59, %v1256_v44  ;;  %v12393_v27 = vcombine.low %v328_v61, %v328_v61  ;;  %v12394_v29 = vcombine.high %v328_v61, %v328_v61  ;;  %v1259_v59 = vld [vmem:[#allocation2 + $0xc0] sm:$0xf] }
  0x97   :  { %v2187_v50 = vsel %vm2019_vm8, %v2182_v41, %v2186_v34  ;;  %v1406_v60 = vld [vmem:[#allocation2 + $0xa8] sm:$0xf]  ;;  %v1533_v49 = vld [vmem:[#allocation2 + $0xac] sm:$0xf]  ;;  %1255 = vst.msk [vmem:[#allocation2 + $0xb8] sm:$0xf] %vm28_vm0, %v761_v16  ;;  %v257_v34 = vmul.bf16 %v14946_v21, %v217_v56  ;;  %v15465_v42 = vcombine.low %v1410_v48, %v1411_v6  ;;  %v12491_v36 = vcombine.low %v15458_v57, %v14207_v26 }
  0x98   :  { %2430 = vrot.lane.b32.xlu1 %v2187_v50, %s14631_s18  ;;  %v1407_v18 = vld [vmem:[#allocation2 + $0xac] sm:$0xf]  ;;  %v15453_v19 = vcombine.low %v1532_v55, %v1533_v49  ;;  %1258 = vst [vmem:[#allocation2 + $0xbc] sm:$0x1] %v1257_v39  ;;  %v764_v23 = vshrl.u32 %v12393_v27, 16  ;;  %v767_v50 = vshll.u32 %v12393_v27, 16 }
  0x99   :  { %v15456_v32 = vcombine.low %v1406_v60, %v1407_v18  ;;  %v297_v37 = vadd.bf16 %v14949_v22, %v257_v34  ;;  %v772_v52 = vshrl.u32 %v12394_v29, 16  ;;  %v2220_v55 = vshll.u32 %v15447_v40, 16  ;;  %v171_v57 = vld [vmem:[%s19190_s0 + $0x110] sm:$0xff]  ;;  %v172_v40 = vld [vmem:[%s19190_s0 + $0x118] sm:$0xff] }
  0x9a   :  { %19398 = vst [vmem:[#allocation21_spill] sm:$0xff] %v15453_v19  ;;  %2847 = vrot.lane.b32.xlu0 %v15453_v19, %s14631_s18  ;;  %v766_v61 = vrot.slane %v764_v23, 7  ;;  %v775_v56 = vshll.u32 %v12394_v29, 16  ;;  %v2213_v39 = vshrl.u32 %v15465_v42, 16  ;;  %v2215_v6 = vshll.u32 %v15465_v42, 16 }
  0x9b   :  { %v2189_v38 = vshrl.u32 %v15456_v32, 16  ;;  %v2191_v41 = vshll.u32 %v15456_v32, 16  ;;  %v13748_v43 = vld [vmem:[#allocation2 + $0xb0] ss:$0 sps:$4 sm:$0x11]   ;;  %v329_v48 = vmax.bf16 %v19198_v2, %v297_v37  ;;  %v15471_v18 = vrot.slane %v772_v52, 7 }
  0x9c   :  { %v1534_v20 = vld [vmem:[#allocation2 + $0xb4] sm:$0xf]  ;;  %v2196_v60 = vshll.u32 %v13748_v43, 16  ;;  %v769_v34 = vor.u32 %v767_v50, %v766_v61 }
  0x9d   :  { %v2193_v44 = vrot.slane %v2191_v41, 1  ;;  %v1408_v49 = vld [vmem:[#allocation2 + $0xb4] sm:$0xf]  ;;  %v770_v41 = vrot.slane %v766_v61, 4  ;;  %v777_v23 = vor.u32 %v775_v56, %v15471_v18  ;;  %v12396_v52 = vcombine.high %v329_v48, %v329_v48 }
  0x9e   :  { %v1535_v27 = vld [vmem:[#allocation2 + $0xb8] sm:$0xf]  ;;  %v2198_v29 = vrot.slane %v2196_v60, 1  ;;  %v1260_v13 = vsel %vm15012_vm6, %v769_v34, %v1259_v59  ;;  %v1475_v60 = vld [vmem:[#allocation2 + $0xc] sm:$0xe]  ;;  %v2217_v61 = vrot.slane %v2215_v6, 1  ;;  %v218_v56 = vpack.c.bf16 %v172_v40, %v171_v57 }
  0x9f   :  { %v2194_v16 = vor.u32 %v2193_v44, %v2189_v38  ;;  %v1409_v43 = vld [vmem:[#allocation2 + $0xb8] sm:$0xf]  ;;  %v12395_v38 = vcombine.low %v329_v48, %v329_v48  ;;  %v15481_v26 = vcombine.low %v1534_v20, %v1535_v27  ;;  %v13752_v44 = vld [vmem:[#allocation2 + $0xbc] ss:$0 sps:$4 sm:$0x11]   ;;  %v778_v20 = vsel %vm14999_vm5, %v770_v41, %v777_v23  ;;  %v173_v57 = vld [vmem:[%s19190_s0 + $0x120] sm:$0xff] }
  0xa0   :  { %v15484_v37 = vcombine.low %v1408_v49, %v1409_v43  ;;  %1261 = vst [vmem:[#allocation2 + $0xc0] sm:$0xf] %v1260_v13  ;;  %1262 = vst.msk [vmem:[#allocation2 + $0xc4] sm:$0xf] %vm28_vm0, %v778_v20  ;;  %v2208_v49 = vshll.u32 %v13752_v44, 16  ;;  %v792_v27 = vshll.u32 %v12396_v52, 16  ;;  %v258_v6 = vmul.bf16 %v14946_v21, %v218_v56 }
  0xa1   :  { %19399 = vst [vmem:[#allocation22_spill] sm:$0xff] %v15481_v26  ;;  %v2199_v2 = vsel %vm2019_vm8, %v2194_v16, %v2198_v29  ;;  %v781_v19 = vshrl.u32 %v12395_v38, 16  ;;  %v784_v35 = vshll.u32 %v12395_v38, 16  ;;  %2849 = vrot.lane.b32.xlu0 %v15481_v26, %s14631_s18  ;;  %v789_v16 = vshrl.u32 %v12396_v52, 16  ;;  %v1266_v29 = vld [vmem:[#allocation2 + $0xe4] sm:$0xf] }
  0xa2   :  { %2432 = vrot.lane.b32.xlu1 %v2199_v2, %s14631_s18  ;;  %v2201_v50 = vshrl.u32 %v15484_v37, 16  ;;  %v2203_v59 = vshll.u32 %v15484_v37, 16  ;;  %v2210_v34 = vrot.slane %v2208_v49, 1  ;;  %v14208_v43 = vld [vmem:[#allocation2 + $0x10] sm:$0xf]  ;;  %v2565_v38 = vrot.slane %v12491_v36, 1 }
  0xa3   :  { %v783_v48 = vrot.slane %v781_v19, 7  ;;  %v12492_v41 = vcombine.low %v1475_v60, %v14208_v43  ;;  %v791_v26 = vrot.slane %v789_v16, 7  ;;  %v174_v19 = vld [vmem:[%s19190_s0 + $0x128] sm:$0xff]  ;;  %v2218_v52 = vor.u32 %v2217_v61, %v2213_v39  ;;  %v175_v16 = vld [vmem:[%s19190_s0 + $0x130] sm:$0xff] }
  0xa4   :  { %v2205_v2 = vrot.slane %v2203_v59, 1  ;;  %v2222_v20 = vrot.slane %v2220_v55, 1  ;;  %v1270_v36 = vld [vmem:[#allocation2 + $0xec] sm:$0x1]  ;;  %v298_v56 = vadd.bf16 %v14949_v22, %v258_v6  ;;  %v219_v43 = vpack.c.bf16 %v174_v19, %v173_v57 }
  0xa5   :  { %v786_v13 = vor.u32 %v784_v35, %v783_v48  ;;  %v787_v23 = vrot.slane %v783_v48, 4  ;;  %v1476_v35 = vld [vmem:[#allocation2 + $0x18] sm:$0xe]  ;;  %v14209_v60 = vld [vmem:[#allocation2 + $0x8] ss:$0 sps:$4 sm:$0x11]   ;;  %v794_v49 = vor.u32 %v792_v27, %v791_v26 }
  0xa6   :  { %v2206_v40 = vor.u32 %v2205_v2, %v2201_v50  ;;  %v2566_v59 = vrot.slane %v14209_v60, 1  ;;  %v796_v48 = vrot.slane %v791_v26, 4  ;;  %v176_v50 = vld [vmem:[%s19190_s0 + $0x138] sm:$0xff]  ;;  %v2568_v39 = vrot.slane %v12492_v41, 1 }
  0xa7   :  { %v1267_v44 = vsel %vm15012_vm6, %v786_v13, %v1266_v29  ;;  %v1536_v29 = vld [vmem:[#allocation2 + $0xc0] sm:$0xf]  ;;  %v14210_v61 = vld [vmem:[#allocation2 + $0x14] ss:$0 sps:$4 sm:$0x11]   ;;  %v795_v26 = vsel %vm14999_vm5, %v787_v23, %v794_v49  ;;  %v259_v41 = vmul.bf16 %v14946_v21, %v219_v43  ;;  %v220_v57 = vpack.c.bf16 %v176_v50, %v175_v16 }
  0xa8   :  { %1268 = vst [vmem:[#allocation2 + $0xe4] sm:$0xf] %v1267_v44  ;;  %v2211_v55 = vsel %vm2019_vm8, %v2206_v40, %v2210_v34  ;;  %v2569_v2 = vrot.slane %v14210_v61, 1  ;;  %v1537_v27 = vld [vmem:[#allocation2 + $0xc4] sm:$0xf]  ;;  %v19400_v44 = vmov 0   ;;  %v1271_v45 = vsel %vm15018_vm7, %v796_v48, %v1270_v36 }
  0xa9   :  { %2434 = vrot.lane.b32.xlu1 %v2211_v55, %s14631_s18  ;;  %v14211_v13 = vld [vmem:[#allocation2 + $0x1c] sm:$0xf]  ;;  %v330_v60 = vmax.bf16 %v19400_v44, %v298_v56  ;;  %v15520_v4 = vcombine.low %v1536_v29, %v1537_v27  ;;  %1269 = vst.msk [vmem:[#allocation2 + $0xe8] sm:$0xf] %vm28_vm0, %v795_v26  ;;  %v2223_v34 = vsel %vm2019_vm8, %v2218_v52, %v2222_v20  ;;  %1272 = vst [vmem:[#allocation2 + $0xec] sm:$0x1] %v1271_v45 }
  0xaa   :  { %v12493_v6 = vcombine.low %v1476_v35, %v14211_v13  ;;  %v1477_v23 = vld [vmem:[#allocation2 + $0x24] sm:$0xe]  ;;  %v2567_v35 = vsel %vm2564_vm9, %v2565_v38, %v2566_v59  ;;  %v2570_v36 = vsel %vm2564_vm9, %v2568_v39, %v2569_v2  ;;  %v299_v49 = vadd.bf16 %v14949_v22, %v259_v41  ;;  %v15533_v50 = vld [vmem:[#allocation2 + $0x20] ss:$0 sps:$4 sm:$0x11]  }
  0xab   :  { %19401 = vst [vmem:[#allocation23_spill] sm:$0xff] %v15520_v4  ;;  %v12397_v19 = vcombine.low %v330_v60, %v330_v60  ;;  %v12398_v40 = vcombine.high %v330_v60, %v330_v60  ;;  %2851 = vrot.lane.b32.xlu0 %v15520_v4, %s14631_s18  ;;  %v260_v55 = vmul.bf16 %v14946_v21, %v220_v57  ;;  %v14213_v43 = vld [vmem:[#allocation2 + $0x28] sm:$0xf] }
  0xac   :  { %v15531_v16 = vrot.slane %v12493_v6, 1  ;;  %v331_v29 = vmax.bf16 %v19400_v44, %v299_v49  ;;  %v12494_v27 = vcombine.low %v1477_v23, %v14213_v43  ;;  %v1273_v6 = vld [vmem:[#allocation2 + $0xf0] sm:$0xf] }
  0xad   :  { %2436 = vrot.lane.b32.xlu1 %v2223_v34, %s14631_s18  ;;  %v798_v52 = vshrl.u32 %v12397_v19, 16  ;;  %v801_v45 = vshll.u32 %v12397_v19, 16  ;;  %v806_v20 = vshrl.u32 %v12398_v40, 16  ;;  %v809_v56 = vshll.u32 %v12398_v40, 16  ;;  %v13749_v19 = vld [vmem:[%s19191_s1 + $0x80] sm:$0xff]  }
  0xae   :  { %v12399_v60 = vcombine.low %v331_v29, %v331_v29  ;;  %v12400_v34 = vcombine.high %v331_v29, %v331_v29  ;;  %v300_v41 = vadd.bf16 %v14949_v22, %v260_v55 }
  0xaf   :  { %v1538_v48 = vld [vmem:[#allocation2 + $0xe4] sm:$0xf]  ;;  %v800_v61 = vrot.slane %v798_v52, 7  ;;  %v15538_v2 = vrot.slane %v806_v20, 7 }
  0xb0   :  { %v1412_v59 = vld [vmem:[#allocation2 + $0xe4] sm:$0xf]  ;;  %v1539_v40 = vld [vmem:[#allocation2 + $0xe8] sm:$0xf]  ;;  %v815_v43 = vshrl.u32 %v12399_v60, 16  ;;  %v332_v55 = vmax.bf16 %v19400_v44, %v300_v41  ;;  %v15571_v41 = vrot.slane %v12494_v27, 1 }
  0xb1   :  { %v803_v49 = vor.u32 %v801_v45, %v800_v61  ;;  %v804_v52 = vrot.slane %v800_v61, 4  ;;  %v811_v23 = vor.u32 %v809_v56, %v15538_v2  ;;  %v1413_v20 = vld [vmem:[#allocation2 + $0xe8] sm:$0xf]  ;;  %v13759_v29 = vld [vmem:[#allocation2 + $0xec] ss:$0 sps:$4 sm:$0x11]  }
  0xb2   :  { %v818_v45 = vshll.u32 %v12399_v60, 16  ;;  %v823_v61 = vshrl.u32 %v12400_v34, 16  ;;  %v177_v56 = vld [vmem:[%s19190_s0 + $0x140] sm:$0xff] }
  0xb3   :  { %v812_v38 = vsel %vm14999_vm5, %v804_v52, %v811_v23  ;;  %v2232_v52 = vshll.u32 %v13759_v29, 16  ;;  %v817_v23 = vrot.slane %v815_v43, 7  ;;  %v179_v29 = vld [vmem:[%s19190_s0 + $0x150] sm:$0xff] }
  0xb4   :  { %1276 = vst.msk [vmem:[#allocation2 + $0xf4] sm:$0xf] %vm28_vm0, %v812_v38  ;;  %v813_v38 = vrot.slane %v15538_v2, 4 }
  0xb5   :  { %v2234_v5 = vrot.slane %v2232_v52, 1 }
  0xb7   :  { %v2822_v39 = vpop.permute.xlu0 %2821 }
  0xb8   :  { %v4616_v26 = vsel %vm4517_vm10, %v2567_v35, %v2822_v39  ;;  %v15547_v35 = vcombine.low %v1538_v48, %v1539_v40  ;;  %v15549_v39 = vcombine.low %v1412_v59, %v1413_v20  ;;  %v178_v48 = vld [vmem:[%s19190_s0 + $0x148] sm:$0xff]  ;;  %v825_v20 = vrot.slane %v823_v61, 7  ;;  %v1284_v61 = vld [vmem:[#allocation2 + $0x104] sm:$0x1] }
  0xb9   :  { %v2824_v13 = vpop.permute.xlu1 %2823  ;;  %5382 = vmatprep.mubr.bf16.mxu0 %v4616_v26  ;;  %v15573_v40 = vld [vmem:[#allocation2 + $0x2c] ss:$0 sps:$4 sm:$0x11]   ;;  %v221_v4 = vpack.c.bf16 %v178_v48, %v177_v56  ;;  %v13763_v48 = vld [vmem:[%s19191_s1 + $0x90] sm:$0xff]  }
  0xba   :  { %v4620_v57 = vsel %vm4517_vm10, %v2570_v36, %v2824_v13  ;;  %19402 = vst [vmem:[#allocation24_spill] sm:$0xff] %v15547_v35  ;;  %v1274_v36 = vsel %vm15012_vm6, %v803_v49, %v1273_v6  ;;  %v1277_v13 = vld [vmem:[#allocation2 + $0xf8] sm:$0x1]  ;;  %2853 = vrot.lane.b32.xlu0 %v15547_v35, %s14631_s18  ;;  %v13756_v6 = vld [vmem:[%s19191_s1 + $0x88] sm:$0xff]   ;;  %v2225_v60 = vshrl.u32 %v15549_v39, 16  ;;  %v12401_v35 = vcombine.low %v332_v55, %v332_v55 }
  0xbb   :  { %v2405_v26 = vpop.permute.xlu0 %2404  ;;  %1275 = vst [vmem:[#allocation2 + $0xf0] sm:$0xf] %v1274_v36  ;;  %v1280_v36 = vld [vmem:[#allocation2 + $0xfc] sm:$0xf]  ;;  %v820_v49 = vor.u32 %v818_v45, %v817_v23  ;;  %v1278_v43 = vsel %vm15018_vm7, %v813_v38, %v1277_v13  ;;  %v1415_v38 = vld [vmem:[#allocation2 + $0xf4] sm:$0xf] }
  0xbc   :  { %v4519_v59 = vsel %vm4517_vm10, %v14955_v31, %v2405_v26  ;;  %v2227_v31 = vshll.u32 %v15549_v39, 16  ;;  %v826_v26 = vshll.u32 %v12400_v34, 16  ;;  %v19403_v34 = vrot.slane %v15533_v50, 1  ;;  %1279 = vst [vmem:[#allocation2 + $0xf8] sm:$0x1] %v1278_v43 }
  0xbd   :  { %5383 = vmatmul.mubr.bf16.vlgmr.msra.gmra.mrb[0].mxu0 %v4519_v59  ;;  %v821_v59 = vrot.slane %v817_v23, 4  ;;  %v1281_v45 = vsel %vm15012_vm6, %v820_v49, %v1280_v36  ;;  %v832_v52 = vshrl.u32 %v12401_v35, 16  ;;  %v835_v13 = vshll.u32 %v12401_v35, 16  ;;  %v14215_v35 = vld [vmem:[#allocation2 + $0x34] sm:$0xf] }
  0xbe   :  { %5640 = vmatpush1.bf16.msra.mxu0 %v13749_v19  ;;  %5390 = vmatprep.mubr.bf16.mxu0 %v4620_v57  ;;  %v2229_v63 = vrot.slane %v2227_v31, 1  ;;  %v2573_v2 = vsel %vm2564_vm9, %v15531_v16, %v19403_v34  ;;  %v828_v57 = vor.u32 %v826_v26, %v825_v20  ;;  %v12402_v31 = vcombine.high %v332_v55, %v332_v55  ;;  %v180_v16 = vld [vmem:[%s19190_s0 + $0x158] sm:$0xff]  ;;  %v1541_v26 = vld [vmem:[#allocation2 + $0xf4] sm:$0xf] }
  0xbf   :  { %v2407_v27 = vpop.permute.xlu1 %2406  ;;  %5641 = vmatprep.subr.bf16.mxu0 %v19400_v44  ;;  %v2826_v19 = vpop.permute.xlu0 %2825  ;;  %1282 = vst [vmem:[#allocation2 + $0xfc] sm:$0xf] %v1281_v45  ;;  %v14216_v43 = vld [vmem:[#allocation2 + $0x38] ss:$0 sps:$4 sm:$0x11]  }
  0xc0   :  { %v2230_v56 = vor.u32 %v2229_v63, %v2225_v60  ;;  %v4522_v50 = vsel %vm4517_vm10, %v15098_v46, %v2407_v27  ;;  %v829_v63 = vsel %vm14999_vm5, %v821_v59, %v828_v57  ;;  %v830_v60 = vrot.slane %v825_v20, 4 }
  0xc1   :  { %v4624_v49 = vsel %vm4517_vm10, %v2573_v2, %v2826_v19  ;;  %1283 = vst.msk [vmem:[#allocation2 + $0x100] sm:$0xf] %vm28_vm0, %v829_v63  ;;  %v261_v46 = vmul.bf16 %v14946_v21, %v221_v4  ;;  %v12495_v20 = vcombine.low %v1478_v1, %v14215_v35  ;;  %v834_v27 = vrot.slane %v832_v52, 7  ;;  %v1287_v2 = vld [vmem:[#allocation2 + $0x108] sm:$0xf] }
  0xc2   :  { %5642 = vmatpush1.bf16.msra.mxu0 %v13756_v6  ;;  %v1540_v23 = vld [vmem:[#allocation2 + $0xf0] sm:$0xf]  ;;  %v2235_v55 = vsel %vm2019_vm8, %v2230_v56, %v2234_v5  ;;  %v222_v59 = vpack.c.bf16 %v180_v16, %v179_v29  ;;  %v840_v5 = vshrl.u32 %v12402_v31, 16  ;;  %v843_v34 = vshll.u32 %v12402_v31, 16  ;;  %v1479_v52 = vld [vmem:[#allocation2 + $0x3c] sm:$0xe] }
  0xc3   :  { %v1414_v36 = vld [vmem:[#allocation2 + $0xf0] sm:$0xf]  ;;  %5643 = vmatprep.subr.bf16.mxu0 %v19400_v44  ;;  %v15605_v6 = vcombine.low %v1540_v23, %v1541_v26  ;;  %2438 = vrot.lane.b32.xlu1 %v2235_v55, %s14631_s18  ;;  %v1285_v57 = vsel %vm15018_vm7, %v830_v60, %v1284_v61  ;;  %v19405_v4 = vrot.slane %v15573_v40, 1  ;;  %v2578_v29 = vrot.slane %v14216_v43, 1  ;;  %v2409_v31 = vpop.permute.xlu1 %2408  ;;  %v2828_v16 = vpop.permute.xlu0 %2827 }
  0xc4   :  { %v15608_v19 = vcombine.low %v1414_v36, %v1415_v38  ;;  %v837_v56 = vor.u32 %v835_v13, %v834_v27  ;;  %v838_v45 = vrot.slane %v834_v27, 4  ;;  %1286 = vst [vmem:[#allocation2 + $0x104] sm:$0x1] %v1285_v57  ;;  %v15620_v63 = vrot.slane %v840_v5, 7 }
  0xc5   :  { %19404 = vst [vmem:[#allocation25_spill] sm:$0xff] %v15605_v6  ;;  %5391 = vmatmul.mubr.bf16.gmra.mrb[4].mxu0 %v4522_v50  ;;  %2855 = vrot.lane.b32.xlu0 %v15605_v6, %s14631_s18  ;;  %v2576_v1 = vsel %vm2564_vm9, %v15571_v41, %v19405_v4  ;;  %v301_v40 = vadd.bf16 %v14949_v22, %v261_v46  ;;  %v13770_v41 = vld [vmem:[%s19191_s1 + $0x98] sm:$0xff]   ;;  %v2577_v13 = vrot.slane %v12495_v20, 1  ;;  %v14217_v46 = vld [vmem:[#allocation2 + $0x40] sm:$0xf] }
  0xc6   :  { %5398 = vmatprep.mubr.bf16.mxu0 %v4624_v49  ;;  %v2237_v50 = vshrl.u32 %v15608_v19, 16  ;;  %v2239_v61 = vshll.u32 %v15608_v19, 16  ;;  %5644 = vmatpush1.bf16.msra.mxu0 %v13763_v48  ;;  %v13762_v60 = vld [vmem:[#allocation2 + $0xf8] ss:$0 sps:$4 sm:$0x11]   ;;  %v1288_v49 = vsel %vm15012_vm6, %v837_v56, %v1287_v2  ;;  %v262_v23 = vmul.bf16 %v14946_v21, %v222_v59 }
  0xc7   :  { %5645 = vmatprep.subr.bf16.mxu0 %v19400_v44  ;;  %v1542_v26 = vld [vmem:[#allocation2 + $0xfc] sm:$0xf]  ;;  %v845_v48 = vor.u32 %v843_v34, %v15620_v63  ;;  %1289 = vst [vmem:[#allocation2 + $0x108] sm:$0xf] %v1288_v49  ;;  %v12496_v38 = vcombine.low %v1479_v52, %v14217_v46  ;;  %v333_v35 = vmax.bf16 %v19400_v44, %v301_v40  ;;  %v2244_v2 = vshll.u32 %v13762_v60, 16 }
  0xc8   :  { %v2241_v55 = vrot.slane %v2239_v61, 1  ;;  %v1416_v36 = vld [vmem:[#allocation2 + $0xfc] sm:$0xf]  ;;  %v4525_v20 = vsel %vm4517_vm10, %v15123_v53, %v2409_v31  ;;  %v4628_v27 = vsel %vm4517_vm10, %v2576_v1, %v2828_v16  ;;  %v1543_v5 = vld [vmem:[#allocation2 + $0x100] sm:$0xf]  ;;  %v847_v59 = vrot.slane %v15620_v63, 4 }
  0xc9   :  { %v1417_v57 = vld [vmem:[#allocation2 + $0x100] sm:$0xf]  ;;  %v15636_v4 = vcombine.low %v1542_v26, %v1543_v5  ;;  %v846_v34 = vsel %vm14999_vm5, %v838_v45, %v845_v48  ;;  %v1291_v52 = vld [vmem:[#allocation2 + $0x110] sm:$0x1]  ;;  %v2246_v1 = vrot.slane %v2244_v2, 1  ;;  %v12403_v31 = vcombine.low %v333_v35, %v333_v35  ;;  %v2411_v26 = vpop.permute.xlu1 %2410 }
  0xca   :  { %v2242_v43 = vor.u32 %v2241_v55, %v2237_v50  ;;  %v15640_v56 = vcombine.low %v1416_v36, %v1417_v57  ;;  %5646 = vmatpush1.bf16.msra.mxu0 %v13770_v41  ;;  %v13777_v53 = vld [vmem:[%s19191_s1 + $0xa0] sm:$0xff]   ;;  %1290 = vst.msk [vmem:[#allocation2 + $0x10c] sm:$0xf] %vm28_vm0, %v846_v34  ;;  %v12404_v16 = vcombine.high %v333_v35, %v333_v35  ;;  %v15646_v61 = vld [vmem:[#allocation2 + $0x48] sm:$0xe]  ;;  %v2580_v36 = vrot.slane %v12496_v38, 1 }
  0xcb   :  { %19406 = vst [vmem:[#allocation26_spill] sm:$0xff] %v15636_v4  ;;  %v302_v50 = vadd.bf16 %v14949_v22, %v262_v23  ;;  %v15652_v45 = vld [vmem:[%s19190_s0 + $0x160] sm:$0xff]  ;;  %5647 = vmatprep.subr.bf16.mxu0 %v19400_v44  ;;  %2857 = vrot.lane.b32.xlu0 %v15636_v4, %s14631_s18  ;;  %v2579_v63 = vsel %vm2564_vm9, %v2577_v13, %v2578_v29  ;;  %v15663_v23 = vld [vmem:[%s19190_s0 + $0x168] sm:$0xff]  ;;  %v849_v46 = vshrl.u32 %v12403_v31, 16  ;;  %v852_v35 = vshll.u32 %v12403_v31, 16 }
  0xcc   :  { %v2249_v40 = vshrl.u32 %v15640_v56, 16  ;;  %v2251_v41 = vshll.u32 %v15640_v56, 16  ;;  %v14218_v60 = vld [vmem:[#allocation2 + $0x44] ss:$0 sps:$4 sm:$0x11]   ;;  %v2247_v55 = vsel %vm2019_vm8, %v2242_v43, %v2246_v1  ;;  %v857_v13 = vshrl.u32 %v12404_v16, 16 }
  0xcd   :  { %5399 = vmatmul.mubr.bf16.gmra.mrb[8].mxu0 %v4525_v20  ;;  %v2581_v49 = vrot.slane %v14218_v60, 1  ;;  %v13766_v48 = vld [vmem:[#allocation2 + $0x104] ss:$0 sps:$4 sm:$0x11]   ;;  %2440 = vrot.lane.b32.xlu1 %v2247_v55, %s14631_s18  ;;  %v860_v20 = vshll.u32 %v12404_v16, 16  ;;  %v13784_v57 = vld [vmem:[%s19191_s1 + $0xa8] sm:$0xff]   ;;  %v1292_v38 = vsel %vm15018_vm7, %v847_v59, %v1291_v52  ;;  %v334_v31 = vmax.bf16 %v19400_v44, %v302_v50 }
  0xce   :  { %5406 = vmatprep.mubr.bf16.mxu0 %v4628_v27  ;;  %v2253_v29 = vrot.slane %v2251_v41, 1  ;;  %v14219_v5 = vld [vmem:[#allocation2 + $0x4c] sm:$0xf]  ;;  %5648 = vmatpush1.bf16.msra.mxu0 %v13777_v53  ;;  %v2830_v27 = vpop.permute.xlu0 %2829  ;;  %v2256_v34 = vshll.u32 %v13766_v48, 16  ;;  %v851_v43 = vrot.slane %v849_v46, 7  ;;  %v4528_v16 = vsel %vm4517_vm10, %v15137_v10, %v2411_v26  ;;  %v13791_v10 = vld [vmem:[%s19191_s1 + $0xb0] sm:$0xff]  }
  0xcf   :  { %v12497_v2 = vcombine.low %v15646_v61, %v14219_v5  ;;  %v1294_v1 = vld [vmem:[#allocation2 + $0x114] sm:$0xf]  ;;  %5649 = vmatprep.subr.bf16.mxu0 %v19400_v44  ;;  %v1544_v61 = vld [vmem:[#allocation2 + $0x108] sm:$0xf]  ;;  %v859_v41 = vrot.slane %v857_v13, 7  ;;  %v223_v55 = vpack.c.bf16 %v15663_v23, %v15652_v45  ;;  %v12405_v4 = vcombine.low %v334_v31, %v334_v31 }
  0xd0   :  { %v2254_v53 = vor.u32 %v2253_v29, %v2249_v40  ;;  %1293 = vst [vmem:[#allocation2 + $0x110] sm:$0x1] %v1292_v38  ;;  %v1418_v60 = vld [vmem:[#allocation2 + $0x108] sm:$0xf]  ;;  %v2258_v48 = vrot.slane %v2256_v34, 1  ;;  %v854_v46 = vor.u32 %v852_v35, %v851_v43  ;;  %v855_v5 = vrot.slane %v851_v43, 4  ;;  %v2413_v34 = vpop.permute.xlu1 %2412 }
  0xd1   :  { %v4632_v59 = vsel %vm4517_vm10, %v2579_v63, %v2830_v27  ;;  %v1545_v52 = vld [vmem:[#allocation2 + $0x10c] sm:$0xf]  ;;  %v862_v50 = vor.u32 %v860_v20, %v859_v41  ;;  %v12406_v15 = vcombine.high %v334_v31, %v334_v31  ;;  %v864_v47 = vrot.slane %v859_v41, 4  ;;  %v1298_v13 = vld [vmem:[#allocation2 + $0x11c] sm:$0x1] }
  0xd2   :  { %v1419_v6 = vld [vmem:[#allocation2 + $0x10c] sm:$0xf]  ;;  %5650 = vmatpush1.bf16.msra.mxu0 %v13784_v57  ;;  %v15683_v40 = vcombine.low %v1544_v61, %v1545_v52  ;;  %v2259_v45 = vsel %vm2019_vm8, %v2254_v53, %v2258_v48  ;;  %v1295_v23 = vsel %vm15012_vm6, %v854_v46, %v1294_v1  ;;  %v866_v35 = vshrl.u32 %v12405_v4, 16  ;;  %v15694_v20 = vld [vmem:[#allocation2 + $0x54] sm:$0xe]  ;;  %v2832_v43 = vpop.permute.xlu0 %2831 }
  0xd3   :  { %v15688_v26 = vcombine.low %v1418_v60, %v1419_v6  ;;  %5651 = vmatprep.subr.bf16.mxu0 %v19400_v44  ;;  %2442 = vrot.lane.b32.xlu1 %v2259_v45, %s14631_s18  ;;  %v863_v63 = vsel %vm14999_vm5, %v855_v5, %v862_v50  ;;  %1296 = vst [vmem:[#allocation2 + $0x114] sm:$0xf] %v1295_v23  ;;  %v869_v29 = vshll.u32 %v12405_v4, 16  ;;  %v1301_v27 = vld [vmem:[#allocation2 + $0x120] sm:$0xf]  ;;  %v874_v4 = vshrl.u32 %v12406_v15, 16 }
  0xd4   :  { %19407 = vst [vmem:[#allocation27_spill] sm:$0xff] %v15683_v40  ;;  %2859 = vrot.lane.b32.xlu0 %v15683_v40, %s14631_s18  ;;  %v2582_v6 = vsel %vm2564_vm9, %v2580_v36, %v2581_v49  ;;  %1297 = vst.msk [vmem:[#allocation2 + $0x118] sm:$0xf] %vm28_vm0, %v863_v63  ;;  %v868_v38 = vrot.slane %v866_v35, 7  ;;  %v877_v31 = vshll.u32 %v12406_v15, 16  ;;  %v2583_v53 = vrot.slane %v12497_v2, 1 }
  0xd5   :  { %5407 = vmatmul.mubr.bf16.gmra.mrb[12].mxu0 %v4528_v16  ;;  %v2261_v57 = vshrl.u32 %v15688_v26, 16  ;;  %v2263_v1 = vshll.u32 %v15688_v26, 16  ;;  %v13798_v16 = vld [vmem:[%s19191_s1 + $0xb8] sm:$0xff]   ;;  %v1299_v49 = vsel %vm15018_vm7, %v864_v47, %v1298_v13  ;;  %v263_v60 = vmul.bf16 %v14946_v21, %v223_v55  ;;  %v1305_v50 = vld [vmem:[#allocation2 + $0x128] sm:$0x1]  ;;  %v183_v55 = vld [vmem:[%s19190_s0 + $0x170] sm:$0xff] }
  0xd6   :  { %5414 = vmatprep.mubr.bf16.mxu0 %v4632_v59  ;;  %5652 = vmatpush1.bf16.msra.mxu0 %v13791_v10  ;;  %v14220_v36 = vld [vmem:[#allocation2 + $0x58] sm:$0xf]  ;;  %v871_v46 = vor.u32 %v869_v29, %v868_v38  ;;  %v872_v15 = vrot.slane %v868_v38, 4  ;;  %v876_v5 = vrot.slane %v874_v4, 7  ;;  %1300 = vst [vmem:[#allocation2 + $0x11c] sm:$0x1] %v1299_v49  ;;  %v4531_v59 = vsel %vm4517_vm10, %v15156_v33, %v2413_v34 }
  0xd7   :  { %v13769_v61 = vld [vmem:[#allocation2 + $0x110] ss:$0 sps:$4 sm:$0x11]   ;;  %v12498_v41 = vcombine.low %v15694_v20, %v14220_v36  ;;  %5653 = vmatprep.subr.bf16.mxu0 %v19400_v44  ;;  %v2265_v48 = vrot.slane %v2263_v1, 1  ;;  %v4636_v2 = vsel %vm4517_vm10, %v2582_v6, %v2832_v43  ;;  %v303_v47 = vadd.bf16 %v14949_v22, %v263_v60  ;;  %v184_v33 = vld [vmem:[%s19190_s0 + $0x178] sm:$0xff]  ;;  %v13805_v35 = vld [vmem:[%s19191_s1 + $0xc0] sm:$0xff]   ;;  %v2415_v36 = vpop.permute.xlu1 %2414 }
  0xd8   :  { %v2268_v52 = vshll.u32 %v13769_v61, 16  ;;  %v879_v45 = vor.u32 %v877_v31, %v876_v5  ;;  %v1302_v23 = vsel %vm15012_vm6, %v871_v46, %v1301_v27  ;;  %v881_v63 = vrot.slane %v876_v5, 4  ;;  %v14221_v20 = vld [vmem:[#allocation2 + $0x50] ss:$0 sps:$4 sm:$0x11]  }
  0xd9   :  { %v2266_v10 = vor.u32 %v2265_v48, %v2261_v57  ;;  %v2584_v6 = vrot.slane %v14221_v20, 1  ;;  %1303 = vst [vmem:[#allocation2 + $0x120] sm:$0xf] %v1302_v23  ;;  %v335_v34 = vmax.bf16 %v19400_v44, %v303_v47  ;;  %v1482_v4 = vld [vmem:[#allocation2 + $0x60] sm:$0xe]  ;;  %v2586_v60 = vrot.slane %v12498_v41, 1 }
  0xda   :  { %5654 = vmatpush1.bf16.msra.mxu0 %v13798_v16  ;;  %v1546_v29 = vld [vmem:[#allocation2 + $0x114] sm:$0xf]  ;;  %v2270_v13 = vrot.slane %v2268_v52, 1  ;;  %v880_v43 = vsel %vm14999_vm5, %v872_v15, %v879_v45  ;;  %v1306_v38 = vsel %vm15018_vm7, %v881_v63, %v1305_v50  ;;  %v224_v46 = vpack.c.bf16 %v184_v33, %v183_v55  ;;  %v2834_v15 = vpop.permute.xlu0 %2833  ;;  %v14222_v52 = vld [vmem:[#allocation2 + $0x64] sm:$0xf]  ;;  %v13812_v50 = vld [vmem:[%s19191_s1 + $0xc8] sm:$0xff]  }
  0xdb   :  { %v1420_v57 = vld [vmem:[#allocation2 + $0x114] sm:$0xf]  ;;  %5655 = vmatprep.subr.bf16.mxu0 %v19400_v44  ;;  %v1547_v27 = vld [vmem:[#allocation2 + $0x118] sm:$0xf]  ;;  %1304 = vst.msk [vmem:[#allocation2 + $0x124] sm:$0xf] %vm28_vm0, %v880_v43  ;;  %v12407_v49 = vcombine.low %v335_v34, %v335_v34  ;;  %v12408_v48 = vcombine.high %v335_v34, %v335_v34  ;;  %v2585_v5 = vsel %vm2564_vm9, %v2583_v53, %v2584_v6 }
  0xdc   :  { %v1421_v1 = vld [vmem:[#allocation2 + $0x118] sm:$0xf]  ;;  %v15731_v31 = vcombine.low %v1546_v29, %v1547_v27  ;;  %v2271_v16 = vsel %vm2019_vm8, %v2266_v10, %v2270_v13  ;;  %1307 = vst [vmem:[#allocation2 + $0x128] sm:$0x1] %v1306_v38  ;;  %v12499_v47 = vcombine.low %v1482_v4, %v14222_v52  ;;  %v264_v23 = vmul.bf16 %v14946_v21, %v224_v46  ;;  %v185_v20 = vld [vmem:[%s19190_s0 + $0x180] sm:$0xff] }
  0xdd   :  { %5415 = vmatmul.mubr.bf16.gmra.mrb[16].mxu0 %v4531_v59  ;;  %v15735_v61 = vcombine.low %v1420_v57, %v1421_v1  ;;  %2444 = vrot.lane.b32.xlu1 %v2271_v16, %s14631_s18  ;;  %v13773_v41 = vld [vmem:[#allocation2 + $0x11c] ss:$0 sps:$4 sm:$0x11]   ;;  %v883_v10 = vshrl.u32 %v12407_v49, 16  ;;  %v886_v55 = vshll.u32 %v12407_v49, 16  ;;  %v891_v45 = vshrl.u32 %v12408_v48, 16 }
  0xde   :  { %5422 = vmatprep.mubr.bf16.mxu0 %v4636_v2  ;;  %19408 = vst [vmem:[#allocation28_spill] sm:$0xff] %v15731_v31  ;;  %2861 = vrot.lane.b32.xlu0 %v15731_v31, %s14631_s18  ;;  %v4534_v53 = vsel %vm4517_vm10, %v15199_v54, %v2415_v36  ;;  %v14223_v33 = vld [vmem:[#allocation2 + $0x5c] ss:$0 sps:$4 sm:$0x11]   ;;  %v894_v13 = vshll.u32 %v12408_v48, 16  ;;  %v4640_v6 = vsel %vm4517_vm10, %v2585_v5, %v2834_v15  ;;  %v2280_v34 = vshll.u32 %v13773_v41, 16 }
  0xdf   :  { %v2273_v59 = vshrl.u32 %v15735_v61, 16  ;;  %v2275_v2 = vshll.u32 %v15735_v61, 16  ;;  %5656 = vmatpush1.bf16.msra.mxu0 %v13805_v35  ;;  %v2587_v29 = vrot.slane %v14223_v33, 1  ;;  %v1308_v35 = vld [vmem:[#allocation2 + $0x12c] sm:$0xf]  ;;  %v885_v27 = vrot.slane %v883_v10, 7 }
  0xe0   :  { %5657 = vmatprep.subr.bf16.mxu0 %v19400_v44  ;;  %v1548_v57 = vld [vmem:[#allocation2 + $0x120] sm:$0xf]  ;;  %v893_v43 = vrot.slane %v891_v45, 7  ;;  %v186_v1 = vld [vmem:[%s19190_s0 + $0x188] sm:$0xff]  ;;  %v2589_v4 = vrot.slane %v12499_v47, 1  ;;  %v304_v16 = vadd.bf16 %v14949_v22, %v264_v23  ;;  %v13819_v36 = vld [vmem:[%s19191_s1 + $0xd0] sm:$0xff]   ;;  %v2417_v45 = vpop.permute.xlu1 %2416 }
  0xe1   :  { %v2277_v63 = vrot.slane %v2275_v2, 1  ;;  %v1422_v38 = vld [vmem:[#allocation2 + $0x120] sm:$0xf]  ;;  %v1312_v49 = vld [vmem:[#allocation2 + $0x134] sm:$0x1]  ;;  %v2282_v46 = vrot.slane %v2280_v34, 1  ;;  %v888_v15 = vor.u32 %v886_v55, %v885_v27  ;;  %v225_v10 = vpack.c.bf16 %v186_v1, %v185_v20 }
  0xe2   :  { %v1549_v48 = vld [vmem:[#allocation2 + $0x124] sm:$0xf]  ;;  %v889_v5 = vrot.slane %v885_v27, 4  ;;  %v896_v2 = vor.u32 %v894_v13, %v893_v43  ;;  %v1483_v33 = vld [vmem:[#allocation2 + $0x6c] sm:$0xe]  ;;  %v2836_v13 = vpop.permute.xlu0 %2835 }
  0xe3   :  { %v2278_v54 = vor.u32 %v2277_v63, %v2273_v59  ;;  %5658 = vmatpush1.bf16.msra.mxu0 %v13812_v50  ;;  %v1423_v52 = vld [vmem:[#allocation2 + $0x124] sm:$0xf]  ;;  %v15762_v59 = vcombine.low %v1548_v57, %v1549_v48  ;;  %v13776_v41 = vld [vmem:[#allocation2 + $0x128] ss:$0 sps:$4 sm:$0x11]   ;;  %v336_v50 = vmax.bf16 %v19400_v44, %v304_v16  ;;  %v898_v63 = vrot.slane %v893_v43, 4 }
  0xe4   :  { %5659 = vmatprep.subr.bf16.mxu0 %v19400_v44  ;;  %v15764_v47 = vcombine.low %v1422_v38, %v1423_v52  ;;  %v897_v55 = vsel %vm14999_vm5, %v889_v5, %v896_v2  ;;  %v14224_v34 = vld [vmem:[#allocation2 + $0x68] ss:$0 sps:$4 sm:$0x11]   ;;  %v4537_v38 = vsel %vm4517_vm10, %v15234_v11, %v2417_v45  ;;  %v265_v48 = vmul.bf16 %v14946_v21, %v225_v10  ;;  %v188_v11 = vld [vmem:[%s19190_s0 + $0x198] sm:$0xff]  ;;  %v14249_v31 = vld [vmem:[#allocation2 + $0x10c] sm:$0xf] }
  0xe5   :  { %5423 = vmatmul.mubr.bf16.gmra.mrb[20].mxu0 %v4534_v53  ;;  %19409 = vst [vmem:[#allocation29_spill] sm:$0xff] %v15762_v59  ;;  %v2283_v23 = vsel %vm2019_vm8, %v2278_v54, %v2282_v46  ;;  %v1309_v53 = vsel %vm15012_vm6, %v888_v15, %v1308_v35  ;;  %2863 = vrot.lane.b32.xlu0 %v15762_v59, %s14631_s18  ;;  %1311 = vst.msk [vmem:[#allocation2 + $0x130] sm:$0xf] %vm28_vm0, %v897_v55  ;;  %v2590_v27 = vrot.slane %v14224_v34, 1  ;;  %v187_v46 = vld [vmem:[%s19190_s0 + $0x190] sm:$0xff]  ;;  %v13826_v55 = vld [vmem:[%s19191_s1 + $0xd8] sm:$0xff]  }
  0xe6   :  { %5430 = vmatprep.mubr.bf16.mxu0 %v4640_v6  ;;  %2446 = vrot.lane.b32.xlu1 %v2283_v23, %s14631_s18  ;;  %v2588_v6 = vsel %vm2564_vm9, %v2586_v60, %v2587_v29  ;;  %1310 = vst [vmem:[#allocation2 + $0x12c] sm:$0xf] %v1309_v53  ;;  %v2285_v20 = vshrl.u32 %v15764_v47, 16  ;;  %v2287_v57 = vshll.u32 %v15764_v47, 16  ;;  %v2292_v35 = vshll.u32 %v13776_v41, 16 }
  0xe7   :  { %v12409_v43 = vcombine.low %v336_v50, %v336_v50  ;;  %v12410_v1 = vcombine.high %v336_v50, %v336_v50  ;;  %v1313_v54 = vsel %vm15018_vm7, %v898_v63, %v1312_v49  ;;  %5660 = vmatpush1.bf16.msra.mxu0 %v13819_v36  ;;  %v14225_v29 = vld [vmem:[#allocation2 + $0x70] sm:$0xf]  ;;  %v4644_v15 = vsel %vm4517_vm10, %v2588_v6, %v2836_v13  ;;  %v2419_v50 = vpop.permute.xlu1 %2418  ;;  %v1319_v6 = vld [vmem:[#allocation2 + $0x140] sm:$0x1]  ;;  %v1496_v28 = vld [vmem:[#allocation2 + $0x120] sm:$0xe] }
  0xe8   :  { %v2289_v60 = vrot.slane %v2287_v57, 1  ;;  %1314 = vst [vmem:[#allocation2 + $0x134] sm:$0x1] %v1313_v54  ;;  %v12500_v16 = vcombine.low %v1483_v33, %v14225_v29  ;;  %5661 = vmatprep.subr.bf16.mxu0 %v19400_v44  ;;  %v2294_v5 = vrot.slane %v2292_v35, 1  ;;  %v2591_v10 = vsel %vm2564_vm9, %v2589_v4, %v2590_v27  ;;  %v1315_v33 = vld [vmem:[#allocation2 + $0x138] sm:$0xf]  ;;  %v2838_v4 = vpop.permute.xlu0 %2837 }
  0xe9   :  { %v900_v49 = vshrl.u32 %v12409_v43, 16  ;;  %v903_v36 = vshll.u32 %v12409_v43, 16  ;;  %v908_v52 = vshrl.u32 %v12410_v1, 16  ;;  %v911_v41 = vshll.u32 %v12410_v1, 16 }
  0xea   :  { %v2290_v2 = vor.u32 %v2289_v60, %v2285_v20  ;;  %v305_v23 = vadd.bf16 %v14949_v22, %v265_v48  ;;  %v2592_v13 = vrot.slane %v12500_v16, 1  ;;  %v226_v20 = vpack.c.bf16 %v188_v11, %v187_v46  ;;  %v14226_v43 = vld [vmem:[#allocation2 + $0x74] ss:$0 sps:$4 sm:$0x11]  }
  0xeb   :  { %v902_v45 = vrot.slane %v900_v49, 7  ;;  %v910_v63 = vrot.slane %v908_v52, 7  ;;  %v2593_v1 = vrot.slane %v14226_v43, 1  ;;  %5662 = vmatpush1.bf16.msra.mxu0 %v13826_v55  ;;  %v4540_v60 = vsel %vm4517_vm10, %v15267_v17, %v2419_v50  ;;  %v16127_v59 = vld [vmem:[#allocation2 + $0x44] ss:$0 sps:$4 sm:$0x11]  }
  0xec   :  { %v2295_v53 = vsel %vm2019_vm8, %v2290_v2, %v2294_v5  ;;  %v1551_v34 = vld [vmem:[#allocation2 + $0x130] sm:$0xf]  ;;  %v337_v54 = vmax.bf16 %v19400_v44, %v305_v23  ;;  %5663 = vmatprep.subr.bf16.mxu0 %v19400_v44  ;;  %v4648_v17 = vsel %vm4517_vm10, %v2591_v10, %v2838_v4  ;;  %v266_v50 = vmul.bf16 %v14946_v21, %v226_v20  ;;  %v189_v20 = vld [vmem:[%s19190_s0 + $0x1a0] sm:$0xff] }
  0xed   :  { %5431 = vmatmul.mubr.bf16.gmra.mrb[24].mxu0 %v4537_v38  ;;  %v1550_v57 = vld [vmem:[#allocation2 + $0x12c] sm:$0xf]  ;;  %2448 = vrot.lane.b32.xlu1 %v2295_v53, %s14631_s18  ;;  %v905_v27 = vor.u32 %v903_v36, %v902_v45  ;;  %v906_v35 = vrot.slane %v902_v45, 4  ;;  %v1484_v38 = vld [vmem:[#allocation2 + $0x78] sm:$0xe]  ;;  %v913_v16 = vor.u32 %v911_v41, %v910_v63  ;;  %v2421_v45 = vpop.permute.xlu1 %2420 }
  0xee   :  { %5438 = vmatprep.mubr.bf16.mxu0 %v4644_v15  ;;  %v15802_v29 = vcombine.low %v1550_v57, %v1551_v34  ;;  %v1424_v48 = vld [vmem:[#allocation2 + $0x12c] sm:$0xf]  ;;  %v1425_v46 = vld [vmem:[#allocation2 + $0x130] sm:$0xf]  ;;  %v915_v15 = vrot.slane %v910_v63, 4  ;;  %v12411_v11 = vcombine.low %v337_v54, %v337_v54  ;;  %v12412_v2 = vcombine.high %v337_v54, %v337_v54 }
  0xef   :  { %v1316_v5 = vsel %vm15012_vm6, %v905_v27, %v1315_v33  ;;  %v15807_v49 = vcombine.low %v1424_v48, %v1425_v46  ;;  %v13780_v36 = vld [vmem:[#allocation2 + $0x134] ss:$0 sps:$4 sm:$0x11]   ;;  %v914_v52 = vsel %vm14999_vm5, %v906_v35, %v913_v16  ;;  %v14227_v33 = vld [vmem:[#allocation2 + $0x7c] sm:$0xf]  ;;  %v190_v35 = vld [vmem:[%s19190_s0 + $0x1a8] sm:$0xff]  ;;  %v4543_v43 = vsel %vm4517_vm10, %v15306_v8, %v2421_v45  ;;  %v2840_v46 = vpop.permute.xlu0 %2839 }
  0xf0   :  { %19410 = vst [vmem:[#allocation30_spill] sm:$0xff] %v15802_v29  ;;  %2865 = vrot.lane.b32.xlu0 %v15802_v29, %s14631_s18  ;;  %1317 = vst [vmem:[#allocation2 + $0x138] sm:$0xf] %v1316_v5  ;;  %v1320_v41 = vsel %vm15018_vm7, %v915_v15, %v1319_v6  ;;  %v2304_v53 = vshll.u32 %v13780_v36, 16  ;;  %v917_v63 = vshrl.u32 %v12411_v11, 16  ;;  %v920_v10 = vshll.u32 %v12411_v11, 16 }
  0xf1   :  { %1318 = vst.msk [vmem:[#allocation2 + $0x13c] sm:$0xf] %vm28_vm0, %v914_v52  ;;  %v2297_v23 = vshrl.u32 %v15807_v49, 16  ;;  %v2299_v55 = vshll.u32 %v15807_v49, 16  ;;  %1321 = vst [vmem:[#allocation2 + $0x140] sm:$0x1] %v1320_v41  ;;  %v12501_v57 = vcombine.low %v1484_v38, %v14227_v33  ;;  %v2594_v54 = vsel %vm2564_vm9, %v2592_v13, %v2593_v1 }
  0xf2   :  { %v2306_v4 = vrot.slane %v2304_v53, 1  ;;  %v919_v27 = vrot.slane %v917_v63, 7  ;;  %v925_v6 = vshrl.u32 %v12412_v2, 16  ;;  %v928_v38 = vshll.u32 %v12412_v2, 16  ;;  %v1485_v11 = vld [vmem:[#allocation2 + $0x84] sm:$0xe] }
  0xf3   :  { %v2301_v34 = vrot.slane %v2299_v55, 1  ;;  %v306_v16 = vadd.bf16 %v14949_v22, %v266_v50  ;;  %v2595_v52 = vrot.slane %v12501_v57, 1  ;;  %v14228_v41 = vld [vmem:[#allocation2 + $0x80] ss:$0 sps:$4 sm:$0x11]   ;;  %v227_v53 = vpack.c.bf16 %v190_v35, %v189_v20 }
  0xf4   :  { %v922_v15 = vor.u32 %v920_v10, %v919_v27  ;;  %v923_v5 = vrot.slane %v919_v27, 4  ;;  %v927_v36 = vrot.slane %v925_v6, 7  ;;  %v2596_v55 = vrot.slane %v14228_v41, 1  ;;  %v14229_v27 = vld [vmem:[#allocation2 + $0x88] sm:$0xf]  ;;  %v13833_v41 = vld [vmem:[%s19191_s1 + $0xe0] sm:$0xff]  }
  0xf5   :  { %5439 = vmatmul.mubr.bf16.gmra.mrb[28].mxu0 %v4540_v60  ;;  %v1322_v60 = vld [vmem:[#allocation2 + $0x144] sm:$0xf]  ;;  %v2302_v48 = vor.u32 %v2301_v34, %v2297_v23  ;;  %v2423_v23 = vpop.permute.xlu1 %2422  ;;  %v4652_v10 = vsel %vm4517_vm10, %v2594_v54, %v2840_v46  ;;  %v12502_v6 = vcombine.low %v1485_v11, %v14229_v27 }
  0xf6   :  { %5446 = vmatprep.mubr.bf16.mxu0 %v4648_v17  ;;  %v338_v17 = vmax.bf16 %v19400_v44, %v306_v16  ;;  %v930_v13 = vor.u32 %v928_v38, %v927_v36  ;;  %v1323_v1 = vsel %vm15012_vm6, %v922_v15, %v1322_v60  ;;  %v932_v50 = vrot.slane %v927_v36, 4  ;;  %v1326_v60 = vld [vmem:[#allocation2 + $0x14c] sm:$0x1]  ;;  %5664 = vmatpush1.bf16.msra.mxu0 %v13833_v41 }
  0xf7   :  { %v1552_v63 = vld [vmem:[#allocation2 + $0x138] sm:$0xf]  ;;  %v2307_v8 = vsel %vm2019_vm8, %v2302_v48, %v2306_v4  ;;  %1324 = vst [vmem:[#allocation2 + $0x144] sm:$0xf] %v1323_v1  ;;  %v267_v16 = vmul.bf16 %v14946_v21, %v227_v53  ;;  %v4546_v15 = vsel %vm4517_vm10, %v15332_v7, %v2423_v23  ;;  %v2597_v11 = vsel %vm2564_vm9, %v2595_v52, %v2596_v55  ;;  %v2842_v1 = vpop.permute.xlu0 %2841 }
  0xf8   :  { %v1426_v2 = vld [vmem:[#allocation2 + $0x138] sm:$0xf]  ;;  %v1553_v45 = vld [vmem:[#allocation2 + $0x13c] sm:$0xf]  ;;  %2450 = vrot.lane.b32.xlu1 %v2307_v8, %s14631_s18  ;;  %v12413_v57 = vcombine.low %v338_v17, %v338_v17  ;;  %v12414_v34 = vcombine.high %v338_v17, %v338_v17  ;;  %v931_v4 = vsel %vm14999_vm5, %v923_v5, %v930_v13  ;;  %v1486_v8 = vld [vmem:[#allocation2 + $0x90] sm:$0xe]  ;;  %v1327_v7 = vsel %vm15018_vm7, %v932_v50, %v1326_v60 }
  0xf9   :  { %v1427_v33 = vld [vmem:[#allocation2 + $0x13c] sm:$0xf]  ;;  %v15836_v20 = vcombine.low %v1552_v63, %v1553_v45  ;;  %v13783_v38 = vld [vmem:[#allocation2 + $0x140] ss:$0 sps:$4 sm:$0x11]   ;;  %v2598_v45 = vrot.slane %v12502_v6, 1  ;;  %v307_v23 = vadd.bf16 %v14949_v22, %v267_v16  ;;  %5665 = vmatprep.subr.bf16.mxu0 %v19400_v44 }
  0xfa   :  { %v15840_v35 = vcombine.low %v1426_v2, %v1427_v33  ;;  %1325 = vst.msk [vmem:[#allocation2 + $0x148] sm:$0xf] %vm28_vm0, %v931_v4  ;;  %v934_v54 = vshrl.u32 %v12413_v57, 16  ;;  %v937_v48 = vshll.u32 %v12413_v57, 16  ;;  %v942_v46 = vshrl.u32 %v12414_v34, 16 }
  0xfb   :  { %19411 = vst [vmem:[#allocation31_spill] sm:$0xff] %v15836_v20  ;;  %2867 = vrot.lane.b32.xlu0 %v15836_v20, %s14631_s18  ;;  %v2316_v17 = vshll.u32 %v13783_v38, 16  ;;  %v945_v63 = vshll.u32 %v12414_v34, 16  ;;  %v1329_v2 = vld [vmem:[#allocation2 + $0x150] sm:$0xf]  ;;  %v339_v50 = vmax.bf16 %v19400_v44, %v307_v23 }
  0xfc   :  { %v2309_v5 = vshrl.u32 %v15840_v35, 16  ;;  %v2311_v36 = vshll.u32 %v15840_v35, 16  ;;  %v936_v53 = vrot.slane %v934_v54, 7  ;;  %1328 = vst [vmem:[#allocation2 + $0x14c] sm:$0x1] %v1327_v7  ;;  %v191_v34 = vld [vmem:[%s19190_s0 + $0x1b0] sm:$0xff] }
  0xfd   :  { %5447 = vmatmul.mubr.bf16.gmra.mrb[32].mxu0 %v4543_v43  ;;  %v944_v43 = vrot.slane %v942_v46, 7  ;;  %v2318_v52 = vrot.slane %v2316_v17, 1  ;;  %v14230_v60 = vld [vmem:[#allocation2 + $0x94] sm:$0xf]  ;;  %v192_v54 = vld [vmem:[%s19190_s0 + $0x1b8] sm:$0xff] }
  0xfe   :  { %5454 = vmatprep.mubr.bf16.mxu0 %v4652_v10  ;;  %v2313_v13 = vrot.slane %v2311_v36, 1  ;;  %v939_v55 = vor.u32 %v937_v48, %v936_v53  ;;  %v940_v33 = vrot.slane %v936_v53, 4  ;;  %v1333_v10 = vld [vmem:[#allocation2 + $0x158] sm:$0x1]  ;;  %v1554_v27 = vld [vmem:[#allocation2 + $0x144] sm:$0xf]  ;;  %v12503_v16 = vcombine.low %v1486_v8, %v14230_v60 }
  0xff   :  { %v947_v57 = vor.u32 %v945_v63, %v944_v43  ;;  %v1428_v38 = vld [vmem:[#allocation2 + $0x144] sm:$0xf]  ;;  %v949_v6 = vrot.slane %v944_v43, 4  ;;  %v4656_v48 = vsel %vm4517_vm10, %v2597_v11, %v2842_v1  ;;  %v14231_v41 = vld [vmem:[#allocation2 + $0x8c] ss:$0 sps:$4 sm:$0x11]   ;;  %v12415_v63 = vcombine.low %v339_v50, %v339_v50 }
 0x100   :  { %v2314_v4 = vor.u32 %v2313_v13, %v2309_v5  ;;  %v1330_v36 = vsel %vm15012_vm6, %v939_v55, %v1329_v2  ;;  %v2599_v5 = vrot.slane %v14231_v41, 1  ;;  %v12416_v8 = vcombine.high %v339_v50, %v339_v50 }
 0x101   :  { %v948_v46 = vsel %vm14999_vm5, %v940_v33, %v947_v57  ;;  %v1555_v17 = vld [vmem:[#allocation2 + $0x148] sm:$0xf]  ;;  %1331 = vst [vmem:[#allocation2 + $0x150] sm:$0xf] %v1330_v36  ;;  %v1334_v11 = vsel %vm15018_vm7, %v949_v6, %v1333_v10  ;;  %v228_v2 = vpack.c.bf16 %v192_v54, %v191_v34  ;;  %v951_v7 = vshrl.u32 %v12415_v63, 16  ;;  %v2844_v6 = vpop.permute.xlu0 %2843 }
 0x102   :  { %v2319_v53 = vsel %vm2019_vm8, %v2314_v4, %v2318_v52  ;;  %1332 = vst.msk [vmem:[#allocation2 + $0x154] sm:$0xf] %vm28_vm0, %v948_v46  ;;  %v1429_v43 = vld [vmem:[#allocation2 + $0x148] sm:$0xf]  ;;  %v15874_v13 = vcombine.low %v1554_v27, %v1555_v17  ;;  %1335 = vst [vmem:[#allocation2 + $0x158] sm:$0x1] %v1334_v11 }
 0x103   :  { %2452 = vrot.lane.b32.xlu1 %v2319_v53, %s14631_s18  ;;  %v15877_v1 = vcombine.low %v1428_v38, %v1429_v43  ;;  %v954_v23 = vshll.u32 %v12415_v63, 16  ;;  %v959_v52 = vshrl.u32 %v12416_v8, 16  ;;  %v2601_v55 = vrot.slane %v12503_v16, 1  ;;  %v14232_v27 = vld [vmem:[#allocation2 + $0x98] ss:$0 sps:$4 sm:$0x11]   ;;  %v2425_v38 = vpop.permute.xlu1 %2424 }
 0x104   :  { %19412 = vst [vmem:[#allocation32_spill] sm:$0xff] %v15874_v13  ;;  %2869 = vrot.lane.b32.xlu0 %v15874_v13, %s14631_s18  ;;  %v962_v10 = vshll.u32 %v12416_v8, 16  ;;  %v2602_v4 = vrot.slane %v14232_v27, 1  ;;  %v13787_v50 = vld [vmem:[#allocation2 + $0x14c] ss:$0 sps:$4 sm:$0x11]   ;;  %v268_v60 = vmul.bf16 %v14946_v21, %v228_v2 }
 0x105   :  { %5455 = vmatmul.mubr.bf16.gmra.mrb[36].mxu0 %v4546_v15  ;;  %v2321_v33 = vshrl.u32 %v15877_v1, 16  ;;  %v2323_v57 = vshll.u32 %v15877_v1, 16  ;;  %v2600_v15 = vsel %vm2564_vm9, %v2598_v45, %v2599_v5  ;;  %v953_v34 = vrot.slane %v951_v7, 7  ;;  %v1336_v46 = vld [vmem:[#allocation2 + $0x15c] sm:$0xf]  ;;  %v193_v43 = vld [vmem:[%s19190_s0 + $0x1c0] sm:$0xff] }
 0x106   :  { %5462 = vmatprep.mubr.bf16.mxu0 %v4656_v48  ;;  %v961_v54 = vrot.slane %v959_v52, 7  ;;  %v1487_v36 = vld [vmem:[#allocation2 + $0x9c] sm:$0xe]  ;;  %v2328_v48 = vshll.u32 %v13787_v50, 16  ;;  %v308_v53 = vadd.bf16 %v14949_v22, %v268_v60  ;;  %v194_v45 = vld [vmem:[%s19190_s0 + $0x1c8] sm:$0xff]  ;;  %v4549_v5 = vsel %vm4517_vm10, %v15355_v0, %v2425_v38 }
 0x107   :  { %v2325_v16 = vrot.slane %v2323_v57, 1  ;;  %v956_v41 = vor.u32 %v954_v23, %v953_v34  ;;  %v957_v17 = vrot.slane %v953_v34, 4  ;;  %v4660_v2 = vsel %vm4517_vm10, %v2600_v15, %v2844_v6  ;;  %v1340_v6 = vld [vmem:[#allocation2 + $0x164] sm:$0x1] }
 0x108   :  { %v1556_v63 = vld [vmem:[#allocation2 + $0x150] sm:$0xf]  ;;  %v964_v7 = vor.u32 %v962_v10, %v961_v54  ;;  %v2330_v57 = vrot.slane %v2328_v48, 1  ;;  %v2603_v34 = vsel %vm2564_vm9, %v2601_v55, %v2602_v4  ;;  %v340_v38 = vmax.bf16 %v19400_v44, %v308_v53  ;;  %v14233_v55 = vld [vmem:[#allocation2 + $0xa0] sm:$0xf] }
 0x109   :  { %v1557_v8 = vld [vmem:[#allocation2 + $0x154] sm:$0xf]  ;;  %v2326_v11 = vor.u32 %v2325_v16, %v2321_v33  ;;  %v1430_v23 = vld [vmem:[#allocation2 + $0x150] sm:$0xf]  ;;  %v1337_v27 = vsel %vm15012_vm6, %v956_v41, %v1336_v46  ;;  %v966_v10 = vrot.slane %v961_v54, 4  ;;  %v12504_v4 = vcombine.low %v1487_v36, %v14233_v55  ;;  %v2427_v46 = vpop.permute.xlu1 %2426 }
 0x10a   :  { %v15895_v52 = vcombine.low %v1556_v63, %v1557_v8  ;;  %v1431_v50 = vld [vmem:[#allocation2 + $0x154] sm:$0xf]  ;;  %v965_v60 = vsel %vm14999_vm5, %v957_v17, %v964_v7  ;;  %1338 = vst [vmem:[#allocation2 + $0x15c] sm:$0xf] %v1337_v27  ;;  %v229_v16 = vpack.c.bf16 %v194_v45, %v193_v43  ;;  %v2846_v17 = vpop.permute.xlu0 %2845  ;;  %v12417_v53 = vcombine.low %v340_v38, %v340_v38  ;;  %v15917_v43 = vld [vmem:[#allocation2 + $0xa8] sm:$0xe] }
 0x10b   :  { %v15902_v0 = vcombine.low %v1430_v23, %v1431_v50  ;;  %v13790_v33 = vld [vmem:[#allocation2 + $0x158] ss:$0 sps:$4 sm:$0x11]   ;;  %v2331_v15 = vsel %vm2019_vm8, %v2326_v11, %v2330_v57  ;;  %1339 = vst.msk [vmem:[#allocation2 + $0x160] sm:$0xf] %vm28_vm0, %v965_v60  ;;  %v12418_v63 = vcombine.high %v340_v38, %v340_v38  ;;  %v1341_v36 = vsel %vm15018_vm7, %v966_v10, %v1340_v6  ;;  %v195_v45 = vld [vmem:[%s19190_s0 + $0x1d0] sm:$0xff] }
 0x10c   :  { %19413 = vst [vmem:[#allocation33_spill] sm:$0xff] %v15895_v52  ;;  %2871 = vrot.lane.b32.xlu0 %v15895_v52, %s14631_s18  ;;  %2454 = vrot.lane.b32.xlu1 %v2331_v15, %s14631_s18  ;;  %v2340_v41 = vshll.u32 %v13790_v33, 16  ;;  %v196_v8 = vld [vmem:[%s19190_s0 + $0x1d8] sm:$0xff]  ;;  %v968_v7 = vshrl.u32 %v12417_v53, 16  ;;  %v971_v23 = vshll.u32 %v12417_v53, 16  ;;  %v4552_v57 = vsel %vm4517_vm10, %v15380_v14, %v2427_v46 }
 0x10d   :  { %5463 = vmatmul.mubr.bf16.gmra.mrb[40].mxu0 %v4549_v5  ;;  %v2333_v48 = vshrl.u32 %v15902_v0, 16  ;;  %v2335_v54 = vshll.u32 %v15902_v0, 16  ;;  %v13840_v5 = vld [vmem:[%s19191_s1 + $0xe8] sm:$0xff]   ;;  %1342 = vst [vmem:[#allocation2 + $0x164] sm:$0x1] %v1341_v36  ;;  %v4664_v27 = vsel %vm4517_vm10, %v2603_v34, %v2846_v17  ;;  %v976_v50 = vshrl.u32 %v12418_v63, 16 }
 0x10e   :  { %5470 = vmatprep.mubr.bf16.mxu0 %v4660_v2  ;;  %v2342_v2 = vrot.slane %v2340_v41, 1  ;;  %5666 = vmatpush1.bf16.msra.mxu0 %v13840_v5  ;;  %v979_v60 = vshll.u32 %v12418_v63, 16  ;;  %v1489_v33 = vld [vmem:[#allocation2 + $0xb4] sm:$0xe]  ;;  %v970_v10 = vrot.slane %v968_v7, 7  ;;  %v2604_v15 = vrot.slane %v12504_v4, 1  ;;  %v2429_v63 = vpop.permute.xlu1 %2428 }
 0x10f   :  { %v2337_v11 = vrot.slane %v2335_v54, 1  ;;  %5667 = vmatprep.subr.bf16.mxu0 %v19400_v44  ;;  %v1343_v6 = vld [vmem:[#allocation2 + $0x168] sm:$0xf]  ;;  %v269_v55 = vmul.bf16 %v14946_v21, %v229_v16  ;;  %v978_v41 = vrot.slane %v976_v50, 7  ;;  %v14235_v52 = vld [vmem:[#allocation2 + $0xac] sm:$0xf]  ;;  %v230_v34 = vpack.c.bf16 %v196_v8, %v195_v45 }
 0x110   :  { %v14234_v5 = vld [vmem:[#allocation2 + $0xa4] ss:$0 sps:$4 sm:$0x11]   ;;  %v12505_v14 = vcombine.low %v15917_v43, %v14235_v52  ;;  %v973_v13 = vor.u32 %v971_v23, %v970_v10  ;;  %v14236_v7 = vld [vmem:[#allocation2 + $0xb8] sm:$0xf]  ;;  %v198_v23 = vld [vmem:[%s19190_s0 + $0x1e8] sm:$0xff] }
 0x111   :  { %v2338_v38 = vor.u32 %v2337_v11, %v2333_v48  ;;  %v1558_v54 = vld [vmem:[#allocation2 + $0x15c] sm:$0xf]  ;;  %v2605_v36 = vrot.slane %v14234_v5, 1  ;;  %v974_v48 = vrot.slane %v970_v10, 4  ;;  %v12506_v4 = vcombine.low %v1489_v33, %v14236_v7  ;;  %v1347_v52 = vld [vmem:[#allocation2 + $0x170] sm:$0x1]  ;;  %v2848_v10 = vpop.permute.xlu0 %2847 }
 0x112   :  { %v1432_v53 = vld [vmem:[#allocation2 + $0x15c] sm:$0xf]  ;;  %v1559_v46 = vld [vmem:[#allocation2 + $0x160] sm:$0xf]  ;;  %v981_v50 = vor.u32 %v979_v60, %v978_v41  ;;  %v983_v20 = vrot.slane %v978_v41, 4  ;;  %v1344_v43 = vsel %vm15012_vm6, %v973_v13, %v1343_v6  ;;  %v309_v45 = vadd.bf16 %v14949_v22, %v269_v55 }
 0x113   :  { %v2343_v17 = vsel %vm2019_vm8, %v2338_v38, %v2342_v2  ;;  %v1433_v11 = vld [vmem:[#allocation2 + $0x160] sm:$0xf]  ;;  %v15932_v16 = vcombine.low %v1558_v54, %v1559_v46  ;;  %v270_v8 = vmul.bf16 %v14946_v21, %v230_v34  ;;  %1345 = vst [vmem:[#allocation2 + $0x168] sm:$0xf] %v1344_v43  ;;  %v2606_v60 = vsel %vm2564_vm9, %v2604_v15, %v2605_v36 }
 0x114   :  { %2456 = vrot.lane.b32.xlu1 %v2343_v17, %s14631_s18  ;;  %v15935_v5 = vcombine.low %v1432_v53, %v1433_v11  ;;  %v197_v2 = vld [vmem:[%s19190_s0 + $0x1e0] sm:$0xff]  ;;  %v982_v13 = vsel %vm14999_vm5, %v974_v48, %v981_v50  ;;  %v341_v6 = vmax.bf16 %v19400_v44, %v309_v45  ;;  %v1348_v55 = vsel %vm15018_vm7, %v983_v20, %v1347_v52  ;;  %v14237_v41 = vld [vmem:[#allocation2 + $0xb0] ss:$0 sps:$4 sm:$0x11]   ;;  %v2431_v17 = vpop.permute.xlu1 %2430  ;;  %v15963_v11 = vld [vmem:[#allocation2 + $0xd8] sm:$0xe] }
 0x115   :  { %5471 = vmatmul.mubr.bf16.gmra.mrb[44].mxu0 %v4552_v57  ;;  %19414 = vst [vmem:[#allocation34_spill] sm:$0xff] %v15932_v16  ;;  %2873 = vrot.lane.b32.xlu0 %v15932_v16, %s14631_s18  ;;  %v4555_v57 = vsel %vm4517_vm10, %v15401_v51, %v2429_v63  ;;  %1346 = vst.msk [vmem:[#allocation2 + $0x16c] sm:$0xf] %vm28_vm0, %v982_v13  ;;  %v13794_v33 = vld [vmem:[#allocation2 + $0x164] ss:$0 sps:$4 sm:$0x11]   ;;  %v310_v51 = vadd.bf16 %v14949_v22, %v270_v8 }
 0x116   :  { %5478 = vmatprep.mubr.bf16.mxu0 %v4664_v27  ;;  %v2345_v27 = vshrl.u32 %v15935_v5, 16  ;;  %v2347_v38 = vshll.u32 %v15935_v5, 16  ;;  %1349 = vst [vmem:[#allocation2 + $0x170] sm:$0x1] %v1348_v55  ;;  %v2607_v54 = vrot.slane %v12505_v14, 1  ;;  %v2608_v53 = vrot.slane %v14237_v41, 1 }
 0x117   :  { %v15961_v34 = vrot.slane %v12506_v4, 1  ;;  %v231_v15 = vpack.c.bf16 %v198_v23, %v197_v2  ;;  %v2352_v46 = vshll.u32 %v13794_v33, 16  ;;  %v12419_v63 = vcombine.low %v341_v6, %v341_v6  ;;  %v1350_v2 = vld [vmem:[#allocation2 + $0x174] sm:$0xf] }
 0x118   :  { %v2349_v36 = vrot.slane %v2347_v38, 1  ;;  %v12420_v48 = vcombine.high %v341_v6, %v341_v6  ;;  %v4668_v7 = vsel %vm4517_vm10, %v2606_v60, %v2848_v10  ;;  %v342_v20 = vmax.bf16 %v19400_v44, %v310_v51  ;;  %v2850_v51 = vpop.permute.xlu0 %2849  ;;  %v14238_v41 = vld [vmem:[#allocation2 + $0xbc] ss:$0 sps:$4 sm:$0x11]  }
 0x119   :  { %v2354_v52 = vrot.slane %v2352_v46, 1  ;;  %v985_v43 = vshrl.u32 %v12419_v63, 16  ;;  %v988_v14 = vshll.u32 %v12419_v63, 16  ;;  %v4558_v4 = vsel %vm4517_vm10, %v15419_v58, %v2431_v17  ;;  %v14239_v46 = vld [vmem:[#allocation2 + $0xdc] sm:$0xf] }
 0x11a   :  { %v2350_v50 = vor.u32 %v2349_v36, %v2345_v27  ;;  %v993_v45 = vshrl.u32 %v12420_v48, 16  ;;  %v996_v8 = vshll.u32 %v12420_v48, 16  ;;  %v271_v23 = vmul.bf16 %v14946_v21, %v231_v15  ;;  %v1560_v13 = vld [vmem:[#allocation2 + $0x168] sm:$0xf] }
 0x11b   :  { %v987_v60 = vrot.slane %v985_v43, 7  ;;  %v1434_v38 = vld [vmem:[#allocation2 + $0x168] sm:$0xf]  ;;  %v12421_v10 = vcombine.low %v342_v20, %v342_v20  ;;  %v12422_v27 = vcombine.high %v342_v20, %v342_v20  ;;  %v2609_v58 = vsel %vm2564_vm9, %v2607_v54, %v2608_v53  ;;  %v199_v54 = vld [vmem:[%s19190_s0 + $0x1f0] sm:$0xff]  ;;  %v200_v53 = vld [vmem:[%s19190_s0 + $0x1f8] sm:$0xff] }
 0x11c   :  { %v2355_v33 = vsel %vm2019_vm8, %v2350_v50, %v2354_v52  ;;  %v1561_v6 = vld [vmem:[#allocation2 + $0x16c] sm:$0xf]  ;;  %v2611_v36 = vrot.slane %v14238_v41, 1  ;;  %v12507_v15 = vcombine.low %v15963_v11, %v14239_v46 }
 0x11d   :  { %5479 = vmatmul.mubr.bf16.gmra.mrb[48].mxu0 %v4555_v57  ;;  %2458 = vrot.lane.b32.xlu1 %v2355_v33, %s14631_s18  ;;  %v995_v57 = vrot.slane %v993_v45, 7  ;;  %v1435_v55 = vld [vmem:[#allocation2 + $0x16c] sm:$0xf]  ;;  %v15974_v17 = vcombine.low %v1560_v13, %v1561_v6  ;;  %v990_v63 = vor.u32 %v988_v14, %v987_v60  ;;  %v991_v48 = vrot.slane %v987_v60, 4  ;;  %v1354_v6 = vld [vmem:[#allocation2 + $0x17c] sm:$0x1] }
 0x11e   :  { %5486 = vmatprep.mubr.bf16.mxu0 %v4668_v7  ;;  %v15976_v7 = vcombine.low %v1434_v38, %v1435_v55  ;;  %v13797_v20 = vld [vmem:[#allocation2 + $0x170] ss:$0 sps:$4 sm:$0x11]   ;;  %v1002_v52 = vshrl.u32 %v12421_v10, 16  ;;  %v1005_v43 = vshll.u32 %v12421_v10, 16  ;;  %v1010_v45 = vshrl.u32 %v12422_v27, 16 }
 0x11f   :  { %19415 = vst [vmem:[#allocation35_spill] sm:$0xff] %v15974_v17  ;;  %v998_v50 = vor.u32 %v996_v8, %v995_v57  ;;  %2875 = vrot.lane.b32.xlu0 %v15974_v17, %s14631_s18  ;;  %v1351_v11 = vsel %vm15012_vm6, %v990_v63, %v1350_v2  ;;  %v4672_v8 = vsel %vm4517_vm10, %v2609_v58, %v2850_v51  ;;  %v2364_v38 = vshll.u32 %v13797_v20, 16  ;;  %v13847_v55 = vld [vmem:[%s19191_s1 + $0xf0] sm:$0xff]   ;;  %v1357_v51 = vld [vmem:[#allocation2 + $0x180] sm:$0xf] }
 0x120   :  { %v2357_v14 = vshrl.u32 %v15976_v7, 16  ;;  %v311_v13 = vadd.bf16 %v14949_v22, %v271_v23  ;;  %1352 = vst [vmem:[#allocation2 + $0x174] sm:$0xf] %v1351_v11  ;;  %v2359_v60 = vshll.u32 %v15976_v7, 16  ;;  %v1004_v10 = vrot.slane %v1002_v52, 7  ;;  %5668 = vmatpush1.bf16.msra.mxu0 %v13847_v55 }
 0x121   :  { %v999_v33 = vsel %vm14999_vm5, %v991_v48, %v998_v50  ;;  %v1012_v2 = vrot.slane %v1010_v45, 7  ;;  %v1013_v41 = vshll.u32 %v12422_v27, 16  ;;  %v1000_v58 = vrot.slane %v995_v57, 4  ;;  %v1361_v17 = vld [vmem:[#allocation2 + $0x188] sm:$0x1]  ;;  %v2852_v45 = vpop.permute.xlu0 %2851  ;;  %5669 = vmatprep.subr.bf16.mxu0 %v19400_v44 }
 0x122   :  { %1353 = vst.msk [vmem:[#allocation2 + $0x178] sm:$0xf] %vm28_vm0, %v999_v33  ;;  %v232_v23 = vpack.c.bf16 %v200_v53, %v199_v54  ;;  %v2361_v46 = vrot.slane %v2359_v60, 1  ;;  %v2366_v63 = vrot.slane %v2364_v38, 1  ;;  %v1007_v48 = vor.u32 %v1005_v43, %v1004_v10  ;;  %v2433_v33 = vpop.permute.xlu1 %2432  ;;  %v1491_v38 = vld [vmem:[#allocation2 + $0xe4] sm:$0xe] }
 0x123   :  { %v1008_v50 = vrot.slane %v1004_v10, 4  ;;  %v1015_v20 = vor.u32 %v1013_v41, %v1012_v2  ;;  %v1355_v52 = vsel %vm15018_vm7, %v1000_v58, %v1354_v6  ;;  %v343_v11 = vmax.bf16 %v19400_v44, %v311_v13 }
 0x124   :  { %v2362_v16 = vor.u32 %v2361_v46, %v2357_v14  ;;  %v1358_v27 = vsel %vm15012_vm6, %v1007_v48, %v1357_v51  ;;  %1356 = vst [vmem:[#allocation2 + $0x17c] sm:$0x1] %v1355_v52  ;;  %v1017_v57 = vrot.slane %v1012_v2, 4  ;;  %v272_v60 = vmul.bf16 %v14946_v21, %v232_v23  ;;  %v16022_v52 = vld [vmem:[#allocation2 + $0x1c] sm:$0xf] }
 0x125   :  { %5487 = vmatmul.mubr.bf16.gmra.mrb[52].mxu0 %v4558_v4  ;;  %v2612_v4 = vsel %vm2564_vm9, %v15961_v34, %v2611_v36  ;;  %v1016_v43 = vsel %vm14999_vm5, %v1008_v50, %v1015_v20  ;;  %1359 = vst [vmem:[#allocation2 + $0x180] sm:$0xf] %v1358_v27  ;;  %v12423_v54 = vcombine.low %v343_v11, %v343_v11  ;;  %v14240_v34 = vld [vmem:[#allocation2 + $0xe0] ss:$0 sps:$4 sm:$0x11]  }
 0x126   :  { %5494 = vmatprep.mubr.bf16.mxu0 %v4672_v8  ;;  %v12424_v53 = vcombine.high %v343_v11, %v343_v11  ;;  %v2613_v8 = vrot.slane %v12507_v15, 1  ;;  %v2367_v14 = vsel %vm2019_vm8, %v2362_v16, %v2366_v63  ;;  %1360 = vst.msk [vmem:[#allocation2 + $0x184] sm:$0xf] %vm28_vm0, %v1016_v43  ;;  %v1362_v13 = vsel %vm15018_vm7, %v1017_v57, %v1361_v17  ;;  %v2435_v51 = vpop.permute.xlu1 %2434  ;;  %v14241_v50 = vld [vmem:[#allocation2 + $0xe8] sm:$0xf]  ;;  %v13853_v11 = vld [vmem:[%s19191_s1 + $0x100] sm:$0xff]  }
 0x127   :  { %v2614_v36 = vrot.slane %v14240_v34, 1  ;;  %v1562_v10 = vld [vmem:[#allocation2 + $0x174] sm:$0xf]  ;;  %2460 = vrot.lane.b32.xlu1 %v2367_v14, %s14631_s18  ;;  %v4561_v15 = vsel %vm4517_vm10, %v15456_v32, %v2433_v33  ;;  %v1019_v55 = vshrl.u32 %v12423_v54, 16  ;;  %v1022_v2 = vshll.u32 %v12423_v54, 16  ;;  %13275 = vmatprep.subr.bf16.mxu1 %v13853_v11 }
 0x128   :  { %v1436_v6 = vld [vmem:[#allocation2 + $0x174] sm:$0xf]  ;;  %1363 = vst [vmem:[#allocation2 + $0x188] sm:$0x1] %v1362_v13  ;;  %v4676_v17 = vsel %vm4517_vm10, %v2612_v4, %v2852_v45  ;;  %v1027_v58 = vshrl.u32 %v12424_v53, 16  ;;  %v1030_v46 = vshll.u32 %v12424_v53, 16  ;;  %v312_v21 = vadd.bf16 %v14949_v22, %v272_v60  ;;  %13276 = vmatpush3.bf16.msra.mxu1 %v13853_v11 }
 0x129   :  { %v1563_v16 = vld [vmem:[#allocation2 + $0x178] sm:$0xf]  ;;  %v1021_v48 = vrot.slane %v1019_v55, 7  ;;  %v12508_v32 = vcombine.low %v1491_v38, %v14241_v50  ;;  %v4564_v57 = vsel %vm4517_vm10, %v15484_v37, %v2435_v51  ;;  %v1364_v43 = vld [vmem:[#allocation2 + $0x18c] sm:$0xf]  ;;  %v2615_v45 = vsel %vm2564_vm9, %v2613_v8, %v2614_v36 }
 0x12a   :  { %v1437_v41 = vld [vmem:[#allocation2 + $0x178] sm:$0xf]  ;;  %v16018_v23 = vcombine.low %v1562_v10, %v1563_v16  ;;  %v16027_v33 = vrot.slane %v1027_v58, 7  ;;  %v344_v27 = vmax.bf16 %v19400_v44, %v312_v21 }
 0x12b   :  { %v16020_v63 = vcombine.low %v1436_v6, %v1437_v41  ;;  %v1635_v20 = vld [vmem:[#allocation2 + $0x18] sm:$0xf]  ;;  %v13801_v53 = vld [vmem:[#allocation2 + $0x17c] ss:$0 sps:$4 sm:$0x11]   ;;  %v1024_v14 = vor.u32 %v1022_v2, %v1021_v48  ;;  %v1025_v13 = vrot.slane %v1021_v48, 4 }
 0x12c   :  { %19416 = vst [vmem:[#allocation36_spill] sm:$0xff] %v16018_v23  ;;  %2877 = vrot.lane.b32.xlu0 %v16018_v23, %s14631_s18  ;;  %v1564_v54 = vld [vmem:[#allocation2 + $0x180] sm:$0xf]  ;;  %v1032_v34 = vor.u32 %v1030_v46, %v16027_v33  ;;  %v16039_v60 = vcombine.low %v1635_v20, %v16022_v52  ;;  %v2854_v6 = vpop.permute.xlu0 %2853  ;;  %v12425_v55 = vcombine.low %v344_v27, %v344_v27  ;;  %v2616_v37 = vrot.slane %v12508_v32, 1  ;;  %v1371_v11 = vld [vmem:[#allocation2 + $0x198] sm:$0xf] }
 0x12d   :  { %19417 = vst [vmem:[#allocation37_spill] sm:$0xff] %v16020_v63  ;;  %5495 = vmatmul.mubr.bf16.gmra.mrb[56].mxu0 %v4561_v15  ;;  %v2369_v22 = vshrl.u32 %v16020_v63, 16  ;;  %v2371_v4 = vshll.u32 %v16020_v63, 16  ;;  %v1565_v38 = vld [vmem:[#allocation2 + $0x184] sm:$0xf]  ;;  %v12426_v16 = vcombine.high %v344_v27, %v344_v27  ;;  %v2376_v8 = vshll.u32 %v13801_v53, 16 }
 0x12e   :  { %5502 = vmatprep.mubr.bf16.mxu0 %v4676_v17  ;;  %19418 = vst [vmem:[#allocation38_spill] sm:$0xff] %v16039_v60  ;;  %v1438_v15 = vld [vmem:[#allocation2 + $0x180] sm:$0xf]  ;;  %v16041_v41 = vcombine.low %v1564_v54, %v1565_v38  ;;  %v1033_v36 = vsel %vm14999_vm5, %v1025_v13, %v1032_v34  ;;  %v1365_v2 = vsel %vm15012_vm6, %v1024_v14, %v1364_v43  ;;  %v1439_v51 = vld [vmem:[#allocation2 + $0x184] sm:$0xf]  ;;  %v1036_v21 = vshrl.u32 %v12425_v55, 16 }
 0x12f   :  { %v2373_v10 = vrot.slane %v2371_v4, 1  ;;  %1366 = vst [vmem:[#allocation2 + $0x18c] sm:$0xf] %v1365_v2  ;;  %1367 = vst.msk [vmem:[#allocation2 + $0x190] sm:$0xf] %vm28_vm0, %v1033_v36  ;;  %v16048_v58 = vcombine.low %v1438_v15, %v1439_v51  ;;  %v1039_v48 = vshll.u32 %v12425_v55, 16  ;;  %v4680_v32 = vsel %vm4517_vm10, %v2615_v45, %v2854_v6  ;;  %v2437_v55 = vpop.permute.xlu1 %2436 }
 0x130   :  { %19419 = vst [vmem:[#allocation39_spill] sm:$0xff] %v16041_v41  ;;  %v13804_v46 = vld [vmem:[#allocation2 + $0x188] ss:$0 sps:$4 sm:$0x11]   ;;  %2879 = vrot.lane.b32.xlu0 %v16041_v41, %s14631_s18  ;;  %v2378_v50 = vrot.slane %v2376_v8, 1  ;;  %v1044_v20 = vshrl.u32 %v12426_v16, 16 }
 0x131   :  { %v2374_v17 = vor.u32 %v2373_v10, %v2369_v22  ;;  %19420 = vst [vmem:[#allocation40_spill] sm:$0xff] %v16048_v58  ;;  %v14242_v27 = vld [vmem:[#allocation2 + $0xec] ss:$0 sps:$4 sm:$0x11]   ;;  %v2381_v22 = vshrl.u32 %v16048_v58, 16  ;;  %v2383_v43 = vshll.u32 %v16048_v58, 16 }
 0x132   :  { %v2617_v4 = vrot.slane %v14242_v27, 1  ;;  %v2388_v54 = vshll.u32 %v13804_v46, 16  ;;  %v1038_v53 = vrot.slane %v1036_v21, 7  ;;  %v13855_v14 = vld [vmem:[%s19191_s1 + $0xf8] sm:$0xff]   ;;  %v13856_v13 = vld [vmem:[%s19191_s1 + $0x108] sm:$0xff]   ;;  %v16062_v34 = vrot.slane %v1044_v20, 7 }
 0x133   :  { %v2379_v45 = vsel %vm2019_vm8, %v2374_v17, %v2378_v50  ;;  %v1047_v38 = vshll.u32 %v12426_v16, 16  ;;  %v16064_v10 = vld [vmem:[#allocation2 + $0x20] ss:$0 sps:$4 sm:$0x11]   ;;  %v2385_v15 = vrot.slane %v2383_v43, 1  ;;  %v13859_v51 = vld [vmem:[%s19191_s1 + $0x110] sm:$0xff]   ;;  %5670 = vmatpush1.bf16.msra.mxu0 %v13855_v14  ;;  %13277 = vmatprep.subr.bf16.mxu1 %v13856_v13 }
 0x134   :  { %19421 = vst [vmem:[#allocation41_spill] sm:$0xff] %v16062_v34  ;;  %2462 = vrot.lane.b32.xlu1 %v2379_v45, %s14631_s18  ;;  %v2390_v6 = vrot.slane %v2388_v54, 1  ;;  %v1041_v8 = vor.u32 %v1039_v48, %v1038_v53  ;;  %v1042_v36 = vrot.slane %v1038_v53, 4  ;;  %v1368_v2 = vld [vmem:[#allocation2 + $0x194] sm:$0x1]  ;;  %v1034_v17 = vrot.slane %v16027_v33, 4  ;;  %13278 = vmatpush3.bf16.msra.mxu1 %v13856_v13 }
 0x135   :  { %5503 = vmatmul.mubr.bf16.gmra.mrb[60].mxu0 %v4564_v57  ;;  %v1049_v57 = vor.u32 %v1047_v38, %v16062_v34  ;;  %v3878_v16 = vshrl.u32 %v16039_v60, 16  ;;  %v2386_v46 = vor.u32 %v2385_v15, %v2381_v22  ;;  %v2618_v48 = vsel %vm2564_vm9, %v2616_v37, %v2617_v4  ;;  %v1602_v20 = vld [vmem:[#allocation2 + $0xc] sm:$0xe]  ;;  %v1492_v27 = vld [vmem:[#allocation2 + $0xf0] sm:$0xe]  ;;  %13279 = vmatprep.subr.bf16.mxu1 %v13859_v51 }
 0x136   :  { %5510 = vmatprep.mubr.bf16.mxu0 %v4680_v32  ;;  %v1372_v21 = vsel %vm15012_vm6, %v1041_v8, %v1371_v11  ;;  %v3880_v32 = vshll.u32 %v16039_v60, 16  ;;  %v1566_v43 = vld [vmem:[#allocation2 + $0x18c] sm:$0xf]  ;;  %v1567_v54 = vld [vmem:[#allocation2 + $0x190] sm:$0xf]  ;;  %v4567_v33 = vsel %vm4517_vm10, %v15465_v42, %v2437_v55  ;;  %v1369_v11 = vsel %vm15018_vm7, %v1034_v17, %v1368_v2 }
 0x137   :  { %v2856_v50 = vpop.permute.xlu0 %2855  ;;  %v1050_v53 = vsel %vm14999_vm5, %v1042_v36, %v1049_v57  ;;  %1373 = vst [vmem:[#allocation2 + $0x198] sm:$0xf] %v1372_v21  ;;  %v1440_v22 = vld [vmem:[#allocation2 + $0x18c] sm:$0xf]  ;;  %v16083_v37 = vcombine.low %v1566_v43, %v1567_v54  ;;  %v2391_v4 = vsel %vm2019_vm8, %v2386_v46, %v2390_v6  ;;  %1370 = vst [vmem:[#allocation2 + $0x194] sm:$0x1] %v1369_v11 }
 0x138   :  { %1374 = vst.msk [vmem:[#allocation2 + $0x19c] sm:$0xf] %vm28_vm0, %v1050_v53  ;;  %v1441_v14 = vld [vmem:[#allocation2 + $0x190] sm:$0xf]  ;;  %v3882_v13 = vrot.slane %v3880_v32, 1  ;;  %v3885_v42 = vshll.u32 %v16064_v10, 16  ;;  %2464 = vrot.lane.b32.xlu1 %v2391_v4, %s14631_s18  ;;  %v4684_v38 = vsel %vm4517_vm10, %v2618_v48, %v2856_v50  ;;  %13280 = vmatpush3.bf16.msra.mxu1 %v13859_v51  ;;  %v2439_v32 = vpop.permute.xlu1 %2438 }
 0x139   :  { %19422 = vst [vmem:[#allocation42_spill] sm:$0xff] %v16083_v37  ;;  %v16089_v45 = vcombine.low %v1440_v22, %v1441_v14  ;;  %v14243_v15 = vld [vmem:[#allocation2 + $0xf4] sm:$0xf]  ;;  %v1637_v8 = vld [vmem:[#allocation2 + $0x24] sm:$0xf]  ;;  %2881 = vrot.lane.b32.xlu0 %v16083_v37, %s14631_s18  ;;  %v13862_v48 = vld [vmem:[%s19191_s1 + $0x118] sm:$0xff]  }
 0x13a   :  { %v12509_v55 = vcombine.low %v1492_v27, %v14243_v15  ;;  %v16092_v36 = vld [vmem:[#allocation2 + $0x28] sm:$0xf]  ;;  %v16096_v6 = vld [vmem:[#allocation2 + $0x14] ss:$0 sps:$4 sm:$0x11]   ;;  %v3883_v27 = vor.u32 %v3882_v13, %v3878_v16  ;;  %v3887_v43 = vrot.slane %v3885_v42, 1  ;;  %13281 = vmatprep.subr.bf16.mxu1 %v13862_v48 }
 0x13b   :  { %19423 = vst [vmem:[#allocation43_spill] sm:$0xff] %v16089_v45  ;;  %v16098_v2 = vld [vmem:[#allocation2 + $0x2c] ss:$0 sps:$4 sm:$0x11]   ;;  %v2395_v57 = vshll.u32 %v16089_v45, 16  ;;  %v16105_v11 = vcombine.low %v1637_v8, %v16092_v36  ;;  %v2393_v22 = vshrl.u32 %v16089_v45, 16 }
 0x13c   :  { %v14244_v17 = vld [vmem:[#allocation2 + $0x10] sm:$0xf]  ;;  %v2619_v21 = vrot.slane %v12509_v55, 1  ;;  %v1493_v50 = vld [vmem:[#allocation2 + $0xfc] sm:$0xe]  ;;  %v3897_v13 = vshll.u32 %v16098_v2, 16  ;;  %13282 = vmatpush3.bf16.msra.mxu1 %v13862_v48  ;;  %v3888_v37 = vsel %vm2019_vm8, %v3883_v27, %v3887_v43 }
 0x13d   :  { %5511 = vmatmul.mubr.bf16.gmra.mrb[64].mxu0 %v4567_v33  ;;  %v12587_v46 = vcombine.low %v1602_v20, %v14244_v17  ;;  %v14245_v54 = vld [vmem:[#allocation2 + $0xf8] ss:$0 sps:$4 sm:$0x11]   ;;  %19424 = vst [vmem:[#allocation44_spill] sm:$0xff] %v16105_v11  ;;  %v1603_v51 = vld [vmem:[#allocation2 + $0x18] sm:$0xe]  ;;  %v2858_v15 = vpop.permute.xlu0 %2857  ;;  %11352 = vmatprep.subr.bf16.mxu1 %v19400_v44 }
 0x13e   :  { %5518 = vmatprep.mubr.bf16.mxu0 %v4684_v38  ;;  %v2620_v53 = vrot.slane %v14245_v54, 1  ;;  %v1639_v33 = vld [vmem:[#allocation2 + $0x30] sm:$0xf]  ;;  %v2397_v20 = vrot.slane %v2395_v57, 1  ;;  %v1568_v14 = vld [vmem:[#allocation2 + $0x198] sm:$0xf]  ;;  %v4570_v57 = vsel %vm4517_vm10, %v15549_v39, %v2439_v32 }
 0x13f   :  { %v16108_v4 = vld [vmem:[#allocation2 + $0x38] ss:$0 sps:$4 sm:$0x11]   ;;  %v3892_v16 = vshll.u32 %v16105_v11, 16  ;;  %v14246_v42 = vld [vmem:[#allocation2 + $0x100] sm:$0xf] }
 0x140   :  { %v2621_v55 = vsel %vm2564_vm9, %v2619_v21, %v2620_v53  ;;  %v12510_v38 = vcombine.low %v1493_v50, %v14246_v42  ;;  %v16113_v8 = vld [vmem:[#allocation2 + $0x34] sm:$0xf]  ;;  %v1569_v17 = vld [vmem:[#allocation2 + $0x19c] sm:$0xf]  ;;  %v3461_v54 = vrot.slane %v12587_v46, 1  ;;  %v3890_v9 = vshrl.u32 %v16105_v11, 16 }
 0x141   :  { %v16119_v21 = vcombine.low %v1568_v14, %v1569_v17  ;;  %v13808_v53 = vld [vmem:[#allocation2 + $0x194] ss:$0 sps:$4 sm:$0x11]   ;;  %v3462_v50 = vrot.slane %v16096_v6, 1  ;;  %v3894_v42 = vrot.slane %v3892_v16, 1  ;;  %v2398_v41 = vor.u32 %v2397_v20, %v2393_v22  ;;  %v2441_v17 = vpop.permute.xlu1 %2440 }
 0x142   :  { %v4688_v48 = vsel %vm4517_vm10, %v2621_v55, %v2858_v15  ;;  %v14247_v23 = vld [vmem:[#allocation2 + $0x1c] sm:$0xf]  ;;  %v16125_v39 = vcombine.low %v1639_v33, %v16113_v8  ;;  %v1494_v46 = vld [vmem:[#allocation2 + $0x108] sm:$0xe]  ;;  %v2400_v14 = vshll.u32 %v13808_v53, 16  ;;  %v3899_v27 = vrot.slane %v3897_v13, 1 }
 0x143   :  { %19425 = vst [vmem:[#allocation45_spill] sm:$0xff] %v16119_v21  ;;  %v12588_v29 = vcombine.low %v1603_v51, %v14247_v23  ;;  %v1641_v32 = vld [vmem:[#allocation2 + $0x3c] sm:$0xf]  ;;  %2883 = vrot.lane.b32.xlu0 %v16119_v21, %s14631_s18  ;;  %v2622_v43 = vrot.slane %v12510_v38, 1  ;;  %v16131_v22 = vld [vmem:[#allocation2 + $0x40] sm:$0xf]  ;;  %v3895_v20 = vor.u32 %v3894_v42, %v3890_v9  ;;  %v3463_v55 = vsel %vm2564_vm9, %v3461_v54, %v3462_v50 }
 0x144   :  { %19426 = vst [vmem:[#allocation46_spill] sm:$0xff] %v16125_v39  ;;  %v14248_v6 = vld [vmem:[#allocation2 + $0x104] ss:$0 sps:$4 sm:$0x11]   ;;  %v3902_v23 = vshrl.u32 %v16125_v39, 16  ;;  %v3904_v51 = vshll.u32 %v16125_v39, 16  ;;  %v12511_v40 = vcombine.low %v1494_v46, %v14249_v31 }
 0x145   :  { %v2623_v16 = vrot.slane %v14248_v6, 1  ;;  %5519 = vmatmul.mubr.bf16.gmra.mrb[68].mxu0 %v4570_v57  ;;  %v3909_v33 = vshll.u32 %v16108_v4, 16  ;;  %v2402_v15 = vrot.slane %v2400_v14, 1  ;;  %v3464_v53 = vrot.slane %v12588_v29, 1  ;;  %v1604_v21 = vld [vmem:[#allocation2 + $0x24] sm:$0xe] }
 0x146   :  { %5526 = vmatprep.mubr.bf16.mxu0 %v4688_v48  ;;  %v3465_v13 = vrot.slane %v13815_v62, 1  ;;  %v3906_v38 = vrot.slane %v3904_v51, 1  ;;  %v2860_v9 = vpop.permute.xlu0 %2859  ;;  %v16140_v42 = vld [vmem:[#allocation2 + $0x2c] ss:$0 sps:$4 sm:$0x11]   ;;  %v16143_v48 = vcombine.low %v1641_v32, %v16131_v22  ;;  %v3900_v62 = vsel %vm2019_vm8, %v3895_v20, %v3899_v27 }
 0x147   :  { %v2403_v6 = vsel %vm2019_vm8, %v2398_v41, %v2402_v15  ;;  %4261 = vrot.lane.b32.xlu0 %v3888_v37, %s14631_s18  ;;  %v2624_v57 = vsel %vm2564_vm9, %v2622_v43, %v2623_v16  ;;  %v3911_v54 = vrot.slane %v3909_v33, 1  ;;  %v3921_v41 = vshll.u32 %v16127_v59, 16  ;;  %v16148_v50 = vld [vmem:[#allocation2 + $0x50] ss:$0 sps:$4 sm:$0x11]  }
 0x148   :  { %19427 = vst [vmem:[#allocation47_spill] sm:$0xff] %v16143_v48  ;;  %2466 = vrot.lane.b32.xlu1 %v2403_v6, %s14631_s18  ;;  %v3907_v29 = vor.u32 %v3906_v38, %v3902_v23  ;;  %v4573_v37 = vsel %vm4517_vm10, %v15608_v19, %v2441_v17  ;;  %v14250_v14 = vld [vmem:[#allocation2 + $0x28] sm:$0xf]  ;;  %v3914_v31 = vshrl.u32 %v16143_v48, 16  ;;  %v3916_v46 = vshll.u32 %v16143_v48, 16  ;;  %v2443_v6 = vpop.permute.xlu1 %2442 }
 0x149   :  { %v12589_v43 = vcombine.low %v1604_v21, %v14250_v14  ;;  %v1643_v32 = vld [vmem:[#allocation2 + $0x48] sm:$0xf]  ;;  %v16154_v16 = vld [vmem:[#allocation2 + $0x4c] sm:$0xf]  ;;  %v4692_v27 = vsel %vm4517_vm10, %v2624_v57, %v2860_v9  ;;  %v1605_v20 = vld [vmem:[#allocation2 + $0x30] sm:$0xe]  ;;  %v3466_v51 = vsel %vm2564_vm9, %v3464_v53, %v3465_v13 }
 0x14a   :  { %v1495_v23 = vld [vmem:[#allocation2 + $0x114] sm:$0xe]  ;;  %v2625_v33 = vrot.slane %v12511_v40, 1  ;;  %v14251_v15 = vld [vmem:[#allocation2 + $0x110] ss:$0 sps:$4 sm:$0x11]   ;;  %v3912_v14 = vsel %vm2019_vm8, %v3907_v29, %v3911_v54  ;;  %v16164_v57 = vcombine.low %v1643_v32, %v16154_v16  ;;  %v4576_v32 = vsel %vm4517_vm10, %v15640_v56, %v2443_v6 }
 0x14b   :  { %4263 = vrot.lane.b32.xlu0 %v3900_v62, %s14631_s18  ;;  %v2626_v19 = vrot.slane %v14251_v15, 1  ;;  %v3918_v17 = vrot.slane %v3916_v46, 1  ;;  %v16159_v21 = vld [vmem:[#allocation2 + $0x38] ss:$0 sps:$4 sm:$0x11]   ;;  %v3923_v9 = vrot.slane %v3921_v41, 1 }
 0x14c   :  { %v1645_v38 = vld [vmem:[#allocation2 + $0x54] sm:$0xf]  ;;  %3557 = vrot.lane.b32.xlu1 %v3463_v55, %s14631_s18  ;;  %19428 = vst [vmem:[#allocation48_spill] sm:$0xff] %v16164_v57  ;;  %v3933_v62 = vshll.u32 %v16148_v50, 16  ;;  %v3467_v40 = vrot.slane %v12589_v43, 1  ;;  %v3468_v13 = vrot.slane %v16140_v42, 1 }
 0x14d   :  { %5527 = vmatmul.mubr.bf16.gmra.mrb[72].mxu0 %v4573_v37  ;;  %v16167_v53 = vld [vmem:[#allocation2 + $0x5c] ss:$0 sps:$4 sm:$0x11]   ;;  %v3919_v46 = vor.u32 %v3918_v17, %v3914_v31  ;;  %v14252_v15 = vld [vmem:[#allocation2 + $0x34] sm:$0xf]  ;;  %v3926_v29 = vshrl.u32 %v16164_v57, 16  ;;  %v2627_v43 = vsel %vm2564_vm9, %v2625_v33, %v2626_v19 }
 0x14e   :  { %5534 = vmatprep.mubr.bf16.mxu0 %v4692_v27  ;;  %v12590_v44 = vcombine.low %v1605_v20, %v14252_v15  ;;  %v16170_v55 = vld [vmem:[#allocation2 + $0x58] sm:$0xf]  ;;  %v3928_v54 = vshll.u32 %v16164_v57, 16  ;;  %v1606_v41 = vld [vmem:[#allocation2 + $0x3c] sm:$0xe]  ;;  %v3935_v27 = vrot.slane %v3933_v62, 1  ;;  %v3469_v33 = vsel %vm2564_vm9, %v3467_v40, %v3468_v13 }
 0x14f   :  { %4265 = vrot.lane.b32.xlu0 %v3912_v14, %s14631_s18  ;;  %v14253_v42 = vld [vmem:[#allocation2 + $0x118] sm:$0xf]  ;;  %v16179_v20 = vld [vmem:[#allocation2 + $0x44] ss:$0 sps:$4 sm:$0x11]   ;;  %v3924_v37 = vsel %vm2019_vm8, %v3919_v46, %v3923_v9  ;;  %v16184_v48 = vcombine.low %v1645_v38, %v16170_v55  ;;  %v3945_v56 = vshll.u32 %v16167_v53, 16 }
 0x150   :  { %v12512_v31 = vcombine.low %v1495_v23, %v14253_v42  ;;  %v1607_v17 = vld [vmem:[#allocation2 + $0x48] sm:$0xe]  ;;  %v1647_v15 = vld [vmem:[#allocation2 + $0x60] sm:$0xf]  ;;  %3559 = vrot.lane.b32.xlu1 %v3466_v51, %s14631_s18  ;;  %v3930_v57 = vrot.slane %v3928_v54, 1  ;;  %v2862_v23 = vpop.permute.xlu0 %2861  ;;  %v3470_v19 = vrot.slane %v12590_v44, 1 }
 0x151   :  { %19429 = vst [vmem:[#allocation49_spill] sm:$0xff] %v16184_v48  ;;  %v16187_v6 = vld [vmem:[#allocation2 + $0x68] ss:$0 sps:$4 sm:$0x11]   ;;  %v3471_v14 = vrot.slane %v16159_v21, 1  ;;  %v4696_v38 = vsel %vm4517_vm10, %v2627_v43, %v2862_v23  ;;  %v3938_v54 = vshrl.u32 %v16184_v48, 16 }
 0x152   :  { %v14254_v62 = vld [vmem:[#allocation2 + $0x40] sm:$0xf]  ;;  %v16191_v51 = vld [vmem:[#allocation2 + $0x50] ss:$0 sps:$4 sm:$0x11]   ;;  %v3931_v46 = vor.u32 %v3930_v57, %v3926_v29  ;;  %v3940_v39 = vshll.u32 %v16184_v48, 16 }
 0x153   :  { %v12591_v42 = vcombine.low %v1606_v41, %v14254_v62  ;;  %v16193_v9 = vld [vmem:[#allocation2 + $0x64] sm:$0xf]  ;;  %v16198_v11 = vld [vmem:[#allocation2 + $0x54] sm:$0xe]  ;;  %4267 = vrot.lane.b32.xlu0 %v3924_v37, %s14631_s18  ;;  %v2628_v44 = vrot.slane %v12512_v31, 1  ;;  %v3947_v13 = vrot.slane %v3945_v56, 1  ;;  %v3472_v56 = vsel %vm2564_vm9, %v3470_v19, %v3471_v14 }
 0x154   :  { %v14255_v21 = vld [vmem:[#allocation2 + $0x11c] ss:$0 sps:$4 sm:$0x11]   ;;  %v14256_v41 = vld [vmem:[#allocation2 + $0x4c] sm:$0xf]  ;;  %3561 = vrot.lane.b32.xlu1 %v3469_v33, %s14631_s18  ;;  %v3936_v57 = vsel %vm2019_vm8, %v3931_v46, %v3935_v27  ;;  %v3942_v29 = vrot.slane %v3940_v39, 1  ;;  %v16206_v43 = vcombine.low %v1647_v15, %v16193_v9 }
 0x155   :  { %v2629_v40 = vrot.slane %v14255_v21, 1  ;;  %v12592_v62 = vcombine.low %v1607_v17, %v14256_v41  ;;  %v1649_v45 = vld [vmem:[#allocation2 + $0x6c] sm:$0xf]  ;;  %v16201_v60 = vld [vmem:[#allocation2 + $0x70] sm:$0xf]  ;;  %5535 = vmatmul.mubr.bf16.gmra.mrb[76].mxu0 %v4576_v32  ;;  %v3957_v37 = vshll.u32 %v16187_v6, 16  ;;  %v2445_v32 = vpop.permute.xlu1 %2444 }
 0x156   :  { %19430 = vst [vmem:[#allocation50_spill] sm:$0xff] %v16206_v43  ;;  %v2984_v31 = vshll.u32 %v15092_v24, 16  ;;  %5542 = vmatprep.mubr.bf16.mxu0 %v4696_v38  ;;  %v3473_v17 = vrot.slane %v12591_v42, 1  ;;  %v3474_v23 = vrot.slane %v16179_v20, 1  ;;  %v14257_v33 = vld [vmem:[#allocation2 + $0x124] sm:$0xf]  ;;  %v3943_v27 = vor.u32 %v3942_v29, %v3938_v54 }
 0x157   :  { %v16212_v21 = vld [vmem:[#allocation2 + $0x74] ss:$0 sps:$4 sm:$0x11]   ;;  %v12513_v41 = vcombine.low %v1496_v28, %v14257_v33  ;;  %v3950_v39 = vshrl.u32 %v16206_v43, 16  ;;  %v3952_v15 = vshll.u32 %v16206_v43, 16  ;;  %v2630_v48 = vsel %vm2564_vm9, %v2628_v44, %v2629_v40  ;;  %4269 = vrot.lane.b32.xlu0 %v3936_v57, %s14631_s18  ;;  %v2864_v40 = vpop.permute.xlu0 %2863 }
 0x158   :  { %v16216_v46 = vld [vmem:[#allocation2 + $0x5c] ss:$0 sps:$4 sm:$0x11]   ;;  %v3476_v19 = vrot.slane %v12592_v62, 1  ;;  %v3477_v14 = vrot.slane %v16191_v51, 1  ;;  %3563 = vrot.lane.b32.xlu1 %v3472_v56, %s14631_s18  ;;  %v3948_v28 = vsel %vm2019_vm8, %v3943_v27, %v3947_v13  ;;  %v3959_v54 = vrot.slane %v3957_v37, 1 }
 0x159   :  { %v14258_v20 = vld [vmem:[#allocation2 + $0x58] sm:$0xf]  ;;  %v3954_v38 = vrot.slane %v3952_v15, 1  ;;  %v16225_v29 = vcombine.low %v1649_v45, %v16201_v60  ;;  %v16227_v43 = vld [vmem:[#allocation2 + $0x7c] sm:$0xf]  ;;  %v4579_v44 = vsel %vm4517_vm10, %v15688_v26, %v2445_v32  ;;  %v3475_v51 = vsel %vm2564_vm9, %v3473_v17, %v3474_v23 }
 0x15a   :  { %v12593_v42 = vcombine.low %v16198_v11, %v14258_v20  ;;  %v1651_v33 = vld [vmem:[#allocation2 + $0x78] sm:$0xf]  ;;  %v3969_v11 = vshll.u32 %v16212_v21, 16  ;;  %v16233_v62 = vld [vmem:[#allocation2 + $0x80] ss:$0 sps:$4 sm:$0x11]   ;;  %v4700_v57 = vsel %vm4517_vm10, %v2630_v48, %v2864_v40  ;;  %v3478_v26 = vsel %vm2564_vm9, %v3476_v19, %v3477_v14 }
 0x15b   :  { %19431 = vst [vmem:[#allocation51_spill] sm:$0xff] %v16225_v29  ;;  %v2631_v37 = vrot.slane %v12513_v41, 1  ;;  %v16237_v45 = vld [vmem:[#allocation2 + $0x12c] sm:$0xe]  ;;  %v3955_v56 = vor.u32 %v3954_v38, %v3950_v39  ;;  %v1609_v27 = vld [vmem:[#allocation2 + $0x60] sm:$0xe]  ;;  %4271 = vrot.lane.b32.xlu0 %v3948_v28, %s14631_s18  ;;  %v16251_v28 = vcombine.low %v1651_v33, %v16227_v43 }
 0x15c   :  { %v1610_v15 = vld [vmem:[#allocation2 + $0x6c] sm:$0xe]  ;;  %v14259_v20 = vld [vmem:[#allocation2 + $0x128] ss:$0 sps:$4 sm:$0x11]   ;;  %v3962_v17 = vshrl.u32 %v16225_v29, 16  ;;  %3565 = vrot.lane.b32.xlu1 %v3475_v51, %s14631_s18 }
 0x15d   :  { %v2632_v24 = vrot.slane %v14259_v20, 1  ;;  %v3964_v23 = vshll.u32 %v16225_v29, 16  ;;  %v16243_v32 = vld [vmem:[#allocation2 + $0x68] ss:$0 sps:$4 sm:$0x11]   ;;  %5543 = vmatmul.mubr.bf16.gmra.mrb[80].mxu0 %v4579_v44  ;;  %v3960_v41 = vsel %vm2019_vm8, %v3955_v56, %v3959_v54  ;;  %v3479_v39 = vrot.slane %v12593_v42, 1  ;;  %v2447_v54 = vpop.permute.xlu1 %2446 }
 0x15e   :  { %v1653_v13 = vld [vmem:[#allocation2 + $0x84] sm:$0xf]  ;;  %v16245_v48 = vld [vmem:[#allocation2 + $0x88] sm:$0xf]  ;;  %v3480_v38 = vrot.slane %v16216_v46, 1  ;;  %19432 = vst [vmem:[#allocation52_spill] sm:$0xff] %v16251_v28  ;;  %5550 = vmatprep.mubr.bf16.mxu0 %v4700_v57 }
 0x15f   :  { %v3966_v19 = vrot.slane %v3964_v23, 1  ;;  %v3971_v14 = vrot.slane %v3969_v11, 1  ;;  %v14260_v40 = vld [vmem:[#allocation2 + $0x64] sm:$0xf]  ;;  %v3981_v29 = vshll.u32 %v16233_v62, 16  ;;  %v16258_v51 = vrot.slane %v2984_v31, 1  ;;  %4273 = vrot.lane.b32.xlu0 %v3960_v41, %s14631_s18 }
 0x160   :  { %v12594_v20 = vcombine.low %v1609_v27, %v14260_v40  ;;  %v16254_v58 = vld [vmem:[#allocation2 + $0x74] ss:$0 sps:$4 sm:$0x11]   ;;  %v16256_v44 = vld [vmem:[#allocation2 + $0x8c] ss:$0 sps:$4 sm:$0x11]   ;;  %v2633_v57 = vsel %vm2564_vm9, %v2631_v37, %v2632_v24  ;;  %3567 = vrot.lane.b32.xlu1 %v3478_v26, %s14631_s18  ;;  %v3481_v31 = vsel %vm2564_vm9, %v3479_v39, %v3480_v38  ;;  %v16269_v34 = vcombine.low %v1653_v13, %v16245_v48 }
 0x161   :  { %19433 = vst [vmem:[#allocation53_spill] sm:$0xff] %v16256_v44  ;;  %19434 = vst [vmem:[#allocation54_spill] sm:$0xff] %v16258_v51  ;;  %v2996_v42 = vshll.u32 %v15096_v30, 16  ;;  %v3974_v46 = vshrl.u32 %v16251_v28, 16  ;;  %v3976_v33 = vshll.u32 %v16251_v28, 16  ;;  %v3967_v27 = vor.u32 %v3966_v19, %v3962_v17 }
 0x162   :  { %v14261_v11 = vld [vmem:[#allocation2 + $0x130] sm:$0xf]  ;;  %v1611_v63 = vld [vmem:[#allocation2 + $0x78] sm:$0xe]  ;;  %v3983_v51 = vrot.slane %v3981_v29, 1  ;;  %19435 = vst [vmem:[#allocation55_spill] sm:$0xff] %v16269_v34  ;;  %v4582_v37 = vsel %vm4517_vm10, %v15735_v61, %v2447_v54  ;;  %v2866_v19 = vpop.permute.xlu0 %2865 }
 0x163   :  { %v12514_v56 = vcombine.low %v16237_v45, %v14261_v11  ;;  %v14262_v23 = vld [vmem:[#allocation2 + $0x70] sm:$0xf]  ;;  %v3978_v30 = vrot.slane %v3976_v33, 1  ;;  %v1656_v24 = vld [vmem:[#allocation2 + $0x94] sm:$0xf]  ;;  %v3972_v45 = vsel %vm2019_vm8, %v3967_v27, %v3971_v14  ;;  %v3482_v17 = vrot.slane %v12594_v20, 1 }
 0x164   :  { %v12595_v40 = vcombine.low %v1610_v15, %v14262_v23  ;;  %v1655_v28 = vld [vmem:[#allocation2 + $0x90] sm:$0xf]  ;;  %v3483_v15 = vrot.slane %v16243_v32, 1  ;;  %v3986_v26 = vshrl.u32 %v16269_v34, 16  ;;  %v3988_v39 = vshll.u32 %v16269_v34, 16  ;;  %4275 = vrot.lane.b32.xlu0 %v3972_v45, %s14631_s18  ;;  %3569 = vrot.lane.b32.xlu1 %v3481_v31, %s14631_s18 }
 0x165   :  { %v3979_v41 = vor.u32 %v3978_v30, %v3974_v46  ;;  %v3993_v29 = vshll.u32 %v16256_v44, 16  ;;  %v16278_v38 = vld [vmem:[#allocation2 + $0x80] ss:$0 sps:$4 sm:$0x11]   ;;  %v3486_v14 = vrot.slane %v16254_v58, 1  ;;  %5551 = vmatmul.mubr.bf16.gmra.mrb[84].mxu0 %v4582_v37  ;;  %v2449_v30 = vpop.permute.xlu1 %2448  ;;  %v4704_v46 = vsel %vm4517_vm10, %v2633_v57, %v2866_v19 }
 0x166   :  { %v16280_v13 = vld [vmem:[#allocation2 + $0x98] ss:$0 sps:$4 sm:$0x11]   ;;  %v3485_v61 = vrot.slane %v12595_v40, 1  ;;  %v14263_v20 = vld [vmem:[#allocation2 + $0x7c] sm:$0xf]  ;;  %5558 = vmatprep.mubr.bf16.mxu0 %v4704_v46  ;;  %v3484_v58 = vsel %vm2564_vm9, %v3482_v17, %v3483_v15  ;;  %v16290_v45 = vcombine.low %v1655_v28, %v1656_v24 }
 0x167   :  { %19436 = vst [vmem:[#allocation56_spill] sm:$0xff] %v16280_v13  ;;  %v12596_v54 = vcombine.low %v1611_v63, %v14263_v20  ;;  %v1612_v32 = vld [vmem:[#allocation2 + $0x84] sm:$0xe]  ;;  %v3984_v33 = vsel %vm2019_vm8, %v3979_v41, %v3983_v51  ;;  %v3990_v11 = vrot.slane %v3988_v39, 1  ;;  %v3995_v27 = vrot.slane %v3993_v29, 1 }
 0x168   :  { %v1657_v23 = vld [vmem:[#allocation2 + $0x9c] sm:$0xf]  ;;  %v16287_v34 = vrot.slane %v2996_v42, 1  ;;  %v1498_v40 = vld [vmem:[#allocation2 + $0x138] sm:$0xe]  ;;  %19438 = vst [vmem:[#allocation58_spill] sm:$0xff] %v16290_v45  ;;  %v4585_v42 = vsel %vm4517_vm10, %v15764_v47, %v2449_v30  ;;  %4277 = vrot.lane.b32.xlu0 %v3984_v33, %s14631_s18  ;;  %v3487_v17 = vsel %vm2564_vm9, %v3485_v61, %v3486_v14  ;;  %3571 = vrot.lane.b32.xlu1 %v3484_v58, %s14631_s18 }
 0x169   :  { %v16292_v63 = vld [vmem:[#allocation2 + $0xa0] sm:$0xf]  ;;  %v13849_v37 = vld [vmem:[#allocation2 + $0xa4] ss:$0 sps:$4 sm:$0x11]   ;;  %v2634_v20 = vrot.slane %v12514_v56, 1  ;;  %v3991_v31 = vor.u32 %v3990_v11, %v3986_v26 }
 0x16a   :  { %19437 = vst [vmem:[#allocation57_spill] sm:$0xff] %v16287_v34  ;;  %19439 = vst [vmem:[#allocation59_spill] sm:$0xff] %v16292_v63  ;;  %v14264_v57 = vld [vmem:[#allocation2 + $0x134] ss:$0 sps:$4 sm:$0x11]   ;;  %v4005_v51 = vshll.u32 %v16280_v13, 16  ;;  %v16307_v30 = vcombine.low %v1657_v23, %v16292_v63  ;;  %v2451_v44 = vpop.permute.xlu1 %2450 }
 0x16b   :  { %v2635_v19 = vrot.slane %v14264_v57, 1  ;;  %v16295_v41 = vld [vmem:[#allocation2 + $0x8c] ss:$0 sps:$4 sm:$0x11]   ;;  %v3998_v28 = vshrl.u32 %v16290_v45, 16  ;;  %v4000_v24 = vshll.u32 %v16290_v45, 16  ;;  %v3996_v56 = vsel %vm2019_vm8, %v3991_v31, %v3995_v27 }
 0x16c   :  { %v3488_v15 = vrot.slane %v12596_v54, 1  ;;  %v3489_v26 = vrot.slane %v16278_v38, 1  ;;  %v14265_v39 = vld [vmem:[#allocation2 + $0x88] sm:$0xf]  ;;  %v1613_v46 = vld [vmem:[#allocation2 + $0x90] sm:$0xe]  ;;  %4279 = vrot.lane.b32.xlu0 %v3996_v56, %s14631_s18  ;;  %3573 = vrot.lane.b32.xlu1 %v3487_v17, %s14631_s18 }
 0x16d   :  { %v12597_v29 = vcombine.low %v1612_v32, %v14265_v39  ;;  %v4002_v11 = vrot.slane %v4000_v24, 1  ;;  %v4007_v47 = vrot.slane %v4005_v51, 1  ;;  %19440 = vst [vmem:[#allocation60_spill] sm:$0xff] %v16307_v30  ;;  %v4017_v61 = vshll.u32 %v13849_v37, 16  ;;  %v1659_v14 = vld [vmem:[#allocation2 + $0xa8] sm:$0xf]  ;;  %5559 = vmatmul.mubr.bf16.gmra.mrb[88].mxu0 %v4585_v42  ;;  %v2868_v17 = vpop.permute.xlu0 %2867 }
 0x16e   :  { %v2636_v57 = vsel %vm2564_vm9, %v2634_v20, %v2635_v19  ;;  %v14266_v58 = vld [vmem:[#allocation2 + $0x13c] sm:$0xf]  ;;  %v16311_v27 = vld [vmem:[#allocation2 + $0x98] ss:$0 sps:$4 sm:$0x11]   ;;  %v4010_v23 = vshrl.u32 %v16307_v30, 16 }
 0x16f   :  { %v12515_v45 = vcombine.low %v1498_v40, %v14266_v58  ;;  %v1660_v54 = vld [vmem:[#allocation2 + $0xac] sm:$0xf]  ;;  %v13852_v38 = vld [vmem:[#allocation2 + $0xb0] ss:$0 sps:$4 sm:$0x11]   ;;  %v4003_v51 = vor.u32 %v4002_v11, %v3998_v28  ;;  %v4012_v37 = vshll.u32 %v16307_v30, 16  ;;  %v3490_v40 = vsel %vm2564_vm9, %v3488_v15, %v3489_v26 }
 0x170   :  { %v14267_v31 = vld [vmem:[#allocation2 + $0x140] ss:$0 sps:$4 sm:$0x11]   ;;  %v1499_v39 = vld [vmem:[#allocation2 + $0x144] sm:$0xe]  ;;  %v3491_v20 = vrot.slane %v12597_v29, 1  ;;  %v16320_v11 = vcombine.low %v1659_v14, %v1660_v54  ;;  %3575 = vrot.lane.b32.xlu1 %v3490_v40, %s14631_s18 }
 0x171   :  { %v2638_v32 = vrot.slane %v14267_v31, 1  ;;  %v1614_v24 = vld [vmem:[#allocation2 + $0x9c] sm:$0xe]  ;;  %v3492_v19 = vrot.slane %v16295_v41, 1  ;;  %v14268_v58 = vld [vmem:[#allocation2 + $0x94] sm:$0xf]  ;;  %v4008_v34 = vsel %vm2019_vm8, %v4003_v51, %v4007_v47 }
 0x172   :  { %v12598_v33 = vcombine.low %v1613_v46, %v14268_v58  ;;  %v13858_v31 = vld [vmem:[#allocation2 + $0xbc] ss:$0 sps:$4 sm:$0x11]   ;;  %v4014_v56 = vrot.slane %v4012_v37, 1  ;;  %v4019_v28 = vrot.slane %v4017_v61, 1  ;;  %v2637_v15 = vrot.slane %v12515_v45, 1  ;;  %4281 = vrot.lane.b32.xlu0 %v4008_v34, %s14631_s18 }
 0x173   :  { %v16322_v63 = vld [vmem:[#allocation2 + $0xa4] ss:$0 sps:$4 sm:$0x11]   ;;  %v1661_v30 = vld [vmem:[#allocation2 + $0xb4] sm:$0xf]  ;;  %v4029_v26 = vshll.u32 %v13852_v38, 16  ;;  %v4708_v46 = vsel %vm4517_vm10, %v2636_v57, %v2868_v17  ;;  %v3493_v37 = vsel %vm2564_vm9, %v3491_v20, %v3492_v19  ;;  %v4588_v34 = vsel %vm4517_vm10, %v15807_v49, %v2451_v44 }
 0x174   :  { %v1662_v42 = vld [vmem:[#allocation2 + $0xb8] sm:$0xf]  ;;  %v1615_v13 = vld [vmem:[#allocation2 + $0xa8] sm:$0xe]  ;;  %v14269_v29 = vld [vmem:[#allocation2 + $0xa0] sm:$0xf]  ;;  %v4015_v47 = vor.u32 %v4014_v56, %v4010_v23  ;;  %5566 = vmatprep.mubr.bf16.mxu0 %v4708_v46  ;;  %3577 = vrot.lane.b32.xlu1 %v3493_v37, %s14631_s18 }
 0x175   :  { %v12599_v41 = vcombine.low %v1614_v24, %v14269_v29  ;;  %v4022_v61 = vshrl.u32 %v16320_v11, 16  ;;  %v4024_v14 = vshll.u32 %v16320_v11, 16  ;;  %v14270_v54 = vld [vmem:[#allocation2 + $0x148] sm:$0xf]  ;;  %v3494_v45 = vrot.slane %v12598_v33, 1  ;;  %5567 = vmatmul.mubr.bf16.gmra.mrb[92].mxu0 %v4588_v34 }
 0x176   :  { %v12516_v51 = vcombine.low %v1499_v39, %v14270_v54  ;;  %v3495_v38 = vrot.slane %v16311_v27, 1  ;;  %v16331_v24 = vld [vmem:[#allocation2 + $0xb0] ss:$0 sps:$4 sm:$0x11]   ;;  %v4020_v57 = vsel %vm2019_vm8, %v4015_v47, %v4019_v28  ;;  %v4031_v58 = vrot.slane %v4029_v26, 1  ;;  %v2453_v54 = vpop.permute.xlu1 %2452 }
 0x177   :  { %v4026_v23 = vrot.slane %v4024_v14, 1  ;;  %v1731_v56 = vld [vmem:[#allocation2 + $0x18] sm:$0xe]  ;;  %v3008_v17 = vshll.u32 %v15133_v3, 16  ;;  %v16337_v39 = vcombine.low %v1661_v30, %v1662_v42  ;;  %v4041_v40 = vshll.u32 %v13858_v31, 16  ;;  %4283 = vrot.lane.b32.xlu0 %v4020_v57, %s14631_s18 }
 0x178   :  { %v14271_v29 = vld [vmem:[#allocation2 + $0xac] sm:$0xf]  ;;  %v1663_v33 = vld [vmem:[#allocation2 + $0xc0] sm:$0xf]  ;;  %v2639_v27 = vsel %vm2564_vm9, %v2637_v15, %v2638_v32  ;;  %v3497_v46 = vrot.slane %v12599_v41, 1  ;;  %v3498_v49 = vrot.slane %v16322_v63, 1  ;;  %v3496_v32 = vsel %vm2564_vm9, %v3494_v45, %v3495_v38 }
 0x179   :  { %v12600_v20 = vcombine.low %v1615_v13, %v14271_v29  ;;  %v4027_v19 = vor.u32 %v4026_v23, %v4022_v61  ;;  %v1664_v44 = vld [vmem:[#allocation2 + $0xc4] sm:$0xf]  ;;  %v2640_v26 = vrot.slane %v12516_v51, 1  ;;  %v14272_v47 = vld [vmem:[#allocation2 + $0x14c] ss:$0 sps:$4 sm:$0x11]   ;;  %v12683_v57 = vcombine.low %v1731_v56, %v16022_v52  ;;  %v2870_v23 = vpop.permute.xlu0 %2869  ;;  %3579 = vrot.lane.b32.xlu1 %v3496_v32, %s14631_s18 }
 0x17a   :  { %v1732_v28 = vld [vmem:[#allocation2 + $0x24] sm:$0xe]  ;;  %v2641_v14 = vrot.slane %v14272_v47, 1  ;;  %v4034_v30 = vshrl.u32 %v16337_v39, 16  ;;  %v4036_v13 = vshll.u32 %v16337_v39, 16  ;;  %v4043_v15 = vrot.slane %v4041_v40, 1 }
 0x17b   :  { %v1263_v31 = vld [vmem:[#allocation2 + $0xc8] sm:$0x1]  ;;  %v4032_v42 = vsel %vm2019_vm8, %v4027_v19, %v4031_v58  ;;  %v3501_v63 = vrot.slane %v16331_v24, 1  ;;  %v1616_v41 = vld [vmem:[#allocation2 + $0xb4] sm:$0xe]  ;;  %v3500_v37 = vrot.slane %v12600_v20, 1  ;;  %v3499_v45 = vsel %vm2564_vm9, %v3497_v46, %v3498_v49 }
 0x17c   :  { %v16348_v61 = vld [vmem:[#allocation2 + $0xbc] ss:$0 sps:$4 sm:$0x11]   ;;  %v16350_v51 = vld [vmem:[#allocation2 + $0x150] sm:$0xe]  ;;  %v4038_v34 = vrot.slane %v4036_v13, 1  ;;  %4285 = vrot.lane.b32.xlu0 %v4032_v42, %s14631_s18  ;;  %v16357_v24 = vcombine.low %v1663_v33, %v1664_v44  ;;  %v4712_v40 = vsel %vm4517_vm10, %v2639_v27, %v2870_v23  ;;  %v12684_v20 = vcombine.low %v1732_v28, %v16092_v36 }
 0x17d   :  { %v4422_v38 = vrot.slane %v16064_v10, 1  ;;  %v779_v58 = vrot.slane %v15471_v18, 4  ;;  %v4421_v19 = vrot.slane %v12683_v57, 1  ;;  %v13869_v52 = vld [vmem:[#allocation2 + $0xd4] ss:$0 sps:$4 sm:$0x11]   ;;  %5574 = vmatprep.mubr.bf16.mxu0 %v4712_v40  ;;  %v4591_v56 = vsel %vm4517_vm10, %v15840_v35, %v2453_v54  ;;  %3581 = vrot.lane.b32.xlu1 %v3499_v45, %s14631_s18 }
 0x17e   :  { %v4039_v29 = vor.u32 %v4038_v34, %v4034_v30  ;;  %v4048_v18 = vshll.u32 %v16357_v24, 16  ;;  %v4425_v33 = vrot.slane %v16098_v2, 1  ;;  %v1665_v46 = vld [vmem:[#allocation2 + $0xcc] sm:$0xf]  ;;  %v16368_v27 = vld [vmem:[#allocation2 + $0xd0] sm:$0xf]  ;;  %v2642_v13 = vsel %vm2564_vm9, %v2640_v26, %v2641_v14  ;;  %5575 = vmatmul.mubr.bf16.gmra.mrb[96].mxu0 %v4591_v56  ;;  %v2455_v56 = vpop.permute.xlu1 %2454 }
 0x17f   :  { %v1264_v10 = vsel %vm15018_vm7, %v779_v58, %v1263_v31  ;;  %v4423_v44 = vsel %vm2564_vm9, %v4421_v19, %v4422_v38  ;;  %v4424_v36 = vrot.slane %v12684_v20, 1  ;;  %v14273_v28 = vld [vmem:[#allocation2 + $0xb8] sm:$0xf]  ;;  %v1617_v30 = vld [vmem:[#allocation2 + $0xc0] sm:$0xe]  ;;  %v16372_v35 = vrot.slane %v3008_v17, 1  ;;  %v2872_v38 = vpop.permute.xlu0 %2871 }
 0x180   :  { %v4044_v49 = vsel %vm2019_vm8, %v4039_v29, %v4043_v15  ;;  %1265 = vst [vmem:[#allocation2 + $0xc8] sm:$0x1] %v1264_v10  ;;  %v12601_v47 = vcombine.low %v1616_v41, %v14273_v28  ;;  %v14274_v31 = vld [vmem:[#allocation2 + $0x154] sm:$0xf]  ;;  %13283 = vmatprep.mubr.msk.bf16.mxu1 %vm4517_vm10, %v4423_v44  ;;  %v3504_v2 = vrot.slane %v16348_v61, 1  ;;  %v16382_v17 = vcombine.low %v1665_v46, %v16368_v27 }
 0x181   :  { %v12517_v32 = vcombine.low %v16350_v51, %v14274_v31  ;;  %4287 = vrot.lane.b32.xlu0 %v4044_v49, %s14631_s18  ;;  %v1733_v42 = vld [vmem:[#allocation2 + $0x30] sm:$0xe]  ;;  %v4426_v15 = vsel %vm2564_vm9, %v4424_v36, %v4425_v33  ;;  %v4065_v26 = vshll.u32 %v13869_v52, 16  ;;  %v3502_v54 = vsel %vm2564_vm9, %v3500_v37, %v3501_v63  ;;  %v14275_v51 = vld [vmem:[#allocation2 + $0xc4] sm:$0xf] }
 0x182   :  { %v3503_v41 = vrot.slane %v12601_v47, 1  ;;  %v1667_v14 = vld [vmem:[#allocation2 + $0xf0] sm:$0xf]  ;;  %13284 = vmatmul.mubr.msk.bf16.vlgmr.msra.gmra.mrb[0].mxu1 %vm4517_vm10, %v4426_v15  ;;  %v12602_v34 = vcombine.low %v1617_v30, %v14275_v51  ;;  %v1668_v57 = vld [vmem:[#allocation2 + $0xf4] sm:$0xf]  ;;  %v4046_v40 = vshrl.u32 %v16357_v24, 16  ;;  %v4716_v63 = vsel %vm4517_vm10, %v2642_v13, %v2872_v38  ;;  %3583 = vrot.lane.b32.xlu1 %v3502_v54, %s14631_s18 }
 0x183   :  { %v1734_v61 = vld [vmem:[#allocation2 + $0x3c] sm:$0xe]  ;;  %v1618_v23 = vld [vmem:[#allocation2 + $0xe4] sm:$0xe]  ;;  %v4050_v29 = vrot.slane %v4048_v18, 1  ;;  %v4060_v19 = vshll.u32 %v16382_v17, 16  ;;  %5582 = vmatprep.mubr.bf16.mxu0 %v4716_v63  ;;  %v12685_v44 = vcombine.low %v1733_v42, %v16113_v8  ;;  %v4594_v47 = vsel %vm4517_vm10, %v15877_v1, %v2455_v56 }
 0x184   :  { %v14276_v58 = vld [vmem:[#allocation2 + $0x158] ss:$0 sps:$4 sm:$0x11]   ;;  %v1669_v52 = vld [vmem:[#allocation2 + $0xfc] sm:$0xf]  ;;  %v2643_v37 = vrot.slane %v12517_v32, 1  ;;  %v3505_v10 = vsel %vm2564_vm9, %v3503_v41, %v3504_v2  ;;  %v16400_v31 = vcombine.low %v1667_v14, %v1668_v57  ;;  %v12686_v32 = vcombine.low %v1734_v61, %v16131_v22 }
 0x185   :  { %v2644_v45 = vrot.slane %v14276_v58, 1  ;;  %v13873_v20 = vld [vmem:[#allocation2 + $0xf8] ss:$0 sps:$4 sm:$0x11]   ;;  %v4058_v33 = vshrl.u32 %v16382_v17, 16  ;;  %v4062_v46 = vrot.slane %v4060_v19, 1  ;;  %v4051_v2 = vor.u32 %v4050_v29, %v4046_v40 }
 0x186   :  { %v4067_v49 = vrot.slane %v4065_v26, 1  ;;  %v4428_v18 = vrot.slane %v16108_v4, 1  ;;  %v16394_v36 = vld [vmem:[#allocation2 + $0xec] ss:$0 sps:$4 sm:$0x11]   ;;  %v3506_v13 = vrot.slane %v12602_v34, 1  ;;  %5583 = vmatmul.mubr.bf16.gmra.mrb[100].mxu0 %v4594_v47  ;;  %3585 = vrot.lane.b32.xlu1 %v3505_v10, %s14631_s18  ;;  %v2457_v19 = vpop.permute.xlu1 %2456 }
 0x187   :  { %v1670_v28 = vld [vmem:[#allocation2 + $0x100] sm:$0xf]  ;;  %v16398_v30 = vld [vmem:[#allocation2 + $0xc8] ss:$0 sps:$4 sm:$0x11]   ;;  %v4427_v41 = vrot.slane %v12685_v44, 1  ;;  %v4063_v54 = vor.u32 %v4062_v46, %v4058_v33 }
 0x188   :  { %v13870_v15 = vld [vmem:[#allocation2 + $0xc8] ss:$0 sps:$4 sm:$0x11]   ;;  %v1501_v42 = vld [vmem:[#allocation2 + $0x15c] sm:$0xe]  ;;  %v4053_v4 = vshll.u32 %v16398_v30, 16  ;;  %v16405_v38 = vcombine.low %v1669_v52, %v1670_v28  ;;  %v2645_v52 = vsel %vm2564_vm9, %v2643_v37, %v2644_v45  ;;  %v4597_v45 = vsel %vm4517_vm10, %v15902_v0, %v2457_v19 }
 0x189   :  { %v14277_v26 = vld [vmem:[#allocation2 + $0xe8] sm:$0xf]  ;;  %v4072_v51 = vshll.u32 %v16400_v31, 16  ;;  %v3507_v1 = vrot.slane %v13870_v15, 1  ;;  %v4429_v14 = vsel %vm2564_vm9, %v4427_v41, %v4428_v18  ;;  %v4070_v22 = vshrl.u32 %v16400_v31, 16 }
 0x18a   :  { %v12603_v8 = vcombine.low %v1618_v23, %v14277_v26  ;;  %19441 = vst [vmem:[#allocation61_spill] sm:$0xff] %v16405_v38  ;;  %v4077_v34 = vshll.u32 %v13873_v20, 16  ;;  %v13877_v57 = vld [vmem:[#allocation2 + $0x104] ss:$0 sps:$4 sm:$0x11]   ;;  %v4055_v61 = vrot.slane %v4053_v4, 1  ;;  %13287 = vmatprep.mubr.msk.bf16.mxu1 %vm4517_vm10, %v4429_v14  ;;  %v4068_v28 = vsel %vm2019_vm8, %v4063_v54, %v4067_v49 }
 0x18b   :  { %v4074_v23 = vrot.slane %v4072_v51, 1  ;;  %v4430_v58 = vrot.slane %v12686_v32, 1  ;;  %v4431_v40 = vrot.slane %v16127_v59, 1  ;;  %v1619_v29 = vld [vmem:[#allocation2 + $0xf0] sm:$0xe]  ;;  %v3508_v56 = vsel %vm2564_vm9, %v3506_v13, %v3507_v1  ;;  %v2874_v32 = vpop.permute.xlu0 %2873 }
 0x18c   :  { %v3509_v63 = vrot.slane %v12603_v8, 1  ;;  %v3510_v10 = vrot.slane %v16394_v36, 1  ;;  %v13878_v33 = vld [vmem:[#allocation2 + $0xf8] ss:$0 sps:$4 sm:$0x11]   ;;  %v4056_v18 = vsel %vm2019_vm8, %v4051_v2, %v4055_v61  ;;  %3587 = vrot.lane.b32.xlu1 %v3508_v56, %s14631_s18  ;;  %v4079_v36 = vrot.slane %v4077_v34, 1 }
 0x18d   :  { %v14278_v46 = vld [vmem:[#allocation2 + $0x160] sm:$0xf]  ;;  %v16415_v44 = vld [vmem:[#allocation2 + $0x168] sm:$0xe]  ;;  %v4432_v59 = vsel %vm2564_vm9, %v4430_v58, %v4431_v40  ;;  %4289 = vrot.lane.b32.xlu0 %v4056_v18, %s14631_s18  ;;  %v4075_v37 = vor.u32 %v4074_v23, %v4070_v22  ;;  %v4084_v13 = vshll.u32 %v16405_v38, 16  ;;  %v4720_v2 = vsel %vm4517_vm10, %v2645_v52, %v2874_v32 }
 0x18e   :  { %v12518_v20 = vcombine.low %v1501_v42, %v14278_v46  ;;  %v13881_v47 = vld [vmem:[#allocation2 + $0x110] ss:$0 sps:$4 sm:$0x11]   ;;  %v1735_v15 = vld [vmem:[#allocation2 + $0x48] sm:$0xe]  ;;  %13288 = vmatmul.mubr.msk.bf16.gmra.mrb[4].mxu1 %vm4517_vm10, %v4432_v59  ;;  %v4082_v49 = vshrl.u32 %v16405_v38, 16  ;;  %5590 = vmatprep.mubr.bf16.mxu0 %v4720_v2  ;;  %v3511_v54 = vsel %vm2564_vm9, %v3509_v63, %v3510_v10 }
 0x18f   :  { %v1671_v41 = vld [vmem:[#allocation2 + $0x108] sm:$0xf]  ;;  %v4089_v26 = vshll.u32 %v13877_v57, 16  ;;  %v14279_v8 = vld [vmem:[#allocation2 + $0xf4] sm:$0xf]  ;;  %v4086_v51 = vrot.slane %v4084_v13, 1  ;;  %v12687_v58 = vcombine.low %v1735_v15, %v16154_v16  ;;  %5591 = vmatmul.mubr.bf16.gmra.mrb[104].mxu0 %v4597_v45  ;;  %v4080_v52 = vsel %vm2019_vm8, %v4075_v37, %v4079_v36 }
 0x190   :  { %v12604_v42 = vcombine.low %v1619_v29, %v14279_v8  ;;  %v1672_v0 = vld [vmem:[#allocation2 + $0x10c] sm:$0xf]  ;;  %v3513_v1 = vrot.slane %v13878_v33, 1  ;;  %v1736_v14 = vld [vmem:[#allocation2 + $0x54] sm:$0xe]  ;;  %v2646_v22 = vrot.slane %v12518_v20, 1  ;;  %3589 = vrot.lane.b32.xlu1 %v3511_v54, %s14631_s18 }
 0x191   :  { %v14280_v34 = vld [vmem:[#allocation2 + $0x164] ss:$0 sps:$4 sm:$0x11]   ;;  %v1620_v40 = vld [vmem:[#allocation2 + $0xfc] sm:$0xe]  ;;  %4291 = vrot.lane.b32.xlu0 %v4068_v28, %s14631_s18  ;;  %v4434_v56 = vrot.slane %v16148_v50, 1  ;;  %v16435_v63 = vcombine.low %v1671_v41, %v1672_v0  ;;  %v4087_v16 = vor.u32 %v4086_v51, %v4082_v49  ;;  %v12688_v50 = vcombine.low %v1736_v14, %v16170_v55  ;;  %v2459_v41 = vpop.permute.xlu1 %2458 }
 0x192   :  { %v2647_v61 = vrot.slane %v14280_v34, 1  ;;  %v3512_v23 = vrot.slane %v12604_v42, 1  ;;  %v13883_v19 = vld [vmem:[#allocation2 + $0x104] ss:$0 sps:$4 sm:$0x11]   ;;  %v4091_v46 = vrot.slane %v4089_v26, 1 }
 0x193   :  { %v14281_v57 = vld [vmem:[#allocation2 + $0x16c] sm:$0xf]  ;;  %19442 = vst [vmem:[#allocation62_spill] sm:$0xff] %v16435_v63  ;;  %v1673_v10 = vld [vmem:[#allocation2 + $0x114] sm:$0xf]  ;;  %v4433_v20 = vrot.slane %v12687_v58, 1  ;;  %v2876_v58 = vpop.permute.xlu0 %2875 }
 0x194   :  { %v12519_v29 = vcombine.low %v16415_v44, %v14281_v57  ;;  %v16437_v33 = vld [vmem:[#allocation2 + $0x118] sm:$0xf]  ;;  %v4101_v18 = vshll.u32 %v13881_v47, 16  ;;  %v16440_v59 = vld [vmem:[#allocation2 + $0x11c] ss:$0 sps:$4 sm:$0x11]   ;;  %v3514_v44 = vsel %vm2564_vm9, %v3512_v23, %v3513_v1  ;;  %v2648_v37 = vsel %vm2564_vm9, %v2646_v22, %v2647_v61 }
 0x195   :  { %v4094_v28 = vshrl.u32 %v16435_v63, 16  ;;  %v4096_v32 = vshll.u32 %v16435_v63, 16  ;;  %v1621_v45 = vld [vmem:[#allocation2 + $0x108] sm:$0xe]  ;;  %v4435_v36 = vsel %vm2564_vm9, %v4433_v20, %v4434_v56  ;;  %v4437_v15 = vrot.slane %v16167_v53, 1  ;;  %4293 = vrot.lane.b32.xlu0 %v4080_v52, %s14631_s18  ;;  %3591 = vrot.lane.b32.xlu1 %v3514_v44, %s14631_s18 }
 0x196   :  { %v4103_v13 = vrot.slane %v4101_v18, 1  ;;  %13291 = vmatprep.mubr.msk.bf16.mxu1 %vm4517_vm10, %v4435_v36  ;;  %v4436_v2 = vrot.slane %v12688_v50, 1  ;;  %v14282_v49 = vld [vmem:[#allocation2 + $0x100] sm:$0xf]  ;;  %v3516_v8 = vrot.slane %v13883_v19, 1  ;;  %v2649_v55 = vrot.slane %v12519_v29, 1 }
 0x197   :  { %v4098_v47 = vrot.slane %v4096_v32, 1  ;;  %v12605_v26 = vcombine.low %v1620_v40, %v14282_v49  ;;  %v13886_v42 = vld [vmem:[#allocation2 + $0x110] ss:$0 sps:$4 sm:$0x11]   ;;  %v4092_v51 = vsel %vm2019_vm8, %v4087_v16, %v4091_v46  ;;  %v16454_v53 = vcombine.low %v1673_v10, %v16437_v33  ;;  %v1675_v23 = vld [vmem:[#allocation2 + $0x120] sm:$0xf] }
 0x198   :  { %v14283_v0 = vld [vmem:[#allocation2 + $0x170] ss:$0 sps:$4 sm:$0x11]   ;;  %v16456_v1 = vld [vmem:[#allocation2 + $0x128] ss:$0 sps:$4 sm:$0x11]   ;;  %v4438_v22 = vsel %vm2564_vm9, %v4436_v2, %v4437_v15  ;;  %v4600_v40 = vsel %vm4517_vm10, %v15935_v5, %v2459_v41  ;;  %v4724_v16 = vsel %vm4517_vm10, %v2648_v37, %v2876_v58 }
 0x199   :  { %v2650_v54 = vrot.slane %v14283_v0, 1  ;;  %19443 = vst [vmem:[#allocation63_spill] sm:$0xff] %v16454_v53  ;;  %v4099_v14 = vor.u32 %v4098_v47, %v4094_v28  ;;  %v3515_v34 = vrot.slane %v12605_v26, 1  ;;  %v4113_v61 = vshll.u32 %v16440_v59, 16  ;;  %13292 = vmatmul.mubr.msk.bf16.gmra.mrb[8].mxu1 %vm4517_vm10, %v4438_v22  ;;  %v14284_v29 = vld [vmem:[#allocation2 + $0x10c] sm:$0xf]  ;;  %4295 = vrot.lane.b32.xlu0 %v4092_v51, %s14631_s18 }
 0x19a   :  { %v4106_v19 = vshrl.u32 %v16454_v53, 16  ;;  %v4108_v57 = vshll.u32 %v16454_v53, 16  ;;  %v12606_v52 = vcombine.low %v1621_v45, %v14284_v29  ;;  %v1737_v56 = vld [vmem:[#allocation2 + $0x60] sm:$0xe]  ;;  %v16465_v10 = vld [vmem:[#allocation2 + $0x124] sm:$0xf]  ;;  %5598 = vmatprep.mubr.bf16.mxu0 %v4724_v16  ;;  %v2461_v16 = vpop.permute.xlu1 %2460 }
 0x19b   :  { %v1503_v46 = vld [vmem:[#allocation2 + $0x174] sm:$0xe]  ;;  %v4104_v20 = vsel %vm2019_vm8, %v4099_v14, %v4103_v13  ;;  %v3517_v5 = vsel %vm2564_vm9, %v3515_v34, %v3516_v8  ;;  %v1738_v18 = vld [vmem:[#allocation2 + $0x6c] sm:$0xe]  ;;  %v4115_v28 = vrot.slane %v4113_v61, 1  ;;  %v3519_v50 = vrot.slane %v13886_v42, 1  ;;  %5599 = vmatmul.mubr.bf16.gmra.mrb[108].mxu0 %v4600_v40 }
 0x19c   :  { %3593 = vrot.lane.b32.xlu1 %v3517_v5, %s14631_s18  ;;  %v4110_v44 = vrot.slane %v4108_v57, 1  ;;  %v3518_v32 = vrot.slane %v12606_v52, 1  ;;  %v1622_v45 = vld [vmem:[#allocation2 + $0x114] sm:$0xe]  ;;  %v12689_v36 = vcombine.low %v1737_v56, %v16193_v9  ;;  %v4440_v37 = vrot.slane %v16187_v6, 1 }
 0x19d   :  { %v13891_v15 = vld [vmem:[#allocation2 + $0x11c] ss:$0 sps:$4 sm:$0x11]   ;;  %v16476_v47 = vcombine.low %v1675_v23, %v16465_v10  ;;  %v4125_v2 = vshll.u32 %v16456_v1, 16  ;;  %4297 = vrot.lane.b32.xlu0 %v4104_v20, %s14631_s18  ;;  %v12690_v26 = vcombine.low %v1738_v18, %v16201_v60  ;;  %v4443_v8 = vrot.slane %v16212_v21, 1 }
 0x19e   :  { %v4111_v41 = vor.u32 %v4110_v44, %v4106_v19  ;;  %v3520_v13 = vsel %vm2564_vm9, %v3518_v32, %v3519_v50  ;;  %v4439_v49 = vrot.slane %v12689_v36, 1  ;;  %v1677_v42 = vld [vmem:[#allocation2 + $0x12c] sm:$0xf]  ;;  %v16482_v9 = vld [vmem:[#allocation2 + $0x130] sm:$0xf]  ;;  %v2651_v19 = vsel %vm2564_vm9, %v2649_v55, %v2650_v54 }
 0x19f   :  { %19444 = vst [vmem:[#allocation64_spill] sm:$0xff] %v16476_v47  ;;  %v14285_v6 = vld [vmem:[#allocation2 + $0x178] sm:$0xf]  ;;  %v4118_v14 = vshrl.u32 %v16476_v47, 16  ;;  %v4120_v22 = vshll.u32 %v16476_v47, 16  ;;  %v4442_v60 = vrot.slane %v12690_v26, 1  ;;  %v16496_v44 = vcombine.low %v1677_v42, %v16482_v9 }
 0x1a0   :  { %v12520_v0 = vcombine.low %v1503_v46, %v14285_v6  ;;  %v4116_v51 = vsel %vm2019_vm8, %v4111_v41, %v4115_v28  ;;  %3595 = vrot.lane.b32.xlu1 %v3520_v13, %s14631_s18  ;;  %v16488_v34 = vld [vmem:[#allocation2 + $0x134] ss:$0 sps:$4 sm:$0x11]   ;;  %v4441_v61 = vsel %vm2564_vm9, %v4439_v49, %v4440_v37  ;;  %v14286_v23 = vld [vmem:[#allocation2 + $0x118] sm:$0xf]  ;;  %v4127_v52 = vrot.slane %v4125_v2, 1 }
 0x1a1   :  { %v12607_v21 = vcombine.low %v1622_v45, %v14286_v23  ;;  %v1623_v58 = vld [vmem:[#allocation2 + $0x120] sm:$0xe]  ;;  %v13894_v40 = vld [vmem:[#allocation2 + $0x128] ss:$0 sps:$4 sm:$0x11]   ;;  %13295 = vmatprep.mubr.msk.bf16.mxu1 %vm4517_vm10, %v4441_v61  ;;  %v4122_v29 = vrot.slane %v4120_v22, 1  ;;  %4299 = vrot.lane.b32.xlu0 %v4116_v51, %s14631_s18  ;;  %v4444_v5 = vsel %vm2564_vm9, %v4442_v60, %v4443_v8  ;;  %v2878_v8 = vpop.permute.xlu0 %2877  ;;  %v4603_v42 = vsel %vm4517_vm10, %v15976_v7, %v2461_v16 }
 0x1a2   :  { %v1504_v57 = vld [vmem:[#allocation2 + $0x180] sm:$0xe]  ;;  %v3522_v56 = vrot.slane %v13891_v15, 1  ;;  %v14287_v46 = vld [vmem:[#allocation2 + $0x17c] ss:$0 sps:$4 sm:$0x11]   ;;  %13296 = vmatmul.mubr.msk.bf16.gmra.mrb[12].mxu1 %vm4517_vm10, %v4444_v5  ;;  %v4728_v22 = vsel %vm4517_vm10, %v2651_v19, %v2878_v8 }
 0x1a3   :  { %v2653_v20 = vrot.slane %v14287_v46, 1  ;;  %v3521_v18 = vrot.slane %v12607_v21, 1  ;;  %19445 = vst [vmem:[#allocation65_spill] sm:$0xff] %v16496_v44  ;;  %v1679_v28 = vld [vmem:[#allocation2 + $0x138] sm:$0xf]  ;;  %v2652_v54 = vrot.slane %v12520_v0, 1  ;;  %v4123_v50 = vor.u32 %v4122_v29, %v4118_v14  ;;  %5606 = vmatprep.mubr.bf16.mxu0 %v4728_v22 }
 0x1a4   :  { %v16498_v32 = vld [vmem:[#allocation2 + $0x13c] sm:$0xf]  ;;  %v16500_v55 = vld [vmem:[#allocation2 + $0x140] ss:$0 sps:$4 sm:$0x11]   ;;  %v4137_v45 = vshll.u32 %v16488_v34, 16  ;;  %5607 = vmatmul.mubr.bf16.gmra.mrb[112].mxu0 %v4603_v42 }
 0x1a5   :  { %v14288_v36 = vld [vmem:[#allocation2 + $0x124] sm:$0xf]  ;;  %v1739_v15 = vld [vmem:[#allocation2 + $0x78] sm:$0xe]  ;;  %v3523_v13 = vsel %vm2564_vm9, %v3521_v18, %v3522_v56  ;;  %v4130_v2 = vshrl.u32 %v16496_v44, 16  ;;  %v4132_v49 = vshll.u32 %v16496_v44, 16  ;;  %v4128_v51 = vsel %vm2019_vm8, %v4123_v50, %v4127_v52 }
 0x1a6   :  { %v12608_v37 = vcombine.low %v1623_v58, %v14288_v36  ;;  %v1740_v41 = vld [vmem:[#allocation2 + $0x84] sm:$0xe]  ;;  %v3525_v26 = vrot.slane %v13894_v40, 1  ;;  %3597 = vrot.lane.b32.xlu1 %v3523_v13, %s14631_s18  ;;  %v14290_v61 = vld [vmem:[#allocation2 + $0x188] ss:$0 sps:$4 sm:$0x11]   ;;  %4301 = vrot.lane.b32.xlu0 %v4128_v51, %s14631_s18  ;;  %v16517_v56 = vcombine.low %v1679_v28, %v16498_v32  ;;  %v2654_v19 = vsel %vm2564_vm9, %v2652_v54, %v2653_v20  ;;  %v2880_v20 = vpop.permute.xlu0 %2879 }
 0x1a7   :  { %v14289_v6 = vld [vmem:[#allocation2 + $0x184] sm:$0xf]  ;;  %v2656_v60 = vrot.slane %v14290_v61, 1  ;;  %v4134_v23 = vrot.slane %v4132_v49, 1  ;;  %v4139_v21 = vrot.slane %v4137_v45, 1  ;;  %v4446_v52 = vrot.slane %v16233_v62, 1 }
 0x1a8   :  { %v12521_v0 = vcombine.low %v1504_v57, %v14289_v6  ;;  %v3524_v14 = vrot.slane %v12608_v37, 1  ;;  %v1624_v58 = vld [vmem:[#allocation2 + $0x12c] sm:$0xe]  ;;  %v13899_v40 = vld [vmem:[#allocation2 + $0x134] ss:$0 sps:$4 sm:$0x11]   ;;  %v12691_v57 = vcombine.low %v1739_v15, %v16227_v43  ;;  %v12692_v5 = vcombine.low %v1740_v41, %v16245_v48 }
 0x1a9   :  { %v1505_v29 = vld [vmem:[#allocation2 + $0x18c] sm:$0xe]  ;;  %19446 = vst [vmem:[#allocation66_spill] sm:$0xff] %v16517_v56  ;;  %v4135_v16 = vor.u32 %v4134_v23, %v4130_v2  ;;  %v4149_v46 = vshll.u32 %v16500_v55, 16  ;;  %v1681_v18 = vld [vmem:[#allocation2 + $0x144] sm:$0xf]  ;;  %v4732_v2 = vsel %vm4517_vm10, %v2654_v19, %v2880_v20 }
 0x1aa   :  { %v3526_v7 = vsel %vm2564_vm9, %v3524_v14, %v3525_v26  ;;  %v16522_v50 = vld [vmem:[#allocation2 + $0x148] sm:$0xf]  ;;  %v16524_v45 = vld [vmem:[#allocation2 + $0x14c] ss:$0 sps:$4 sm:$0x11]   ;;  %v4445_v43 = vrot.slane %v12691_v57, 1  ;;  %5614 = vmatprep.mubr.bf16.mxu0 %v4732_v2 }
 0x1ab   :  { %3599 = vrot.lane.b32.xlu1 %v3526_v7, %s14631_s18  ;;  %v4142_v62 = vshrl.u32 %v16517_v56, 16  ;;  %v4144_v28 = vshll.u32 %v16517_v56, 16  ;;  %v19447_v36 = vld [vmem:[#allocation53_spill] sm:$0xff]  ;;  %v2655_v54 = vrot.slane %v12521_v0, 1  ;;  %v4140_v15 = vsel %vm2019_vm8, %v4135_v16, %v4139_v21  ;;  %v14291_v8 = vld [vmem:[#allocation2 + $0x130] sm:$0xf]  ;;  %v2463_v21 = vpop.permute.xlu1 %2462 }
 0x1ac   :  { %v4449_v37 = vrot.slane %v19447_v36, 1  ;;  %v4151_v13 = vrot.slane %v4149_v46, 1  ;;  %v4448_v48 = vrot.slane %v12692_v5, 1  ;;  %v13902_v41 = vld [vmem:[#allocation2 + $0x140] ss:$0 sps:$4 sm:$0x11]   ;;  %4303 = vrot.lane.b32.xlu0 %v4140_v15, %s14631_s18  ;;  %v4447_v49 = vsel %vm2564_vm9, %v4445_v43, %v4446_v52 }
 0x1ad   :  { %v4146_v26 = vrot.slane %v4144_v28, 1  ;;  %v12609_v42 = vcombine.low %v1624_v58, %v14291_v8  ;;  %v1625_v6 = vld [vmem:[#allocation2 + $0x138] sm:$0xe]  ;;  %v19448_v51 = vld [vmem:[#allocation41_spill] sm:$0xff]  ;;  %v14292_v22 = vld [vmem:[#allocation2 + $0x190] sm:$0xf]  ;;  %13299 = vmatprep.mubr.msk.bf16.mxu1 %vm4517_vm10, %v4447_v49  ;;  %v16539_v52 = vcombine.low %v1681_v18, %v16522_v50  ;;  %v2657_v5 = vsel %vm2564_vm9, %v2655_v54, %v2656_v60 }
 0x1ae   :  { %v12522_v0 = vcombine.low %v1505_v29, %v14292_v22  ;;  %v4450_v61 = vsel %vm2564_vm9, %v4448_v48, %v4449_v37  ;;  %v3528_v23 = vrot.slane %v13899_v40, 1  ;;  %v4161_v58 = vshll.u32 %v16524_v45, 16  ;;  %v1683_v19 = vld [vmem:[#allocation2 + $0x150] sm:$0xf]  ;;  %v16542_v16 = vld [vmem:[#allocation2 + $0x154] sm:$0xf] }
 0x1af   :  { %v4147_v7 = vor.u32 %v4146_v26, %v4142_v62  ;;  %13300 = vmatmul.mubr.msk.bf16.gmra.mrb[16].mxu1 %vm4517_vm10, %v4450_v61  ;;  %v3527_v57 = vrot.slane %v12609_v42, 1  ;;  %19449 = vst [vmem:[#allocation53_spill] sm:$0xff] %v16539_v52  ;;  %v19450_v46 = vld [vmem:[#allocation37_spill] sm:$0xff]  ;;  %v14293_v43 = vld [vmem:[#allocation2 + $0x13c] sm:$0xf]  ;;  %v3531_v28 = vrot.slane %v13902_v41, 1 }
 0x1b0   :  { %v4606_v29 = vsel %vm4517_vm10, %v19450_v46, %v2463_v21  ;;  %v12610_v40 = vcombine.low %v1625_v6, %v14293_v43  ;;  %v1741_v62 = vld [vmem:[#allocation2 + $0x90] sm:$0xe]  ;;  %v16547_v36 = vld [vmem:[#allocation2 + $0x158] ss:$0 sps:$4 sm:$0x11]   ;;  %v4154_v20 = vshrl.u32 %v16539_v52, 16 }
 0x1b1   :  { %v4152_v37 = vsel %vm2019_vm8, %v4147_v7, %v4151_v13  ;;  %v3529_v18 = vsel %vm2564_vm9, %v3527_v57, %v3528_v23  ;;  %v4156_v15 = vshll.u32 %v16539_v52, 16  ;;  %v1742_v48 = vld [vmem:[#allocation2 + $0x9c] sm:$0xe]  ;;  %5615 = vmatmul.mubr.bf16.gmra.mrb[116].mxu0 %v4606_v29  ;;  %v2658_v2 = vrot.slane %v12522_v0, 1  ;;  %v14296_v42 = vld [vmem:[#allocation2 + $0x94] sm:$0xf]  ;;  %v2465_v0 = vpop.permute.xlu1 %2464 }
 0x1b2   :  { %v14294_v49 = vld [vmem:[#allocation2 + $0x194] ss:$0 sps:$4 sm:$0x11]   ;;  %4305 = vrot.lane.b32.xlu0 %v4152_v37, %s14631_s18  ;;  %v3530_v41 = vrot.slane %v12610_v40, 1  ;;  %3601 = vrot.lane.b32.xlu1 %v3529_v18, %s14631_s18  ;;  %v4163_v8 = vrot.slane %v4161_v58, 1  ;;  %v12693_v6 = vcombine.low %v1741_v62, %v14296_v42  ;;  %v19451_v22 = vld [vmem:[#allocation56_spill] sm:$0xff]  ;;  %v16561_v57 = vcombine.low %v1683_v19, %v16542_v16  ;;  %v2882_v40 = vpop.permute.xlu0 %2881 }
 0x1b3   :  { %v2659_v26 = vrot.slane %v14294_v49, 1  ;;  %v16553_v60 = vld [vmem:[#allocation2 + $0x14] ss:$0 sps:$4 sm:$0x11]   ;;  %v4158_v13 = vrot.slane %v4156_v15, 1  ;;  %v4452_v61 = vrot.slane %v19451_v22, 1  ;;  %v4736_v62 = vsel %vm4517_vm10, %v2657_v5, %v2882_v40 }
 0x1b4   :  { %v2989_v54 = vshll.u32 %v16553_v60, 16  ;;  %v1626_v23 = vld [vmem:[#allocation2 + $0x144] sm:$0xe]  ;;  %v13907_v21 = vld [vmem:[#allocation2 + $0x14c] ss:$0 sps:$4 sm:$0x11]   ;;  %v3532_v7 = vsel %vm2564_vm9, %v3530_v41, %v3531_v28  ;;  %5622 = vmatprep.mubr.bf16.mxu0 %v4736_v62 }
 0x1b5   :  { %19452 = vst [vmem:[#allocation41_spill] sm:$0xff] %v16561_v57  ;;  %v4173_v46 = vshll.u32 %v16547_v36, 16  ;;  %v19453_v29 = vld [vmem:[#allocation59_spill] sm:$0xff]  ;;  %v4159_v37 = vor.u32 %v4158_v13, %v4154_v20  ;;  %v4451_v18 = vrot.slane %v12693_v6, 1  ;;  %v19454_v49 = vld [vmem:[#allocation40_spill] sm:$0xff]  ;;  %v4166_v28 = vshrl.u32 %v16561_v57, 16 }
 0x1b6   :  { %v12694_v43 = vcombine.low %v1742_v48, %v19453_v29  ;;  %v1685_v58 = vld [vmem:[#allocation2 + $0x15c] sm:$0xf]  ;;  %v16565_v15 = vld [vmem:[#allocation2 + $0x164] ss:$0 sps:$4 sm:$0x11]   ;;  %v4609_v42 = vsel %vm4517_vm10, %v19454_v49, %v2465_v0  ;;  %v4168_v19 = vshll.u32 %v16561_v57, 16  ;;  %3603 = vrot.lane.b32.xlu1 %v3532_v7, %s14631_s18 }
 0x1b7   :  { %v16572_v41 = vld [vmem:[#allocation2 + $0x160] sm:$0xf]  ;;  %v4164_v48 = vsel %vm2019_vm8, %v4159_v37, %v4163_v8  ;;  %v4453_v20 = vsel %vm2564_vm9, %v4451_v18, %v4452_v61  ;;  %v4175_v13 = vrot.slane %v4173_v46, 1  ;;  %v1627_v22 = vld [vmem:[#allocation2 + $0x150] sm:$0xe]  ;;  %v3534_v14 = vrot.slane %v13907_v21, 1 }
 0x1b8   :  { %v4454_v6 = vrot.slane %v12694_v43, 1  ;;  %4307 = vrot.lane.b32.xlu0 %v4164_v48, %s14631_s18  ;;  %13303 = vmatprep.mubr.msk.bf16.mxu1 %vm4517_vm10, %v4453_v20  ;;  %v4170_v5 = vrot.slane %v4168_v19, 1  ;;  %v14297_v0 = vld [vmem:[#allocation2 + $0xa4] ss:$0 sps:$4 sm:$0x11]   ;;  %v16580_v7 = vcombine.low %v1685_v58, %v16572_v41  ;;  %v4185_v61 = vshll.u32 %v16565_v15, 16 }
 0x1b9   :  { %v4455_v29 = vrot.slane %v14297_v0, 1  ;;  %v14298_v40 = vld [vmem:[#allocation2 + $0x148] sm:$0xf]  ;;  %v13910_v62 = vld [vmem:[#allocation2 + $0x158] ss:$0 sps:$4 sm:$0x11]   ;;  %5623 = vmatmul.mubr.bf16.gmra.mrb[120].mxu0 %v4609_v42  ;;  %v2660_v21 = vsel %vm2564_vm9, %v2658_v2, %v2659_v26 }
 0x1ba   :  { %v12611_v49 = vcombine.low %v1626_v23, %v14298_v40  ;;  %v14299_v4 = vld [vmem:[#allocation2 + $0x20] ss:$0 sps:$4 sm:$0x11]   ;;  %19455 = vst [vmem:[#allocation37_spill] sm:$0xff] %v16580_v7  ;;  %v4171_v46 = vor.u32 %v4170_v5, %v4166_v28  ;;  %v14300_v18 = vld [vmem:[#allocation2 + $0x154] sm:$0xf]  ;;  %v2884_v40 = vpop.permute.xlu0 %2883 }
 0x1bb   :  { %v3001_v8 = vshll.u32 %v14299_v4, 16  ;;  %v4456_v43 = vsel %vm2564_vm9, %v4454_v6, %v4455_v29  ;;  %v12612_v19 = vcombine.low %v1627_v22, %v14300_v18  ;;  %v1687_v48 = vld [vmem:[#allocation2 + $0x168] sm:$0xf]  ;;  %v16584_v20 = vld [vmem:[#allocation2 + $0x16c] sm:$0xf]  ;;  %v4178_v4 = vshrl.u32 %v16580_v7, 16 }
 0x1bc   :  { %v3533_v37 = vrot.slane %v12611_v49, 1  ;;  %v16586_v23 = vld [vmem:[#allocation2 + $0x170] ss:$0 sps:$4 sm:$0x11]   ;;  %13304 = vmatmul.mubr.msk.bf16.gmra.mrb[20].mxu1 %vm4517_vm10, %v4456_v43  ;;  %v4180_v58 = vshll.u32 %v16580_v7, 16  ;;  %v4176_v28 = vsel %vm2019_vm8, %v4171_v46, %v4175_v13  ;;  %v3537_v22 = vrot.slane %v13910_v62, 1 }
 0x1bd   :  { %v1743_v42 = vld [vmem:[#allocation2 + $0xa8] sm:$0xe]  ;;  %v3536_v5 = vrot.slane %v12612_v19, 1  ;;  %v1744_v0 = vld [vmem:[#allocation2 + $0xb4] sm:$0xe]  ;;  %v2991_v49 = vrot.slane %v2989_v54, 1  ;;  %4309 = vrot.lane.b32.xlu0 %v4176_v28, %s14631_s18  ;;  %v4740_v18 = vsel %vm4517_vm10, %v2660_v21, %v2884_v40  ;;  %v16603_v54 = vcombine.low %v1687_v48, %v16584_v20 }
 0x1be   :  { %v3535_v6 = vsel %vm2564_vm9, %v3533_v37, %v3534_v14  ;;  %v1628_v29 = vld [vmem:[#allocation2 + $0x15c] sm:$0xe]  ;;  %v4182_v2 = vrot.slane %v4180_v58, 1  ;;  %v4187_v26 = vrot.slane %v4185_v61, 1  ;;  %v14301_v14 = vld [vmem:[#allocation2 + $0xac] sm:$0xf]  ;;  %5630 = vmatprep.mubr.bf16.mxu0 %v4740_v18 }
 0x1bf   :  { %3605 = vrot.lane.b32.xlu1 %v3535_v6, %s14631_s18  ;;  %v13915_v43 = vld [vmem:[#allocation2 + $0x164] ss:$0 sps:$4 sm:$0x11]   ;;  %v3538_v13 = vsel %vm2564_vm9, %v3536_v5, %v3537_v22  ;;  %v12695_v46 = vcombine.low %v1743_v42, %v14301_v14  ;;  %v14302_v62 = vld [vmem:[#allocation2 + $0xb0] ss:$0 sps:$4 sm:$0x11]  }
 0x1c0   :  { %v4458_v37 = vrot.slane %v14302_v62, 1  ;;  %v16600_v19 = vrot.slane %v3001_v8, 1  ;;  %v4183_v60 = vor.u32 %v4182_v2, %v4178_v4  ;;  %19456 = vst [vmem:[#allocation56_spill] sm:$0xff] %v16603_v54  ;;  %v4197_v28 = vshll.u32 %v16586_v23, 16  ;;  %v1689_v58 = vld [vmem:[#allocation2 + $0x174] sm:$0xf]  ;;  %v4262_v62 = vpop.permute.xlu0 %4261 }
 0x1c1   :  { %v16606_v61 = vld [vmem:[#allocation2 + $0x17c] ss:$0 sps:$4 sm:$0x11]   ;;  %v4457_v6 = vrot.slane %v12695_v46, 1  ;;  %v14303_v21 = vld [vmem:[#allocation2 + $0xb8] sm:$0xf] }
 0x1c2   :  { %v12696_v40 = vcombine.low %v1744_v0, %v14303_v21  ;;  %v14304_v5 = vld [vmem:[#allocation2 + $0xbc] ss:$0 sps:$4 sm:$0x11]   ;;  %v14305_v42 = vld [vmem:[#allocation2 + $0x160] sm:$0xf]  ;;  %v19457_v18 = vld [vmem:[#allocation10_spill] sm:$0xff]  ;;  %v4188_v48 = vsel %vm2019_vm8, %v4183_v60, %v4187_v26  ;;  %v2467_v0 = vpop.permute.xlu1 %2466 }
 0x1c3   :  { %v4461_v22 = vrot.slane %v14304_v5, 1  ;;  %v12613_v14 = vcombine.low %v1628_v29, %v14305_v42  ;;  %v19458_v8 = vshrl.u32 %v19457_v18, 16  ;;  %v19459_v7 = vld [vmem:[#allocation54_spill] sm:$0xff]  ;;  %3607 = vrot.lane.b32.xlu1 %v3538_v13, %s14631_s18  ;;  %v4190_v2 = vshrl.u32 %v16603_v54, 16  ;;  %v16615_v46 = vld [vmem:[#allocation2 + $0x178] sm:$0xf]  ;;  %4311 = vrot.lane.b32.xlu0 %v4188_v48, %s14631_s18 }
 0x1c4   :  { %v4192_v57 = vshll.u32 %v16603_v54, 16  ;;  %v19460_v21 = vld [vmem:[#allocation38_spill] sm:$0xff]  ;;  %v4459_v29 = vsel %vm2564_vm9, %v4457_v6, %v4458_v37  ;;  %v4199_v42 = vrot.slane %v4197_v28, 1  ;;  %v1629_v18 = vld [vmem:[#allocation2 + $0x168] sm:$0xe]  ;;  %v19461_v26 = vld [vmem:[#allocation43_spill] sm:$0xff] }
 0x1c5   :  { %v2987_v4 = vor.u32 %v19459_v7, %v19458_v8  ;;  %v4871_v5 = vsel %vm4517_vm10, %v19460_v21, %v4262_v62  ;;  %v4460_v7 = vrot.slane %v12696_v40, 1  ;;  %v4612_v13 = vsel %vm4517_vm10, %v19461_v26, %v2467_v0  ;;  %13307 = vmatprep.mubr.msk.bf16.mxu1 %vm4517_vm10, %v4459_v29  ;;  %v13918_v52 = vld [vmem:[#allocation2 + $0x170] ss:$0 sps:$4 sm:$0x11]   ;;  %v1691_v48 = vld [vmem:[#allocation2 + $0x180] sm:$0xf]  ;;  %v4264_v21 = vpop.permute.xlu0 %4263 }
 0x1c6   :  { %v4194_v60 = vrot.slane %v4192_v57, 1  ;;  %v3539_v8 = vrot.slane %v12613_v14, 1  ;;  %v3540_v54 = vrot.slane %v13915_v43, 1  ;;  %5631 = vmatmul.mubr.bf16.gmra.mrb[124].mxu0 %v4612_v13  ;;  %v16626_v62 = vcombine.low %v1689_v58, %v16615_v46  ;;  %v14306_v40 = vld [vmem:[#allocation2 + $0x16c] sm:$0xf]  ;;  %v3558_v0 = vpop.permute.xlu1 %3557  ;;  %v19463_v26 = vld [vmem:[#allocation11_spill] sm:$0xff] }
 0x1c7   :  { %v4462_v56 = vsel %vm2564_vm9, %v4460_v7, %v4461_v22  ;;  %5671 = vmatprep.mubr.bf16.mxu0 %v4871_v5  ;;  %v4209_v6 = vshll.u32 %v16606_v61, 16  ;;  %v12614_v57 = vcombine.low %v1629_v18, %v14306_v40  ;;  %v16631_v14 = vld [vmem:[#allocation2 + $0x184] sm:$0xf]  ;;  %v16633_v43 = vld [vmem:[#allocation2 + $0x188] ss:$0 sps:$4 sm:$0x11]   ;;  %v2992_v22 = vsel %vm2019_vm8, %v2987_v4, %v2991_v49 }
 0x1c8   :  { %19462 = vst [vmem:[#allocation59_spill] sm:$0xff] %v16626_v62  ;;  %v4195_v37 = vor.u32 %v4194_v60, %v4190_v2  ;;  %13308 = vmatmul.mubr.msk.bf16.gmra.mrb[24].mxu1 %vm4517_vm10, %v4462_v56  ;;  %v3541_v28 = vsel %vm2564_vm9, %v3539_v8, %v3540_v54  ;;  %v4202_v58 = vshrl.u32 %v16626_v62, 16  ;;  %v4204_v2 = vshll.u32 %v16626_v62, 16  ;;  %v1745_v56 = vld [vmem:[#allocation2 + $0xc0] sm:$0xe]  ;;  %v19465_v60 = vld [vmem:[#allocation57_spill] sm:$0xff] }
 0x1c9   :  { %3609 = vrot.lane.b32.xlu1 %v3541_v28, %s14631_s18  ;;  %v14307_v54 = vld [vmem:[#allocation2 + $0x2c] ss:$0 sps:$4 sm:$0x11]   ;;  %v3542_v7 = vrot.slane %v12614_v57, 1  ;;  %v1746_v18 = vld [vmem:[#allocation2 + $0xcc] sm:$0xe]  ;;  %v4744_v62 = vsel %vm4517_vm10, %v2992_v22, %v3558_v0 }
 0x1ca   :  { %v3013_v5 = vshll.u32 %v14307_v54, 16  ;;  %v4200_v29 = vsel %vm2019_vm8, %v4195_v37, %v4199_v42  ;;  %v19464_v13 = vshrl.u32 %v19463_v26, 16  ;;  %v4206_v49 = vrot.slane %v4204_v2, 1  ;;  %v1630_v40 = vld [vmem:[#allocation2 + $0x174] sm:$0xe]  ;;  %v19467_v37 = vld [vmem:[#allocation44_spill] sm:$0xff] }
 0x1cb   :  { %4313 = vrot.lane.b32.xlu0 %v4200_v29, %s14631_s18  ;;  %v4211_v4 = vrot.slane %v4209_v6, 1  ;;  %v3543_v28 = vrot.slane %v13918_v52, 1  ;;  %v13923_v44 = vld [vmem:[#allocation2 + $0x17c] ss:$0 sps:$4 sm:$0x11]   ;;  %v4464_v54 = vrot.slane %v16398_v30, 1  ;;  %v16647_v42 = vcombine.low %v1691_v48, %v16631_v14 }
 0x1cc   :  { %v2999_v8 = vor.u32 %v19465_v60, %v19464_v13  ;;  %v14308_v47 = vld [vmem:[#allocation2 + $0xc4] sm:$0xf]  ;;  %v4874_v57 = vsel %vm4517_vm10, %v19467_v37, %v4264_v21  ;;  %v4207_v26 = vor.u32 %v4206_v49, %v4202_v58  ;;  %v4221_v6 = vshll.u32 %v16633_v43, 16  ;;  %v16653_v52 = vld [vmem:[#allocation2 + $0x194] ss:$0 sps:$4 sm:$0x11]  }
 0x1cd   :  { %v12697_v53 = vcombine.low %v1745_v56, %v14308_v47  ;;  %19466 = vst [vmem:[#allocation40_spill] sm:$0xff] %v16647_v42  ;;  %v3544_v29 = vsel %vm2564_vm9, %v3542_v7, %v3543_v28  ;;  %v1693_v0 = vld [vmem:[#allocation2 + $0x18c] sm:$0xf]  ;;  %v16656_v47 = vld [vmem:[#allocation2 + $0x190] sm:$0xf]  ;;  %v4214_v2 = vshrl.u32 %v16647_v42, 16  ;;  %v12698_v56 = vcombine.low %v1746_v18, %v16368_v27  ;;  %v4266_v18 = vpop.permute.xlu0 %4265 }
 0x1ce   :  { %3611 = vrot.lane.b32.xlu1 %v3544_v29, %s14631_s18  ;;  %v13926_v30 = vld [vmem:[#allocation2 + $0x188] ss:$0 sps:$4 sm:$0x11]   ;;  %5672 = vmatmul.mubr.bf16.vlgmr.msra.gmra.mrb[0].mxu0 %v4744_v62  ;;  %v4212_v48 = vsel %vm2019_vm8, %v4207_v26, %v4211_v4  ;;  %v4216_v58 = vshll.u32 %v16647_v42, 16  ;;  %v1631_v21 = vld [vmem:[#allocation2 + $0x180] sm:$0xe]  ;;  %v3004_v7 = vsel %vm2019_vm8, %v2999_v8, %v16600_v19  ;;  %v3560_v4 = vpop.permute.xlu1 %3559 }
 0x1cf   :  { %v4463_v22 = vrot.slane %v12697_v53, 1  ;;  %5679 = vmatprep.mubr.bf16.mxu0 %v4874_v57  ;;  %4315 = vrot.lane.b32.xlu0 %v4212_v48, %s14631_s18  ;;  %v14309_v13 = vld [vmem:[#allocation2 + $0xd4] ss:$0 sps:$4 sm:$0x11]   ;;  %v14310_v62 = vld [vmem:[#allocation2 + $0x178] sm:$0xf] }
 0x1d0   :  { %v4467_v60 = vrot.slane %v14309_v13, 1  ;;  %v12615_v49 = vcombine.low %v1630_v40, %v14310_v62  ;;  %v4218_v28 = vrot.slane %v4216_v58, 1  ;;  %v4223_v37 = vrot.slane %v4221_v6, 1 }
 0x1d1   :  { %v4465_v53 = vsel %vm2564_vm9, %v4463_v22, %v4464_v54  ;;  %v4466_v26 = vrot.slane %v12698_v56, 1  ;;  %v3546_v27 = vrot.slane %v13923_v44, 1  ;;  %v19468_v57 = vshrl.u32 %v15133_v3, 16  ;;  %v14311_v3 = vld [vmem:[#allocation2 + $0x184] sm:$0xf] }
 0x1d2   :  { %13311 = vmatprep.mubr.msk.bf16.mxu1 %vm4517_vm10, %v4465_v53  ;;  %v3015_v8 = vrot.slane %v3013_v5, 1  ;;  %v3545_v29 = vrot.slane %v12615_v49, 1  ;;  %v4219_v48 = vor.u32 %v4218_v28, %v4214_v2  ;;  %v16672_v22 = vcombine.low %v1693_v0, %v16656_v47  ;;  %v1375_v53 = vld [vmem:[#allocation2 + $0x1a0] sm:$0x1]  ;;  %v1747_v5 = vld [vmem:[#allocation2 + $0xf0] sm:$0xe] }
 0x1d3   :  { %v3011_v19 = vor.u32 %v16372_v35, %v19468_v57  ;;  %v4468_v54 = vsel %vm2564_vm9, %v4466_v26, %v4467_v60  ;;  %v4233_v40 = vshll.u32 %v16653_v52, 16  ;;  %v4748_v6 = vsel %vm4517_vm10, %v3004_v7, %v3560_v4 }
 0x1d4   :  { %19469 = vst [vmem:[#allocation10_spill] sm:$0xff] %v16672_v22  ;;  %13312 = vmatmul.mubr.msk.bf16.gmra.mrb[28].mxu1 %vm4517_vm10, %v4468_v54  ;;  %v3547_v44 = vsel %vm2564_vm9, %v3545_v29, %v3546_v27  ;;  %v12616_v58 = vcombine.low %v1631_v21, %v14311_v3  ;;  %v3549_v35 = vrot.slane %v13926_v30, 1 }
 0x1d5   :  { %12 = vsyncpa [#allocation4], 0  ;;  %v19470_v2 = vld [vmem:[#allocation46_spill] sm:$0xff]  ;;  %v4224_v0 = vsel %vm2019_vm8, %v4219_v48, %v4223_v37  ;;  %3613 = vrot.lane.b32.xlu1 %v3547_v44, %s14631_s18  ;;  %v4226_v13 = vshrl.u32 %v16672_v22, 16  ;;  %v4228_v7 = vshll.u32 %v16672_v22, 16  ;;  %v3018_v49 = vshrl.u32 %v15150_v25, 16 }
 0x1d6   :  { %v4877_v56 = vsel %vm4517_vm10, %v19470_v2, %v4266_v18  ;;  %v1695_v60 = vld [vmem:[#allocation2 + $0x198] sm:$0xf]  ;;  %v16684_v62 = vld [vmem:[#allocation2 + $0x19c] sm:$0xf]  ;;  %v19471_v30 = vshll.u32 %v15150_v25, 16  ;;  %4317 = vrot.lane.b32.xlu0 %v4224_v0, %s14631_s18  ;;  %v3548_v4 = vrot.slane %v12616_v58, 1  ;;  %5680 = vmatmul.mubr.bf16.gmra.mrb[4].mxu0 %v4748_v6  ;;  %v3562_v2 = vpop.permute.xlu1 %3561 }
 0x1d7   :  { %v14312_v28 = vld [vmem:[#allocation2 + $0x38] ss:$0 sps:$4 sm:$0x11]   ;;  %v4230_v26 = vrot.slane %v4228_v7, 1  ;;  %v4235_v27 = vrot.slane %v4233_v40, 1  ;;  %5687 = vmatprep.mubr.bf16.mxu0 %v4877_v56  ;;  %v19472_v3 = vrot.slane %v19448_v51, 4  ;;  %v16696_v58 = vcombine.low %v1695_v60, %v16684_v62 }
 0x1d8   :  { %v3022_v21 = vrot.slane %v19471_v30, 1  ;;  %v3025_v37 = vshll.u32 %v14312_v28, 16  ;;  %v14313_v18 = vld [vmem:[#allocation2 + $0xf4] sm:$0xf]  ;;  %v1748_v29 = vld [vmem:[#allocation2 + $0xfc] sm:$0xe]  ;;  %v3550_v48 = vsel %vm2564_vm9, %v3548_v4, %v3549_v35  ;;  %v3016_v40 = vsel %vm2019_vm8, %v3011_v19, %v3015_v8  ;;  %v4268_v30 = vpop.permute.xlu0 %4267 }
 0x1d9   :  { %v12699_v57 = vcombine.low %v1747_v5, %v14313_v18  ;;  %v14314_v54 = vld [vmem:[#allocation2 + $0xf8] ss:$0 sps:$4 sm:$0x11]   ;;  %v1376_v25 = vsel %vm15018_vm7, %v19472_v3, %v1375_v53  ;;  %19473 = vst [vmem:[#allocation54_spill] sm:$0xff] %v16696_v58  ;;  %v4231_v0 = vor.u32 %v4230_v26, %v4226_v13  ;;  %3615 = vrot.lane.b32.xlu1 %v3550_v48, %s14631_s18  ;;  %v1632_v35 = vld [vmem:[#allocation2 + $0x18c] sm:$0xe] }
 0x1da   :  { %v4470_v44 = vrot.slane %v14314_v54, 1  ;;  %v13931_v6 = vld [vmem:[#allocation2 + $0x194] ss:$0 sps:$4 sm:$0x11]   ;;  %1377 = vst [vmem:[#allocation2 + $0x1a0] sm:$0x1] %v1376_v25  ;;  %v3023_v51 = vor.u32 %v3022_v21, %v3018_v49  ;;  %v4752_v48 = vsel %vm4517_vm10, %v3016_v40, %v3562_v2 }
 0x1db   :  { %v4469_v5 = vrot.slane %v12699_v57, 1  ;;  %v19474_v56 = vld [vmem:[#allocation12_spill] sm:$0xff]  ;;  %v4240_v4 = vshll.u32 %v16696_v58, 16  ;;  %v16702_v18 = vld [vmem:[#allocation2 + $0x1a8] sm:$0xf]  ;;  %v3027_v54 = vrot.slane %v3025_v37, 1  ;;  %v4236_v19 = vsel %vm2019_vm8, %v4231_v0, %v4235_v27 }
 0x1dc   :  { %v14315_v53 = vld [vmem:[#allocation2 + $0x100] sm:$0xf]  ;;  %v1697_v60 = vld [vmem:[#allocation2 + $0x1a4] sm:$0xf]  ;;  %4319 = vrot.lane.b32.xlu0 %v4236_v19, %s14631_s18  ;;  %v14317_v21 = vld [vmem:[#allocation2 + $0x190] sm:$0xf]  ;;  %v4270_v7 = vpop.permute.xlu0 %4269 }
 0x1dd   :  { %v12700_v28 = vcombine.low %v1748_v29, %v14315_v53  ;;  %v4471_v8 = vsel %vm2564_vm9, %v4469_v5, %v4470_v44  ;;  %v14316_v13 = vld [vmem:[#allocation2 + $0x104] ss:$0 sps:$4 sm:$0x11]   ;;  %v16706_v57 = vld [vmem:[#allocation2 + $0x1ac] ss:$0 sps:$4 sm:$0x11]   ;;  %v12617_v29 = vcombine.low %v1632_v35, %v14317_v21  ;;  %v16715_v5 = vcombine.low %v1697_v60, %v16702_v18  ;;  %v3564_v35 = vpop.permute.xlu1 %3563 }
 0x1de   :  { %v4473_v26 = vrot.slane %v14316_v13, 1  ;;  %13315 = vmatprep.mubr.msk.bf16.mxu1 %vm4517_vm10, %v4471_v8  ;;  %v3552_v3 = vrot.slane %v13931_v6, 1  ;;  %v3032_v37 = vshll.u32 %v19474_v56, 16  ;;  %v19475_v25 = vld [vmem:[#allocation47_spill] sm:$0xff]  ;;  %v4238_v2 = vshrl.u32 %v16696_v58, 16  ;;  %5688 = vmatmul.mubr.bf16.gmra.mrb[8].mxu0 %v4752_v48  ;;  %s14632_s19 = smov [#allocation3]  }
 0x1df   :  { %v4472_v49 = vrot.slane %v12700_v28, 1  ;;  %v4880_v27 = vsel %vm4517_vm10, %v19475_v25, %v4268_v30  ;;  %v14318_v44 = vld [vmem:[#allocation2 + $0x44] ss:$0 sps:$4 sm:$0x11]   ;;  %19476 = vst [vmem:[#allocation38_spill] sm:$0xff] %v16715_v5  ;;  %v4242_v40 = vrot.slane %v4240_v4, 1  ;;  %v3028_v6 = vsel %vm2019_vm8, %v3023_v51, %v3027_v54 }
 0x1e0   :  { %v3037_v0 = vshll.u32 %v14318_v44, 16  ;;  %v1633_v53 = vld [vmem:[#allocation2 + $0x198] sm:$0xe]  ;;  %v3551_v28 = vrot.slane %v12617_v29, 1  ;;  %v4252_v30 = vshll.u32 %v16715_v5, 16  ;;  %v4257_v8 = vshll.u32 %v16706_v57, 16  ;;  %5695 = vmatprep.mubr.bf16.mxu0 %v4880_v27 }
 0x1e1   :  { %v4474_v19 = vsel %vm2564_vm9, %v4472_v49, %v4473_v26  ;;  %v1749_v13 = vld [vmem:[#allocation2 + $0x108] sm:$0xe]  ;;  %v1750_v60 = vld [vmem:[#allocation2 + $0x114] sm:$0xe]  ;;  %v4250_v26 = vshrl.u32 %v16715_v5, 16  ;;  %v3034_v29 = vrot.slane %v3032_v37, 1  ;;  %v4243_v12 = vor.u32 %v4242_v40, %v4238_v2 }
 0x1e2   :  { %13316 = vmatmul.mubr.msk.bf16.gmra.mrb[32].mxu1 %vm4517_vm10, %v4474_v19  ;;  %v16723_v21 = vld [vmem:[#allocation2 + $0x1a0] ss:$0 sps:$4 sm:$0x11]   ;;  %v3553_v4 = vsel %vm2564_vm9, %v3551_v28, %v3552_v3  ;;  %v14319_v49 = vld [vmem:[#allocation2 + $0x19c] sm:$0xf]  ;;  %v19477_v25 = vld [vmem:[#allocation13_spill] sm:$0xff]  ;;  %v4756_v19 = vsel %vm4517_vm10, %v3028_v6, %v3564_v35  ;;  %v12702_v37 = vcombine.low %v1750_v60, %v16437_v33 }
 0x1e3   :  { %v12618_v48 = vcombine.low %v1633_v53, %v14319_v49  ;;  %v3044_v51 = vshll.u32 %v19477_v25, 16  ;;  %v3039_v54 = vrot.slane %v3037_v0, 1  ;;  %3617 = vrot.lane.b32.xlu1 %v3553_v4, %s14631_s18  ;;  %v4254_v44 = vrot.slane %v4252_v30, 1  ;;  %v13934_v58 = vld [vmem:[#allocation2 + $0x1a0] ss:$0 sps:$4 sm:$0x11]  }
 0x1e4   :  { %v4245_v27 = vshll.u32 %v16723_v21, 16  ;;  %v4259_v3 = vrot.slane %v4257_v8, 1  ;;  %v14320_v28 = vld [vmem:[#allocation2 + $0x10c] sm:$0xf]  ;;  %v3555_v63 = vrot.slane %v13934_v58, 1  ;;  %v4479_v30 = vrot.slane %v16440_v59, 1 }
 0x1e5   :  { %v3554_v22 = vrot.slane %v12618_v48, 1  ;;  %v12701_v5 = vcombine.low %v1749_v13, %v14320_v28  ;;  %v14321_v42 = vld [vmem:[#allocation2 + $0x110] ss:$0 sps:$4 sm:$0x11]   ;;  %v4255_v0 = vor.u32 %v4254_v44, %v4250_v26  ;;  %v19478_v4 = vld [vmem:[#allocation48_spill] sm:$0xff]  ;;  %v19479_v2 = vshrl.u32 %v19474_v56, 16  ;;  %v4272_v44 = vpop.permute.xlu0 %4271 }
 0x1e6   :  { %v4476_v53 = vrot.slane %v14321_v42, 1  ;;  %v4247_v49 = vrot.slane %v4245_v27, 1  ;;  %v4883_v35 = vsel %vm4517_vm10, %v19478_v4, %v4270_v7  ;;  %v4478_v48 = vrot.slane %v12702_v37, 1  ;;  %v1751_v8 = vld [vmem:[#allocation2 + $0x120] sm:$0xe]  ;;  %5696 = vmatmul.mubr.bf16.gmra.mrb[12].mxu0 %v4756_v19  ;;  %s12352_s20 = sshll.u32 %s14632_s19, 4  ;;  %s12353_s20 = int_to_ptr.vmem [resolvable:$true] %s12352_s20 }
 0x1e7   :  { %v3035_v40 = vor.u32 %v3034_v29, %v19479_v2  ;;  %v4475_v6 = vrot.slane %v12701_v5, 1  ;;  %v1752_v38 = vld [vmem:[#allocation2 + $0x12c] sm:$0xe]  ;;  %v3556_v42 = vsel %vm2564_vm9, %v3554_v22, %v3555_v63  ;;  %5703 = vmatprep.mubr.bf16.mxu0 %v4883_v35  ;;  %v4260_v58 = vsel %vm2019_vm8, %v4255_v0, %v4259_v3  ;;  %v3566_v5 = vpop.permute.xlu1 %3565  ;;  %v14322_v26 = vld [vmem:[#allocation2 + $0x50] ss:$0 sps:$4 sm:$0x11]   ;;  %p14611_p1 = scmp.lt.s32.totalorder %s12353_s20, %s12353_s20 }
 0x1e8   :  { %v4248_v13 = vsel %vm2019_vm8, %v4243_v12, %v4247_v49  ;;  %v4480_v59 = vsel %vm2564_vm9, %v4478_v48, %v4479_v30  ;;  %3619 = vrot.lane.b32.xlu1 %v3556_v42, %s14631_s18  ;;  %v12703_v56 = vcombine.low %v1751_v8, %v16465_v10  ;;  %v4482_v7 = vrot.slane %v16456_v1, 1  ;;  %v14323_v30 = vld [vmem:[#allocation2 + $0x5c] ss:$0 sps:$4 sm:$0x11]   ;;  %v1753_v48 = vld [vmem:[#allocation2 + $0x138] sm:$0xe] }
 0x1e9   :  { %4321 = vrot.lane.b32.xlu0 %v4248_v13, %s14631_s18  ;;  %v4477_v33 = vsel %vm2564_vm9, %v4475_v6, %v4476_v53  ;;  %v12704_v12 = vcombine.low %v1752_v38, %v16482_v9  ;;  %v3042_v63 = vshrl.u32 %v19477_v25, 16  ;;  %v3046_v22 = vrot.slane %v3044_v51, 1  ;;  %v19480_v25 = vld [vmem:[#allocation14_spill] sm:$0xff]  ;;  %v4274_v35 = vpop.permute.xlu0 %4273  ;;  %v19482_v2 = vld [vmem:[#allocation15_spill] sm:$0xff]  ;;  %s14606_s27 = scalar_lea.vmem %s12353_s20, 8192 }
 0x1ea   :  { %v3040_v60 = vsel %vm2019_vm8, %v3035_v40, %v3039_v54  ;;  %v3049_v29 = vshll.u32 %v14322_v26, 16  ;;  %13319 = vmatprep.mubr.msk.bf16.mxu1 %vm4517_vm10, %v4477_v33  ;;  %v4481_v19 = vrot.slane %v12703_v56, 1  ;;  %v4485_v1 = vrot.slane %v16488_v34, 1  ;;  %v19481_v54 = vld [vmem:[#allocation49_spill] sm:$0xff]  ;;  %v19483_v8 = vld [vmem:[#allocation50_spill] sm:$0xff]  ;;  %p14607_p0 = scmp.ne.s32.totalorder %s12353_s20, %s14606_s27  ;;  %p14612_p2 = scmp.lt.s32.totalorder %s14606_s27, %s14606_s27 }
 0x1eb   :  { %13320 = vmatmul.mubr.msk.bf16.gmra.mrb[36].mxu1 %vm4517_vm10, %v4480_v59  ;;  %v4484_v10 = vrot.slane %v12704_v12, 1  ;;  %v4760_v38 = vsel %vm4517_vm10, %v3040_v60, %v3566_v5  ;;  %v3056_v51 = vshll.u32 %v19480_v25, 16  ;;  %v4886_v27 = vsel %vm4517_vm10, %v19481_v54, %v4272_v44  ;;  %v3568_v49 = vpop.permute.xlu1 %3567  ;;  %v14324_v44 = vld [vmem:[#allocation2 + $0x68] ss:$0 sps:$4 sm:$0x11]  }
 0x1ec   :  { %v4483_v9 = vsel %vm2564_vm9, %v4481_v19, %v4482_v7  ;;  %v3047_v3 = vor.u32 %v3046_v22, %v3042_v63  ;;  %v3051_v28 = vrot.slane %v3049_v29, 1  ;;  %v3054_v37 = vshrl.u32 %v19480_v25, 16  ;;  %p14613_p3 = por %p14612_p2, %p14611_p1 }
 0x1ed   :  { %4323 = vrot.lane.b32.xlu0 %v4260_v58, %s14631_s18  ;;  %13323 = vmatprep.mubr.msk.bf16.mxu1 %vm4517_vm10, %v4483_v9  ;;  %v4486_v53 = vsel %vm2564_vm9, %v4484_v10, %v4485_v1  ;;  %v3058_v34 = vrot.slane %v3056_v51, 1  ;;  %v3061_v4 = vshll.u32 %v14323_v30, 16  ;;  %v3068_v40 = vshll.u32 %v19482_v2, 16  ;;  %v1754_v58 = vld [vmem:[#allocation2 + $0x144] sm:$0xe]  ;;  %v4276_v10 = vpop.permute.xlu0 %4275 }
 0x1ee   :  { %5704 = vmatmul.mubr.bf16.gmra.mrb[16].mxu0 %v4760_v38  ;;  %v3052_v0 = vsel %vm2019_vm8, %v3047_v3, %v3051_v28  ;;  %v4889_v13 = vsel %vm4517_vm10, %v19483_v8, %v4274_v35  ;;  %v12705_v59 = vcombine.low %v1753_v48, %v16498_v32  ;;  %v12706_v56 = vcombine.low %v1754_v58, %v16522_v50  ;;  %v19485_v38 = vld [vmem:[#allocation51_spill] sm:$0xff]  ;;  %v19487_v35 = vld [vmem:[#allocation52_spill] sm:$0xff]  ;;  %p14614_p4 = pnand %p14613_p3, %p14607_p0 }
 0x1ef   :  { %5711 = vmatprep.mubr.bf16.mxu0 %v4886_v27  ;;  %v4764_v6 = vsel %vm4517_vm10, %v3052_v0, %v3568_v49  ;;  %v3059_v42 = vor.u32 %v3058_v34, %v3054_v37  ;;  %v3063_v33 = vrot.slane %v3061_v4, 1  ;;  %v4488_v12 = vrot.slane %v16500_v55, 1  ;;  %v3570_v26 = vpop.permute.xlu1 %3569  ;;  %v19486_v49 = vld [vmem:[#allocation17_spill] sm:$0xff]  ;;  %v1755_v4 = vld [vmem:[#allocation2 + $0x150] sm:$0xe] }
 0x1f0   :  { %v4487_v7 = vrot.slane %v12705_v59, 1  ;;  %v4491_v63 = vrot.slane %v16524_v45, 1  ;;  %v3066_v22 = vshrl.u32 %v19482_v2, 16  ;;  %v4490_v5 = vrot.slane %v12706_v56, 1  ;;  %v19484_v45 = vld [vmem:[#allocation16_spill] sm:$0xff] }
 0x1f1   :  { %v3070_v60 = vrot.slane %v3068_v40, 1  ;;  %v3064_v29 = vsel %vm2019_vm8, %v3059_v42, %v3063_v33  ;;  %v3073_v19 = vshll.u32 %v14324_v44, 16  ;;  %v3080_v1 = vshll.u32 %v19484_v45, 16  ;;  %v4278_v34 = vpop.permute.xlu0 %4277  ;;  %v1756_v8 = vld [vmem:[#allocation2 + $0x15c] sm:$0xe] }
 0x1f2   :  { %v4489_v32 = vsel %vm2564_vm9, %v4487_v7, %v4488_v12  ;;  %v4492_v50 = vsel %vm2564_vm9, %v4490_v5, %v4491_v63  ;;  %v4768_v55 = vsel %vm4517_vm10, %v3064_v29, %v3570_v26  ;;  %v4892_v9 = vsel %vm4517_vm10, %v19485_v38, %v4276_v10  ;;  %v19489_v29 = vld [vmem:[#allocation55_spill] sm:$0xff] }
 0x1f3   :  { %13324 = vmatmul.mubr.msk.bf16.gmra.mrb[40].mxu1 %vm4517_vm10, %v4486_v53  ;;  %v3071_v25 = vor.u32 %v3070_v60, %v3066_v22  ;;  %v3075_v51 = vrot.slane %v3073_v19, 1  ;;  %v3078_v54 = vshrl.u32 %v19484_v45, 16  ;;  %v3082_v27 = vrot.slane %v3080_v1, 1  ;;  %v3572_v3 = vpop.permute.xlu1 %3571  ;;  %v14325_v53 = vld [vmem:[#allocation2 + $0x74] ss:$0 sps:$4 sm:$0x11]  }
 0x1f4   :  { %13327 = vmatprep.mubr.msk.bf16.mxu1 %vm4517_vm10, %v4489_v32  ;;  %v3085_v37 = vshll.u32 %v14325_v53, 16  ;;  %v3092_v0 = vshll.u32 %v19486_v49, 16  ;;  %v4895_v2 = vsel %vm4517_vm10, %v19487_v35, %v4278_v34  ;;  %v12707_v48 = vcombine.low %v1755_v4, %v16542_v16  ;;  %v14326_v22 = vld [vmem:[#allocation2 + $0x80] ss:$0 sps:$4 sm:$0x11]  }
 0x1f5   :  { %v3076_v28 = vsel %vm2019_vm8, %v3071_v25, %v3075_v51  ;;  %v3083_v40 = vor.u32 %v3082_v27, %v3078_v54  ;;  %v4494_v33 = vrot.slane %v16547_v36, 1  ;;  %v4497_v59 = vrot.slane %v16565_v15, 1  ;;  %v4280_v60 = vpop.permute.xlu0 %4279  ;;  %v19488_v15 = vld [vmem:[#allocation18_spill] sm:$0xff]  ;;  %v14327_v1 = vld [vmem:[#allocation2 + $0x8c] ss:$0 sps:$4 sm:$0x11]  }
 0x1f6   :  { %5712 = vmatmul.mubr.bf16.gmra.mrb[20].mxu0 %v4764_v6  ;;  %v4772_v30 = vsel %vm4517_vm10, %v3076_v28, %v3572_v3  ;;  %v3087_v6 = vrot.slane %v3085_v37, 1  ;;  %v4493_v42 = vrot.slane %v12707_v48, 1  ;;  %v3090_v58 = vshrl.u32 %v19486_v49, 16  ;;  %v19490_v25 = vld [vmem:[#allocation19_spill] sm:$0xff]  ;;  %v1757_v27 = vld [vmem:[#allocation2 + $0x168] sm:$0xe] }
 0x1f7   :  { %5719 = vmatprep.mubr.bf16.mxu0 %v4889_v13  ;;  %v12708_v13 = vcombine.low %v1756_v8, %v16572_v41  ;;  %v3094_v7 = vrot.slane %v3092_v0, 1  ;;  %v3574_v12 = vpop.permute.xlu1 %3573  ;;  %v3097_v5 = vshll.u32 %v14326_v22, 16  ;;  %v3104_v26 = vshll.u32 %v19488_v15, 16  ;;  %v19491_v3 = vld [vmem:[#allocation58_spill] sm:$0xff] }
 0x1f8   :  { %v3088_v63 = vsel %vm2019_vm8, %v3083_v40, %v3087_v6  ;;  %v4495_v16 = vsel %vm2564_vm9, %v4493_v42, %v4494_v33  ;;  %v4898_v44 = vsel %vm4517_vm10, %v19489_v29, %v4280_v60  ;;  %v3102_v10 = vshrl.u32 %v19488_v15, 16  ;;  %v1758_v49 = vld [vmem:[#allocation2 + $0x174] sm:$0xe]  ;;  %v14329_v60 = vld [vmem:[#allocation2 + $0xa4] ss:$0 sps:$4 sm:$0x11]  }
 0x1f9   :  { %v4496_v56 = vrot.slane %v12708_v13, 1  ;;  %v4776_v36 = vsel %vm4517_vm10, %v3088_v63, %v3574_v12  ;;  %v3095_v19 = vor.u32 %v3094_v7, %v3090_v58  ;;  %v3099_v32 = vrot.slane %v3097_v5, 1  ;;  %v14328_v13 = vld [vmem:[#allocation2 + $0x98] ss:$0 sps:$4 sm:$0x11]   ;;  %v19493_v58 = vld [vmem:[#allocation60_spill] sm:$0xff] }
 0x1fa   :  { %v3109_v38 = vshll.u32 %v14327_v1, 16  ;;  %v3116_v51 = vshll.u32 %v19490_v25, 16  ;;  %v12709_v34 = vcombine.low %v1757_v27, %v16584_v20  ;;  %v12710_v0 = vcombine.low %v1758_v49, %v16615_v46  ;;  %v19494_v15 = vld [vmem:[#allocation21_spill] sm:$0xff] }
 0x1fb   :  { %13328 = vmatmul.mubr.msk.bf16.gmra.mrb[44].mxu1 %vm4517_vm10, %v4492_v50  ;;  %v4498_v41 = vsel %vm2564_vm9, %v4496_v56, %v4497_v59  ;;  %v3106_v50 = vrot.slane %v3104_v26, 1  ;;  %v3100_v45 = vsel %vm2019_vm8, %v3095_v19, %v3099_v32  ;;  %v4500_v4 = vrot.slane %v16586_v23, 1 }
 0x1fc   :  { %13331 = vmatprep.mubr.msk.bf16.mxu1 %vm4517_vm10, %v4495_v16  ;;  %v3111_v37 = vrot.slane %v3109_v38, 1  ;;  %v4503_v35 = vrot.slane %v16606_v61, 1  ;;  %v4502_v40 = vrot.slane %v12710_v0, 1  ;;  %v3118_v6 = vrot.slane %v3116_v51, 1  ;;  %v19492_v61 = vld [vmem:[#allocation20_spill] sm:$0xff] }
 0x1fd   :  { %v3107_v53 = vor.u32 %v3106_v50, %v3102_v10  ;;  %v3121_v42 = vshll.u32 %v14328_v13, 16  ;;  %v3128_v59 = vshll.u32 %v19492_v61, 16  ;;  %v3126_v63 = vshrl.u32 %v19492_v61, 16  ;;  %v1762_v61 = vld [vmem:[#allocation2 + $0x1a4] sm:$0xe] }
 0x1fe   :  { %5720 = vmatmul.mubr.bf16.gmra.mrb[24].mxu0 %v4768_v55  ;;  %v3576_v55 = vpop.permute.xlu1 %3575  ;;  %v4504_v46 = vsel %vm2564_vm9, %v4502_v40, %v4503_v35  ;;  %v3140_v26 = vshll.u32 %v19494_v15, 16  ;;  %v4506_v38 = vrot.slane %v16633_v43, 1  ;;  %v4509_v51 = vrot.slane %v16653_v52, 1  ;;  %v14331_v40 = vld [vmem:[#allocation2 + $0xbc] ss:$0 sps:$4 sm:$0x11]  }
 0x1ff   :  { %5727 = vmatprep.mubr.bf16.mxu0 %v4892_v9  ;;  %v4282_v9 = vpop.permute.xlu0 %4281  ;;  %v4780_v54 = vsel %vm4517_vm10, %v3100_v45, %v3576_v55  ;;  %v3112_v8 = vsel %vm2019_vm8, %v3107_v53, %v3111_v37  ;;  %v3123_v12 = vrot.slane %v3121_v42, 1  ;;  %v3130_v22 = vrot.slane %v3128_v59, 1  ;;  %v1760_v55 = vld [vmem:[#allocation2 + $0x18c] sm:$0xe]  ;;  %v19495_v37 = vld [vmem:[#allocation22_spill] sm:$0xff] }
 0x200   :  { %v4901_v28 = vsel %vm4517_vm10, %v19491_v3, %v4282_v9  ;;  %v12712_v45 = vcombine.low %v1760_v55, %v16656_v47  ;;  %v3138_v9 = vshrl.u32 %v19494_v15, 16  ;;  %v14330_v3 = vld [vmem:[#allocation2 + $0xb0] ss:$0 sps:$4 sm:$0x11]   ;;  %v7385_v15 = vld [vmem:[#allocation2 + $0x4] sm:$0xf] }
 0x201   :  { %v3131_v32 = vor.u32 %v3130_v22, %v3126_v63  ;;  %v14332_v63 = vld [vmem:[#allocation2 + $0xc8] ss:$0 sps:$4 sm:$0x11]  }
 0x202   :  { %v3578_v48 = vpop.permute.xlu1 %3577  ;;  %v3169_v22 = vshll.u32 %v14332_v63, 16  ;;  %v13957_v63 = vld [vmem:[%s19192_s2 + $0x110] sm:$0xff]  }
 0x203   :  { %13332 = vmatmul.mubr.msk.bf16.gmra.mrb[48].mxu1 %vm4517_vm10, %v4498_v41  ;;  %v4284_v33 = vpop.permute.xlu0 %4283  ;;  %v4784_v23 = vsel %vm4517_vm10, %v3112_v8, %v3578_v48  ;;  %v3133_v41 = vshll.u32 %v14329_v60, 16  ;;  %v19496_v8 = vld [vmem:[#allocation23_spill] sm:$0xff] }
 0x204   :  { %v4904_v56 = vsel %vm4517_vm10, %v19493_v58, %v4284_v33  ;;  %v3164_v13 = vshll.u32 %v19496_v8, 16  ;;  %v3162_v59 = vshrl.u32 %v19496_v8, 16  ;;  %v19499_v8 = vld [vmem:[#allocation26_spill] sm:$0xff] }
 0x205   :  { %v3135_v10 = vrot.slane %v3133_v41, 1  ;;  %v4515_v41 = vrot.slane %v16706_v57, 1  ;;  %v13950_v57 = vld [vmem:[#allocation2 + $0x8] ss:$0 sps:$4 sm:$0x11]  }
 0x206   :  { %5728 = vmatmul.mubr.bf16.gmra.mrb[28].mxu0 %v4772_v30  ;;  %v4499_v30 = vrot.slane %v12709_v34, 1  ;;  %v3580_v5 = vpop.permute.xlu1 %3579  ;;  %v3152_v34 = vshll.u32 %v19495_v37, 16  ;;  %v3166_v58 = vrot.slane %v3164_v13, 1  ;;  %v3200_v13 = vshll.u32 %v19499_v8, 16 }
 0x207   :  { %5735 = vmatprep.mubr.bf16.mxu0 %v4895_v2  ;;  %v3114_v2 = vshrl.u32 %v19490_v25, 16  ;;  %v4508_v25 = vrot.slane %v12712_v45, 1 }
 0x208   :  { %v4501_v20 = vsel %vm2564_vm9, %v4499_v30, %v4500_v4  ;;  %v3150_v30 = vshrl.u32 %v19495_v37, 16  ;;  %v3154_v4 = vrot.slane %v3152_v34, 1 }
 0x209   :  { %13335 = vmatprep.mubr.msk.bf16.mxu1 %vm4517_vm10, %v4501_v20  ;;  %v3119_v7 = vor.u32 %v3118_v6, %v3114_v2  ;;  %v4510_v47 = vsel %vm2564_vm9, %v4508_v25, %v4509_v51  ;;  %v3157_v6 = vshll.u32 %v14331_v40, 16 }
 0x20a   :  { %v3582_v27 = vpop.permute.xlu1 %3581  ;;  %v3155_v20 = vor.u32 %v3154_v4, %v3150_v30 }
 0x20b   :  { %13336 = vmatmul.mubr.msk.bf16.gmra.mrb[52].mxu1 %vm4517_vm10, %v4504_v46  ;;  %v3124_v16 = vsel %vm2019_vm8, %v3119_v7, %v3123_v12  ;;  %v3159_v33 = vrot.slane %v3157_v6, 1  ;;  %v1761_v46 = vld [vmem:[#allocation2 + $0x198] sm:$0xe]  ;;  %v13946_v6 = vld [vmem:[%s19192_s2] sm:$0xff]  }
 0x20c   :  { %v4788_v29 = vsel %vm4517_vm10, %v3124_v16, %v3580_v5  ;;  %11353 = vmatpush1.bf16.msra.mxu1 %v13946_v6 }
 0x20d   :  { %v3160_v12 = vsel %vm2019_vm8, %v3155_v20, %v3159_v33 }
 0x20e   :  { %5736 = vmatmul.mubr.bf16.gmra.mrb[32].mxu0 %v4776_v36  ;;  %v4286_v36 = vpop.permute.xlu0 %4285  ;;  %v3584_v35 = vpop.permute.xlu1 %3583 }
 0x20f   :  { %5743 = vmatprep.mubr.bf16.mxu0 %v4898_v44  ;;  %v1759_v44 = vld [vmem:[#allocation2 + $0x180] sm:$0xe]  ;;  %v4907_v19 = vsel %vm4517_vm10, %v16320_v11, %v4286_v36  ;;  %v3136_v11 = vsel %vm2019_vm8, %v3131_v32, %v3135_v10  ;;  %v3167_v32 = vor.u32 %v3166_v58, %v3162_v59  ;;  %v3171_v10 = vrot.slane %v3169_v22, 1 }
 0x210   :  { %v12711_v50 = vcombine.low %v1759_v44, %v16631_v14  ;;  %v4792_v43 = vsel %vm4517_vm10, %v3136_v11, %v3582_v27  ;;  %v7384_v36 = vld [vmem:[#allocation2] sm:$0xf] }
 0x211   :  { %v19497_v44 = vld [vmem:[#allocation24_spill] sm:$0xff]  ;;  %v3172_v51 = vsel %vm2019_vm8, %v3167_v32, %v3171_v10 }
 0x212   :  { %v4505_v1 = vrot.slane %v12711_v50, 1  ;;  %v4288_v53 = vpop.permute.xlu0 %4287  ;;  %v3586_v7 = vpop.permute.xlu1 %3585 }
 0x213   :  { %v4910_v52 = vsel %vm4517_vm10, %v16337_v39, %v4288_v53  ;;  %v19498_v53 = vld [vmem:[#allocation25_spill] sm:$0xff] }
 0x214   :  { %v4507_v14 = vsel %vm2564_vm9, %v4505_v1, %v4506_v38  ;;  %v8032_v1 = vshll.u32 %v13950_v57, 16  ;;  %v3174_v38 = vshrl.u32 %v19497_v44, 16  ;;  %v13952_v57 = vld [vmem:[%s19192_s2 + $0x10] sm:$0xff]  }
 0x215   :  { %13339 = vmatprep.mubr.msk.bf16.mxu1 %vm4517_vm10, %v4507_v14 }
 0x216   :  { %5744 = vmatmul.mubr.bf16.gmra.mrb[36].mxu0 %v4780_v54  ;;  %v3142_v54 = vrot.slane %v3140_v26, 1  ;;  %13340 = vmatmul.mubr.msk.bf16.gmra.mrb[56].mxu1 %vm4517_vm10, %v4510_v47  ;;  %v4290_v48 = vpop.permute.xlu0 %4289  ;;  %v4800_v26 = vsel %vm4517_vm10, %v3160_v12, %v3586_v7  ;;  %v3588_v25 = vpop.permute.xlu1 %3587  ;;  %v3188_v47 = vshll.u32 %v19498_v53, 16  ;;  %v13947_v12 = vld [vmem:[%s19192_s2 + $0x8] sm:$0xff]  }
 0x217   :  { %5751 = vmatprep.mubr.bf16.mxu0 %v4901_v28  ;;  %v3145_v28 = vshll.u32 %v14330_v3, 16  ;;  %v4913_v39 = vsel %vm4517_vm10, %v16357_v24, %v4290_v48  ;;  %v4512_v24 = vrot.slane %v16723_v21, 1  ;;  %v8034_v3 = vrot.slane %v8032_v1, 1  ;;  %v19504_v1 = vld [vmem:[#allocation28_spill] sm:$0xff] }
 0x218   :  { %v3143_v49 = vor.u32 %v3142_v54, %v3138_v9 }
 0x219   :  { %v3147_v0 = vrot.slane %v3145_v28, 1  ;;  %v4804_v28 = vsel %vm4517_vm10, %v3172_v51, %v3588_v25 }
 0x21a   :  { %v4292_v16 = vpop.permute.xlu0 %4291  ;;  %v3590_v30 = vpop.permute.xlu1 %3589 }
 0x21b   :  { %v3148_v2 = vsel %vm2019_vm8, %v3143_v49, %v3147_v0  ;;  %v4916_v21 = vsel %vm4517_vm10, %v16382_v17, %v4292_v16  ;;  %v14333_v17 = vld [vmem:[#allocation2 + $0xec] ss:$0 sps:$4 sm:$0x11]   ;;  %v3186_v49 = vshrl.u32 %v19498_v53, 16  ;;  %v3190_v0 = vrot.slane %v3188_v47, 1 }
 0x21c   :  { %v4796_v42 = vsel %vm4517_vm10, %v3148_v2, %v3584_v35  ;;  %v3181_v54 = vshll.u32 %v14333_v17, 16  ;;  %v14334_v35 = vld [vmem:[#allocation2 + $0xf8] ss:$0 sps:$4 sm:$0x11]   ;;  %v13953_v2 = vld [vmem:[%s19192_s2 + $0x108] sm:$0xff]  }
 0x21d   :  { %v3191_v20 = vor.u32 %v3190_v0, %v3186_v49  ;;  %v14337_v53 = vld [vmem:[#allocation2 + $0x11c] ss:$0 sps:$4 sm:$0x11]   ;;  %v19507_v0 = vld [vmem:[#allocation64_spill] sm:$0xff] }
 0x21e   :  { %5752 = vmatmul.mubr.bf16.gmra.mrb[40].mxu0 %v4784_v23  ;;  %v12713_v23 = vcombine.low %v1761_v46, %v16684_v62  ;;  %v4294_v27 = vpop.permute.xlu0 %4293  ;;  %v3183_v34 = vrot.slane %v3181_v54, 1  ;;  %v19501_v46 = vmov 0   ;;  %v3592_v59 = vpop.permute.xlu1 %3591  ;;  %v3229_v47 = vshll.u32 %v14337_v53, 16 }
 0x21f   :  { %5759 = vmatprep.mubr.bf16.mxu0 %v4904_v56  ;;  %v12714_v56 = vcombine.low %v1762_v61, %v16702_v18  ;;  %11354 = vmatprep.subr.bf16.mxu1 %v19501_v46  ;;  %v3202_v61 = vrot.slane %v3200_v13, 1  ;;  %v14338_v13 = vld [vmem:[#allocation2 + $0x128] ss:$0 sps:$4 sm:$0x11]  }
 0x220   :  { %v4511_v5 = vrot.slane %v12713_v23, 1  ;;  %v3198_v23 = vshrl.u32 %v19499_v8, 16  ;;  %11355 = vmatpush1.bf16.msra.mxu1 %v13947_v12 }
 0x221   :  { %v4514_v60 = vrot.slane %v12714_v56, 1  ;;  %v14335_v56 = vld [vmem:[#allocation2 + $0x104] ss:$0 sps:$4 sm:$0x11]   ;;  %11356 = vmatprep.subr.bf16.mxu1 %v19501_v46 }
 0x222   :  { %v4513_v62 = vsel %vm2564_vm9, %v4511_v5, %v4512_v24  ;;  %v4296_v40 = vpop.permute.xlu0 %4295  ;;  %v3205_v7 = vshll.u32 %v14335_v56, 16  ;;  %v19502_v24 = vld [vmem:[#allocation27_spill] sm:$0xff]  ;;  %v19509_v56 = vld [vmem:[#allocation65_spill] sm:$0xff] }
 0x223   :  { %13343 = vmatprep.mubr.msk.bf16.mxu1 %vm4517_vm10, %v4513_v62  ;;  %v4516_v18 = vsel %vm2564_vm9, %v4514_v60, %v4515_v41  ;;  %v3212_v16 = vshll.u32 %v19502_v24, 16  ;;  %v19503_v60 = vld [vmem:[#allocation62_spill] sm:$0xff]  ;;  %v3203_v62 = vor.u32 %v3202_v61, %v3198_v23  ;;  %v13968_v23 = vld [vmem:[%s19192_s2 + $0x20] sm:$0xff]  }
 0x224   :  { %13344 = vmatmul.mubr.msk.bf16.gmra.mrb[60].mxu1 %vm4517_vm10, %v4516_v18 }
 0x225   :  { %v3214_v18 = vrot.slane %v3212_v16, 1  ;;  %11357 = vmatpush1.bf16.msra.mxu1 %v13952_v57 }
 0x226   :  { %5760 = vmatmul.mubr.bf16.gmra.mrb[44].mxu0 %v4788_v29  ;;  %v16857_v29 = vcombine.low %v7384_v36, %v7385_v15  ;;  %v4298_v22 = vpop.permute.xlu0 %4297  ;;  %v3207_v36 = vrot.slane %v3205_v7, 1  ;;  %v13962_v15 = vld [vmem:[%s19192_s2 + $0x118] sm:$0xff]   ;;  %11358 = vmatprep.subr.bf16.mxu1 %v19501_v46 }
 0x227   :  { %5767 = vmatprep.mubr.bf16.mxu0 %v4907_v19  ;;  %v3176_v19 = vshll.u32 %v19497_v44, 16  ;;  %v4925_v41 = vsel %vm4517_vm10, %v19503_v60, %v4298_v22  ;;  %v3594_v44 = vpop.permute.xlu1 %3593  ;;  %v14339_v60 = vld [vmem:[#allocation2 + $0x134] ss:$0 sps:$4 sm:$0x11]  }
 0x228   :  { %v8027_v50 = vshll.u32 %v16857_v29, 16  ;;  %v8025_v55 = vshrl.u32 %v16857_v29, 16 }
 0x229   :  { %v3178_v9 = vrot.slane %v3176_v19, 1  ;;  %v3208_v19 = vsel %vm2019_vm8, %v3203_v62, %v3207_v36 }
 0x22a   :  { %v8029_v45 = vrot.slane %v8027_v50, 1  ;;  %v4300_v10 = vpop.permute.xlu0 %4299 }
 0x22b   :  { %v3179_v37 = vor.u32 %v3178_v9, %v3174_v38  ;;  %v3224_v38 = vshll.u32 %v19504_v1, 16  ;;  %v19505_v9 = vld [vmem:[#allocation63_spill] sm:$0xff] }
 0x22c   :  { %v8030_v11 = vor.u32 %v8029_v45, %v8025_v55  ;;  %v4816_v55 = vsel %vm4517_vm10, %v3208_v19, %v3594_v44  ;;  %v4928_v25 = vsel %vm4517_vm10, %v19505_v9, %v4300_v10  ;;  %v19511_v10 = vld [vmem:[#allocation66_spill] sm:$0xff] }
 0x22d   :  { %v3184_v4 = vsel %vm2019_vm8, %v3179_v37, %v3183_v34 }
 0x22e   :  { %5768 = vmatmul.mubr.bf16.gmra.mrb[48].mxu0 %v4792_v43  ;;  %v8035_v14 = vsel %vm2019_vm8, %v8030_v11, %v8034_v3  ;;  %v4919_v43 = vsel %vm4517_vm10, %v16400_v31, %v4294_v27  ;;  %v3193_v31 = vshll.u32 %v14334_v35, 16  ;;  %v4808_v48 = vsel %vm4517_vm10, %v3184_v4, %v3590_v30  ;;  %v4302_v37 = vpop.permute.xlu0 %4301 }
 0x22f   :  { %5775 = vmatprep.mubr.bf16.mxu0 %v4910_v52  ;;  %8408 = vrot.lane.b32.xlu1 %v8035_v14, %s14631_s18  ;;  %v13951_v52 = vld [vmem:[%s19192_s2 + $0x100] sm:$0xff]   ;;  %v3222_v11 = vshrl.u32 %v19504_v1, 16  ;;  %v3226_v3 = vrot.slane %v3224_v38, 1  ;;  %v4931_v30 = vsel %vm4517_vm10, %v19507_v0, %v4302_v37  ;;  %v3231_v35 = vrot.slane %v3229_v47, 1  ;;  %v13982_v47 = vld [vmem:[%s19192_s2 + $0x30] sm:$0xff]  }
 0x230   :  { %13347 = vmatprep.subr.bf16.mxu0 %v13951_v52  ;;  %v3195_v33 = vrot.slane %v3193_v31, 1 }
 0x231   :  { %13348 = vmatpush3.bf16.msra.mxu0 %v13951_v52  ;;  %v19506_v52 = vld [vmem:[#allocation29_spill] sm:$0xff]  ;;  %v3227_v4 = vor.u32 %v3226_v3, %v3222_v11 }
 0x232   :  { %13349 = vmatprep.subr.bf16.mxu0 %v13953_v2  ;;  %v3196_v58 = vsel %vm2019_vm8, %v3191_v20, %v3195_v33  ;;  %v3236_v49 = vshll.u32 %v19506_v52, 16  ;;  %v4304_v20 = vpop.permute.xlu0 %4303 }
 0x233   :  { %v4812_v5 = vsel %vm4517_vm10, %v3196_v58, %v3592_v59  ;;  %v3232_v8 = vsel %vm2019_vm8, %v3227_v4, %v3231_v35  ;;  %v19508_v59 = vld [vmem:[#allocation30_spill] sm:$0xff]  ;;  %v4934_v7 = vsel %vm4517_vm10, %v19509_v56, %v4304_v20  ;;  %v13989_v20 = vld [vmem:[%s19192_s2 + $0x38] sm:$0xff]  }
 0x234   :  { %v3238_v6 = vrot.slane %v3236_v49, 1  ;;  %v3248_v58 = vshll.u32 %v19508_v59, 16  ;;  %v3246_v22 = vshrl.u32 %v19508_v59, 16 }
 0x235   :  { %13350 = vmatpush3.bf16.msra.mxu0 %v13953_v2 }
 0x236   :  { %5776 = vmatmul.mubr.bf16.gmra.mrb[52].mxu0 %v4796_v42  ;;  %v19500_v42 = vld [vmem:[#allocation61_spill] sm:$0xff]  ;;  %13351 = vmatprep.subr.bf16.mxu0 %v13957_v63  ;;  %v4306_v36 = vpop.permute.xlu0 %4305 }
 0x237   :  { %5783 = vmatprep.mubr.bf16.mxu0 %v4913_v39  ;;  %v4922_v39 = vsel %vm4517_vm10, %v19500_v42, %v4296_v40  ;;  %v3234_v40 = vshrl.u32 %v19506_v52, 16  ;;  %v3241_v42 = vshll.u32 %v14338_v13, 16  ;;  %v4937_v57 = vsel %vm4517_vm10, %v19511_v10, %v4306_v36  ;;  %v13996_v10 = vld [vmem:[%s19192_s2 + $0x40] sm:$0xff]  }
 0x239   :  { %13352 = vmatpush3.bf16.msra.mxu0 %v13957_v63  ;;  %v3239_v12 = vor.u32 %v3238_v6, %v3234_v40  ;;  %v3243_v63 = vrot.slane %v3241_v42, 1 }
 0x23a   :  { %13353 = vmatprep.subr.bf16.mxu0 %v13962_v15  ;;  %v4308_v3 = vpop.permute.xlu0 %4307 }
 0x23b   :  { %v3244_v16 = vsel %vm2019_vm8, %v3239_v12, %v3243_v63 }
 0x23d   :  { %13354 = vmatpush3.bf16.msra.mxu0 %v13962_v15 }
 0x23e   :  { %5784 = vmatmul.mubr.bf16.gmra.mrb[56].mxu0 %v4800_v26  ;;  %v3210_v26 = vshrl.u32 %v19502_v24, 16  ;;  %v4310_v42 = vpop.permute.xlu0 %4309 }
 0x23f   :  { %5791 = vmatprep.mubr.bf16.mxu0 %v4916_v21  ;;  %v14336_v21 = vld [vmem:[#allocation2 + $0x110] ss:$0 sps:$4 sm:$0x11]  }
 0x240   :  { %v3217_v32 = vshll.u32 %v14336_v21, 16  ;;  %v3215_v51 = vor.u32 %v3214_v18, %v3210_v26  ;;  %v13975_v18 = vld [vmem:[%s19192_s2 + $0x28] sm:$0xff]   ;;  %v19510_v21 = vld [vmem:[#allocation31_spill] sm:$0xff] }
 0x241   :  { %v3258_v38 = vshrl.u32 %v19510_v21, 16 }
 0x242   :  { %v3219_v17 = vrot.slane %v3217_v32, 1  ;;  %v3260_v32 = vshll.u32 %v19510_v21, 16  ;;  %v4312_v21 = vpop.permute.xlu0 %4311 }
 0x244   :  { %v3220_v14 = vsel %vm2019_vm8, %v3215_v51, %v3219_v17  ;;  %v3262_v9 = vrot.slane %v3260_v32, 1  ;;  %v14340_v17 = vld [vmem:[#allocation2 + $0x140] ss:$0 sps:$4 sm:$0x11]  }
 0x245   :  { %v3265_v11 = vshll.u32 %v14340_v17, 16 }
 0x246   :  { %5792 = vmatmul.mubr.bf16.gmra.mrb[60].mxu0 %v4804_v28  ;;  %v3596_v28 = vpop.permute.xlu1 %3595  ;;  %v3263_v49 = vor.u32 %v3262_v9, %v3258_v38 }
 0x247   :  { %5799 = vmatprep.mubr.bf16.mxu0 %v4919_v43  ;;  %v13961_v43 = vld [vmem:[%s19192_s2 + $0x18] sm:$0xff]   ;;  %v4820_v34 = vsel %vm4517_vm10, %v3220_v14, %v3596_v28  ;;  %v3267_v0 = vrot.slane %v3265_v11, 1 }
 0x248   :  { %11359 = vmatpush1.bf16.msra.mxu1 %v13961_v43  ;;  %v19512_v43 = vld [vmem:[#allocation32_spill] sm:$0xff] }
 0x249   :  { %11360 = vmatprep.subr.bf16.mxu1 %v19501_v46  ;;  %v3272_v37 = vshll.u32 %v19512_v43, 16  ;;  %v3270_v35 = vshrl.u32 %v19512_v43, 16 }
 0x24b   :  { %v3274_v40 = vrot.slane %v3272_v37, 1  ;;  %v4314_v37 = vpop.permute.xlu0 %4313 }
 0x24c   :  { %11361 = vmatpush1.bf16.msra.mxu1 %v13968_v23 }
 0x24d   :  { %11362 = vmatprep.subr.bf16.mxu1 %v19501_v46 }
 0x24e   :  { %5800 = vmatmul.mubr.bf16.gmra.mrb[64].mxu0 %v4808_v48  ;;  %v3598_v48 = vpop.permute.xlu1 %3597 }
 0x24f   :  { %5807 = vmatprep.mubr.bf16.mxu0 %v4922_v39  ;;  %v4824_v61 = vsel %vm4517_vm10, %v3232_v8, %v3598_v48  ;;  %v3268_v48 = vsel %vm2019_vm8, %v3263_v49, %v3267_v0  ;;  %v14341_v8 = vld [vmem:[#allocation2 + $0x14c] ss:$0 sps:$4 sm:$0x11]  }
 0x250   :  { %11363 = vmatpush1.bf16.msra.mxu1 %v13975_v18  ;;  %v3277_v13 = vshll.u32 %v14341_v8, 16  ;;  %v14342_v18 = vld [vmem:[#allocation2 + $0x158] ss:$0 sps:$4 sm:$0x11]  }
 0x251   :  { %11364 = vmatprep.subr.bf16.mxu1 %v19501_v46 }
 0x252   :  { %v3600_v24 = vpop.permute.xlu1 %3599  ;;  %v3279_v12 = vrot.slane %v3277_v13, 1 }
 0x253   :  { %v4828_v44 = vsel %vm4517_vm10, %v3244_v16, %v3600_v24 }
 0x254   :  { %11365 = vmatpush1.bf16.msra.mxu1 %v13982_v47 }
 0x255   :  { %v16910_v50 = vpop.f32.mrb[0].mxu1  ;;  %11366 = vmatprep.subr.bf16.mxu1 %v19501_v46 }
 0x256   :  { %5808 = vmatmul.mubr.bf16.gmra.mrb[68].mxu0 %v4812_v5  ;;  %v16913_v45 = vpop.f32.mrb[1].mxu1  ;;  %v3250_v5 = vrot.slane %v3248_v58, 1  ;;  %v19515_v58 = vld [vmem:[#allocation41_spill] sm:$0xff] }
 0x257   :  { %5815 = vmatprep.mubr.bf16.mxu0 %v4925_v41  ;;  %v16918_v54 = vpop.f32.mrb[2].mxu1  ;;  %v3253_v41 = vshll.u32 %v14339_v60, 16  ;;  %v4943_v56 = vsel %vm4517_vm10, %v19515_v58, %v4310_v42  ;;  %v14003_v42 = vld [vmem:[%s19192_s2 + $0x48] sm:$0xff]   ;;  %v14344_v58 = vld [vmem:[#allocation2 + $0x170] ss:$0 sps:$4 sm:$0x11]  }
 0x258   :  { %v16921_v27 = vpop.f32.mrb[3].mxu1  ;;  %11367 = vmatpush1.bf16.msra.mxu1 %v13989_v20 }
 0x259   :  { %v3255_v1 = vrot.slane %v3253_v41, 1  ;;  %11368 = vmatprep.subr.bf16.mxu1 %v19501_v46 }
 0x25c   :  { %11369 = vmatpush1.bf16.msra.mxu1 %v13996_v10 }
 0x25d   :  { %11370 = vmatprep.subr.bf16.mxu1 %v19501_v46 }
 0x25e   :  { %5816 = vmatmul.mubr.bf16.gmra.mrb[72].mxu0 %v4816_v55  ;;  %v3251_v55 = vor.u32 %v3250_v5, %v3246_v22 }
 0x25f   :  { %5823 = vmatprep.mubr.bf16.mxu0 %v4928_v25  ;;  %v3602_v25 = vpop.permute.xlu1 %3601 }
 0x260   :  { %v3256_v51 = vsel %vm2019_vm8, %v3251_v55, %v3255_v1  ;;  %v19517_v1 = vld [vmem:[#allocation37_spill] sm:$0xff]  ;;  %11371 = vmatpush1.bf16.msra.mxu1 %v14003_v42 }
 0x261   :  { %v16933_v31 = vpop.f32.mrb[4].mxu1  ;;  %v4832_v14 = vsel %vm4517_vm10, %v3256_v51, %v3602_v25  ;;  %v4946_v38 = vsel %vm4517_vm10, %v19517_v1, %v4312_v21  ;;  %11372 = vmatprep.subr.bf16.mxu1 %v19501_v46  ;;  %v14010_v1 = vld [vmem:[%s19192_s2 + $0x50] sm:$0xff]  }
 0x262   :  { %v16935_v2 = vpop.f32.mrb[5].mxu1 }
 0x263   :  { %v16939_v39 = vpop.f32.mrb[6].mxu1  ;;  %v3604_v6 = vpop.permute.xlu1 %3603 }
 0x264   :  { %v16941_v33 = vpop.f32.mrb[7].mxu1  ;;  %v4836_v23 = vsel %vm4517_vm10, %v3268_v48, %v3604_v6  ;;  %v19519_v6 = vld [vmem:[#allocation56_spill] sm:$0xff]  ;;  %11373 = vmatpush1.bf16.msra.mxu1 %v14010_v1 }
 0x265   :  { %v4949_v48 = vsel %vm4517_vm10, %v19519_v6, %v4314_v37  ;;  %11374 = vmatprep.subr.bf16.mxu1 %v19501_v46  ;;  %v19522_v6 = vld [vmem:[#allocation39_spill] sm:$0xff] }
 0x266   :  { %5824 = vmatmul.mubr.bf16.gmra.mrb[76].mxu0 %v4820_v34  ;;  %v19513_v34 = vld [vmem:[#allocation53_spill] sm:$0xff] }
 0x267   :  { %5831 = vmatprep.mubr.bf16.mxu0 %v4931_v30  ;;  %v4940_v52 = vsel %vm4517_vm10, %v19513_v34, %v4308_v3  ;;  %v3606_v41 = vpop.permute.xlu1 %3605 }
 0x26b   :  { %v3608_v11 = vpop.permute.xlu1 %3607 }
 0x26c   :  { %v16953_v62 = vpop.f32.mrb[8].mxu1 }
 0x26d   :  { %v16955_v15 = vpop.f32.mrb[9].mxu1 }
 0x26e   :  { %5832 = vmatmul.mubr.bf16.gmra.mrb[80].mxu0 %v4824_v61  ;;  %v16957_v26 = vpop.f32.mrb[10].mxu1  ;;  %v19514_v61 = vld [vmem:[#allocation33_spill] sm:$0xff] }
 0x26f   :  { %5839 = vmatprep.mubr.bf16.mxu0 %v4934_v7  ;;  %v16963_v19 = vpop.f32.mrb[11].mxu1  ;;  %v3284_v59 = vshll.u32 %v19514_v61, 16  ;;  %v3275_v7 = vor.u32 %v3274_v40, %v3270_v35  ;;  %v3282_v16 = vshrl.u32 %v19514_v61, 16  ;;  %v19518_v35 = vld [vmem:[#allocation35_spill] sm:$0xff]  ;;  %v3610_v61 = vpop.permute.xlu1 %3609 }
 0x270   :  { %v3308_v40 = vshll.u32 %v19518_v35, 16  ;;  %v3306_v20 = vshrl.u32 %v19518_v35, 16 }
 0x271   :  { %v3286_v60 = vrot.slane %v3284_v59, 1  ;;  %v3280_v36 = vsel %vm2019_vm8, %v3275_v7, %v3279_v12  ;;  %v4316_v7 = vpop.permute.xlu0 %4315 }
 0x272   :  { %v4840_v32 = vsel %vm4517_vm10, %v3280_v36, %v3606_v41  ;;  %v19520_v41 = vld [vmem:[#allocation36_spill] sm:$0xff] }
 0x273   :  { %v3287_v9 = vor.u32 %v3286_v60, %v3282_v16  ;;  %v3320_v36 = vshll.u32 %v19520_v41, 16 }
 0x275   :  { %v16971_v28 = vpop.f32.mrb[12].mxu1  ;;  %v4318_v37 = vpop.permute.xlu0 %4317 }
 0x276   :  { %5840 = vmatmul.mubr.bf16.gmra.mrb[84].mxu0 %v4828_v44  ;;  %v16974_v53 = vpop.f32.mrb[13].mxu1  ;;  %v3289_v44 = vshll.u32 %v14342_v18, 16  ;;  %v6249_v18 = vld [vmem:[%s19195_s5] sm:$0x1] }
 0x277   :  { %5847 = vmatprep.mubr.bf16.mxu0 %v4937_v57  ;;  %v16982_v30 = vpop.f32.mrb[14].mxu1  ;;  %v19516_v57 = vld [vmem:[#allocation34_spill] sm:$0xff] }
 0x278   :  { %v16984_v4 = vpop.f32.mrb[15].mxu1  ;;  %v3296_v55 = vshll.u32 %v19516_v57, 16  ;;  %v3291_v25 = vrot.slane %v3289_v44, 1  ;;  %v3294_v51 = vshrl.u32 %v19516_v57, 16  ;;  %v19521_v44 = vld [vmem:[#allocation59_spill] sm:$0xff] }
 0x279   :  { %v4952_v21 = vsel %vm4517_vm10, %v19521_v44, %v4316_v7  ;;  %v4320_v1 = vpop.permute.xlu0 %4319 }
 0x27a   :  { %v3298_v17 = vrot.slane %v3296_v55, 1  ;;  %v3292_v3 = vsel %vm2019_vm8, %v3287_v9, %v3291_v25  ;;  %v6289_v9 = vld [vmem:[%s19196_s6] sm:$0x1]  ;;  %v3318_v25 = vshrl.u32 %v19520_v41, 16 }
 0x27b   :  { %v4844_v49 = vsel %vm4517_vm10, %v3292_v3, %v3608_v11  ;;  %v14345_v3 = vld [vmem:[#allocation2 + $0x17c] ss:$0 sps:$4 sm:$0x11]  }
 0x27c   :  { %v3299_v8 = vor.u32 %v3298_v17, %v3294_v51  ;;  %v3322_v51 = vrot.slane %v3320_v36, 1  ;;  %v3612_v17 = vpop.permute.xlu1 %3611  ;;  %v14017_v36 = vld [vmem:[%s19192_s2 + $0x58] sm:$0xff]  }
 0x27d   :  { %11375 = vmatpush1.bf16.msra.mxu1 %v14017_v36  ;;  %v14024_v36 = vld [vmem:[%s19192_s2 + $0x60] sm:$0xff]  }
 0x27e   :  { %5848 = vmatmul.mubr.bf16.gmra.mrb[88].mxu0 %v4832_v14  ;;  %v14343_v14 = vld [vmem:[#allocation2 + $0x164] ss:$0 sps:$4 sm:$0x11]   ;;  %11376 = vmatprep.subr.bf16.mxu1 %v19501_v46 }
 0x27f   :  { %5855 = vmatprep.mubr.bf16.mxu0 %v4940_v52  ;;  %v3301_v47 = vshll.u32 %v14343_v14, 16  ;;  %v3325_v14 = vshll.u32 %v14345_v3, 16 }
 0x280   :  { %v3614_v44 = vpop.permute.xlu1 %3613 }
 0x281   :  { %v3303_v13 = vrot.slane %v3301_v47, 1  ;;  %v3327_v7 = vrot.slane %v3325_v14, 1  ;;  %11377 = vmatpush1.bf16.msra.mxu1 %v14024_v36 }
 0x282   :  { %v16996_v63 = vpop.f32.mrb[16].mxu1  ;;  %11378 = vmatprep.subr.bf16.mxu1 %v19501_v46 }
 0x283   :  { %v16998_v22 = vpop.f32.mrb[17].mxu1  ;;  %v3304_v59 = vsel %vm2019_vm8, %v3299_v8, %v3303_v13  ;;  %v19523_v13 = vld [vmem:[#allocation6_spill] sm:$0xff] }
 0x284   :  { %v17001_v5 = vpop.f32.mrb[18].mxu1  ;;  %v4848_v16 = vsel %vm4517_vm10, %v3304_v59, %v3610_v61  ;;  %v19524_v59 = vld [vmem:[#allocation40_spill] sm:$0xff] }
 0x285   :  { %v17003_v24 = vpop.f32.mrb[19].mxu1 }
 0x286   :  { %5856 = vmatmul.mubr.bf16.gmra.mrb[92].mxu0 %v4836_v23  ;;  %v3310_v23 = vrot.slane %v3308_v40, 1  ;;  %v6291_v40 = vpack.i.b16 %v6289_v9, %v6289_v9 }
 0x287   :  { %5863 = vmatprep.mubr.bf16.mxu0 %v4943_v56  ;;  %v3313_v56 = vshll.u32 %v14344_v58, 16  ;;  %v4955_v58 = vsel %vm4517_vm10, %v19524_v59, %v4318_v37 }
 0x289   :  { %v3315_v10 = vrot.slane %v3313_v56, 1  ;;  %v3323_v56 = vor.u32 %v3322_v51, %v3318_v25  ;;  %v19525_v51 = vld [vmem:[#allocation42_spill] sm:$0xff] }
 0x28e   :  { %5864 = vmatmul.mubr.bf16.gmra.mrb[96].mxu0 %v4840_v32  ;;  %v3311_v32 = vor.u32 %v3310_v23, %v3306_v20 }
 0x28f   :  { %5871 = vmatprep.mubr.bf16.mxu0 %v4946_v38  ;;  %v17017_v43 = vpop.f32.mrb[20].mxu1  ;;  %v6251_v38 = vpack.i.b16 %v6249_v18, %v6249_v18  ;;  %v3330_v18 = vshrl.u32 %v19522_v6, 16 }
 0x290   :  { %v17019_v34 = vpop.f32.mrb[21].mxu1  ;;  %v3316_v11 = vsel %vm2019_vm8, %v3311_v32, %v3315_v10  ;;  %v3328_v10 = vsel %vm2019_vm8, %v3323_v56, %v3327_v7  ;;  %v14347_v7 = vld [vmem:[#allocation2 + $0x194] ss:$0 sps:$4 sm:$0x11]  }
 0x291   :  { %v17021_v52 = vpop.f32.mrb[22].mxu1  ;;  %v17062_v42 = vrot.slane %v6251_v38, %v19523_v13  ;;  %v4852_v20 = vsel %vm4517_vm10, %v3316_v11, %v3612_v17  ;;  %v14346_v38 = vld [vmem:[#allocation2 + $0x188] ss:$0 sps:$4 sm:$0x11]   ;;  %v3344_v17 = vshll.u32 %v19525_v51, 16 }
 0x292   :  { %v17024_v0 = vpop.f32.mrb[23].mxu1  ;;  %v3337_v9 = vshll.u32 %v14346_v38, 16 }
 0x293   :  { %v3346_v59 = vrot.slane %v3344_v17, 1 }
 0x296   :  { %5872 = vmatmul.mubr.bf16.gmra.mrb[100].mxu0 %v4844_v49 }
 0x297   :  { %5879 = vmatprep.mubr.bf16.mxu0 %v4949_v48  ;;  %v3332_v48 = vshll.u32 %v19522_v6, 16 }
 0x29b   :  { %v17035_v12 = vpop.f32.mrb[24].mxu1 }
 0x29c   :  { %v17038_v60 = vpop.f32.mrb[25].mxu1 }
 0x29d   :  { %v17046_v57 = vpop.f32.mrb[26].mxu1 }
 0x29e   :  { %v17048_v55 = vpop.f32.mrb[27].mxu1  ;;  %5880 = vmatmul.mubr.bf16.gmra.mrb[104].mxu0 %v4848_v16 }
 0x29f   :  { %5887 = vmatprep.mubr.bf16.mxu0 %v4952_v21 }
 0x2a1   :  { %v5673_v47 = vpop.f32.mrb[0].mxu0 }
 0x2a2   :  { %v5963_v49 = vadd.f32 %v16913_v45, %v5673_v47  ;;  %v5675_v35 = vpop.f32.mrb[1].mxu0  ;;  %v17069_v45 = vrot.slane %v6291_v40, %v19523_v13  ;;  %v19526_v13 = vld [vmem:[#allocation10_spill] sm:$0xff] }
 0x2a3   :  { %v5676_v8 = vpop.f32.mrb[2].mxu0  ;;  %v4856_v35 = vsel %vm4517_vm10, %v3328_v10, %v3614_v44  ;;  %v19527_v10 = vld [vmem:[#allocation45_spill] sm:$0xff] }
 0x2a4   :  { %v5966_v23 = vadd.f32 %v16921_v27, %v5676_v8  ;;  %v5678_v61 = vpop.f32.mrb[3].mxu0  ;;  %v3334_v27 = vrot.slane %v3332_v48, 1 }
 0x2a5   :  { %v3342_v61 = vshrl.u32 %v19525_v51, 16 }
 0x2a6   :  { %v6217_v16 = vpack.c.bf16 %v5966_v23, %v5963_v49  ;;  %5888 = vmatmul.mubr.bf16.gmra.mrb[108].mxu0 %v4852_v20  ;;  %v3335_v40 = vor.u32 %v3334_v27, %v3330_v18  ;;  %v4958_v20 = vsel %vm4517_vm10, %v19526_v13, %v4320_v1  ;;  %v3339_v23 = vrot.slane %v3337_v9, 1  ;;  %v3616_v27 = vpop.permute.xlu1 %3615 }
 0x2a7   :  { %v17071_v41 = vpop.f32.mrb[28].mxu1  ;;  %5895 = vmatprep.mubr.bf16.mxu0 %v4955_v58  ;;  %v3356_v1 = vshll.u32 %v19527_v10, 16  ;;  %v3347_v17 = vor.u32 %v3346_v59, %v3342_v61 }
 0x2a8   :  { %v17077_v21 = vpop.f32.mrb[29].mxu1  ;;  %v6257_v32 = vmul.bf16 %v17062_v42, %v6217_v16  ;;  %v3349_v16 = vshll.u32 %v14347_v7, 16  ;;  %v3340_v44 = vsel %vm2019_vm8, %v3335_v40, %v3339_v23 }
 0x2a9   :  { %v17081_v25 = vpop.f32.mrb[30].mxu1  ;;  %v5681_v11 = vpop.f32.mrb[4].mxu0  ;;  %v4860_v13 = vsel %vm4517_vm10, %v3340_v44, %v3616_v27 }
 0x2aa   :  { %v17084_v3 = vpop.f32.mrb[31].mxu1  ;;  %v6297_v14 = vadd.bf16 %v17069_v45, %v6257_v32  ;;  %v5971_v47 = vadd.f32 %v16910_v50, %v5681_v11  ;;  %v5683_v37 = vpop.f32.mrb[5].mxu0  ;;  %v3351_v61 = vrot.slane %v3349_v16, 1  ;;  %v14348_v16 = vld [vmem:[#allocation2 + $0xc] sm:$0xf] }
 0x2ab   :  { %v5684_v49 = vpop.f32.mrb[6].mxu0  ;;  %v4322_v32 = vpop.permute.xlu0 %4321 }
 0x2ac   :  { %v6329_v6 = vmax.bf16 %v19501_v46, %v6297_v14  ;;  %v5974_v48 = vadd.f32 %v16918_v54, %v5684_v49  ;;  %v5686_v8 = vpop.f32.mrb[7].mxu0 }
 0x2ae   :  { %v12783_v58 = vcombine.low %v6329_v6, %v6329_v6  ;;  %v12784_v56 = vcombine.high %v6329_v6, %v6329_v6  ;;  %v6218_v50 = vpack.c.bf16 %v5974_v48, %v5971_v47  ;;  %5896 = vmatmul.mubr.bf16.gmra.mrb[112].mxu0 %v4856_v35  ;;  %v7164_v6 = vld [vmem:[#allocation2 + $0x14] sm:$0x1] }
 0x2af   :  { %5903 = vmatprep.mubr.bf16.mxu0 %v4958_v20  ;;  %v19528_v20 = vld [vmem:[#allocation54_spill] sm:$0xff] }
 0x2b0   :  { %v6522_v54 = vshrl.u32 %v12783_v58, 16  ;;  %v6530_v18 = vshrl.u32 %v12784_v56, 16  ;;  %v6525_v38 = vshll.u32 %v12783_v58, 16  ;;  %v6258_v9 = vmul.bf16 %v17062_v42, %v6218_v50 }
 0x2b1   :  { %v5689_v51 = vpop.f32.mrb[8].mxu0  ;;  %v6533_v37 = vshll.u32 %v12784_v56, 16  ;;  %v4961_v23 = vsel %vm4517_vm10, %v19528_v20, %v4322_v32  ;;  %v14031_v20 = vld [vmem:[%s19192_s2 + $0x68] sm:$0xff]  }
 0x2b2   :  { %v6524_v14 = vrot.slane %v6522_v54, 7  ;;  %v6532_v47 = vrot.slane %v6530_v18, 7  ;;  %v5979_v49 = vadd.f32 %v16935_v2, %v5689_v51  ;;  %v5691_v35 = vpop.f32.mrb[9].mxu0  ;;  %v6298_v48 = vadd.bf16 %v17069_v45, %v6258_v9  ;;  %11379 = vmatpush1.bf16.msra.mxu1 %v14031_v20 }
 0x2b3   :  { %v5692_v8 = vpop.f32.mrb[10].mxu0  ;;  %v3354_v54 = vshrl.u32 %v19527_v10, 16  ;;  %v3358_v18 = vrot.slane %v3356_v1, 1  ;;  %11380 = vmatprep.subr.bf16.mxu1 %v19501_v46 }
 0x2b4   :  { %v6527_v58 = vor.u32 %v6525_v38, %v6524_v14  ;;  %v6528_v56 = vrot.slane %v6524_v14, 4  ;;  %v6535_v2 = vor.u32 %v6533_v37, %v6532_v47  ;;  %v6537_v50 = vrot.slane %v6532_v47, 4  ;;  %v5694_v7 = vpop.f32.mrb[11].mxu0  ;;  %v14349_v37 = vld [vmem:[#allocation2 + $0x1a0] ss:$0 sps:$4 sm:$0x11]  }
 0x2b5   :  { %v17101_v11 = vpop.f32.mrb[32].mxu1  ;;  %v6330_v9 = vmax.bf16 %v19501_v46, %v6298_v48  ;;  %v5982_v27 = vadd.f32 %v16941_v33, %v5692_v8  ;;  %v3361_v35 = vshll.u32 %v14349_v37, 16  ;;  %v3618_v48 = vpop.permute.xlu1 %3617  ;;  %v3352_v8 = vsel %vm2019_vm8, %v3347_v17, %v3351_v61  ;;  %v14186_v14 = vld [vmem:[%s19192_s2 + $0xf8] sm:$0xff]  }
 0x2b6   :  { %v17105_v40 = vpop.f32.mrb[33].mxu1  ;;  %v6536_v32 = vsel %vm14999_vm5, %v6528_v56, %v6535_v2  ;;  %v7161_v38 = vsel %vm15012_vm6, %v6527_v58, %v14348_v16  ;;  %v7165_v47 = vsel %vm15018_vm7, %v6537_v50, %v7164_v6  ;;  %5904 = vmatmul.mubr.bf16.gmra.mrb[116].mxu0 %v4860_v13  ;;  %v4324_v56 = vpop.permute.xlu0 %4323  ;;  %v3359_v2 = vor.u32 %v3358_v18, %v3354_v54 }
 0x2b7   :  { %v17111_v59 = vpop.f32.mrb[34].mxu1  ;;  %7162 = vst [vmem:[#allocation2 + $0xc] sm:$0xf] %v7161_v38  ;;  %7163 = vst.msk [vmem:[#allocation2 + $0x10] sm:$0xf] %vm28_vm0, %v6536_v32  ;;  %v12785_v10 = vcombine.low %v6330_v9, %v6330_v9  ;;  %v12786_v1 = vcombine.high %v6330_v9, %v6330_v9  ;;  %v6219_v33 = vpack.c.bf16 %v5982_v27, %v5979_v49  ;;  %5911 = vmatprep.mubr.bf16.mxu0 %v4961_v23 }
 0x2b8   :  { %v17113_v36 = vpop.f32.mrb[35].mxu1  ;;  %7166 = vst [vmem:[#allocation2 + $0x14] sm:$0x1] %v7165_v47  ;;  %v4864_v49 = vsel %vm4517_vm10, %v3352_v8, %v3618_v48  ;;  %v3363_v9 = vrot.slane %v3361_v35, 1  ;;  %v7167_v38 = vld [vmem:[#allocation2 + $0x18] sm:$0xf] }
 0x2b9   :  { %v6539_v58 = vshrl.u32 %v12785_v10, 16  ;;  %v6547_v6 = vshrl.u32 %v12786_v1, 16  ;;  %v5697_v13 = vpop.f32.mrb[12].mxu0  ;;  %v6259_v50 = vmul.bf16 %v17062_v42, %v6219_v33  ;;  %v6542_v17 = vshll.u32 %v12785_v10, 16  ;;  %v7171_v47 = vld [vmem:[#allocation2 + $0x20] sm:$0x1] }
 0x2ba   :  { %v5987_v7 = vadd.f32 %v16933_v31, %v5697_v13  ;;  %v5699_v32 = vpop.f32.mrb[13].mxu0  ;;  %v6550_v27 = vshll.u32 %v12786_v1, 16  ;;  %v19532_v31 = vld [vmem:[#allocation38_spill] sm:$0xff]  ;;  %v3364_v13 = vsel %vm2019_vm8, %v3359_v2, %v3363_v9 }
 0x2bb   :  { %v6541_v23 = vrot.slane %v6539_v58, 7  ;;  %v6549_v61 = vrot.slane %v6547_v6, 7  ;;  %v5700_v16 = vpop.f32.mrb[14].mxu0  ;;  %v6299_v54 = vadd.bf16 %v17069_v45, %v6259_v50  ;;  %v4964_v33 = vsel %vm4517_vm10, %v19532_v31, %v4324_v56 }
 0x2bc   :  { %v5990_v18 = vadd.f32 %v16939_v39, %v5700_v16  ;;  %v5702_v37 = vpop.f32.mrb[15].mxu0  ;;  %v14038_v16 = vld [vmem:[%s19192_s2 + $0x70] sm:$0xff]  }
 0x2bd   :  { %v6544_v48 = vor.u32 %v6542_v17, %v6541_v23  ;;  %v6545_v35 = vrot.slane %v6541_v23, 4  ;;  %v6552_v8 = vor.u32 %v6550_v27, %v6549_v61  ;;  %v6554_v20 = vrot.slane %v6549_v61, 4  ;;  %v3620_v17 = vpop.permute.xlu1 %3619  ;;  %11381 = vmatpush1.bf16.msra.mxu1 %v14038_v16 }
 0x2be   :  { %v6331_v10 = vmax.bf16 %v19501_v46, %v6299_v54  ;;  %v6220_v1 = vpack.c.bf16 %v5990_v18, %v5987_v7  ;;  %5912 = vmatmul.mubr.bf16.gmra.mrb[120].mxu0 %v4864_v49  ;;  %v7512_v58 = vld [vmem:[#allocation2 + $0xc] sm:$0xf]  ;;  %v7513_v6 = vld [vmem:[#allocation2 + $0x10] sm:$0xf]  ;;  %11382 = vmatprep.subr.bf16.mxu1 %v19501_v46 }
 0x2bf   :  { %v7386_v32 = vld [vmem:[#allocation2 + $0xc] sm:$0xf]  ;;  %v6553_v39 = vsel %vm14999_vm5, %v6545_v35, %v6552_v8  ;;  %v7168_v50 = vsel %vm15012_vm6, %v6544_v48, %v7167_v38  ;;  %v7172_v56 = vsel %vm15018_vm7, %v6554_v20, %v7171_v47  ;;  %v17145_v23 = vcombine.low %v7512_v58, %v7513_v6  ;;  %5919 = vmatprep.mubr.bf16.mxu0 %v4964_v33  ;;  %v7387_v7 = vld [vmem:[#allocation2 + $0x10] sm:$0xf]  ;;  %v17156_v47 = vpop.f32.mrb[36].mxu1 }
 0x2c0   :  { %7170 = vst.msk [vmem:[#allocation2 + $0x1c] sm:$0xf] %vm28_vm0, %v6553_v39  ;;  %7173 = vst [vmem:[#allocation2 + $0x20] sm:$0x1] %v7172_v56  ;;  %v12787_v2 = vcombine.low %v6331_v10, %v6331_v10  ;;  %v12788_v49 = vcombine.high %v6331_v10, %v6331_v10  ;;  %v6260_v9 = vmul.bf16 %v17062_v42, %v6220_v1  ;;  %v17159_v48 = vpop.f32.mrb[37].mxu1 }
 0x2c1   :  { %19533 = vst [vmem:[#allocation43_spill] sm:$0xff] %v17145_v23  ;;  %7169 = vst [vmem:[#allocation2 + $0x18] sm:$0xf] %v7168_v50  ;;  %v17149_v61 = vcombine.low %v7386_v32, %v7387_v7  ;;  %v13955_v27 = vld [vmem:[#allocation2 + $0x14] ss:$0 sps:$4 sm:$0x11]   ;;  %8824 = vrot.lane.b32.xlu0 %v17145_v23, %s14631_s18  ;;  %v4868_v33 = vsel %vm4517_vm10, %v3364_v13, %v3620_v17 }
 0x2c2   :  { %v5705_v38 = vpop.f32.mrb[16].mxu0  ;;  %v6556_v54 = vshrl.u32 %v12787_v2, 16  ;;  %v6559_v18 = vshll.u32 %v12787_v2, 16  ;;  %v6564_v37 = vshrl.u32 %v12788_v49, 16  ;;  %v6567_v35 = vshll.u32 %v12788_v49, 16  ;;  %v17165_v6 = vpop.f32.mrb[38].mxu1 }
 0x2c3   :  { %19534 = vst [vmem:[#allocation11_spill] sm:$0xff] %v17149_v61  ;;  %v5707_v31 = vpop.f32.mrb[17].mxu0  ;;  %v7174_v8 = vld [vmem:[#allocation2 + $0x24] sm:$0xf]  ;;  %v6300_v20 = vadd.bf16 %v17069_v45, %v6260_v9  ;;  %v5995_v10 = vadd.f32 %v16955_v15, %v5705_v38  ;;  %v8039_v58 = vshll.u32 %v17149_v61, 16  ;;  %19535 = vst [vmem:[#allocation57_spill] sm:$0xff] %v17165_v6 }
 0x2c4   :  { %v5708_v1 = vpop.f32.mrb[18].mxu0  ;;  %v6558_v32 = vrot.slane %v6556_v54, 7  ;;  %v6566_v39 = vrot.slane %v6564_v37, 7  ;;  %v8044_v56 = vshll.u32 %v13955_v27, 16  ;;  %v17168_v17 = vpop.f32.mrb[39].mxu1  ;;  %v8037_v15 = vshrl.u32 %v17149_v61, 16 }
 0x2c5   :  { %v5998_v13 = vadd.f32 %v16963_v19, %v5708_v1  ;;  %v5710_v50 = vpop.f32.mrb[19].mxu0  ;;  %v7178_v7 = vld [vmem:[#allocation2 + $0x2c] sm:$0x1]  ;;  %v6332_v2 = vmax.bf16 %v19501_v46, %v6300_v20  ;;  %v8041_v49 = vrot.slane %v8039_v58, 1  ;;  %v14045_v9 = vld [vmem:[%s19192_s2 + $0x78] sm:$0xff]  }
 0x2c6   :  { %v6561_v16 = vor.u32 %v6559_v18, %v6558_v32  ;;  %v6562_v38 = vrot.slane %v6558_v32, 4  ;;  %v6569_v54 = vor.u32 %v6567_v35, %v6566_v39  ;;  %v6571_v37 = vrot.slane %v6566_v39, 4  ;;  %5920 = vmatmul.mubr.bf16.gmra.mrb[124].mxu0 %v4868_v33  ;;  %11383 = vmatpush1.bf16.msra.mxu1 %v14045_v9 }
 0x2c7   :  { %v12789_v19 = vcombine.low %v6332_v2, %v6332_v2  ;;  %v12790_v31 = vcombine.high %v6332_v2, %v6332_v2  ;;  %v6221_v27 = vpack.c.bf16 %v5998_v13, %v5995_v10  ;;  %v8042_v1 = vor.u32 %v8041_v49, %v8037_v15  ;;  %v7515_v23 = vld [vmem:[#allocation2 + $0x1c] sm:$0xf]  ;;  %11641 = vmatprep.subr.bf16.mxu1 %v19501_v46  ;;  %v7181_v2 = vld [vmem:[#allocation2 + $0x30] sm:$0xf]  ;;  %v7185_v15 = vld [vmem:[#allocation2 + $0x38] sm:$0x1] }
 0x2c8   :  { %v7514_v50 = vld [vmem:[#allocation2 + $0x18] sm:$0xf]  ;;  %v6570_v20 = vsel %vm14999_vm5, %v6562_v38, %v6569_v54  ;;  %v7175_v58 = vsel %vm15012_vm6, %v6561_v16, %v7174_v8  ;;  %v7179_v18 = vsel %vm15018_vm7, %v6571_v37, %v7178_v7  ;;  %v8046_v32 = vrot.slane %v8044_v56, 1  ;;  %v7641_v35 = vld [vmem:[#allocation2 + $0x1c] sm:$0xf] }
 0x2c9   :  { %7177 = vst.msk [vmem:[#allocation2 + $0x28] sm:$0xf] %vm28_vm0, %v6570_v20  ;;  %7180 = vst [vmem:[#allocation2 + $0x2c] sm:$0x1] %v7179_v18  ;;  %v6573_v33 = vshrl.u32 %v12789_v19, 16  ;;  %v6576_v10 = vshll.u32 %v12789_v19, 16  ;;  %v6261_v49 = vmul.bf16 %v17062_v42, %v6221_v27  ;;  %v17185_v9 = vcombine.low %v7514_v50, %v7515_v23 }
 0x2ca   :  { %7176 = vst [vmem:[#allocation2 + $0x24] sm:$0xf] %v7175_v58  ;;  %v6581_v39 = vshrl.u32 %v12790_v31, 16  ;;  %v5713_v13 = vpop.f32.mrb[20].mxu0  ;;  %v8047_v8 = vsel %vm2019_vm8, %v8042_v1, %v8046_v32  ;;  %v7736_v16 = vld [vmem:[#allocation2 + $0x18] sm:$0xe] }
 0x2cb   :  { %19536 = vst [vmem:[#allocation44_spill] sm:$0xff] %v17185_v9  ;;  %v6003_v56 = vadd.f32 %v16953_v62, %v5713_v13  ;;  %v5715_v7 = vpop.f32.mrb[21].mxu0  ;;  %v13959_v38 = vld [vmem:[#allocation2 + $0x20] ss:$0 sps:$4 sm:$0x11]   ;;  %v6575_v54 = vrot.slane %v6573_v33, 7  ;;  %8410 = vrot.lane.b32.xlu1 %v8047_v8, %s14631_s18  ;;  %v13103_v58 = vcombine.low %v7736_v16, %v7641_v35  ;;  %v6301_v61 = vadd.bf16 %v17069_v45, %v6261_v49 }
 0x2cc   :  { %v6583_v37 = vrot.slane %v6581_v39, 7  ;;  %v6584_v20 = vshll.u32 %v12790_v31, 16  ;;  %v5716_v19 = vpop.f32.mrb[22].mxu0  ;;  %v7388_v18 = vld [vmem:[#allocation2 + $0x18] sm:$0xf]  ;;  %8826 = vrot.lane.b32.xlu0 %v17185_v9, %s14631_s18  ;;  %v10425_v62 = vrot.slane %v13959_v38, 1 }
 0x2cd   :  { %v6006_v23 = vadd.f32 %v16957_v26, %v5716_v19  ;;  %v5718_v27 = vpop.f32.mrb[23].mxu0  ;;  %v7389_v1 = vld [vmem:[#allocation2 + $0x1c] sm:$0xf]  ;;  %v6578_v50 = vor.u32 %v6576_v10, %v6575_v54  ;;  %v6579_v32 = vrot.slane %v6575_v54, 4  ;;  %v6333_v13 = vmax.bf16 %v19501_v46, %v6301_v61 }
 0x2ce   :  { %v6586_v33 = vor.u32 %v6584_v20, %v6583_v37  ;;  %v6588_v39 = vrot.slane %v6583_v37, 4  ;;  %v13964_v31 = vld [vmem:[#allocation2 + $0x20] ss:$0 sps:$4 sm:$0x11]   ;;  %v10424_v35 = vrot.slane %v13103_v58, 1  ;;  %v17194_v7 = vcombine.low %v7388_v18, %v7389_v1 }
 0x2cf   :  { %v6222_v8 = vpack.c.bf16 %v6006_v23, %v6003_v56  ;;  %v7182_v26 = vsel %vm15012_vm6, %v6578_v50, %v7181_v2  ;;  %v8056_v10 = vshll.u32 %v13964_v31, 16  ;;  %v12791_v38 = vcombine.low %v6333_v13, %v6333_v13 }
 0x2d0   :  { %19537 = vst [vmem:[#allocation46_spill] sm:$0xff] %v17194_v7  ;;  %v6587_v49 = vsel %vm14999_vm5, %v6579_v32, %v6586_v33  ;;  %v7186_v16 = vsel %vm15018_vm7, %v6588_v39, %v7185_v15  ;;  %7183 = vst [vmem:[#allocation2 + $0x30] sm:$0xf] %v7182_v26  ;;  %v12792_v61 = vcombine.high %v6333_v13, %v6333_v13  ;;  %v7517_v20 = vld [vmem:[#allocation2 + $0x28] sm:$0xf]  ;;  %v8051_v2 = vshll.u32 %v17194_v7, 16 }
 0x2d1   :  { %7184 = vst.msk [vmem:[#allocation2 + $0x34] sm:$0xf] %vm28_vm0, %v6587_v49  ;;  %7187 = vst [vmem:[#allocation2 + $0x38] sm:$0x1] %v7186_v16  ;;  %v6262_v56 = vmul.bf16 %v17062_v42, %v6222_v8  ;;  %v10426_v54 = vsel %vm2564_vm9, %v10424_v35, %v10425_v62  ;;  %v7516_v37 = vld [vmem:[#allocation2 + $0x24] sm:$0xf] }
 0x2d2   :  { %13355 = vmatprep.mubr.msk.bf16.mxu0 %vm4517_vm10, %v10426_v54  ;;  %v17207_v19 = vcombine.low %v7516_v37, %v7517_v20  ;;  %v5721_v15 = vpop.f32.mrb[24].mxu0  ;;  %v7643_v58 = vld [vmem:[#allocation2 + $0x28] sm:$0xf]  ;;  %v6590_v18 = vshrl.u32 %v12791_v38, 16  ;;  %v6593_v23 = vshll.u32 %v12791_v38, 16  ;;  %v6598_v27 = vshrl.u32 %v12792_v61, 16 }
 0x2d3   :  { %v8049_v1 = vshrl.u32 %v17194_v7, 16  ;;  %v5723_v50 = vpop.f32.mrb[25].mxu0  ;;  %v6601_v32 = vshll.u32 %v12792_v61, 16  ;;  %v7188_v33 = vld [vmem:[#allocation2 + $0x3c] sm:$0xf]  ;;  %v6302_v62 = vadd.bf16 %v17069_v45, %v6262_v56  ;;  %v8053_v39 = vrot.slane %v8051_v2, 1 }
 0x2d4   :  { %19538 = vst [vmem:[#allocation12_spill] sm:$0xff] %v17207_v19  ;;  %8828 = vrot.lane.b32.xlu0 %v17207_v19, %s14631_s18  ;;  %v6011_v31 = vadd.f32 %v16974_v53, %v5721_v15  ;;  %v5724_v13 = vpop.f32.mrb[26].mxu0  ;;  %v7737_v8 = vld [vmem:[#allocation2 + $0x24] sm:$0xe]  ;;  %v6592_v35 = vrot.slane %v6590_v18, 7  ;;  %v6600_v49 = vrot.slane %v6598_v27, 7 }
 0x2d5   :  { %v7192_v26 = vld [vmem:[#allocation2 + $0x44] sm:$0x1]  ;;  %v6014_v16 = vadd.f32 %v16984_v4, %v5724_v13  ;;  %v5726_v38 = vpop.f32.mrb[27].mxu0  ;;  %v13104_v54 = vcombine.low %v7737_v8, %v7643_v58  ;;  %v6334_v61 = vmax.bf16 %v19501_v46, %v6302_v62  ;;  %v8054_v37 = vor.u32 %v8053_v39, %v8049_v1  ;;  %v13966_v56 = vld [vmem:[#allocation2 + $0x2c] ss:$0 sps:$4 sm:$0x11]  }
 0x2d6   :  { %v8058_v20 = vrot.slane %v8056_v10, 1  ;;  %v6595_v2 = vor.u32 %v6593_v23, %v6592_v35  ;;  %v6596_v50 = vrot.slane %v6592_v35, 4  ;;  %v6603_v9 = vor.u32 %v6601_v32, %v6600_v49  ;;  %v13970_v7 = vld [vmem:[#allocation2 + $0x2c] ss:$0 sps:$4 sm:$0x11]   ;;  %v17216_v53 = vpop.f32.mrb[40].mxu1 }
 0x2d7   :  { %v6605_v19 = vrot.slane %v6600_v49, 4  ;;  %v12793_v15 = vcombine.low %v6334_v61, %v6334_v61  ;;  %v12794_v18 = vcombine.high %v6334_v61, %v6334_v61  ;;  %v6223_v6 = vpack.c.bf16 %v6014_v16, %v6011_v31  ;;  %v7390_v4 = vld [vmem:[#allocation2 + $0x24] sm:$0xf]  ;;  %v7391_v13 = vld [vmem:[#allocation2 + $0x28] sm:$0xf] }
 0x2d8   :  { %v8059_v27 = vsel %vm2019_vm8, %v8054_v37, %v8058_v20  ;;  %v7518_v58 = vld [vmem:[#allocation2 + $0x30] sm:$0xf]  ;;  %v6604_v1 = vsel %vm14999_vm5, %v6596_v50, %v6603_v9  ;;  %v7189_v10 = vsel %vm15012_vm6, %v6595_v2, %v7188_v33  ;;  %v10427_v32 = vrot.slane %v13104_v54, 1  ;;  %v7519_v62 = vld [vmem:[#allocation2 + $0x34] sm:$0xf] }
 0x2d9   :  { %v7193_v23 = vsel %vm15018_vm7, %v6605_v19, %v7192_v26  ;;  %8412 = vrot.lane.b32.xlu1 %v8059_v27, %s14631_s18  ;;  %7191 = vst.msk [vmem:[#allocation2 + $0x40] sm:$0xf] %vm28_vm0, %v6604_v1  ;;  %7190 = vst [vmem:[#allocation2 + $0x3c] sm:$0xf] %v7189_v10  ;;  %v6607_v39 = vshrl.u32 %v12793_v15, 16  ;;  %v6610_v31 = vshll.u32 %v12793_v15, 16  ;;  %v6263_v33 = vmul.bf16 %v17062_v42, %v6223_v6 }
 0x2da   :  { %7194 = vst [vmem:[#allocation2 + $0x44] sm:$0x1] %v7193_v23  ;;  %v6615_v8 = vshrl.u32 %v12794_v18, 16  ;;  %v6618_v35 = vshll.u32 %v12794_v18, 16  ;;  %v5729_v49 = vpop.f32.mrb[28].mxu0  ;;  %v10428_v38 = vrot.slane %v13966_v56, 1  ;;  %v17228_v61 = vcombine.low %v7390_v4, %v7391_v13 }
 0x2db   :  { %v7195_v9 = vld [vmem:[#allocation2 + $0x48] sm:$0xf]  ;;  %v7199_v16 = vld [vmem:[#allocation2 + $0x50] sm:$0x1]  ;;  %v8068_v19 = vshll.u32 %v13970_v7, 16  ;;  %v5731_v26 = vpop.f32.mrb[29].mxu0  ;;  %v17230_v20 = vcombine.low %v7518_v58, %v7519_v62  ;;  %v6019_v2 = vadd.f32 %v16971_v28, %v5729_v49  ;;  %v6303_v18 = vadd.bf16 %v17069_v45, %v6263_v33 }
 0x2dc   :  { %19539 = vst [vmem:[#allocation47_spill] sm:$0xff] %v17228_v61  ;;  %v6609_v54 = vrot.slane %v6607_v39, 7  ;;  %v6617_v37 = vrot.slane %v6615_v8, 7  ;;  %v5732_v50 = vpop.f32.mrb[30].mxu0  ;;  %v10429_v27 = vsel %vm2564_vm9, %v10427_v32, %v10428_v38  ;;  %v8063_v6 = vshll.u32 %v17228_v61, 16  ;;  %v17238_v1 = vpop.f32.mrb[41].mxu1 }
 0x2dd   :  { %19540 = vst [vmem:[#allocation13_spill] sm:$0xff] %v17230_v20  ;;  %v17233_v15 = vld [vmem:[#allocation2 + $0x38] ss:$0 sps:$4 sm:$0x11]   ;;  %v5734_v56 = vpop.f32.mrb[31].mxu0  ;;  %13356 = vmatmul.mubr.msk.bf16.vlgmr.msra.gmra.mrb[128].mxu0 %vm4517_vm10, %v10429_v27  ;;  %8830 = vrot.lane.b32.xlu0 %v17230_v20, %s14631_s18  ;;  %v6335_v32 = vmax.bf16 %v19501_v46, %v6303_v18  ;;  %v8061_v39 = vshrl.u32 %v17228_v61, 16  ;;  %v6022_v49 = vadd.f32 %v16982_v30, %v5732_v50 }
 0x2de   :  { %v7645_v4 = vld [vmem:[#allocation2 + $0x34] sm:$0xf]  ;;  %v7738_v13 = vld [vmem:[#allocation2 + $0x30] sm:$0xe]  ;;  %v6612_v10 = vor.u32 %v6610_v31, %v6609_v54  ;;  %v6613_v58 = vrot.slane %v6609_v54, 4  ;;  %v6620_v23 = vor.u32 %v6618_v35, %v6617_v37  ;;  %v6622_v62 = vrot.slane %v6617_v37, 4 }
 0x2df   :  { %v7392_v7 = vld [vmem:[#allocation2 + $0x30] sm:$0xf]  ;;  %v7393_v28 = vld [vmem:[#allocation2 + $0x34] sm:$0xf]  ;;  %v8065_v8 = vrot.slane %v8063_v6, 1  ;;  %v17246_v38 = vpop.f32.mrb[42].mxu1  ;;  %v12795_v37 = vcombine.low %v6335_v32, %v6335_v32  ;;  %v12796_v18 = vcombine.high %v6335_v32, %v6335_v32  ;;  %v6224_v50 = vpack.c.bf16 %v6022_v49, %v6019_v2 }
 0x2e0   :  { %v13977_v33 = vld [vmem:[#allocation2 + $0x38] ss:$0 sps:$4 sm:$0x11]   ;;  %19541 = vst [vmem:[#allocation48_spill] sm:$0xff] %v17246_v38  ;;  %v6621_v31 = vsel %vm14999_vm5, %v6613_v58, %v6620_v23  ;;  %v7196_v35 = vsel %vm15012_vm6, %v6612_v10, %v7195_v9  ;;  %v7200_v26 = vsel %vm15018_vm7, %v6622_v62, %v7199_v16  ;;  %v8070_v54 = vrot.slane %v8068_v19, 1  ;;  %v17258_v20 = vpop.f32.mrb[43].mxu1 }
 0x2e1   :  { %7198 = vst.msk [vmem:[#allocation2 + $0x4c] sm:$0xf] %vm28_vm0, %v6621_v31  ;;  %7201 = vst [vmem:[#allocation2 + $0x50] sm:$0x1] %v7200_v26  ;;  %v8066_v30 = vor.u32 %v8065_v8, %v8061_v39  ;;  %v7520_v27 = vld [vmem:[#allocation2 + $0x3c] sm:$0xf]  ;;  %v13105_v6 = vcombine.low %v7738_v13, %v7645_v4  ;;  %v17256_v58 = vcombine.low %v7392_v7, %v7393_v28 }
 0x2e2   :  { %7197 = vst [vmem:[#allocation2 + $0x48] sm:$0xf] %v7196_v35  ;;  %v10431_v56 = vrot.slane %v17233_v15, 1  ;;  %v8080_v23 = vshll.u32 %v13977_v33, 16  ;;  %v7521_v9 = vld [vmem:[#allocation2 + $0x40] sm:$0xf]  ;;  %v6264_v4 = vmul.bf16 %v17062_v42, %v6224_v50 }
 0x2e3   :  { %19542 = vst [vmem:[#allocation14_spill] sm:$0xff] %v17256_v58  ;;  %v5737_v10 = vpop.f32.mrb[32].mxu0  ;;  %v6624_v16 = vshrl.u32 %v12795_v37, 16  ;;  %v6627_v19 = vshll.u32 %v12795_v37, 16  ;;  %v6632_v62 = vshrl.u32 %v12796_v18, 16  ;;  %v6635_v31 = vshll.u32 %v12796_v18, 16 }
 0x2e4   :  { %v5739_v35 = vpop.f32.mrb[33].mxu0  ;;  %v7202_v26 = vld [vmem:[#allocation2 + $0x54] sm:$0xf]  ;;  %v7206_v32 = vld [vmem:[#allocation2 + $0x5c] sm:$0x1]  ;;  %v8071_v2 = vsel %vm2019_vm8, %v8066_v30, %v8070_v54  ;;  %v10430_v13 = vrot.slane %v13105_v6, 1  ;;  %v6304_v18 = vadd.bf16 %v17069_v45, %v6264_v4  ;;  %v17267_v54 = vcombine.low %v7520_v27, %v7521_v9 }
 0x2e5   :  { %v8073_v15 = vshrl.u32 %v17256_v58, 16  ;;  %v5740_v7 = vpop.f32.mrb[34].mxu0  ;;  %v7647_v28 = vld [vmem:[#allocation2 + $0x40] sm:$0xf]  ;;  %v6626_v39 = vrot.slane %v6624_v16, 7  ;;  %v6634_v8 = vrot.slane %v6632_v62, 7  ;;  %8414 = vrot.lane.b32.xlu1 %v8071_v2, %s14631_s18  ;;  %v6027_v30 = vadd.f32 %v16998_v22, %v5737_v10 }
 0x2e6   :  { %v8075_v49 = vshll.u32 %v17256_v58, 16  ;;  %v8082_v33 = vrot.slane %v8080_v23, 1  ;;  %v5742_v37 = vpop.f32.mrb[35].mxu0  ;;  %v10432_v35 = vsel %vm2564_vm9, %v10430_v13, %v10431_v56  ;;  %19543 = vst [vmem:[#allocation49_spill] sm:$0xff] %v17267_v54  ;;  %v7739_v50 = vld [vmem:[#allocation2 + $0x3c] sm:$0xe]  ;;  %v6336_v23 = vmax.bf16 %v19501_v46, %v6304_v18  ;;  %8832 = vrot.lane.b32.xlu0 %v17267_v54, %s14631_s18 }
 0x2e7   :  { %v13980_v6 = vld [vmem:[#allocation2 + $0x44] ss:$0 sps:$4 sm:$0x11]   ;;  %v6629_v61 = vor.u32 %v6627_v19, %v6626_v39  ;;  %v6630_v38 = vrot.slane %v6626_v39, 4  ;;  %v6637_v16 = vor.u32 %v6635_v31, %v6634_v8  ;;  %v6639_v62 = vrot.slane %v6634_v8, 4  ;;  %13359 = vmatprep.mubr.msk.bf16.mxu0 %vm4517_vm10, %v10432_v35 }
 0x2e8   :  { %v7394_v2 = vld [vmem:[#allocation2 + $0x3c] sm:$0xf]  ;;  %v7395_v58 = vld [vmem:[#allocation2 + $0x40] sm:$0xf]  ;;  %v8077_v37 = vrot.slane %v8075_v49, 1  ;;  %v6030_v27 = vadd.f32 %v17003_v24, %v5740_v7  ;;  %v13106_v19 = vcombine.low %v7739_v50, %v7647_v28  ;;  %v12797_v31 = vcombine.low %v6336_v23, %v6336_v23 }
 0x2e9   :  { %v13984_v56 = vld [vmem:[#allocation2 + $0x44] ss:$0 sps:$4 sm:$0x11]   ;;  %v6638_v22 = vsel %vm14999_vm5, %v6630_v38, %v6637_v16  ;;  %v7203_v9 = vsel %vm15012_vm6, %v6629_v61, %v7202_v26  ;;  %v7207_v10 = vsel %vm15018_vm7, %v6639_v62, %v7206_v32  ;;  %v12798_v4 = vcombine.high %v6336_v23, %v6336_v23  ;;  %v7522_v24 = vld [vmem:[#allocation2 + $0x48] sm:$0xf]  ;;  %v5745_v7 = vpop.f32.mrb[36].mxu0 }
 0x2ea   :  { %7205 = vst.msk [vmem:[#allocation2 + $0x58] sm:$0xf] %vm28_vm0, %v6638_v22  ;;  %7208 = vst [vmem:[#allocation2 + $0x5c] sm:$0x1] %v7207_v10  ;;  %v8078_v13 = vor.u32 %v8077_v37, %v8073_v15  ;;  %v6225_v39 = vpack.c.bf16 %v6030_v27, %v6027_v30  ;;  %v10433_v8 = vrot.slane %v13106_v19, 1  ;;  %v10434_v49 = vrot.slane %v13980_v6, 1 }
 0x2eb   :  { %7204 = vst [vmem:[#allocation2 + $0x54] sm:$0xf] %v7203_v9  ;;  %v17282_v38 = vcombine.low %v7394_v2, %v7395_v58  ;;  %v8092_v18 = vshll.u32 %v13984_v56, 16  ;;  %v7523_v61 = vld [vmem:[#allocation2 + $0x4c] sm:$0xf]  ;;  %v5747_v26 = vpop.f32.mrb[37].mxu0 }
 0x2ec   :  { %v6641_v35 = vshrl.u32 %v12797_v31, 16  ;;  %v6644_v32 = vshll.u32 %v12797_v31, 16  ;;  %v6649_v28 = vshrl.u32 %v12798_v4, 16  ;;  %v6652_v50 = vshll.u32 %v12798_v4, 16  ;;  %v5748_v16 = vpop.f32.mrb[38].mxu0 }
 0x2ed   :  { %19544 = vst [vmem:[#allocation15_spill] sm:$0xff] %v17282_v38  ;;  %v7209_v62 = vld [vmem:[#allocation2 + $0x60] sm:$0xf]  ;;  %v7213_v22 = vld [vmem:[#allocation2 + $0x68] sm:$0x1]  ;;  %v8083_v23 = vsel %vm2019_vm8, %v8078_v13, %v8082_v33  ;;  %v6265_v15 = vmul.bf16 %v17062_v42, %v6225_v39  ;;  %v10435_v30 = vsel %vm2564_vm9, %v10433_v8, %v10434_v49  ;;  %v8085_v6 = vshrl.u32 %v17282_v38, 16 }
 0x2ee   :  { %v5750_v58 = vpop.f32.mrb[39].mxu0  ;;  %v7649_v2 = vld [vmem:[#allocation2 + $0x4c] sm:$0xf]  ;;  %v6643_v37 = vrot.slane %v6641_v35, 7  ;;  %v6651_v27 = vrot.slane %v6649_v28, 7  ;;  %8416 = vrot.lane.b32.xlu1 %v8083_v23, %s14631_s18  ;;  %13360 = vmatmul.mubr.msk.bf16.gmra.mrb[132].mxu0 %vm4517_vm10, %v10435_v30  ;;  %v8087_v56 = vshll.u32 %v17282_v38, 16  ;;  %v17292_v19 = vcombine.low %v7522_v24, %v7523_v61 }
 0x2ef   :  { %v8094_v9 = vrot.slane %v8092_v18, 1  ;;  %v7740_v10 = vld [vmem:[#allocation2 + $0x48] sm:$0xe]  ;;  %v6305_v33 = vadd.bf16 %v17069_v45, %v6265_v15  ;;  %v6035_v31 = vadd.f32 %v16996_v63, %v5745_v7  ;;  %v6038_v4 = vadd.f32 %v17001_v5, %v5748_v16  ;;  %v13987_v13 = vld [vmem:[#allocation2 + $0x50] ss:$0 sps:$4 sm:$0x11]  }
 0x2f0   :  { %19545 = vst [vmem:[#allocation50_spill] sm:$0xff] %v17292_v19  ;;  %v6646_v39 = vor.u32 %v6644_v32, %v6643_v37  ;;  %v6647_v8 = vrot.slane %v6643_v37, 4  ;;  %v6654_v49 = vor.u32 %v6652_v50, %v6651_v27  ;;  %v6656_v26 = vrot.slane %v6651_v27, 4  ;;  %v13991_v35 = vld [vmem:[#allocation2 + $0x50] ss:$0 sps:$4 sm:$0x11]   ;;  %8834 = vrot.lane.b32.xlu0 %v17292_v19, %s14631_s18 }
 0x2f1   :  { %v6337_v28 = vmax.bf16 %v19501_v46, %v6305_v33  ;;  %v8089_v23 = vrot.slane %v8087_v56, 1  ;;  %v6226_v18 = vpack.c.bf16 %v6038_v4, %v6035_v31  ;;  %v7396_v15 = vld [vmem:[#allocation2 + $0x48] sm:$0xf]  ;;  %v7397_v24 = vld [vmem:[#allocation2 + $0x4c] sm:$0xf]  ;;  %v17299_v61 = vpop.f32.mrb[44].mxu1  ;;  %v13107_v32 = vcombine.low %v7740_v10, %v7649_v2 }
 0x2f2   :  { %v6655_v63 = vsel %vm14999_vm5, %v6647_v8, %v6654_v49  ;;  %v7210_v5 = vsel %vm15012_vm6, %v6646_v39, %v7209_v62  ;;  %v7214_v7 = vsel %vm15018_vm7, %v6656_v26, %v7213_v22  ;;  %v5753_v50 = vpop.f32.mrb[40].mxu0  ;;  %v17307_v16 = vpop.f32.mrb[45].mxu1  ;;  %v7524_v56 = vld [vmem:[#allocation2 + $0x54] sm:$0xf]  ;;  %v10437_v4 = vrot.slane %v13987_v13, 1 }
 0x2f3   :  { %7212 = vst.msk [vmem:[#allocation2 + $0x64] sm:$0xf] %vm28_vm0, %v6655_v63  ;;  %7215 = vst [vmem:[#allocation2 + $0x68] sm:$0x1] %v7214_v7  ;;  %v12799_v30 = vcombine.low %v6337_v28, %v6337_v28  ;;  %v12800_v58 = vcombine.high %v6337_v28, %v6337_v28  ;;  %v8090_v37 = vor.u32 %v8089_v23, %v8085_v6  ;;  %v5755_v33 = vpop.f32.mrb[41].mxu0  ;;  %v17311_v31 = vpop.f32.mrb[46].mxu1 }
 0x2f4   :  { %7211 = vst [vmem:[#allocation2 + $0x60] sm:$0xf] %v7210_v5  ;;  %v6266_v27 = vmul.bf16 %v17062_v42, %v6226_v18  ;;  %v10436_v62 = vrot.slane %v13107_v32, 1  ;;  %v17313_v22 = vcombine.low %v7396_v15, %v7397_v24  ;;  %v8104_v2 = vshll.u32 %v13991_v35, 16  ;;  %v7525_v10 = vld [vmem:[#allocation2 + $0x58] sm:$0xf] }
 0x2f5   :  { %v5756_v39 = vpop.f32.mrb[42].mxu0  ;;  %v6658_v8 = vshrl.u32 %v12799_v30, 16  ;;  %v6661_v49 = vshll.u32 %v12799_v30, 16  ;;  %v6666_v26 = vshrl.u32 %v12800_v58, 16  ;;  %v6669_v63 = vshll.u32 %v12800_v58, 16  ;;  %v17315_v28 = vpop.f32.mrb[47].mxu1 }
 0x2f6   :  { %19546 = vst [vmem:[#allocation16_spill] sm:$0xff] %v17313_v22  ;;  %v5758_v5 = vpop.f32.mrb[43].mxu0  ;;  %v7216_v6 = vld [vmem:[#allocation2 + $0x6c] sm:$0xf]  ;;  %v8095_v23 = vsel %vm2019_vm8, %v8090_v37, %v8094_v9  ;;  %v6306_v18 = vadd.bf16 %v17069_v45, %v6266_v27  ;;  %v10438_v7 = vsel %vm2564_vm9, %v10436_v62, %v10437_v4  ;;  %v8097_v13 = vshrl.u32 %v17313_v22, 16 }
 0x2f7   :  { %v6660_v15 = vrot.slane %v6658_v8, 7  ;;  %v6668_v35 = vrot.slane %v6666_v26, 7  ;;  %8418 = vrot.lane.b32.xlu1 %v8095_v23, %s14631_s18  ;;  %13363 = vmatprep.mubr.msk.bf16.mxu0 %vm4517_vm10, %v10438_v7  ;;  %v8099_v24 = vshll.u32 %v17313_v22, 16  ;;  %v8106_v32 = vrot.slane %v8104_v2, 1  ;;  %v7220_v30 = vld [vmem:[#allocation2 + $0x74] sm:$0x1] }
 0x2f8   :  { %v6338_v58 = vmax.bf16 %v19501_v46, %v6306_v18  ;;  %v17325_v33 = vcombine.low %v7524_v56, %v7525_v10  ;;  %v6043_v9 = vadd.f32 %v17019_v34, %v5753_v50  ;;  %v6046_v37 = vadd.f32 %v17024_v0, %v5756_v39  ;;  %v7651_v27 = vld [vmem:[#allocation2 + $0x58] sm:$0xf]  ;;  %v7741_v62 = vld [vmem:[#allocation2 + $0x54] sm:$0xe] }
 0x2f9   :  { %v6663_v4 = vor.u32 %v6661_v49, %v6660_v15  ;;  %v6664_v8 = vrot.slane %v6660_v15, 4  ;;  %v6671_v26 = vor.u32 %v6669_v63, %v6668_v35  ;;  %v6673_v5 = vrot.slane %v6668_v35, 4  ;;  %v13994_v23 = vld [vmem:[#allocation2 + $0x5c] ss:$0 sps:$4 sm:$0x11]   ;;  %v5761_v18 = vpop.f32.mrb[44].mxu0 }
 0x2fa   :  { %19547 = vst [vmem:[#allocation51_spill] sm:$0xff] %v17325_v33  ;;  %v12801_v7 = vcombine.low %v6338_v58, %v6338_v58  ;;  %v12802_v19 = vcombine.high %v6338_v58, %v6338_v58  ;;  %v8101_v54 = vrot.slane %v8099_v24, 1  ;;  %8836 = vrot.lane.b32.xlu0 %v17325_v33, %s14631_s18  ;;  %v6227_v2 = vpack.c.bf16 %v6046_v37, %v6043_v9  ;;  %v7398_v56 = vld [vmem:[#allocation2 + $0x54] sm:$0xf]  ;;  %v7399_v10 = vld [vmem:[#allocation2 + $0x58] sm:$0xf] }
 0x2fb   :  { %v6672_v34 = vsel %vm14999_vm5, %v6664_v8, %v6671_v26  ;;  %v7217_v0 = vsel %vm15012_vm6, %v6663_v4, %v7216_v6  ;;  %v7221_v50 = vsel %vm15018_vm7, %v6673_v5, %v7220_v30  ;;  %v17337_v39 = vld [vmem:[#allocation2 + $0x5c] ss:$0 sps:$4 sm:$0x11]   ;;  %v7526_v49 = vld [vmem:[#allocation2 + $0x60] sm:$0xf]  ;;  %v5763_v63 = vpop.f32.mrb[45].mxu0  ;;  %v13108_v6 = vcombine.low %v7741_v62, %v7651_v27 }
 0x2fc   :  { %7219 = vst.msk [vmem:[#allocation2 + $0x70] sm:$0xf] %vm28_vm0, %v6672_v34  ;;  %7222 = vst [vmem:[#allocation2 + $0x74] sm:$0x1] %v7221_v50  ;;  %v6675_v15 = vshrl.u32 %v12801_v7, 16  ;;  %v6678_v35 = vshll.u32 %v12801_v7, 16  ;;  %v8102_v37 = vor.u32 %v8101_v54, %v8097_v13  ;;  %v6267_v8 = vmul.bf16 %v17062_v42, %v6227_v2 }
 0x2fd   :  { %7218 = vst [vmem:[#allocation2 + $0x6c] sm:$0xf] %v7217_v0  ;;  %v6683_v24 = vshrl.u32 %v12802_v19, 16  ;;  %v7527_v58 = vld [vmem:[#allocation2 + $0x64] sm:$0xf]  ;;  %v5764_v9 = vpop.f32.mrb[46].mxu0  ;;  %v17341_v63 = vcombine.low %v7398_v56, %v7399_v10 }
 0x2fe   :  { %v10440_v4 = vrot.slane %v13994_v23, 1  ;;  %v5766_v26 = vpop.f32.mrb[47].mxu0  ;;  %v6677_v30 = vrot.slane %v6675_v15, 7  ;;  %v6686_v33 = vshll.u32 %v12802_v19, 16  ;;  %v7223_v22 = vld [vmem:[#allocation2 + $0x78] sm:$0xf]  ;;  %v8107_v0 = vsel %vm2019_vm8, %v8102_v37, %v8106_v32 }
 0x2ff   :  { %v6685_v5 = vrot.slane %v6683_v24, 7  ;;  %19548 = vst [vmem:[#allocation17_spill] sm:$0xff] %v17341_v63  ;;  %v7227_v34 = vld [vmem:[#allocation2 + $0x80] sm:$0x1]  ;;  %v6307_v7 = vadd.bf16 %v17069_v45, %v6267_v8  ;;  %v10439_v50 = vrot.slane %v13108_v6, 1  ;;  %v17345_v38 = vcombine.low %v7526_v49, %v7527_v58  ;;  %8420 = vrot.lane.b32.xlu1 %v8107_v0, %s14631_s18 }
 0x300   :  { %v14001_v54 = vld [vmem:[#allocation2 + $0x68] ss:$0 sps:$4 sm:$0x11]   ;;  %v6680_v13 = vor.u32 %v6678_v35, %v6677_v30  ;;  %v6681_v2 = vrot.slane %v6677_v30, 4  ;;  %v8111_v56 = vshll.u32 %v17341_v63, 16  ;;  %v8116_v32 = vshll.u32 %v17337_v39, 16 }
 0x301   :  { %19549 = vst [vmem:[#allocation52_spill] sm:$0xff] %v17345_v38  ;;  %v6688_v27 = vor.u32 %v6686_v33, %v6685_v5  ;;  %v6690_v62 = vrot.slane %v6685_v5, 4  ;;  %v6339_v19 = vmax.bf16 %v19501_v46, %v6307_v7  ;;  %v10441_v23 = vsel %vm2564_vm9, %v10439_v50, %v10440_v4  ;;  %8838 = vrot.lane.b32.xlu0 %v17345_v38, %s14631_s18  ;;  %v7653_v10 = vld [vmem:[#allocation2 + $0x64] sm:$0xf]  ;;  %v7742_v49 = vld [vmem:[#allocation2 + $0x60] sm:$0xe] }
 0x302   :  { %v7224_v33 = vsel %vm15012_vm6, %v6680_v13, %v7223_v22  ;;  %13364 = vmatmul.mubr.msk.bf16.gmra.mrb[136].mxu0 %vm4517_vm10, %v10441_v23  ;;  %v8109_v24 = vshrl.u32 %v17341_v63, 16  ;;  %v7400_v58 = vld [vmem:[#allocation2 + $0x60] sm:$0xf]  ;;  %v7401_v39 = vld [vmem:[#allocation2 + $0x64] sm:$0xf]  ;;  %v5769_v37 = vpop.f32.mrb[48].mxu0  ;;  %v6051_v26 = vadd.f32 %v17017_v43, %v5761_v18  ;;  %v6054_v5 = vadd.f32 %v17021_v52, %v5764_v9 }
 0x303   :  { %v6689_v15 = vsel %vm14999_vm5, %v6681_v2, %v6688_v27  ;;  %v7228_v35 = vsel %vm15018_vm7, %v6690_v62, %v7227_v34  ;;  %7225 = vst [vmem:[#allocation2 + $0x78] sm:$0xf] %v7224_v33  ;;  %v12803_v8 = vcombine.low %v6339_v19, %v6339_v19  ;;  %v12804_v6 = vcombine.high %v6339_v19, %v6339_v19  ;;  %v14005_v22 = vld [vmem:[#allocation2 + $0x68] ss:$0 sps:$4 sm:$0x11]   ;;  %v5771_v30 = vpop.f32.mrb[49].mxu0 }
 0x304   :  { %7226 = vst.msk [vmem:[#allocation2 + $0x7c] sm:$0xf] %vm28_vm0, %v6689_v15  ;;  %7229 = vst [vmem:[#allocation2 + $0x80] sm:$0x1] %v7228_v35  ;;  %v8113_v4 = vrot.slane %v8111_v56, 1  ;;  %v13109_v34 = vcombine.low %v7742_v49, %v7653_v10  ;;  %v10443_v0 = vrot.slane %v14001_v54, 1  ;;  %v6228_v43 = vpack.c.bf16 %v6054_v5, %v6051_v26 }
 0x305   :  { %v7528_v7 = vld [vmem:[#allocation2 + $0x6c] sm:$0xf]  ;;  %v7529_v50 = vld [vmem:[#allocation2 + $0x70] sm:$0xf]  ;;  %v5772_v13 = vpop.f32.mrb[50].mxu0  ;;  %v6692_v2 = vshrl.u32 %v12803_v8, 16  ;;  %v17367_v30 = vcombine.low %v7400_v58, %v7401_v39 }
 0x306   :  { %v6695_v27 = vshll.u32 %v12803_v8, 16  ;;  %v6700_v62 = vshrl.u32 %v12804_v6, 16  ;;  %v8118_v23 = vrot.slane %v8116_v32, 1  ;;  %v5774_v15 = vpop.f32.mrb[51].mxu0  ;;  %v17365_v33 = vpop.f32.mrb[48].mxu1  ;;  %v8114_v35 = vor.u32 %v8113_v4, %v8109_v24 }
 0x307   :  { %v7230_v19 = vld [vmem:[#allocation2 + $0x84] sm:$0xf]  ;;  %v7234_v56 = vld [vmem:[#allocation2 + $0x8c] sm:$0x1]  ;;  %v10442_v18 = vrot.slane %v13109_v34, 1  ;;  %19550 = vst [vmem:[#allocation18_spill] sm:$0xff] %v17367_v30  ;;  %v17371_v49 = vcombine.low %v7528_v7, %v7529_v50  ;;  %v6268_v15 = vmul.bf16 %v17062_v42, %v6228_v43 }
 0x308   :  { %v17369_v52 = vpop.f32.mrb[49].mxu1  ;;  %v6694_v9 = vrot.slane %v6692_v2, 7  ;;  %v6702_v54 = vrot.slane %v6700_v62, 7  ;;  %v6703_v10 = vshll.u32 %v12804_v6, 16  ;;  %v7655_v8 = vld [vmem:[#allocation2 + $0x70] sm:$0xf]  ;;  %v8119_v32 = vsel %vm2019_vm8, %v8114_v35, %v8118_v23 }
 0x309   :  { %19551 = vst [vmem:[#allocation55_spill] sm:$0xff] %v17371_v49  ;;  %v10444_v38 = vsel %vm2564_vm9, %v10442_v18, %v10443_v0  ;;  %v8128_v63 = vshll.u32 %v14005_v22, 16  ;;  %v14008_v24 = vld [vmem:[#allocation2 + $0x74] ss:$0 sps:$4 sm:$0x11]   ;;  %v17376_v4 = vpop.f32.mrb[50].mxu1  ;;  %8422 = vrot.lane.b32.xlu1 %v8119_v32, %s14631_s18  ;;  %v6308_v34 = vadd.bf16 %v17069_v45, %v6268_v15  ;;  %8840 = vrot.lane.b32.xlu0 %v17371_v49, %s14631_s18 }
 0x30a   :  { %v6697_v58 = vor.u32 %v6695_v27, %v6694_v9  ;;  %v6698_v39 = vrot.slane %v6694_v9, 4  ;;  %v6705_v26 = vor.u32 %v6703_v10, %v6702_v54  ;;  %v6707_v5 = vrot.slane %v6702_v54, 4  ;;  %13367 = vmatprep.mubr.msk.bf16.mxu0 %vm4517_vm10, %v10444_v38  ;;  %v7743_v6 = vld [vmem:[#allocation2 + $0x6c] sm:$0xe]  ;;  %v7403_v50 = vld [vmem:[#allocation2 + $0x70] sm:$0xf] }
 0x30b   :  { %v8123_v7 = vshll.u32 %v17367_v30, 16  ;;  %v6059_v22 = vadd.f32 %v17038_v60, %v5769_v37  ;;  %v7402_v0 = vld [vmem:[#allocation2 + $0x6c] sm:$0xf]  ;;  %v5777_v2 = vpop.f32.mrb[52].mxu0  ;;  %v6062_v23 = vadd.f32 %v17048_v55, %v5772_v13  ;;  %v17392_v18 = vpop.f32.mrb[51].mxu1  ;;  %v6340_v60 = vmax.bf16 %v19501_v46, %v6308_v34 }
 0x30c   :  { %v6706_v27 = vsel %vm14999_vm5, %v6698_v39, %v6705_v26  ;;  %v7231_v62 = vsel %vm15012_vm6, %v6697_v58, %v7230_v19  ;;  %v7235_v38 = vsel %vm15018_vm7, %v6707_v5, %v7234_v56  ;;  %v14012_v35 = vld [vmem:[#allocation2 + $0x74] ss:$0 sps:$4 sm:$0x11]   ;;  %v5779_v43 = vpop.f32.mrb[53].mxu0  ;;  %v8121_v37 = vshrl.u32 %v17367_v30, 16 }
 0x30d   :  { %7233 = vst.msk [vmem:[#allocation2 + $0x88] sm:$0xf] %vm28_vm0, %v6706_v27  ;;  %7236 = vst [vmem:[#allocation2 + $0x8c] sm:$0x1] %v7235_v38  ;;  %v8125_v9 = vrot.slane %v8123_v7, 1  ;;  %v13110_v54 = vcombine.low %v7743_v6, %v7655_v8  ;;  %v5780_v19 = vpop.f32.mrb[54].mxu0  ;;  %v6229_v32 = vpack.c.bf16 %v6062_v23, %v6059_v22  ;;  %v17397_v15 = vcombine.low %v7402_v0, %v7403_v50 }
 0x30e   :  { %7232 = vst [vmem:[#allocation2 + $0x84] sm:$0xf] %v7231_v62  ;;  %v8130_v10 = vrot.slane %v8128_v63, 1  ;;  %v10446_v56 = vrot.slane %v14008_v24, 1  ;;  %v5782_v55 = vpop.f32.mrb[55].mxu0  ;;  %v12805_v13 = vcombine.low %v6340_v60, %v6340_v60  ;;  %v12806_v58 = vcombine.high %v6340_v60, %v6340_v60 }
 0x30f   :  { %19552 = vst [vmem:[#allocation19_spill] sm:$0xff] %v17397_v15  ;;  %v8126_v39 = vor.u32 %v8125_v9, %v8121_v37  ;;  %v10445_v26 = vrot.slane %v13110_v54, 1  ;;  %v7530_v5 = vld [vmem:[#allocation2 + $0x78] sm:$0xf]  ;;  %v6269_v27 = vmul.bf16 %v17062_v42, %v6229_v32  ;;  %v8133_v34 = vshrl.u32 %v17397_v15, 16 }
 0x310   :  { %v8135_v62 = vshll.u32 %v17397_v15, 16  ;;  %v8140_v7 = vshll.u32 %v14012_v35, 16  ;;  %v7531_v8 = vld [vmem:[#allocation2 + $0x7c] sm:$0xf]  ;;  %v6709_v6 = vshrl.u32 %v12805_v13, 16  ;;  %v6712_v63 = vshll.u32 %v12805_v13, 16 }
 0x311   :  { %v6717_v22 = vshrl.u32 %v12806_v58, 16  ;;  %v6720_v24 = vshll.u32 %v12806_v58, 16  ;;  %v7237_v0 = vld [vmem:[#allocation2 + $0x90] sm:$0xf]  ;;  %v7241_v50 = vld [vmem:[#allocation2 + $0x98] sm:$0x1]  ;;  %v8131_v38 = vsel %vm2019_vm8, %v8126_v39, %v8130_v10  ;;  %v6309_v23 = vadd.bf16 %v17069_v45, %v6269_v27 }
 0x312   :  { %v10447_v43 = vsel %vm2564_vm9, %v10445_v26, %v10446_v56  ;;  %v8137_v60 = vrot.slane %v8135_v62, 1  ;;  %v7657_v37 = vld [vmem:[#allocation2 + $0x7c] sm:$0xf]  ;;  %v6711_v9 = vrot.slane %v6709_v6, 7  ;;  %8424 = vrot.lane.b32.xlu1 %v8131_v38, %s14631_s18  ;;  %v17407_v35 = vcombine.low %v7530_v5, %v7531_v8  ;;  %v17410_v13 = vpop.f32.mrb[56].mxu0 }
 0x313   :  { %v6719_v54 = vrot.slane %v6717_v22, 7  ;;  %13368 = vmatmul.mubr.msk.bf16.gmra.mrb[140].mxu0 %vm4517_vm10, %v10447_v43  ;;  %v6067_v32 = vadd.f32 %v17035_v12, %v5777_v2  ;;  %v14015_v55 = vld [vmem:[#allocation2 + $0x80] ss:$0 sps:$4 sm:$0x11]   ;;  %v6341_v10 = vmax.bf16 %v19501_v46, %v6309_v23  ;;  %v8142_v39 = vrot.slane %v8140_v7, 1  ;;  %v5787_v62 = vpop.f32.mrb[57].mxu0 }
 0x314   :  { %19553 = vst [vmem:[#allocation58_spill] sm:$0xff] %v17407_v35  ;;  %v8138_v58 = vor.u32 %v8137_v60, %v8133_v34  ;;  %v6070_v56 = vadd.f32 %v17046_v57, %v5780_v19  ;;  %v7744_v26 = vld [vmem:[#allocation2 + $0x78] sm:$0xe]  ;;  %v6714_v6 = vor.u32 %v6712_v63, %v6711_v9  ;;  %v6715_v22 = vrot.slane %v6711_v9, 4  ;;  %8842 = vrot.lane.b32.xlu0 %v17407_v35, %s14631_s18  ;;  %v7405_v12 = vld [vmem:[#allocation2 + $0x7c] sm:$0xf] }
 0x315   :  { %v7404_v27 = vld [vmem:[#allocation2 + $0x78] sm:$0xf]  ;;  %v6722_v38 = vor.u32 %v6720_v24, %v6719_v54  ;;  %v6724_v43 = vrot.slane %v6719_v54, 4  ;;  %v5788_v2 = vpop.f32.mrb[58].mxu0  ;;  %v12807_v5 = vcombine.low %v6341_v10, %v6341_v10  ;;  %v12808_v8 = vcombine.high %v6341_v10, %v6341_v10  ;;  %v7532_v9 = vld [vmem:[#allocation2 + $0x84] sm:$0xf] }
 0x316   :  { %v8143_v23 = vsel %vm2019_vm8, %v8138_v58, %v8142_v39  ;;  %v6230_v34 = vpack.c.bf16 %v6070_v56, %v6067_v32  ;;  %v14019_v7 = vld [vmem:[#allocation2 + $0x80] ss:$0 sps:$4 sm:$0x11]   ;;  %v5790_v60 = vpop.f32.mrb[59].mxu0  ;;  %v7238_v19 = vsel %vm15012_vm6, %v6714_v6, %v7237_v0  ;;  %v13111_v24 = vcombine.low %v7744_v26, %v7657_v37  ;;  %v7533_v54 = vld [vmem:[#allocation2 + $0x88] sm:$0xf] }
 0x317   :  { %v6723_v57 = vsel %vm14999_vm5, %v6715_v22, %v6722_v38  ;;  %v7242_v63 = vsel %vm15018_vm7, %v6724_v43, %v7241_v50  ;;  %8426 = vrot.lane.b32.xlu1 %v8143_v23, %s14631_s18  ;;  %7239 = vst [vmem:[#allocation2 + $0x90] sm:$0xf] %v7238_v19  ;;  %v6726_v32 = vshrl.u32 %v12807_v5, 16  ;;  %v6729_v10 = vshll.u32 %v12807_v5, 16  ;;  %v7244_v39 = vld [vmem:[#allocation2 + $0x9c] sm:$0xf] }
 0x318   :  { %7240 = vst.msk [vmem:[#allocation2 + $0x94] sm:$0xf] %vm28_vm0, %v6723_v57  ;;  %7243 = vst [vmem:[#allocation2 + $0x98] sm:$0x1] %v7242_v63  ;;  %v6734_v58 = vshrl.u32 %v12808_v8, 16  ;;  %v6270_v56 = vmul.bf16 %v17062_v42, %v6230_v34  ;;  %v10448_v62 = vrot.slane %v13111_v24, 1  ;;  %v17426_v6 = vcombine.low %v7404_v27, %v7405_v12 }
 0x319   :  { %v10449_v0 = vrot.slane %v14015_v55, 1  ;;  %v6728_v50 = vrot.slane %v6726_v32, 7  ;;  %v6737_v38 = vshll.u32 %v12808_v8, 16  ;;  %v7248_v37 = vld [vmem:[#allocation2 + $0xa4] sm:$0x1]  ;;  %v17428_v26 = vcombine.low %v7532_v9, %v7533_v54  ;;  %v5793_v63 = vpop.f32.mrb[60].mxu0 }
 0x31a   :  { %19554 = vst [vmem:[#allocation20_spill] sm:$0xff] %v17426_v6  ;;  %v6736_v22 = vrot.slane %v6734_v58, 7  ;;  %v6310_v43 = vadd.bf16 %v17069_v45, %v6270_v56  ;;  %v8147_v5 = vshll.u32 %v17426_v6, 16  ;;  %v8152_v60 = vshll.u32 %v14019_v7, 16  ;;  %v7659_v57 = vld [vmem:[#allocation2 + $0x88] sm:$0xf] }
 0x31b   :  { %19555 = vst [vmem:[#allocation60_spill] sm:$0xff] %v17428_v26  ;;  %v10450_v23 = vsel %vm2564_vm9, %v10448_v62, %v10449_v0  ;;  %v7745_v19 = vld [vmem:[#allocation2 + $0x84] sm:$0xe]  ;;  %v14022_v34 = vld [vmem:[#allocation2 + $0x8c] ss:$0 sps:$4 sm:$0x11]   ;;  %v6731_v55 = vor.u32 %v6729_v10, %v6728_v50  ;;  %8844 = vrot.lane.b32.xlu0 %v17428_v26, %s14631_s18  ;;  %v6075_v10 = vadd.f32 %v17077_v21, %v17410_v13 }
 0x31c   :  { %v6732_v27 = vrot.slane %v6728_v50, 4  ;;  %v6739_v12 = vor.u32 %v6737_v38, %v6736_v22  ;;  %v6741_v24 = vrot.slane %v6736_v22, 4  ;;  %13371 = vmatprep.mubr.msk.bf16.mxu0 %vm4517_vm10, %v10450_v23  ;;  %v7406_v8 = vld [vmem:[#allocation2 + $0x84] sm:$0xf]  ;;  %v5795_v9 = vpop.f32.mrb[61].mxu0  ;;  %v17436_v54 = vpop.f32.mrb[52].mxu1  ;;  %v6342_v32 = vmax.bf16 %v19501_v46, %v6310_v43 }
 0x31d   :  { %19556 = vst [vmem:[#allocation21_spill] sm:$0xff] %v17436_v54  ;;  %v8145_v7 = vshrl.u32 %v17426_v6, 16  ;;  %v8149_v58 = vrot.slane %v8147_v5, 1  ;;  %v7407_v56 = vld [vmem:[#allocation2 + $0x88] sm:$0xf]  ;;  %v5796_v62 = vpop.f32.mrb[62].mxu0  ;;  %v7245_v22 = vsel %vm15012_vm6, %v6731_v55, %v7244_v39  ;;  %v6078_v43 = vadd.f32 %v17084_v3, %v5788_v2 }
 0x31e   :  { %v17442_v0 = vpop.f32.mrb[53].mxu1  ;;  %v6740_v50 = vsel %vm14999_vm5, %v6732_v27, %v6739_v12  ;;  %v7249_v38 = vsel %vm15018_vm7, %v6741_v24, %v7248_v37  ;;  %v5798_v23 = vpop.f32.mrb[63].mxu0  ;;  %7246 = vst [vmem:[#allocation2 + $0x9c] sm:$0xf] %v7245_v22  ;;  %v12809_v21 = vcombine.low %v6342_v32, %v6342_v32  ;;  %v12810_v13 = vcombine.high %v6342_v32, %v6342_v32  ;;  %v7534_v39 = vld [vmem:[#allocation2 + $0x90] sm:$0xf] }
 0x31f   :  { %7247 = vst.msk [vmem:[#allocation2 + $0xa0] sm:$0xf] %vm28_vm0, %v6740_v50  ;;  %7250 = vst [vmem:[#allocation2 + $0xa4] sm:$0x1] %v7249_v38  ;;  %v8150_v5 = vor.u32 %v8149_v58, %v8145_v7  ;;  %v8154_v9 = vrot.slane %v8152_v60, 1  ;;  %v6231_v35 = vpack.c.bf16 %v6078_v43, %v6075_v10  ;;  %v13112_v27 = vcombine.low %v7745_v19, %v7659_v57  ;;  %v17454_v55 = vpop.f32.mrb[54].mxu1 }
 0x320   :  { %v14026_v26 = vld [vmem:[#allocation2 + $0x8c] ss:$0 sps:$4 sm:$0x11]   ;;  %v10452_v12 = vrot.slane %v14022_v34, 1  ;;  %v17452_v49 = vcombine.low %v7406_v8, %v7407_v56  ;;  %19558 = vst [vmem:[#allocation23_spill] sm:$0xff] %v17454_v55  ;;  %v6743_v37 = vshrl.u32 %v12809_v21, 16 }
 0x321   :  { %v6746_v3 = vshll.u32 %v12809_v21, 16  ;;  %v6751_v2 = vshrl.u32 %v12810_v13, 16  ;;  %v6754_v24 = vshll.u32 %v12810_v13, 16  ;;  %v7535_v50 = vld [vmem:[#allocation2 + $0x94] sm:$0xf]  ;;  %v8155_v32 = vsel %vm2019_vm8, %v8150_v5, %v8154_v9  ;;  %v17459_v19 = vpop.f32.mrb[55].mxu1 }
 0x322   :  { %19557 = vst [vmem:[#allocation22_spill] sm:$0xff] %v17452_v49  ;;  %v7251_v38 = vld [vmem:[#allocation2 + $0xa8] sm:$0xf]  ;;  %v7255_v22 = vld [vmem:[#allocation2 + $0xb0] sm:$0x1]  ;;  %v6271_v60 = vmul.bf16 %v17062_v42, %v6231_v35  ;;  %v10451_v7 = vrot.slane %v13112_v27, 1  ;;  %8428 = vrot.lane.b32.xlu1 %v8155_v32, %s14631_s18  ;;  %v17467_v21 = vcombine.low %v7534_v39, %v7535_v50  ;;  %v6083_v35 = vadd.f32 %v17071_v41, %v5793_v63 }
 0x323   :  { %v8157_v57 = vshrl.u32 %v17452_v49, 16  ;;  %v6745_v34 = vrot.slane %v6743_v37, 7  ;;  %v6753_v8 = vrot.slane %v6751_v2, 7  ;;  %v8159_v58 = vshll.u32 %v17452_v49, 16  ;;  %v17463_v56 = vld [vmem:[#allocation2 + $0xc] sm:$0xe] }
 0x324   :  { %v8164_v10 = vshll.u32 %v14026_v26, 16  ;;  %v6311_v43 = vadd.bf16 %v17069_v45, %v6271_v60  ;;  %v10453_v23 = vsel %vm2564_vm9, %v10451_v7, %v10452_v12  ;;  %19559 = vst [vmem:[#allocation24_spill] sm:$0xff] %v17467_v21  ;;  %v7661_v13 = vld [vmem:[#allocation2 + $0x94] sm:$0xf]  ;;  %v7746_v5 = vld [vmem:[#allocation2 + $0x90] sm:$0xe]  ;;  %8846 = vrot.lane.b32.xlu0 %v17467_v21, %s14631_s18  ;;  %v6086_v41 = vadd.f32 %v17081_v25, %v5796_v62 }
 0x325   :  { %v14029_v9 = vld [vmem:[#allocation2 + $0x98] ss:$0 sps:$4 sm:$0x11]   ;;  %v5801_v27 = vpop.f32.mrb[64].mxu0  ;;  %v6748_v37 = vor.u32 %v6746_v3, %v6745_v34  ;;  %v6749_v2 = vrot.slane %v6745_v34, 4  ;;  %v6756_v32 = vor.u32 %v6754_v24, %v6753_v8  ;;  %v6758_v6 = vrot.slane %v6753_v8, 4  ;;  %13372 = vmatmul.mubr.msk.bf16.gmra.mrb[144].mxu0 %vm4517_vm10, %v10453_v23 }
 0x326   :  { %v7408_v26 = vld [vmem:[#allocation2 + $0x90] sm:$0xf]  ;;  %v5803_v49 = vpop.f32.mrb[65].mxu0  ;;  %v6343_v60 = vmax.bf16 %v19501_v46, %v6311_v43  ;;  %v8161_v15 = vrot.slane %v8159_v58, 1  ;;  %v7409_v63 = vld [vmem:[#allocation2 + $0x94] sm:$0xf]  ;;  %v6232_v58 = vpack.c.bf16 %v6086_v41, %v6083_v35  ;;  %v13113_v23 = vcombine.low %v7746_v5, %v7661_v13 }
 0x327   :  { %v17475_v12 = vld [vmem:[#allocation2 + $0x98] ss:$0 sps:$4 sm:$0x11]   ;;  %v6757_v39 = vsel %vm14999_vm5, %v6749_v2, %v6756_v32  ;;  %v7252_v3 = vsel %vm15012_vm6, %v6748_v37, %v7251_v38  ;;  %v7256_v49 = vsel %vm15018_vm7, %v6758_v6, %v7255_v22  ;;  %v5804_v24 = vpop.f32.mrb[66].mxu0  ;;  %v17483_v50 = vld [vmem:[#allocation2] sm:$0xe]  ;;  %v17490_v22 = vcombine.low %v7408_v26, %v7409_v63 }
 0x328   :  { %v17485_v7 = vld [vmem:[#allocation2 + $0x10] sm:$0xf]  ;;  %7254 = vst.msk [vmem:[#allocation2 + $0xac] sm:$0xf] %vm28_vm0, %v6757_v39  ;;  %7257 = vst [vmem:[#allocation2 + $0xb0] sm:$0x1] %v7256_v49  ;;  %v12811_v62 = vcombine.low %v6343_v60, %v6343_v60  ;;  %v12812_v34 = vcombine.high %v6343_v60, %v6343_v60  ;;  %v8162_v8 = vor.u32 %v8161_v15, %v8157_v57 }
 0x329   :  { %7253 = vst [vmem:[#allocation2 + $0xa8] sm:$0xf] %v7252_v3  ;;  %v5806_v38 = vpop.f32.mrb[67].mxu0  ;;  %v8166_v43 = vrot.slane %v8164_v10, 1  ;;  %v10455_v6 = vrot.slane %v14029_v9, 1  ;;  %v8176_v21 = vshll.u32 %v17475_v12, 16  ;;  %v6272_v35 = vmul.bf16 %v17062_v42, %v6232_v58 }
 0x32a   :  { %v7536_v37 = vld [vmem:[#allocation2 + $0x9c] sm:$0xf]  ;;  %v6760_v2 = vshrl.u32 %v12811_v62, 16  ;;  %v6768_v32 = vshrl.u32 %v12812_v34, 16  ;;  %v7537_v25 = vld [vmem:[#allocation2 + $0xa0] sm:$0xf] }
 0x32b   :  { %v17493_v55 = vld [vmem:[#allocation2 + $0x4] sm:$0xf]  ;;  %v6763_v60 = vshll.u32 %v12811_v62, 16  ;;  %v7258_v15 = vld [vmem:[#allocation2 + $0xb4] sm:$0xf]  ;;  %v8167_v10 = vsel %vm2019_vm8, %v8162_v8, %v8166_v43  ;;  %v10454_v13 = vrot.slane %v13113_v23, 1  ;;  %v6312_v49 = vadd.bf16 %v17069_v45, %v6272_v35 }
 0x32c   :  { %v7262_v57 = vld [vmem:[#allocation2 + $0xbc] sm:$0x1]  ;;  %v7663_v5 = vld [vmem:[#allocation2 + $0xa0] sm:$0xf]  ;;  %v7747_v9 = vld [vmem:[#allocation2 + $0x9c] sm:$0xe]  ;;  %8430 = vrot.lane.b32.xlu1 %v8167_v10, %s14631_s18  ;;  %v17503_v38 = vcombine.low %v7536_v37, %v7537_v25  ;;  %v6091_v8 = vadd.f32 %v17105_v40, %v5801_v27  ;;  %v6094_v40 = vadd.f32 %v17113_v36, %v5804_v24 }
 0x32d   :  { %v6762_v26 = vrot.slane %v6760_v2, 7  ;;  %v6770_v41 = vrot.slane %v6768_v32, 7  ;;  %v6771_v63 = vshll.u32 %v12812_v34, 16  ;;  %v8171_v12 = vshll.u32 %v17490_v22, 16  ;;  %v5809_v3 = vpop.f32.mrb[68].mxu0 }
 0x32e   :  { %v10456_v62 = vsel %vm2564_vm9, %v10454_v13, %v10455_v6  ;;  %19560 = vst [vmem:[#allocation25_spill] sm:$0xff] %v17503_v38  ;;  %v14036_v58 = vld [vmem:[#allocation2 + $0xa4] ss:$0 sps:$4 sm:$0x11]   ;;  %v7410_v43 = vld [vmem:[#allocation2 + $0x9c] sm:$0xf]  ;;  %v6344_v30 = vmax.bf16 %v19501_v46, %v6312_v49  ;;  %8848 = vrot.lane.b32.xlu0 %v17503_v38, %s14631_s18  ;;  %v6233_v24 = vpack.c.bf16 %v6094_v40, %v6091_v8 }
 0x32f   :  { %v5811_v23 = vpop.f32.mrb[69].mxu0  ;;  %v6765_v39 = vor.u32 %v6763_v60, %v6762_v26  ;;  %v6766_v2 = vrot.slane %v6762_v26, 4  ;;  %v6773_v32 = vor.u32 %v6771_v63, %v6770_v41  ;;  %v6775_v34 = vrot.slane %v6770_v41, 4  ;;  %13375 = vmatprep.mubr.msk.bf16.mxu0 %vm4517_vm10, %v10456_v62  ;;  %v7411_v10 = vld [vmem:[#allocation2 + $0xa0] sm:$0xf] }
 0x330   :  { %v5812_v54 = vpop.f32.mrb[70].mxu0  ;;  %v8169_v35 = vshrl.u32 %v17490_v22, 16  ;;  %v8173_v6 = vrot.slane %v8171_v12, 1  ;;  %v17512_v27 = vld [vmem:[#allocation2 + $0xa4] ss:$0 sps:$4 sm:$0x11]   ;;  %v13114_v26 = vcombine.low %v7747_v9, %v7663_v5  ;;  %v12813_v41 = vcombine.low %v6344_v30, %v6344_v30 }
 0x331   :  { %v5814_v25 = vpop.f32.mrb[71].mxu0  ;;  %v6774_v37 = vsel %vm14999_vm5, %v6766_v2, %v6773_v32  ;;  %v7259_v60 = vsel %vm15012_vm6, %v6765_v39, %v7258_v15  ;;  %v7263_v13 = vsel %vm15018_vm7, %v6775_v34, %v7262_v57  ;;  %v12814_v63 = vcombine.high %v6344_v30, %v6344_v30  ;;  %v17521_v12 = vpop.f32.mrb[56].mxu1  ;;  %v7538_v39 = vld [vmem:[#allocation2 + $0xa8] sm:$0xf]  ;;  %v7539_v32 = vld [vmem:[#allocation2 + $0xac] sm:$0xf] }
 0x332   :  { %7261 = vst.msk [vmem:[#allocation2 + $0xb8] sm:$0xf] %vm28_vm0, %v6774_v37  ;;  %7264 = vst [vmem:[#allocation2 + $0xbc] sm:$0x1] %v7263_v13  ;;  %v8174_v36 = vor.u32 %v8173_v6, %v8169_v35  ;;  %v8178_v49 = vrot.slane %v8176_v21, 1  ;;  %v10457_v62 = vrot.slane %v13114_v26, 1  ;;  %v17523_v2 = vcombine.low %v7410_v43, %v7411_v10 }
 0x333   :  { %7260 = vst [vmem:[#allocation2 + $0xb4] sm:$0xf] %v7259_v60  ;;  %v10458_v23 = vrot.slane %v14036_v58, 1  ;;  %v17525_v15 = vpop.f32.mrb[57].mxu1  ;;  %v6777_v57 = vshrl.u32 %v12813_v41, 16  ;;  %v6785_v5 = vshrl.u32 %v12814_v63, 16  ;;  %v19561_v30 = vcombine.low %v17463_v56, %v17485_v7 }
 0x334   :  { %v8188_v9 = vshll.u32 %v17512_v27, 16  ;;  %v6780_v8 = vshll.u32 %v12813_v41, 16  ;;  %v7265_v35 = vld [vmem:[#allocation2 + $0xc0] sm:$0xf]  ;;  %v7269_v21 = vld [vmem:[#allocation2 + $0xc8] sm:$0x1]  ;;  %v8179_v58 = vsel %vm2019_vm8, %v8174_v36, %v8178_v49  ;;  %v6273_v43 = vmul.bf16 %v17062_v42, %v6233_v24 }
 0x335   :  { %v17531_v34 = vrot.slane %v19561_v30, 1  ;;  %v10459_v10 = vsel %vm2564_vm9, %v10457_v62, %v10458_v23  ;;  %v7665_v6 = vld [vmem:[#allocation2 + $0xac] sm:$0xf]  ;;  %v6779_v40 = vrot.slane %v6777_v57, 7  ;;  %v6787_v25 = vrot.slane %v6785_v5, 7  ;;  %8432 = vrot.lane.b32.xlu1 %v8179_v58, %s14631_s18  ;;  %v5817_v27 = vpop.f32.mrb[72].mxu0 }
 0x336   :  { %v6788_v37 = vshll.u32 %v12814_v63, 16  ;;  %13376 = vmatmul.mubr.msk.bf16.gmra.mrb[148].mxu0 %vm4517_vm10, %v10459_v10  ;;  %v8183_v56 = vshll.u32 %v17523_v2, 16  ;;  %v14043_v7 = vld [vmem:[#allocation2 + $0xb0] ss:$0 sps:$4 sm:$0x11]   ;;  %v6313_v60 = vadd.bf16 %v17069_v45, %v6273_v43  ;;  %v17540_v13 = vcombine.low %v7538_v39, %v7539_v32  ;;  %v5819_v49 = vpop.f32.mrb[73].mxu0 }
 0x337   :  { %v6099_v26 = vadd.f32 %v17101_v11, %v5809_v3  ;;  %v6102_v41 = vadd.f32 %v17111_v59, %v5812_v54  ;;  %v7748_v36 = vld [vmem:[#allocation2 + $0xa8] sm:$0xe]  ;;  %v17544_v63 = vpop.f32.mrb[58].mxu1  ;;  %v6782_v62 = vor.u32 %v6780_v8, %v6779_v40  ;;  %v6783_v23 = vrot.slane %v6779_v40, 4  ;;  %v7413_v30 = vld [vmem:[#allocation2 + $0xac] sm:$0xf] }
 0x338   :  { %19562 = vst [vmem:[#allocation26_spill] sm:$0xff] %v17540_v13  ;;  %v7412_v24 = vld [vmem:[#allocation2 + $0xa8] sm:$0xf]  ;;  %v6790_v57 = vor.u32 %v6788_v37, %v6787_v25  ;;  %v6792_v5 = vrot.slane %v6787_v25, 4  ;;  %v5820_v58 = vpop.f32.mrb[74].mxu0  ;;  %v17546_v10 = vpop.f32.mrb[59].mxu1  ;;  %v6345_v39 = vmax.bf16 %v19501_v46, %v6313_v60  ;;  %8850 = vrot.lane.b32.xlu0 %v17540_v13, %s14631_s18  ;;  %v13115_v25 = vcombine.low %v7748_v36, %v7665_v6 }
 0x339   :  { %v8181_v32 = vshrl.u32 %v17523_v2, 16  ;;  %v8185_v11 = vrot.slane %v8183_v56, 1  ;;  %v6234_v59 = vpack.c.bf16 %v6102_v41, %v6099_v26  ;;  %v14047_v54 = vld [vmem:[#allocation2 + $0xb0] ss:$0 sps:$4 sm:$0x11]   ;;  %v5822_v3 = vpop.f32.mrb[75].mxu0  ;;  %v7266_v43 = vsel %vm15012_vm6, %v6782_v62, %v7265_v35 }
 0x33a   :  { %v6791_v8 = vsel %vm14999_vm5, %v6783_v23, %v6790_v57  ;;  %v7270_v40 = vsel %vm15018_vm7, %v6792_v5, %v7269_v21  ;;  %7267 = vst [vmem:[#allocation2 + $0xc0] sm:$0xf] %v7266_v43  ;;  %v12815_v37 = vcombine.low %v6345_v39, %v6345_v39  ;;  %v12816_v56 = vcombine.high %v6345_v39, %v6345_v39  ;;  %v7540_v57 = vld [vmem:[#allocation2 + $0xb4] sm:$0xf]  ;;  %v17562_v35 = vpop.f32.mrb[76].mxu0 }
 0x33b   :  { %7268 = vst.msk [vmem:[#allocation2 + $0xc4] sm:$0xf] %vm28_vm0, %v6791_v8  ;;  %7271 = vst [vmem:[#allocation2 + $0xc8] sm:$0x1] %v7270_v40  ;;  %v8186_v60 = vor.u32 %v8185_v11, %v8181_v32  ;;  %v6274_v26 = vmul.bf16 %v17062_v42, %v6234_v59  ;;  %v8190_v41 = vrot.slane %v8188_v9, 1  ;;  %v10460_v49 = vrot.slane %v13115_v25, 1 }
 0x33c   :  { %v10461_v3 = vrot.slane %v14043_v7, 1  ;;  %v17560_v23 = vcombine.low %v7412_v24, %v7413_v30  ;;  %v6794_v62 = vshrl.u32 %v12815_v37, 16  ;;  %v6797_v21 = vshll.u32 %v12815_v37, 16  ;;  %v7541_v5 = vld [vmem:[#allocation2 + $0xb8] sm:$0xf]  ;;  %v5827_v30 = vpop.f32.mrb[77].mxu0 }
 0x33d   :  { %v6802_v6 = vshrl.u32 %v12816_v56, 16  ;;  %v8200_v36 = vshll.u32 %v14047_v54, 16  ;;  %v6805_v8 = vshll.u32 %v12816_v56, 16  ;;  %v8191_v43 = vsel %vm2019_vm8, %v8186_v60, %v8190_v41  ;;  %v7272_v59 = vld [vmem:[#allocation2 + $0xe4] sm:$0xf]  ;;  %v17576_v60 = vpop.f32.mrb[78].mxu0 }
 0x33e   :  { %19563 = vst [vmem:[#allocation61_spill] sm:$0xff] %v17560_v23  ;;  %v6314_v39 = vadd.bf16 %v17069_v45, %v6274_v26  ;;  %v10462_v32 = vsel %vm2564_vm9, %v10460_v49, %v10461_v3  ;;  %v6796_v9 = vrot.slane %v6794_v62, 7  ;;  %8434 = vrot.lane.b32.xlu1 %v8191_v43, %s14631_s18  ;;  %v8193_v7 = vshrl.u32 %v17560_v23, 16  ;;  %v7276_v54 = vld [vmem:[#allocation2 + $0xec] sm:$0x1] }
 0x33f   :  { %v6804_v11 = vrot.slane %v6802_v6, 7  ;;  %13379 = vmatprep.mubr.msk.bf16.mxu0 %vm4517_vm10, %v10462_v32  ;;  %v8195_v24 = vshll.u32 %v17560_v23, 16  ;;  %v17572_v25 = vcombine.low %v7540_v57, %v7541_v5  ;;  %v6107_v37 = vadd.f32 %v17159_v48, %v5817_v27  ;;  %v14050_v62 = vld [vmem:[#allocation2 + $0xbc] ss:$0 sps:$4 sm:$0x11]   ;;  %v5830_v6 = vpop.f32.mrb[79].mxu0 }
 0x340   :  { %v6346_v40 = vmax.bf16 %v19501_v46, %v6314_v39  ;;  %v6110_v56 = vadd.f32 %v17168_v17, %v5820_v58  ;;  %v6799_v26 = vor.u32 %v6797_v21, %v6796_v9  ;;  %v6800_v41 = vrot.slane %v6796_v9, 4  ;;  %v7667_v5 = vld [vmem:[#allocation2 + $0xb8] sm:$0xf]  ;;  %v7749_v39 = vld [vmem:[#allocation2 + $0xb4] sm:$0xe] }
 0x341   :  { %19564 = vst [vmem:[#allocation27_spill] sm:$0xff] %v17572_v25  ;;  %v6807_v49 = vor.u32 %v6805_v8, %v6804_v11  ;;  %v6809_v3 = vrot.slane %v6804_v11, 4  ;;  %v8197_v30 = vrot.slane %v8195_v24, 1  ;;  %8852 = vrot.lane.b32.xlu0 %v17572_v25, %s14631_s18  ;;  %v8202_v58 = vrot.slane %v8200_v36, 1  ;;  %v7414_v21 = vld [vmem:[#allocation2 + $0xb4] sm:$0xf] }
 0x342   :  { %v12817_v43 = vcombine.low %v6346_v40, %v6346_v40  ;;  %v12818_v32 = vcombine.high %v6346_v40, %v6346_v40  ;;  %v6235_v57 = vpack.c.bf16 %v6110_v56, %v6107_v37  ;;  %v7273_v17 = vsel %vm15012_vm6, %v6799_v26, %v7272_v59  ;;  %v8409_v40 = vpop.permute.xlu1 %8408  ;;  %v7415_v37 = vld [vmem:[#allocation2 + $0xb8] sm:$0xf]  ;;  %v7279_v56 = vld [vmem:[#allocation2 + $0xf0] sm:$0xf]  ;;  %v17590_v36 = vpop.f32.mrb[60].mxu1 }
 0x343   :  { %v6808_v48 = vsel %vm14999_vm5, %v6800_v41, %v6807_v49  ;;  %v7277_v27 = vsel %vm15018_vm7, %v6809_v3, %v7276_v54  ;;  %7274 = vst [vmem:[#allocation2 + $0xe4] sm:$0xf] %v7273_v17  ;;  %v7283_v41 = vld [vmem:[#allocation2 + $0xf8] sm:$0x1]  ;;  %v8198_v49 = vor.u32 %v8197_v30, %v8193_v7  ;;  %v13116_v26 = vcombine.low %v7749_v39, %v7667_v5  ;;  %v17588_v54 = vpop.f32.mrb[80].mxu0  ;;  %v17595_v13 = vpop.f32.mrb[61].mxu1 }
 0x344   :  { %7275 = vst.msk [vmem:[#allocation2 + $0xe8] sm:$0xf] %vm28_vm0, %v6808_v48  ;;  %7278 = vst [vmem:[#allocation2 + $0xec] sm:$0x1] %v7277_v27  ;;  %v6811_v8 = vshrl.u32 %v12817_v43, 16  ;;  %v6814_v9 = vshll.u32 %v12817_v43, 16  ;;  %v6275_v59 = vmul.bf16 %v17062_v42, %v6235_v57  ;;  %v19565_v43 = vcombine.low %v17483_v50, %v17493_v55 }
 0x345   :  { %v6819_v11 = vshrl.u32 %v12818_v32, 16  ;;  %v6822_v24 = vshll.u32 %v12818_v32, 16  ;;  %v10464_v6 = vrot.slane %v14050_v62, 1  ;;  %v14352_v32 = vld [vmem:[#allocation2 + $0x8] ss:$0 sps:$4 sm:$0x11]   ;;  %v8203_v7 = vsel %vm2019_vm8, %v8198_v49, %v8202_v58  ;;  %v8825_v62 = vpop.permute.xlu0 %8824 }
 0x346   :  { %v6813_v3 = vrot.slane %v6811_v8, 7  ;;  %v8568_v17 = vrot.slane %v19565_v43, 1  ;;  %v8569_v27 = vrot.slane %v14352_v32, 1  ;;  %v5835_v25 = vpop.f32.mrb[81].mxu0  ;;  %v6315_v30 = vadd.bf16 %v17069_v45, %v6275_v59  ;;  %8436 = vrot.lane.b32.xlu1 %v8203_v7, %s14631_s18  ;;  %v7543_v59 = vld [vmem:[#allocation2 + $0xc4] sm:$0xf] }
 0x347   :  { %v6821_v48 = vrot.slane %v6819_v11, 7  ;;  %v10463_v57 = vrot.slane %v13116_v26, 1  ;;  %v17599_v5 = vcombine.low %v7414_v21, %v7415_v37  ;;  %v14054_v39 = vld [vmem:[#allocation2 + $0xbc] ss:$0 sps:$4 sm:$0x11]   ;;  %v17601_v8 = vpop.f32.mrb[82].mxu0  ;;  %v10521_v58 = vsel %vm4517_vm10, %v16857_v29, %v8409_v40 }
 0x348   :  { %v6816_v11 = vor.u32 %v6814_v9, %v6813_v3  ;;  %v6817_v38 = vrot.slane %v6813_v3, 4  ;;  %v5838_v25 = vpop.f32.mrb[83].mxu0  ;;  %v6347_v43 = vmax.bf16 %v19501_v46, %v6315_v30  ;;  %v8570_v21 = vsel %vm2564_vm9, %v8568_v17, %v8569_v27  ;;  %v14052_v37 = vld [vmem:[%s19192_s2 + $0x80] sm:$0xff]  }
 0x349   :  { %19566 = vst [vmem:[#allocation62_spill] sm:$0xff] %v17599_v5  ;;  %v6824_v55 = vor.u32 %v6822_v24, %v6821_v48  ;;  %v6826_v50 = vrot.slane %v6821_v48, 4  ;;  %v10465_v49 = vsel %vm2564_vm9, %v10463_v57, %v10464_v6  ;;  %v7542_v9 = vld [vmem:[#allocation2 + $0xc0] sm:$0xf]  ;;  %v17612_v24 = vpop.f32.mrb[62].mxu1  ;;  %v10618_v40 = vsel %vm4517_vm10, %v8570_v21, %v8825_v62  ;;  %v19568_v62 = vld [vmem:[#allocation57_spill] sm:$0xff] }
 0x34a   :  { %v7280_v3 = vsel %vm15012_vm6, %v6816_v11, %v7279_v56  ;;  %13380 = vmatmul.mubr.msk.bf16.gmra.mrb[152].mxu0 %vm4517_vm10, %v10465_v49  ;;  %v7669_v6 = vld [vmem:[#allocation2 + $0xc4] sm:$0xf]  ;;  %v7750_v48 = vld [vmem:[#allocation2 + $0xc0] sm:$0xe]  ;;  %v12819_v17 = vcombine.low %v6347_v43, %v6347_v43  ;;  %v12820_v32 = vcombine.high %v6347_v43, %v6347_v43  ;;  %11384 = vmatprep.mubr.bf16.mxu1 %v10618_v40  ;;  %v8212_v27 = vshll.u32 %v14054_v39, 16  ;;  %v8411_v43 = vpop.permute.xlu1 %8410  ;;  %v14062_v39 = vld [vmem:[%s19192_s2 + $0x88] sm:$0xff]  }
 0x34b   :  { %v6825_v26 = vsel %vm14999_vm5, %v6817_v38, %v6824_v55  ;;  %v7284_v29 = vsel %vm15018_vm7, %v6826_v50, %v7283_v41  ;;  %7281 = vst [vmem:[#allocation2 + $0xf0] sm:$0xf] %v7280_v3  ;;  %v8207_v38 = vshll.u32 %v17599_v5, 16  ;;  %v14057_v56 = vld [vmem:[#allocation2 + $0xc8] ss:$0 sps:$4 sm:$0x11]   ;;  %11385 = vmatmul.mubr.bf16.vlgmr.msra.gmra.mrb[64].mxu1 %v10521_v58  ;;  %v17625_v7 = vcombine.low %v7542_v9, %v7543_v59 }
 0x34c   :  { %7282 = vst.msk [vmem:[#allocation2 + $0xf4] sm:$0xf] %vm28_vm0, %v6825_v26  ;;  %7285 = vst [vmem:[#allocation2 + $0xf8] sm:$0x1] %v7284_v29  ;;  %v8205_v41 = vshrl.u32 %v17599_v5, 16  ;;  %v6115_v30 = vadd.f32 %v17156_v47, %v17562_v35  ;;  %v6118_v57 = vadd.f32 %v19568_v62, %v17576_v60  ;;  %v6828_v11 = vshrl.u32 %v12819_v17, 16  ;;  %11642 = vmatpush1.bf16.msra.mxu1 %v14052_v37 }
 0x34d   :  { %19567 = vst [vmem:[#allocation28_spill] sm:$0xff] %v17625_v7  ;;  %v6831_v55 = vshll.u32 %v12819_v17, 16  ;;  %v6836_v50 = vshrl.u32 %v12820_v32, 16  ;;  %v6839_v25 = vshll.u32 %v12820_v32, 16  ;;  %v17634_v58 = vpop.f32.mrb[84].mxu0  ;;  %v8209_v21 = vrot.slane %v8207_v38, 1  ;;  %8854 = vrot.lane.b32.xlu0 %v17625_v7, %s14631_s18  ;;  %11643 = vmatprep.subr.bf16.mxu1 %v19501_v46 }
 0x34e   :  { %v7286_v49 = vld [vmem:[#allocation2 + $0xfc] sm:$0xf]  ;;  %v8214_v9 = vrot.slane %v8212_v27, 1  ;;  %v6236_v47 = vpack.c.bf16 %v6118_v57, %v6115_v30  ;;  %v13117_v35 = vcombine.low %v7750_v48, %v7669_v6  ;;  %v14061_v60 = vld [vmem:[#allocation2 + $0xe0] ss:$0 sps:$4 sm:$0x11]  }
 0x34f   :  { %v5843_v59 = vpop.f32.mrb[85].mxu0  ;;  %v6830_v37 = vrot.slane %v6828_v11, 7  ;;  %v6838_v26 = vrot.slane %v6836_v50, 7  ;;  %v10467_v3 = vrot.slane %v14057_v56, 1  ;;  %v17641_v32 = vpop.f32.mrb[63].mxu1  ;;  %v8210_v27 = vor.u32 %v8209_v21, %v8205_v41  ;;  %v19569_v30 = vld [vmem:[#allocation11_spill] sm:$0xff] }
 0x350   :  { %v14353_v29 = vld [vmem:[#allocation2 + $0x14] ss:$0 sps:$4 sm:$0x11]   ;;  %v17639_v17 = vpop.f32.mrb[86].mxu0  ;;  %v7290_v38 = vld [vmem:[#allocation2 + $0x104] sm:$0x1]  ;;  %v6276_v62 = vmul.bf16 %v17062_v42, %v6236_v47  ;;  %v10524_v6 = vsel %vm4517_vm10, %v19569_v30, %v8411_v43  ;;  %11644 = vmatpush1.bf16.msra.mxu1 %v14062_v39 }
 0x351   :  { %v8572_v40 = vrot.slane %v14353_v29, 1  ;;  %v10466_v7 = vrot.slane %v13117_v35, 1  ;;  %v5846_v48 = vpop.f32.mrb[87].mxu0  ;;  %v14078_v57 = vld [vmem:[%s19192_s2 + $0x90] sm:$0xff]   ;;  %v6833_v56 = vor.u32 %v6831_v55, %v6830_v37  ;;  %v6834_v11 = vrot.slane %v6830_v37, 4  ;;  %v8827_v29 = vpop.permute.xlu0 %8826  ;;  %11645 = vmatprep.subr.bf16.mxu1 %v19501_v46 }
 0x352   :  { %v6841_v50 = vor.u32 %v6839_v25, %v6838_v26  ;;  %v6843_v59 = vrot.slane %v6838_v26, 4  ;;  %v7544_v5 = vld [vmem:[#allocation2 + $0xe4] sm:$0xf]  ;;  %v7545_v23 = vld [vmem:[#allocation2 + $0xe8] sm:$0xf]  ;;  %v8215_v41 = vsel %vm2019_vm8, %v8210_v27, %v8214_v9  ;;  %v6316_v21 = vadd.bf16 %v17069_v45, %v6276_v62  ;;  %v17670_v26 = vpop.f32.mrb[88].mxu0 }
 0x353   :  { %v10468_v47 = vsel %vm2564_vm9, %v10466_v7, %v10467_v3  ;;  %v8573_v43 = vsel %vm2564_vm9, %v17531_v34, %v8572_v40  ;;  %v7416_v35 = vld [vmem:[#allocation2 + $0xd8] sm:$0xf]  ;;  %v7417_v30 = vld [vmem:[#allocation2 + $0xdc] sm:$0xf]  ;;  %v7287_v25 = vsel %vm15012_vm6, %v6833_v56, %v7286_v49  ;;  %8438 = vrot.lane.b32.xlu1 %v8215_v41, %s14631_s18  ;;  %v8224_v7 = vshll.u32 %v14061_v60, 16 }
 0x354   :  { %v7482_v48 = vld [vmem:[#allocation2 + $0x18] sm:$0xe]  ;;  %v6842_v55 = vsel %vm14999_vm5, %v6834_v11, %v6841_v50  ;;  %v7291_v39 = vsel %vm15018_vm7, %v6843_v59, %v7290_v38  ;;  %13383 = vmatprep.mubr.msk.bf16.mxu0 %vm4517_vm10, %v10468_v47  ;;  %7288 = vst [vmem:[#allocation2 + $0xfc] sm:$0xf] %v7287_v25  ;;  %v6348_v34 = vmax.bf16 %v19501_v46, %v6316_v21  ;;  %v14354_v38 = vld [vmem:[#allocation2 + $0x1c] sm:$0xf] }
 0x355   :  { %7289 = vst.msk [vmem:[#allocation2 + $0x100] sm:$0xf] %vm28_vm0, %v6842_v55  ;;  %7292 = vst [vmem:[#allocation2 + $0x104] sm:$0x1] %v7291_v39  ;;  %v10622_v9 = vsel %vm4517_vm10, %v8573_v43, %v8827_v29  ;;  %v17666_v37 = vcombine.low %v7544_v5, %v7545_v23  ;;  %v6123_v49 = vadd.f32 %v17238_v1, %v17588_v54  ;;  %v14091_v3 = vld [vmem:[%s19192_s2 + $0x98] sm:$0xff]   ;;  %v5851_v5 = vpop.f32.mrb[89].mxu0  ;;  %11646 = vmatpush1.bf16.msra.mxu1 %v14078_v57  ;;  %v8829_v41 = vpop.permute.xlu0 %8828 }
 0x356   :  { %11392 = vmatprep.mubr.bf16.mxu1 %v10622_v9  ;;  %v17675_v60 = vcombine.low %v7416_v35, %v7417_v30  ;;  %v6126_v40 = vadd.f32 %v17258_v20, %v17601_v8  ;;  %v12913_v27 = vcombine.low %v7482_v48, %v14354_v38  ;;  %v7418_v62 = vld [vmem:[#allocation2 + $0xe4] sm:$0xf]  ;;  %v14064_v23 = vld [vmem:[#allocation2 + $0xec] ss:$0 sps:$4 sm:$0x11]   ;;  %v12821_v56 = vcombine.low %v6348_v34, %v6348_v34  ;;  %v17683_v47 = vpop.f32.mrb[90].mxu0  ;;  %v8413_v30 = vpop.permute.xlu1 %8412 }
 0x357   :  { %v12822_v1 = vcombine.high %v6348_v34, %v6348_v34  ;;  %11393 = vmatmul.mubr.bf16.gmra.mrb[68].mxu1 %v10524_v6  ;;  %8856 = vrot.lane.b32.xlu0 %v17666_v37, %s14631_s18  ;;  %v8226_v54 = vrot.slane %v8224_v7, 1  ;;  %v14355_v11 = vld [vmem:[#allocation2 + $0x20] ss:$0 sps:$4 sm:$0x11]   ;;  %v7419_v59 = vld [vmem:[#allocation2 + $0xe8] sm:$0xf] }
 0x358   :  { %v8575_v50 = vrot.slane %v14355_v11, 1  ;;  %v8217_v29 = vshrl.u32 %v17675_v60, 16  ;;  %v8219_v20 = vshll.u32 %v17675_v60, 16  ;;  %v6237_v8 = vpack.c.bf16 %v6126_v40, %v6123_v49  ;;  %11647 = vmatprep.subr.bf16.mxu1 %v19501_v46  ;;  %v5854_v48 = vpop.f32.mrb[91].mxu0  ;;  %v7293_v55 = vld [vmem:[#allocation2 + $0x108] sm:$0xf] }
 0x359   :  { %v8574_v21 = vrot.slane %v12913_v27, 1  ;;  %v6845_v57 = vshrl.u32 %v12821_v56, 16  ;;  %v6848_v6 = vshll.u32 %v12821_v56, 16  ;;  %v6853_v43 = vshrl.u32 %v12822_v1, 16  ;;  %11648 = vmatpush1.bf16.msra.mxu1 %v14091_v3  ;;  %v14104_v9 = vld [vmem:[%s19192_s2 + $0xa0] sm:$0xff]   ;;  %v19570_v11 = vld [vmem:[#allocation46_spill] sm:$0xff] }
 0x35a   :  { %v6856_v35 = vshll.u32 %v12822_v1, 16  ;;  %v8221_v25 = vrot.slane %v8219_v20, 1  ;;  %v6277_v39 = vmul.bf16 %v17062_v42, %v6237_v8  ;;  %v17688_v34 = vcombine.low %v7418_v62, %v7419_v59  ;;  %v7297_v38 = vld [vmem:[#allocation2 + $0x110] sm:$0x1]  ;;  %11649 = vmatprep.subr.bf16.mxu1 %v19501_v46  ;;  %v7751_v59 = vld [vmem:[#allocation2 + $0xcc] sm:$0xe] }
 0x35b   :  { %v8576_v7 = vsel %vm2564_vm9, %v8574_v21, %v8575_v50  ;;  %v6847_v49 = vrot.slane %v6845_v57, 7  ;;  %v6855_v40 = vrot.slane %v6853_v43, 7  ;;  %v8236_v5 = vshll.u32 %v14064_v23, 16  ;;  %v7671_v50 = vld [vmem:[#allocation2 + $0xd0] sm:$0xf] }
 0x35c   :  { %v10626_v27 = vsel %vm4517_vm10, %v8576_v7, %v8829_v41  ;;  %v8222_v56 = vor.u32 %v8221_v25, %v8217_v29  ;;  %v6317_v1 = vadd.bf16 %v17069_v45, %v6277_v39  ;;  %v10527_v62 = vsel %vm4517_vm10, %v19570_v11, %v8413_v30  ;;  %v14067_v20 = vld [vmem:[#allocation2 + $0xd4] ss:$0 sps:$4 sm:$0x11]   ;;  %v7546_v41 = vld [vmem:[#allocation2 + $0xf0] sm:$0xf]  ;;  %v14117_v30 = vld [vmem:[%s19192_s2 + $0xa8] sm:$0xff]  }
 0x35d   :  { %11400 = vmatprep.mubr.bf16.mxu1 %v10626_v27  ;;  %v8231_v3 = vshll.u32 %v17688_v34, 16  ;;  %v6850_v8 = vor.u32 %v6848_v6, %v6847_v49  ;;  %v6851_v21 = vrot.slane %v6847_v49, 4  ;;  %v6858_v57 = vor.u32 %v6856_v35, %v6855_v40  ;;  %v7547_v23 = vld [vmem:[#allocation2 + $0xf4] sm:$0xf]  ;;  %11650 = vmatpush1.bf16.msra.mxu1 %v14104_v9 }
 0x35e   :  { %v6860_v43 = vrot.slane %v6855_v40, 4  ;;  %v8227_v48 = vsel %vm2019_vm8, %v8222_v56, %v8226_v54  ;;  %v6349_v29 = vmax.bf16 %v19501_v46, %v6317_v1  ;;  %v8229_v25 = vshrl.u32 %v17688_v34, 16  ;;  %v17715_v56 = vld [vmem:[#allocation2 + $0xf8] ss:$0 sps:$4 sm:$0x11]   ;;  %11651 = vmatprep.subr.bf16.mxu1 %v19501_v46 }
 0x35f   :  { %v8233_v39 = vrot.slane %v8231_v3, 1  ;;  %v6859_v6 = vsel %vm14999_vm5, %v6851_v21, %v6858_v57  ;;  %v7294_v35 = vsel %vm15012_vm6, %v6850_v8, %v7293_v55  ;;  %8440 = vrot.lane.b32.xlu1 %v8227_v48, %s14631_s18  ;;  %11401 = vmatmul.mubr.bf16.gmra.mrb[72].mxu1 %v10527_v62  ;;  %v8238_v54 = vrot.slane %v8236_v5, 1  ;;  %v7483_v1 = vld [vmem:[#allocation2 + $0x24] sm:$0xe]  ;;  %v17717_v55 = vpop.f32.mrb[92].mxu0 }
 0x360   :  { %v7298_v7 = vsel %vm15018_vm7, %v6860_v43, %v7297_v38  ;;  %7296 = vst.msk [vmem:[#allocation2 + $0x10c] sm:$0xf] %vm28_vm0, %v6859_v6  ;;  %7295 = vst [vmem:[#allocation2 + $0x108] sm:$0xf] %v7294_v35  ;;  %v12823_v9 = vcombine.low %v6349_v29, %v6349_v29  ;;  %v12824_v49 = vcombine.high %v6349_v29, %v6349_v29  ;;  %v19572_v5 = vld [vmem:[#allocation48_spill] sm:$0xff]  ;;  %v10470_v3 = vrot.slane %v14067_v20, 1 }
 0x361   :  { %7299 = vst [vmem:[#allocation2 + $0x110] sm:$0x1] %v7298_v7  ;;  %v8234_v40 = vor.u32 %v8233_v39, %v8229_v25  ;;  %v17713_v27 = vcombine.low %v7546_v41, %v7547_v23  ;;  %v6131_v38 = vadd.f32 %v17216_v53, %v17634_v58  ;;  %v6134_v11 = vadd.f32 %v19572_v5, %v17639_v17  ;;  %v7673_v8 = vld [vmem:[#allocation2 + $0xf4] sm:$0xf]  ;;  %v7752_v21 = vld [vmem:[#allocation2 + $0xf0] sm:$0xe] }
 0x362   :  { %v13118_v62 = vcombine.low %v7751_v59, %v7671_v50  ;;  %v5859_v57 = vpop.f32.mrb[93].mxu0  ;;  %v6862_v43 = vshrl.u32 %v12823_v9, 16  ;;  %v6865_v41 = vshll.u32 %v12823_v9, 16  ;;  %v6870_v23 = vshrl.u32 %v12824_v49, 16  ;;  %11652 = vmatpush1.bf16.msra.mxu1 %v14117_v30  ;;  %v14130_v53 = vld [vmem:[%s19192_s2 + $0xb0] sm:$0xff]  }
 0x363   :  { %19571 = vst [vmem:[#allocation63_spill] sm:$0xff] %v17713_v27  ;;  %8858 = vrot.lane.b32.xlu0 %v17713_v27, %s14631_s18  ;;  %v17726_v48 = vpop.f32.mrb[94].mxu0  ;;  %v6873_v58 = vshll.u32 %v12824_v49, 16  ;;  %v7300_v17 = vld [vmem:[#allocation2 + $0x114] sm:$0xf]  ;;  %v8239_v59 = vsel %vm2019_vm8, %v8234_v40, %v8238_v54  ;;  %v6238_v20 = vpack.c.bf16 %v6134_v11, %v6131_v38  ;;  %11653 = vmatprep.subr.bf16.mxu1 %v19501_v46  ;;  %v10473_v7 = vrot.slane %v17715_v56, 1 }
 0x364   :  { %v7304_v50 = vld [vmem:[#allocation2 + $0x11c] sm:$0x1]  ;;  %v10469_v29 = vrot.slane %v13118_v62, 1  ;;  %v7420_v25 = vld [vmem:[#allocation2 + $0xf0] sm:$0xf]  ;;  %v5862_v39 = vpop.f32.mrb[95].mxu0  ;;  %8442 = vrot.lane.b32.xlu1 %v8239_v59, %s14631_s18  ;;  %v13119_v30 = vcombine.low %v7752_v21, %v7673_v8  ;;  %v8831_v21 = vpop.permute.xlu0 %8830 }
 0x365   :  { %v6864_v6 = vrot.slane %v6862_v43, 7  ;;  %v6872_v35 = vrot.slane %v6870_v23, 7  ;;  %v7421_v9 = vld [vmem:[#allocation2 + $0xf4] sm:$0xf]  ;;  %v6278_v49 = vmul.bf16 %v17062_v42, %v6238_v20  ;;  %v14356_v57 = vld [vmem:[#allocation2 + $0x28] sm:$0xf] }
 0x366   :  { %v10471_v5 = vsel %vm2564_vm9, %v10469_v29, %v10470_v3  ;;  %v12914_v54 = vcombine.low %v7483_v1, %v14356_v57  ;;  %v14357_v40 = vld [vmem:[#allocation2 + $0x2c] ss:$0 sps:$4 sm:$0x11]   ;;  %v14073_v11 = vld [vmem:[#allocation2 + $0xf8] ss:$0 sps:$4 sm:$0x11]   ;;  %11654 = vmatpush1.bf16.msra.mxu1 %v14130_v53  ;;  %v8415_v3 = vpop.permute.xlu1 %8414 }
 0x367   :  { %v8578_v38 = vrot.slane %v14357_v40, 1  ;;  %v17737_v62 = vpop.f32.mrb[96].mxu0  ;;  %v6867_v39 = vor.u32 %v6865_v41, %v6864_v6  ;;  %v6868_v43 = vrot.slane %v6864_v6, 4  ;;  %v6875_v23 = vor.u32 %v6873_v58, %v6872_v35  ;;  %13384 = vmatmul.mubr.msk.bf16.gmra.mrb[156].mxu0 %vm4517_vm10, %v10471_v5  ;;  %v14137_v56 = vld [vmem:[%s19192_s2 + $0xb8] sm:$0xff]   ;;  %v7549_v57 = vld [vmem:[#allocation2 + $0x100] sm:$0xf]  ;;  %11655 = vmatprep.subr.bf16.mxu1 %v19501_v46 }
 0x368   :  { %v6877_v27 = vrot.slane %v6872_v35, 4  ;;  %v5867_v8 = vpop.f32.mrb[97].mxu0  ;;  %v6318_v1 = vadd.bf16 %v17069_v45, %v6278_v49  ;;  %v10472_v59 = vrot.slane %v13119_v30, 1  ;;  %v8577_v20 = vrot.slane %v12914_v54, 1  ;;  %v7548_v29 = vld [vmem:[#allocation2 + $0xfc] sm:$0xf] }
 0x369   :  { %v6876_v41 = vsel %vm14999_vm5, %v6868_v43, %v6875_v23  ;;  %v7301_v53 = vsel %vm15012_vm6, %v6867_v39, %v7300_v17  ;;  %v17751_v6 = vcombine.low %v7420_v25, %v7421_v9  ;;  %v8248_v5 = vshll.u32 %v14073_v11, 16  ;;  %v7675_v54 = vld [vmem:[#allocation2 + $0x100] sm:$0xf]  ;;  %v7753_v40 = vld [vmem:[#allocation2 + $0xfc] sm:$0xe] }
 0x36a   :  { %v7305_v58 = vsel %vm15018_vm7, %v6877_v27, %v7304_v50  ;;  %7303 = vst.msk [vmem:[#allocation2 + $0x118] sm:$0xf] %vm28_vm0, %v6876_v41  ;;  %7302 = vst [vmem:[#allocation2 + $0x114] sm:$0xf] %v7301_v53  ;;  %v6350_v35 = vmax.bf16 %v19501_v46, %v6318_v1  ;;  %v10474_v30 = vsel %vm2564_vm9, %v10472_v59, %v10473_v7  ;;  %v19573_v27 = vld [vmem:[#allocation47_spill] sm:$0xff]  ;;  %11656 = vmatpush1.bf16.msra.mxu1 %v14137_v56  ;;  %v17772_v1 = vpop.f32.mrb[98].mxu0 }
 0x36b   :  { %7306 = vst [vmem:[#allocation2 + $0x11c] sm:$0x1] %v7305_v58  ;;  %v8579_v49 = vsel %vm2564_vm9, %v8577_v20, %v8578_v38  ;;  %13387 = vmatprep.mubr.msk.bf16.mxu0 %vm4517_vm10, %v10474_v30  ;;  %v10530_v50 = vsel %vm4517_vm10, %v19573_v27, %v8415_v3  ;;  %v8243_v25 = vshll.u32 %v17751_v6, 16  ;;  %v17762_v9 = vcombine.low %v7548_v29, %v7549_v57  ;;  %v14076_v39 = vld [vmem:[#allocation2 + $0x104] ss:$0 sps:$4 sm:$0x11]  }
 0x36c   :  { %v10630_v17 = vsel %vm4517_vm10, %v8579_v49, %v8831_v21  ;;  %v12825_v43 = vcombine.low %v6350_v35, %v6350_v35  ;;  %v12826_v7 = vcombine.high %v6350_v35, %v6350_v35  ;;  %v6139_v38 = vadd.f32 %v17307_v16, %v17670_v26  ;;  %11657 = vmatprep.subr.bf16.mxu1 %v19501_v46  ;;  %v7484_v56 = vld [vmem:[#allocation2 + $0x30] sm:$0xe]  ;;  %v7422_v26 = vld [vmem:[#allocation2 + $0xfc] sm:$0xf]  ;;  %v5870_v29 = vpop.f32.mrb[99].mxu0  ;;  %v14144_v57 = vld [vmem:[%s19192_s2 + $0xc0] sm:$0xff]  }
 0x36d   :  { %19574 = vst [vmem:[#allocation29_spill] sm:$0xff] %v17762_v9  ;;  %11408 = vmatprep.mubr.bf16.mxu1 %v10630_v17  ;;  %v8241_v11 = vshrl.u32 %v17751_v6, 16  ;;  %v8245_v23 = vrot.slane %v8243_v25, 1  ;;  %8860 = vrot.lane.b32.xlu0 %v17762_v9, %s14631_s18  ;;  %v6142_v8 = vadd.f32 %v17315_v28, %v17683_v47  ;;  %v13120_v3 = vcombine.low %v7753_v40, %v7675_v54  ;;  %v7307_v41 = vld [vmem:[#allocation2 + $0x120] sm:$0xf]  ;;  %v17779_v49 = vpop.f32.mrb[100].mxu0 }
 0x36e   :  { %11409 = vmatmul.mubr.bf16.gmra.mrb[76].mxu1 %v10530_v50  ;;  %v6879_v21 = vshrl.u32 %v12825_v43, 16  ;;  %v6882_v59 = vshll.u32 %v12825_v43, 16  ;;  %v6887_v20 = vshrl.u32 %v12826_v7, 16  ;;  %v8250_v16 = vrot.slane %v8248_v5, 1  ;;  %v7311_v53 = vld [vmem:[#allocation2 + $0x128] sm:$0x1] }
 0x36f   :  { %v8246_v58 = vor.u32 %v8245_v23, %v8241_v11  ;;  %v6239_v35 = vpack.c.bf16 %v6142_v8, %v6139_v38  ;;  %v10475_v30 = vrot.slane %v13120_v3, 1  ;;  %v10476_v28 = vrot.slane %v14076_v39, 1  ;;  %v17777_v47 = vld [vmem:[#allocation2 + $0x104] ss:$0 sps:$4 sm:$0x11]   ;;  %v5875_v25 = vpop.f32.mrb[101].mxu0  ;;  %11658 = vmatpush1.bf16.msra.mxu1 %v14144_v57  ;;  %v8833_v57 = vpop.permute.xlu0 %8832 }
 0x370   :  { %v6881_v54 = vrot.slane %v6879_v21, 7  ;;  %v6889_v40 = vrot.slane %v6887_v20, 7  ;;  %v6890_v17 = vshll.u32 %v12826_v7, 16  ;;  %v14358_v5 = vld [vmem:[#allocation2 + $0x34] sm:$0xf]  ;;  %11659 = vmatprep.subr.bf16.mxu1 %v19501_v46 }
 0x371   :  { %v12915_v27 = vcombine.low %v7484_v56, %v14358_v5  ;;  %v7423_v50 = vld [vmem:[#allocation2 + $0x100] sm:$0xf]  ;;  %v8251_v43 = vsel %vm2019_vm8, %v8246_v58, %v8250_v16  ;;  %v6279_v29 = vmul.bf16 %v17062_v42, %v6239_v35  ;;  %v10477_v38 = vsel %vm2564_vm9, %v10475_v30, %v10476_v28  ;;  %v14359_v11 = vld [vmem:[#allocation2 + $0x38] ss:$0 sps:$4 sm:$0x11]   ;;  %v8417_v56 = vpop.permute.xlu1 %8416 }
 0x372   :  { %v8581_v39 = vrot.slane %v14359_v11, 1  ;;  %v7550_v23 = vld [vmem:[#allocation2 + $0x108] sm:$0xf]  ;;  %v7551_v8 = vld [vmem:[#allocation2 + $0x10c] sm:$0xf]  ;;  %v6884_v3 = vor.u32 %v6882_v59, %v6881_v54  ;;  %v6885_v21 = vrot.slane %v6881_v54, 4  ;;  %v6892_v7 = vor.u32 %v6890_v17, %v6889_v40  ;;  %8444 = vrot.lane.b32.xlu1 %v8251_v43, %s14631_s18  ;;  %13388 = vmatmul.mubr.msk.bf16.gmra.mrb[160].mxu0 %vm4517_vm10, %v10477_v38 }
 0x373   :  { %v6894_v20 = vrot.slane %v6889_v40, 4  ;;  %v6319_v16 = vadd.bf16 %v17069_v45, %v6279_v29  ;;  %v8580_v58 = vrot.slane %v12915_v27, 1  ;;  %v17788_v35 = vcombine.low %v7422_v26, %v7423_v50  ;;  %v7677_v30 = vld [vmem:[#allocation2 + $0x10c] sm:$0xf]  ;;  %v7485_v28 = vld [vmem:[#allocation2 + $0x3c] sm:$0xe] }
 0x374   :  { %v6893_v5 = vsel %vm14999_vm5, %v6885_v21, %v6892_v7  ;;  %v7308_v59 = vsel %vm15012_vm6, %v6884_v3, %v7307_v41  ;;  %v17796_v40 = vcombine.low %v7550_v23, %v7551_v8  ;;  %v7754_v17 = vld [vmem:[#allocation2 + $0x108] sm:$0xe]  ;;  %v14083_v25 = vld [vmem:[#allocation2 + $0x110] ss:$0 sps:$4 sm:$0x11]   ;;  %v17798_v43 = vpop.f32.mrb[102].mxu0  ;;  %v6147_v23 = vadd.f32 %v17299_v61, %v17717_v55 }
 0x375   :  { %v7312_v54 = vsel %vm15018_vm7, %v6894_v20, %v7311_v53  ;;  %7310 = vst.msk [vmem:[#allocation2 + $0x124] sm:$0xf] %vm28_vm0, %v6893_v5  ;;  %7309 = vst [vmem:[#allocation2 + $0x120] sm:$0xf] %v7308_v59  ;;  %v6351_v26 = vmax.bf16 %v19501_v46, %v6319_v16  ;;  %v8582_v27 = vsel %vm2564_vm9, %v8580_v58, %v8581_v39  ;;  %v8255_v50 = vshll.u32 %v17788_v35, 16  ;;  %v5878_v29 = vpop.f32.mrb[103].mxu0 }
 0x376   :  { %19575 = vst [vmem:[#allocation64_spill] sm:$0xff] %v17796_v40  ;;  %7313 = vst [vmem:[#allocation2 + $0x128] sm:$0x1] %v7312_v54  ;;  %v8260_v41 = vshll.u32 %v17777_v47, 16  ;;  %v10634_v53 = vsel %vm4517_vm10, %v8582_v27, %v8833_v57  ;;  %v19576_v38 = vld [vmem:[#allocation14_spill] sm:$0xff]  ;;  %8862 = vrot.lane.b32.xlu0 %v17796_v40, %s14631_s18  ;;  %v6150_v8 = vadd.f32 %v17311_v31, %v17726_v48  ;;  %v17814_v39 = vpop.f32.mrb[104].mxu0 }
 0x377   :  { %v10533_v11 = vsel %vm4517_vm10, %v19576_v38, %v8417_v56  ;;  %v12827_v3 = vcombine.low %v6351_v26, %v6351_v26  ;;  %v12828_v21 = vcombine.high %v6351_v26, %v6351_v26  ;;  %11416 = vmatprep.mubr.bf16.mxu1 %v10634_v53  ;;  %v8253_v47 = vshrl.u32 %v17788_v35, 16  ;;  %v5883_v20 = vpop.f32.mrb[105].mxu0  ;;  %v14360_v58 = vld [vmem:[#allocation2 + $0x40] sm:$0xf]  ;;  %v7424_v59 = vld [vmem:[#allocation2 + $0x108] sm:$0xf] }
 0x378   :  { %v8257_v7 = vrot.slane %v8255_v50, 1  ;;  %11417 = vmatmul.mubr.bf16.gmra.mrb[80].mxu1 %v10533_v11  ;;  %v6240_v56 = vpack.c.bf16 %v6150_v8, %v6147_v23  ;;  %v13121_v16 = vcombine.low %v7754_v17, %v7677_v30  ;;  %v10479_v57 = vrot.slane %v14083_v25, 1  ;;  %v7425_v61 = vld [vmem:[#allocation2 + $0x10c] sm:$0xf]  ;;  %v17817_v55 = vpop.f32.mrb[106].mxu0  ;;  %v8419_v23 = vpop.permute.xlu1 %8418 }
 0x379   :  { %v12916_v5 = vcombine.low %v7485_v28, %v14360_v58  ;;  %v6896_v31 = vshrl.u32 %v12827_v3, 16  ;;  %v6899_v48 = vshll.u32 %v12827_v3, 16  ;;  %v6904_v54 = vshrl.u32 %v12828_v21, 16  ;;  %v5886_v26 = vpop.f32.mrb[107].mxu0  ;;  %v7314_v29 = vld [vmem:[#allocation2 + $0x12c] sm:$0xf] }
 0x37a   :  { %v8262_v27 = vrot.slane %v8260_v41, 1  ;;  %v8258_v53 = vor.u32 %v8257_v7, %v8253_v47  ;;  %v6280_v50 = vmul.bf16 %v17062_v42, %v6240_v56  ;;  %v10478_v38 = vrot.slane %v13121_v16, 1  ;;  %v14151_v30 = vld [vmem:[%s19192_s2 + $0xc8] sm:$0xff]   ;;  %v14361_v8 = vld [vmem:[#allocation2 + $0x44] ss:$0 sps:$4 sm:$0x11]   ;;  %v8835_v47 = vpop.permute.xlu0 %8834 }
 0x37b   :  { %v8583_v11 = vrot.slane %v12916_v5, 1  ;;  %v6898_v28 = vrot.slane %v6896_v31, 7  ;;  %v6906_v17 = vrot.slane %v6904_v54, 7  ;;  %v6907_v25 = vshll.u32 %v12828_v21, 16  ;;  %v7318_v3 = vld [vmem:[#allocation2 + $0x134] sm:$0x1]  ;;  %11660 = vmatpush1.bf16.msra.mxu1 %v14151_v30 }
 0x37c   :  { %v8584_v20 = vrot.slane %v14361_v8, 1  ;;  %v8263_v41 = vsel %vm2019_vm8, %v8258_v53, %v8262_v27  ;;  %v6320_v58 = vadd.bf16 %v17069_v45, %v6280_v50  ;;  %v10480_v7 = vsel %vm2564_vm9, %v10478_v38, %v10479_v57  ;;  %v14086_v16 = vld [vmem:[#allocation2 + $0x110] ss:$0 sps:$4 sm:$0x11]   ;;  %v7552_v21 = vld [vmem:[#allocation2 + $0x114] sm:$0xf]  ;;  %11661 = vmatprep.subr.bf16.mxu1 %v19501_v46 }
 0x37d   :  { %v17826_v56 = vcombine.low %v7424_v59, %v7425_v61  ;;  %v6901_v5 = vor.u32 %v6899_v48, %v6898_v28  ;;  %v6902_v26 = vrot.slane %v6898_v28, 4  ;;  %v6909_v31 = vor.u32 %v6907_v25, %v6906_v17  ;;  %8446 = vrot.lane.b32.xlu1 %v8263_v41, %s14631_s18  ;;  %13391 = vmatprep.mubr.msk.bf16.mxu0 %vm4517_vm10, %v10480_v7  ;;  %v19577_v50 = vld [vmem:[#allocation15_spill] sm:$0xff] }
 0x37e   :  { %v6911_v54 = vrot.slane %v6906_v17, 4  ;;  %v6352_v27 = vmax.bf16 %v19501_v46, %v6320_v58  ;;  %v8585_v53 = vsel %vm2564_vm9, %v8583_v11, %v8584_v20  ;;  %v10536_v57 = vsel %vm4517_vm10, %v19577_v50, %v8419_v23  ;;  %v7553_v61 = vld [vmem:[#allocation2 + $0x118] sm:$0xf]  ;;  %v7755_v17 = vld [vmem:[#allocation2 + $0x114] sm:$0xe]  ;;  %v17843_v23 = vpop.f32.mrb[108].mxu0 }
 0x37f   :  { %v8267_v59 = vshll.u32 %v17826_v56, 16  ;;  %v7679_v38 = vld [vmem:[#allocation2 + $0x118] sm:$0xf]  ;;  %v6910_v48 = vsel %vm14999_vm5, %v6902_v26, %v6909_v31  ;;  %v7315_v30 = vsel %vm15012_vm6, %v6901_v5, %v7314_v29  ;;  %v10638_v11 = vsel %vm4517_vm10, %v8585_v53, %v8835_v47  ;;  %v14089_v25 = vld [vmem:[#allocation2 + $0x11c] ss:$0 sps:$4 sm:$0x11]  }
 0x380   :  { %v7319_v28 = vsel %vm15018_vm7, %v6911_v54, %v7318_v3  ;;  %7317 = vst.msk [vmem:[#allocation2 + $0x130] sm:$0xf] %vm28_vm0, %v6910_v48  ;;  %7316 = vst [vmem:[#allocation2 + $0x12c] sm:$0xf] %v7315_v30  ;;  %v12829_v8 = vcombine.low %v6352_v27, %v6352_v27  ;;  %v12830_v20 = vcombine.high %v6352_v27, %v6352_v27  ;;  %11424 = vmatprep.mubr.bf16.mxu1 %v10638_v11  ;;  %v5891_v7 = vpop.f32.mrb[109].mxu0 }
 0x381   :  { %7320 = vst [vmem:[#allocation2 + $0x134] sm:$0x1] %v7319_v28  ;;  %v8269_v41 = vrot.slane %v8267_v59, 1  ;;  %v8272_v58 = vshll.u32 %v14086_v16, 16  ;;  %11425 = vmatmul.mubr.bf16.gmra.mrb[84].mxu1 %v10536_v57  ;;  %v8265_v29 = vshrl.u32 %v17826_v56, 16  ;;  %v17847_v3 = vcombine.low %v7552_v21, %v7553_v61  ;;  %v17853_v31 = vpop.f32.mrb[110].mxu0 }
 0x382   :  { %v6155_v47 = vadd.f32 %v17369_v52, %v17737_v62  ;;  %v6158_v5 = vadd.f32 %v17392_v18, %v17772_v1  ;;  %v7486_v26 = vld [vmem:[#allocation2 + $0x48] sm:$0xe]  ;;  %v6913_v54 = vshrl.u32 %v12829_v8, 16  ;;  %v6916_v27 = vshll.u32 %v12829_v8, 16  ;;  %v5894_v16 = vpop.f32.mrb[111].mxu0 }
 0x383   :  { %19578 = vst [vmem:[#allocation30_spill] sm:$0xff] %v17847_v3  ;;  %v6921_v53 = vshrl.u32 %v12830_v20, 16  ;;  %v6924_v50 = vshll.u32 %v12830_v20, 16  ;;  %v7321_v59 = vld [vmem:[#allocation2 + $0x138] sm:$0xf]  ;;  %v8270_v48 = vor.u32 %v8269_v41, %v8265_v29  ;;  %v8274_v30 = vrot.slane %v8272_v58, 1  ;;  %8864 = vrot.lane.b32.xlu0 %v17847_v3, %s14631_s18 }
 0x384   :  { %v7325_v57 = vld [vmem:[#allocation2 + $0x140] sm:$0x1]  ;;  %v6241_v21 = vpack.c.bf16 %v6158_v5, %v6155_v47  ;;  %v13122_v52 = vcombine.low %v7755_v17, %v7679_v38  ;;  %v7426_v62 = vld [vmem:[#allocation2 + $0x114] sm:$0xf]  ;;  %v7427_v61 = vld [vmem:[#allocation2 + $0x118] sm:$0xf]  ;;  %v8837_v17 = vpop.permute.xlu0 %8836 }
 0x385   :  { %v14093_v18 = vld [vmem:[#allocation2 + $0x11c] ss:$0 sps:$4 sm:$0x11]   ;;  %v6915_v1 = vrot.slane %v6913_v54, 7  ;;  %v6923_v28 = vrot.slane %v6921_v53, 7  ;;  %v10482_v11 = vrot.slane %v14089_v25, 1  ;;  %v8275_v20 = vsel %vm2019_vm8, %v8270_v48, %v8274_v30  ;;  %v8421_v25 = vpop.permute.xlu1 %8420 }
 0x386   :  { %v14362_v7 = vld [vmem:[#allocation2 + $0x4c] sm:$0xf]  ;;  %v6281_v16 = vmul.bf16 %v17062_v42, %v6241_v21  ;;  %v10481_v40 = vrot.slane %v13122_v52, 1  ;;  %v14363_v41 = vld [vmem:[#allocation2 + $0x50] ss:$0 sps:$4 sm:$0x11]   ;;  %8448 = vrot.lane.b32.xlu1 %v8275_v20, %s14631_s18  ;;  %v17871_v52 = vcombine.low %v7426_v62, %v7427_v61 }
 0x387   :  { %v12917_v8 = vcombine.low %v7486_v26, %v14362_v7  ;;  %v8587_v58 = vrot.slane %v14363_v41, 1  ;;  %v7554_v29 = vld [vmem:[#allocation2 + $0x120] sm:$0xf]  ;;  %v6918_v9 = vor.u32 %v6916_v27, %v6915_v1  ;;  %v6919_v3 = vrot.slane %v6915_v1, 4  ;;  %v7555_v5 = vld [vmem:[#allocation2 + $0x124] sm:$0xf] }
 0x388   :  { %v6926_v47 = vor.u32 %v6924_v50, %v6923_v28  ;;  %v6928_v38 = vrot.slane %v6923_v28, 4  ;;  %v17860_v54 = vpop.f32.mrb[112].mxu0  ;;  %v6321_v26 = vadd.bf16 %v17069_v45, %v6281_v16  ;;  %v10483_v53 = vsel %vm2564_vm9, %v10481_v40, %v10482_v11  ;;  %v14096_v1 = vld [vmem:[#allocation2 + $0x128] ss:$0 sps:$4 sm:$0x11]   ;;  %v19579_v7 = vld [vmem:[#allocation16_spill] sm:$0xff] }
 0x389   :  { %v8586_v48 = vrot.slane %v12917_v8, 1  ;;  %v5899_v30 = vpop.f32.mrb[113].mxu0  ;;  %v7322_v27 = vsel %vm15012_vm6, %v6918_v9, %v7321_v59  ;;  %13392 = vmatmul.mubr.msk.bf16.gmra.mrb[164].mxu0 %vm4517_vm10, %v10483_v53  ;;  %v17876_v11 = vcombine.low %v7554_v29, %v7555_v5  ;;  %v7681_v9 = vld [vmem:[#allocation2 + $0x124] sm:$0xf]  ;;  %v7756_v59 = vld [vmem:[#allocation2 + $0x120] sm:$0xe]  ;;  %v10539_v62 = vsel %vm4517_vm10, %v19579_v7, %v8421_v25 }
 0x38a   :  { %v6927_v21 = vsel %vm14999_vm5, %v6919_v3, %v6926_v47  ;;  %v7326_v50 = vsel %vm15018_vm7, %v6928_v38, %v7325_v57  ;;  %7323 = vst [vmem:[#allocation2 + $0x138] sm:$0xf] %v7322_v27  ;;  %v6353_v40 = vmax.bf16 %v19501_v46, %v6321_v26  ;;  %v8284_v3 = vshll.u32 %v14093_v18, 16  ;;  %v7487_v41 = vld [vmem:[#allocation2 + $0x54] sm:$0xe] }
 0x38b   :  { %7324 = vst.msk [vmem:[#allocation2 + $0x13c] sm:$0xf] %vm28_vm0, %v6927_v21  ;;  %7327 = vst [vmem:[#allocation2 + $0x140] sm:$0x1] %v7326_v50  ;;  %v8588_v28 = vsel %vm2564_vm9, %v8586_v48, %v8587_v58  ;;  %v8279_v61 = vshll.u32 %v17871_v52, 16  ;;  %v6163_v8 = vadd.f32 %v17365_v33, %v17779_v49  ;;  %8866 = vrot.lane.b32.xlu0 %v17876_v11, %s14631_s18  ;;  %v8277_v58 = vshrl.u32 %v17871_v52, 16 }
 0x38c   :  { %v10642_v57 = vsel %vm4517_vm10, %v8588_v28, %v8837_v17  ;;  %v12831_v20 = vcombine.low %v6353_v40, %v6353_v40  ;;  %v12832_v16 = vcombine.high %v6353_v40, %v6353_v40  ;;  %v6166_v18 = vadd.f32 %v17376_v4, %v17798_v43  ;;  %v17889_v17 = vpop.f32.mrb[114].mxu0  ;;  %v14156_v33 = vld [vmem:[%s19192_s2 + $0xd0] sm:$0xff]   ;;  %v7328_v48 = vld [vmem:[#allocation2 + $0x144] sm:$0xf]  ;;  %v7332_v4 = vld [vmem:[#allocation2 + $0x14c] sm:$0x1] }
 0x38d   :  { %11432 = vmatprep.mubr.bf16.mxu1 %v10642_v57  ;;  %v8281_v29 = vrot.slane %v8279_v61, 1  ;;  %v13123_v47 = vcombine.low %v7756_v59, %v7681_v9  ;;  %v10485_v38 = vrot.slane %v14096_v1, 1  ;;  %v8286_v26 = vrot.slane %v8284_v3, 1  ;;  %v5902_v53 = vpop.f32.mrb[115].mxu0  ;;  %v14364_v27 = vld [vmem:[#allocation2 + $0x58] sm:$0xf]  ;;  %11662 = vmatpush1.bf16.msra.mxu1 %v14156_v33 }
 0x38e   :  { %11433 = vmatmul.mubr.bf16.gmra.mrb[88].mxu1 %v10539_v62  ;;  %v6930_v49 = vshrl.u32 %v12831_v20, 16  ;;  %v6933_v5 = vshll.u32 %v12831_v20, 16  ;;  %v6938_v25 = vshrl.u32 %v12832_v16, 16  ;;  %v6242_v30 = vpack.c.bf16 %v6166_v18, %v6163_v8  ;;  %v7428_v40 = vld [vmem:[#allocation2 + $0x120] sm:$0xf]  ;;  %v17894_v28 = vpop.f32.mrb[116].mxu0  ;;  %11663 = vmatprep.subr.bf16.mxu1 %v19501_v46  ;;  %v8839_v20 = vpop.permute.xlu0 %8838 }
 0x38f   :  { %v8282_v43 = vor.u32 %v8281_v29, %v8277_v58  ;;  %v10484_v21 = vrot.slane %v13123_v47, 1  ;;  %v12918_v50 = vcombine.low %v7487_v41, %v14364_v27  ;;  %v7429_v1 = vld [vmem:[#allocation2 + $0x124] sm:$0xf]  ;;  %v6941_v57 = vshll.u32 %v12832_v16, 16  ;;  %v5907_v61 = vpop.f32.mrb[117].mxu0 }
 0x390   :  { %v6932_v9 = vrot.slane %v6930_v49, 7  ;;  %v6940_v59 = vrot.slane %v6938_v25, 7  ;;  %v14365_v7 = vld [vmem:[#allocation2 + $0x5c] ss:$0 sps:$4 sm:$0x11]   ;;  %v6282_v8 = vmul.bf16 %v17062_v42, %v6242_v30  ;;  %v17900_v29 = vpop.f32.mrb[118].mxu0  ;;  %v8423_v25 = vpop.permute.xlu1 %8422 }
 0x391   :  { %v8590_v62 = vrot.slane %v14365_v7, 1  ;;  %v8287_v3 = vsel %vm2019_vm8, %v8282_v43, %v8286_v26  ;;  %v10486_v18 = vsel %vm2564_vm9, %v10484_v21, %v10485_v38  ;;  %v8589_v41 = vrot.slane %v12918_v50, 1  ;;  %v14099_v58 = vld [vmem:[#allocation2 + $0x128] ss:$0 sps:$4 sm:$0x11]   ;;  %v5910_v27 = vpop.f32.mrb[119].mxu0 }
 0x392   :  { %v6935_v47 = vor.u32 %v6933_v5, %v6932_v9  ;;  %v6936_v33 = vrot.slane %v6932_v9, 4  ;;  %v6943_v49 = vor.u32 %v6941_v57, %v6940_v59  ;;  %v6945_v16 = vrot.slane %v6940_v59, 4  ;;  %8450 = vrot.lane.b32.xlu1 %v8287_v3, %s14631_s18  ;;  %13395 = vmatprep.mubr.msk.bf16.mxu0 %vm4517_vm10, %v10486_v18  ;;  %v7556_v53 = vld [vmem:[#allocation2 + $0x12c] sm:$0xf]  ;;  %v7557_v26 = vld [vmem:[#allocation2 + $0x130] sm:$0xf] }
 0x393   :  { %v6322_v43 = vadd.bf16 %v17069_v45, %v6282_v8  ;;  %v8591_v30 = vsel %vm2564_vm9, %v8589_v41, %v8590_v62  ;;  %v17906_v38 = vcombine.low %v7428_v40, %v7429_v1  ;;  %v7683_v21 = vld [vmem:[#allocation2 + $0x130] sm:$0xf]  ;;  %v7757_v57 = vld [vmem:[#allocation2 + $0x12c] sm:$0xe]  ;;  %v7488_v3 = vld [vmem:[#allocation2 + $0x60] sm:$0xe]  ;;  %v17921_v8 = vcombine.low %v7556_v53, %v7557_v26 }
 0x394   :  { %v6944_v5 = vsel %vm14999_vm5, %v6936_v33, %v6943_v49  ;;  %v7329_v50 = vsel %vm15012_vm6, %v6935_v47, %v7328_v48  ;;  %v7333_v9 = vsel %vm15018_vm7, %v6945_v16, %v7332_v4  ;;  %v10646_v59 = vsel %vm4517_vm10, %v8591_v30, %v8839_v20  ;;  %v14102_v7 = vld [vmem:[#allocation2 + $0x134] ss:$0 sps:$4 sm:$0x11]   ;;  %v19580_v1 = vld [vmem:[#allocation17_spill] sm:$0xff]  ;;  %v14366_v53 = vld [vmem:[#allocation2 + $0x64] sm:$0xf] }
 0x395   :  { %7331 = vst.msk [vmem:[#allocation2 + $0x148] sm:$0xf] %vm28_vm0, %v6944_v5  ;;  %7334 = vst [vmem:[#allocation2 + $0x14c] sm:$0x1] %v7333_v9  ;;  %v6354_v40 = vmax.bf16 %v19501_v46, %v6322_v43  ;;  %11440 = vmatprep.mubr.bf16.mxu1 %v10646_v59  ;;  %v10542_v62 = vsel %vm4517_vm10, %v19580_v1, %v8423_v25  ;;  %v8291_v61 = vshll.u32 %v17906_v38, 16  ;;  %v8296_v48 = vshll.u32 %v14099_v58, 16 }
 0x396   :  { %7330 = vst [vmem:[#allocation2 + $0x144] sm:$0xf] %v7329_v50  ;;  %11441 = vmatmul.mubr.bf16.gmra.mrb[92].mxu1 %v10542_v62  ;;  %v8289_v4 = vshrl.u32 %v17906_v38, 16  ;;  %19581 = vst [vmem:[#allocation65_spill] sm:$0xff] %v17921_v8  ;;  %v6171_v20 = vadd.f32 %v17442_v0, %v17814_v39  ;;  %v6174_v18 = vadd.f32 %v17459_v19, %v17817_v55  ;;  %v7430_v16 = vld [vmem:[#allocation2 + $0x12c] sm:$0xf]  ;;  %8868 = vrot.lane.b32.xlu0 %v17921_v8, %s14631_s18 }
 0x397   :  { %v12833_v41 = vcombine.low %v6354_v40, %v6354_v40  ;;  %v12834_v47 = vcombine.high %v6354_v40, %v6354_v40  ;;  %v8293_v33 = vrot.slane %v8291_v61, 1  ;;  %v13124_v49 = vcombine.low %v7757_v57, %v7683_v21  ;;  %v17927_v25 = vpop.f32.mrb[120].mxu0  ;;  %v14367_v30 = vld [vmem:[#allocation2 + $0x68] ss:$0 sps:$4 sm:$0x11]  }
 0x398   :  { %v6243_v58 = vpack.c.bf16 %v6174_v18, %v6171_v20  ;;  %v10488_v43 = vrot.slane %v14102_v7, 1  ;;  %v12919_v26 = vcombine.low %v7488_v3, %v14366_v53  ;;  %v8593_v27 = vrot.slane %v14367_v30, 1  ;;  %v7431_v0 = vld [vmem:[#allocation2 + $0x130] sm:$0xf]  ;;  %v5915_v39 = vpop.f32.mrb[121].mxu0  ;;  %v8425_v3 = vpop.permute.xlu1 %8424 }
 0x399   :  { %v6947_v5 = vshrl.u32 %v12833_v41, 16  ;;  %v6950_v19 = vshll.u32 %v12833_v41, 16  ;;  %v6955_v55 = vshrl.u32 %v12834_v47, 16  ;;  %v8298_v50 = vrot.slane %v8296_v48, 1  ;;  %v17931_v9 = vpop.f32.mrb[122].mxu0  ;;  %v8841_v20 = vpop.permute.xlu0 %8840 }
 0x39a   :  { %v8294_v21 = vor.u32 %v8293_v33, %v8289_v4  ;;  %v6283_v59 = vmul.bf16 %v17062_v42, %v6243_v58  ;;  %v10487_v57 = vrot.slane %v13124_v49, 1  ;;  %v8592_v40 = vrot.slane %v12919_v26, 1  ;;  %v5918_v1 = vpop.f32.mrb[123].mxu0  ;;  %v14106_v53 = vld [vmem:[#allocation2 + $0x134] ss:$0 sps:$4 sm:$0x11]  }
 0x39b   :  { %v6949_v62 = vrot.slane %v6947_v5, 7  ;;  %v6957_v7 = vrot.slane %v6955_v55, 7  ;;  %v6958_v61 = vshll.u32 %v12834_v47, 16  ;;  %v17934_v18 = vcombine.low %v7430_v16, %v7431_v0  ;;  %v7335_v30 = vld [vmem:[#allocation2 + $0x150] sm:$0xf] }
 0x39c   :  { %v7339_v41 = vld [vmem:[#allocation2 + $0x158] sm:$0x1]  ;;  %v8299_v48 = vsel %vm2019_vm8, %v8294_v21, %v8298_v50  ;;  %v6323_v39 = vadd.bf16 %v17069_v45, %v6283_v59  ;;  %v10489_v4 = vsel %vm2564_vm9, %v10487_v57, %v10488_v43  ;;  %v8594_v33 = vsel %vm2564_vm9, %v8592_v40, %v8593_v27  ;;  %v7559_v16 = vld [vmem:[#allocation2 + $0x13c] sm:$0xf]  ;;  %v19582_v50 = vld [vmem:[#allocation18_spill] sm:$0xff] }
 0x39d   :  { %v7558_v49 = vld [vmem:[#allocation2 + $0x138] sm:$0xf]  ;;  %v6952_v58 = vor.u32 %v6950_v19, %v6949_v62  ;;  %v6953_v26 = vrot.slane %v6949_v62, 4  ;;  %v6960_v5 = vor.u32 %v6958_v61, %v6957_v7  ;;  %v6962_v47 = vrot.slane %v6957_v7, 4  ;;  %8452 = vrot.lane.b32.xlu1 %v8299_v48, %s14631_s18  ;;  %13396 = vmatmul.mubr.msk.bf16.gmra.mrb[168].mxu0 %vm4517_vm10, %v10489_v4  ;;  %v7685_v40 = vld [vmem:[#allocation2 + $0x13c] sm:$0xf] }
 0x39e   :  { %v6355_v0 = vmax.bf16 %v19501_v46, %v6323_v39  ;;  %v10650_v55 = vsel %vm4517_vm10, %v8594_v33, %v8841_v20  ;;  %v10545_v21 = vsel %vm4517_vm10, %v19582_v50, %v8425_v3  ;;  %v8303_v43 = vshll.u32 %v17934_v18, 16  ;;  %v14109_v1 = vld [vmem:[#allocation2 + $0x140] ss:$0 sps:$4 sm:$0x11]   ;;  %v7758_v20 = vld [vmem:[#allocation2 + $0x138] sm:$0xe] }
 0x39f   :  { %v6961_v27 = vsel %vm14999_vm5, %v6953_v26, %v6960_v5  ;;  %v7336_v19 = vsel %vm15012_vm6, %v6952_v58, %v7335_v30  ;;  %v7340_v59 = vsel %vm15018_vm7, %v6962_v47, %v7339_v41  ;;  %11448 = vmatprep.mubr.bf16.mxu1 %v10650_v55  ;;  %v8308_v57 = vshll.u32 %v14106_v53, 16  ;;  %v19584_v48 = vld [vmem:[#allocation21_spill] sm:$0xff]  ;;  %v19585_v53 = vld [vmem:[#allocation23_spill] sm:$0xff]  ;;  %v17961_v33 = vpop.f32.mrb[124].mxu0  ;;  %v7346_v8 = vld [vmem:[#allocation2 + $0x164] sm:$0x1] }
 0x3a0   :  { %7338 = vst.msk [vmem:[#allocation2 + $0x154] sm:$0xf] %vm28_vm0, %v6961_v27  ;;  %7341 = vst [vmem:[#allocation2 + $0x158] sm:$0x1] %v7340_v59  ;;  %v12835_v62 = vcombine.low %v6355_v0, %v6355_v0  ;;  %v12836_v7 = vcombine.high %v6355_v0, %v6355_v0  ;;  %11449 = vmatmul.mubr.bf16.gmra.mrb[96].mxu1 %v10545_v21  ;;  %v8305_v61 = vrot.slane %v8303_v43, 1  ;;  %v8301_v30 = vshrl.u32 %v17934_v18, 16 }
 0x3a1   :  { %7337 = vst [vmem:[#allocation2 + $0x150] sm:$0xf] %v7336_v19  ;;  %v17954_v3 = vcombine.low %v7558_v49, %v7559_v16  ;;  %v6179_v41 = vadd.f32 %v19584_v48, %v17843_v23  ;;  %v6182_v39 = vadd.f32 %v19585_v53, %v17853_v31  ;;  %v7489_v4 = vld [vmem:[#allocation2 + $0x6c] sm:$0xe]  ;;  %v14161_v58 = vld [vmem:[%s19192_s2 + $0xd8] sm:$0xff]   ;;  %v8310_v47 = vrot.slane %v8308_v57, 1 }
 0x3a2   :  { %v6964_v26 = vshrl.u32 %v12835_v62, 16  ;;  %v6967_v5 = vshll.u32 %v12835_v62, 16  ;;  %v6972_v49 = vshrl.u32 %v12836_v7, 16  ;;  %v7432_v16 = vld [vmem:[#allocation2 + $0x138] sm:$0xf]  ;;  %v5923_v23 = vpop.f32.mrb[125].mxu0  ;;  %v8306_v55 = vor.u32 %v8305_v61, %v8301_v30  ;;  %11664 = vmatpush1.bf16.msra.mxu1 %v14161_v58 }
 0x3a3   :  { %19583 = vst [vmem:[#allocation31_spill] sm:$0xff] %v17954_v3  ;;  %8870 = vrot.lane.b32.xlu0 %v17954_v3, %s14631_s18  ;;  %v17968_v0 = vld [vmem:[#allocation2 + $0x140] ss:$0 sps:$4 sm:$0x11]   ;;  %v6244_v31 = vpack.c.bf16 %v6182_v39, %v6179_v41  ;;  %v13125_v50 = vcombine.low %v7758_v20, %v7685_v40  ;;  %v10491_v21 = vrot.slane %v14109_v1, 1  ;;  %v17970_v27 = vpop.f32.mrb[126].mxu0  ;;  %11665 = vmatprep.subr.bf16.mxu1 %v19501_v46 }
 0x3a4   :  { %v7433_v43 = vld [vmem:[#allocation2 + $0x13c] sm:$0xf]  ;;  %v6966_v19 = vrot.slane %v6964_v26, 7  ;;  %v6974_v59 = vrot.slane %v6972_v49, 7  ;;  %v6975_v62 = vshll.u32 %v12836_v7, 16  ;;  %v5926_v53 = vpop.f32.mrb[127].mxu0  ;;  %v8311_v23 = vsel %vm2019_vm8, %v8306_v55, %v8310_v47  ;;  %v8427_v7 = vpop.permute.xlu1 %8426 }
 0x3a5   :  { %v14368_v48 = vld [vmem:[#allocation2 + $0x70] sm:$0xf]  ;;  %v7342_v3 = vld [vmem:[#allocation2 + $0x15c] sm:$0xf]  ;;  %v6284_v61 = vmul.bf16 %v17062_v42, %v6244_v31  ;;  %v10490_v40 = vrot.slane %v13125_v50, 1  ;;  %8454 = vrot.lane.b32.xlu1 %v8311_v23, %s14631_s18  ;;  %v8843_v26 = vpop.permute.xlu0 %8842  ;;  %v17978_v53 = vcombine.low %v7432_v16, %v7433_v43 }
 0x3a6   :  { %v12920_v57 = vcombine.low %v7489_v4, %v14368_v48  ;;  %v14369_v1 = vld [vmem:[#allocation2 + $0x74] ss:$0 sps:$4 sm:$0x11]   ;;  %v6969_v30 = vor.u32 %v6967_v5, %v6966_v19  ;;  %v6970_v41 = vrot.slane %v6966_v19, 4  ;;  %v6977_v39 = vor.u32 %v6975_v62, %v6974_v59  ;;  %v7560_v47 = vld [vmem:[#allocation2 + $0x144] sm:$0xf] }
 0x3a7   :  { %v8596_v20 = vrot.slane %v14369_v1, 1  ;;  %v6979_v58 = vrot.slane %v6974_v59, 4  ;;  %v6324_v4 = vadd.bf16 %v17069_v45, %v6284_v61  ;;  %v10492_v49 = vsel %vm2564_vm9, %v10490_v40, %v10491_v21  ;;  %v7561_v55 = vld [vmem:[#allocation2 + $0x148] sm:$0xf]  ;;  %v7490_v31 = vld [vmem:[#allocation2 + $0x78] sm:$0xe] }
 0x3a8   :  { %v8595_v48 = vrot.slane %v12920_v57, 1  ;;  %v6978_v5 = vsel %vm14999_vm5, %v6970_v41, %v6977_v39  ;;  %v7343_v50 = vsel %vm15012_vm6, %v6969_v30, %v7342_v3  ;;  %13399 = vmatprep.mubr.msk.bf16.mxu0 %vm4517_vm10, %v10492_v49  ;;  %v8320_v59 = vshll.u32 %v17968_v0, 16  ;;  %v7687_v21 = vld [vmem:[#allocation2 + $0x148] sm:$0xf]  ;;  %v19586_v57 = vld [vmem:[#allocation19_spill] sm:$0xff] }
 0x3a9   :  { %v7347_v19 = vsel %vm15018_vm7, %v6979_v58, %v7346_v8  ;;  %v14115_v62 = vld [vmem:[#allocation2 + $0x14c] ss:$0 sps:$4 sm:$0x11]   ;;  %7345 = vst.msk [vmem:[#allocation2 + $0x160] sm:$0xf] %vm28_vm0, %v6978_v5  ;;  %v6356_v16 = vmax.bf16 %v19501_v46, %v6324_v4  ;;  %v10548_v3 = vsel %vm4517_vm10, %v19586_v57, %v8427_v7  ;;  %v8315_v23 = vshll.u32 %v17978_v53, 16  ;;  %v8429_v4 = vpop.permute.xlu1 %8428 }
 0x3aa   :  { %7348 = vst [vmem:[#allocation2 + $0x164] sm:$0x1] %v7347_v19  ;;  %7344 = vst [vmem:[#allocation2 + $0x15c] sm:$0xf] %v7343_v50  ;;  %v8597_v43 = vsel %vm2564_vm9, %v8595_v48, %v8596_v20  ;;  %v7759_v8 = vld [vmem:[#allocation2 + $0x144] sm:$0xe]  ;;  %v17996_v40 = vcombine.low %v7560_v47, %v7561_v55  ;;  %v6187_v1 = vadd.f32 %v17525_v15, %v17860_v54 }
 0x3ab   :  { %v10654_v61 = vsel %vm4517_vm10, %v8597_v43, %v8843_v26  ;;  %v8313_v0 = vshrl.u32 %v17978_v53, 16  ;;  %v12837_v30 = vcombine.low %v6356_v16, %v6356_v16  ;;  %v12838_v41 = vcombine.high %v6356_v16, %v6356_v16  ;;  %v14166_v58 = vld [vmem:[%s19192_s2 + $0xe0] sm:$0xff]   ;;  %v14370_v15 = vld [vmem:[#allocation2 + $0x7c] sm:$0xf]  ;;  %v7435_v47 = vld [vmem:[#allocation2 + $0x148] sm:$0xf] }
 0x3ac   :  { %11456 = vmatprep.mubr.bf16.mxu1 %v10654_v61  ;;  %v8317_v39 = vrot.slane %v8315_v23, 1  ;;  %v6190_v20 = vadd.f32 %v17546_v10, %v17889_v17  ;;  %v8322_v7 = vrot.slane %v8320_v59, 1  ;;  %8872 = vrot.lane.b32.xlu0 %v17996_v40, %s14631_s18  ;;  %v13126_v26 = vcombine.low %v7759_v8, %v7687_v21  ;;  %v7434_v48 = vld [vmem:[#allocation2 + $0x144] sm:$0xf]  ;;  %v7349_v17 = vld [vmem:[#allocation2 + $0x168] sm:$0xf] }
 0x3ad   :  { %11457 = vmatmul.mubr.bf16.gmra.mrb[100].mxu1 %v10548_v3  ;;  %v10494_v49 = vrot.slane %v14115_v62, 1  ;;  %v12921_v54 = vcombine.low %v7490_v31, %v14370_v15  ;;  %v6981_v55 = vshrl.u32 %v12837_v30, 16  ;;  %v6984_v5 = vshll.u32 %v12837_v30, 16  ;;  %v7353_v21 = vld [vmem:[#allocation2 + $0x170] sm:$0x1]  ;;  %v19587_v31 = vld [vmem:[#allocation20_spill] sm:$0xff] }
 0x3ae   :  { %v6989_v50 = vshrl.u32 %v12838_v41, 16  ;;  %v6992_v10 = vshll.u32 %v12838_v41, 16  ;;  %11666 = vmatpush1.bf16.msra.mxu1 %v14166_v58  ;;  %v8318_v19 = vor.u32 %v8317_v39, %v8313_v0  ;;  %v6245_v16 = vpack.c.bf16 %v6190_v20, %v6187_v1  ;;  %v14371_v62 = vld [vmem:[#allocation2 + $0x80] ss:$0 sps:$4 sm:$0x11]   ;;  %v8845_v41 = vpop.permute.xlu0 %8844 }
 0x3af   :  { %v10493_v43 = vrot.slane %v13126_v26, 1  ;;  %v8598_v59 = vrot.slane %v12921_v54, 1  ;;  %11667 = vmatprep.subr.bf16.mxu1 %v19501_v46  ;;  %v6983_v57 = vrot.slane %v6981_v55, 7  ;;  %v8599_v23 = vrot.slane %v14371_v62, 1  ;;  %v7562_v20 = vld [vmem:[#allocation2 + $0x150] sm:$0xf] }
 0x3b0   :  { %v6991_v3 = vrot.slane %v6989_v50, 7  ;;  %v10551_v8 = vsel %vm4517_vm10, %v19587_v31, %v8429_v4  ;;  %v8323_v61 = vsel %vm2019_vm8, %v8318_v19, %v8322_v7  ;;  %v6285_v30 = vmul.bf16 %v17062_v42, %v6245_v16  ;;  %v14119_v39 = vld [vmem:[#allocation2 + $0x14c] ss:$0 sps:$4 sm:$0x11]   ;;  %v7563_v4 = vld [vmem:[#allocation2 + $0x154] sm:$0xf] }
 0x3b1   :  { %v10495_v0 = vsel %vm2564_vm9, %v10493_v43, %v10494_v49  ;;  %v18013_v1 = vcombine.low %v7434_v48, %v7435_v47  ;;  %v6986_v58 = vor.u32 %v6984_v5, %v6983_v57  ;;  %v6987_v26 = vrot.slane %v6983_v57, 4  ;;  %8456 = vrot.lane.b32.xlu1 %v8323_v61, %s14631_s18  ;;  %v7689_v48 = vld [vmem:[#allocation2 + $0x154] sm:$0xf]  ;;  %v7760_v47 = vld [vmem:[#allocation2 + $0x150] sm:$0xe] }
 0x3b2   :  { %v6994_v15 = vor.u32 %v6992_v10, %v6991_v3  ;;  %v6996_v54 = vrot.slane %v6991_v3, 4  ;;  %13400 = vmatmul.mubr.msk.bf16.gmra.mrb[172].mxu0 %vm4517_vm10, %v10495_v0  ;;  %v6325_v7 = vadd.bf16 %v17069_v45, %v6285_v30  ;;  %v8600_v55 = vsel %vm2564_vm9, %v8598_v59, %v8599_v23  ;;  %v14122_v43 = vld [vmem:[#allocation2 + $0x158] ss:$0 sps:$4 sm:$0x11]   ;;  %v7491_v23 = vld [vmem:[#allocation2 + $0x84] sm:$0xe] }
 0x3b3   :  { %v8325_v50 = vshrl.u32 %v18013_v1, 16  ;;  %v8327_v49 = vshll.u32 %v18013_v1, 16  ;;  %v7350_v10 = vsel %vm15012_vm6, %v6986_v58, %v7349_v17  ;;  %v10658_v16 = vsel %vm4517_vm10, %v8600_v55, %v8845_v41  ;;  %v7436_v58 = vld [vmem:[#allocation2 + $0x150] sm:$0xf]  ;;  %v7565_v55 = vld [vmem:[#allocation2 + $0x160] sm:$0xf] }
 0x3b4   :  { %v6995_v5 = vsel %vm14999_vm5, %v6987_v26, %v6994_v15  ;;  %v7354_v19 = vsel %vm15018_vm7, %v6996_v54, %v7353_v21  ;;  %7351 = vst [vmem:[#allocation2 + $0x168] sm:$0xf] %v7350_v10  ;;  %v6357_v59 = vmax.bf16 %v19501_v46, %v6325_v7  ;;  %11464 = vmatprep.mubr.bf16.mxu1 %v10658_v16  ;;  %v8332_v3 = vshll.u32 %v14119_v39, 16  ;;  %v7437_v39 = vld [vmem:[#allocation2 + $0x154] sm:$0xf] }
 0x3b5   :  { %7352 = vst.msk [vmem:[#allocation2 + $0x16c] sm:$0xf] %vm28_vm0, %v6995_v5  ;;  %7355 = vst [vmem:[#allocation2 + $0x170] sm:$0x1] %v7354_v19  ;;  %v8329_v57 = vrot.slane %v8327_v49, 1  ;;  %v18030_v62 = vcombine.low %v7562_v20, %v7563_v4  ;;  %11465 = vmatmul.mubr.bf16.gmra.mrb[104].mxu1 %v10551_v8  ;;  %v6195_v17 = vadd.f32 %v17521_v12, %v17894_v28  ;;  %v18038_v20 = vpop.f32.mrb[128].mxu0 }
 0x3b6   :  { %v6198_v21 = vadd.f32 %v17544_v63, %v17900_v29  ;;  %v13127_v31 = vcombine.low %v7760_v47, %v7689_v48  ;;  %v12839_v61 = vcombine.low %v6357_v59, %v6357_v59  ;;  %v12840_v30 = vcombine.high %v6357_v59, %v6357_v59  ;;  %19589 = vst [vmem:[#allocation32_spill] sm:$0xff] %v18038_v20  ;;  %v14372_v54 = vld [vmem:[#allocation2 + $0x88] sm:$0xf]  ;;  %v7564_v28 = vld [vmem:[#allocation2 + $0x15c] sm:$0xf]  ;;  %v18040_v4 = vpop.f32.mrb[129].mxu0 }
 0x3b7   :  { %19588 = vst [vmem:[#allocation66_spill] sm:$0xff] %v18030_v62  ;;  %v8330_v41 = vor.u32 %v8329_v57, %v8325_v50  ;;  %v8334_v0 = vrot.slane %v8332_v3, 1  ;;  %8874 = vrot.lane.b32.xlu0 %v18030_v62, %s14631_s18  ;;  %v10497_v15 = vrot.slane %v14122_v43, 1  ;;  %v12922_v12 = vcombine.low %v7491_v23, %v14372_v54  ;;  %19590 = vst [vmem:[#allocation53_spill] sm:$0xff] %v18040_v4  ;;  %v18042_v50 = vpop.f32.mrb[130].mxu0  ;;  %v8431_v54 = vpop.permute.xlu1 %8430 }
 0x3b8   :  { %v6246_v26 = vpack.c.bf16 %v6198_v21, %v6195_v17  ;;  %v10496_v8 = vrot.slane %v13127_v31, 1  ;;  %v6998_v63 = vshrl.u32 %v12839_v61, 16  ;;  %v7001_v29 = vshll.u32 %v12839_v61, 16  ;;  %19591 = vst [vmem:[#allocation33_spill] sm:$0xff] %v18042_v50  ;;  %v18047_v19 = vpop.f32.mrb[131].mxu0  ;;  %v8847_v31 = vpop.permute.xlu0 %8846 }
 0x3b9   :  { %v7006_v7 = vshrl.u32 %v12840_v30, 16  ;;  %v8335_v49 = vsel %vm2019_vm8, %v8330_v41, %v8334_v0  ;;  %v8601_v5 = vrot.slane %v12922_v12, 1  ;;  %v14125_v10 = vld [vmem:[#allocation2 + $0x158] ss:$0 sps:$4 sm:$0x11]   ;;  %19592 = vst [vmem:[#allocation41_spill] sm:$0xff] %v18047_v19  ;;  %v18052_v61 = vcombine.low %v7436_v58, %v7437_v39 }
 0x3ba   :  { %v6286_v48 = vmul.bf16 %v17062_v42, %v6246_v26  ;;  %v10498_v47 = vsel %vm2564_vm9, %v10496_v8, %v10497_v15  ;;  %v7000_v16 = vrot.slane %v6998_v63, 7  ;;  %v7009_v59 = vshll.u32 %v12840_v30, 16  ;;  %8458 = vrot.lane.b32.xlu1 %v8335_v49, %s14631_s18  ;;  %v14373_v57 = vld [vmem:[#allocation2 + $0x8c] ss:$0 sps:$4 sm:$0x11]  }
 0x3bb   :  { %v7008_v43 = vrot.slane %v7006_v7, 7  ;;  %13403 = vmatprep.mubr.msk.bf16.mxu0 %vm4517_vm10, %v10498_v47  ;;  %v8602_v3 = vrot.slane %v14373_v57, 1  ;;  %v7356_v23 = vld [vmem:[#allocation2 + $0x174] sm:$0xf]  ;;  %v7360_v17 = vld [vmem:[#allocation2 + $0x17c] sm:$0x1]  ;;  %v18054_v41 = vcombine.low %v7564_v28, %v7565_v55 }
 0x3bc   :  { %v6326_v21 = vadd.bf16 %v17069_v45, %v6286_v48  ;;  %v14171_v0 = vld [vmem:[%s19192_s2 + $0xe8] sm:$0xff]   ;;  %v7003_v30 = vor.u32 %v7001_v29, %v7000_v16  ;;  %v7004_v26 = vrot.slane %v7000_v16, 4  ;;  %v7691_v12 = vld [vmem:[#allocation2 + $0x160] sm:$0xf]  ;;  %v8339_v49 = vshll.u32 %v18052_v61, 16  ;;  %v19594_v16 = vld [vmem:[#allocation22_spill] sm:$0xff] }
 0x3bd   :  { %19593 = vst [vmem:[#allocation34_spill] sm:$0xff] %v18054_v41  ;;  %v7011_v8 = vor.u32 %v7009_v59, %v7008_v43  ;;  %v7013_v15 = vrot.slane %v7008_v43, 4  ;;  %v8603_v7 = vsel %vm2564_vm9, %v8601_v5, %v8602_v3  ;;  %v8344_v58 = vshll.u32 %v14125_v10, 16  ;;  %8876 = vrot.lane.b32.xlu0 %v18054_v41, %s14631_s18  ;;  %v7761_v39 = vld [vmem:[#allocation2 + $0x15c] sm:$0xe]  ;;  %11668 = vmatpush1.bf16.msra.mxu1 %v14171_v0 }
 0x3be   :  { %v6358_v63 = vmax.bf16 %v19501_v46, %v6326_v21  ;;  %v7357_v29 = vsel %vm15012_vm6, %v7003_v30, %v7356_v23  ;;  %v10662_v48 = vsel %vm4517_vm10, %v8603_v7, %v8847_v31  ;;  %v14128_v47 = vld [vmem:[#allocation2 + $0x164] ss:$0 sps:$4 sm:$0x11]   ;;  %11669 = vmatprep.subr.bf16.mxu1 %v19501_v46  ;;  %v10554_v43 = vsel %vm4517_vm10, %v19594_v16, %v8431_v54  ;;  %v7492_v21 = vld [vmem:[#allocation2 + $0x90] sm:$0xe] }
 0x3bf   :  { %v7012_v28 = vsel %vm14999_vm5, %v7004_v26, %v7011_v8  ;;  %v7361_v55 = vsel %vm15018_vm7, %v7013_v15, %v7360_v17  ;;  %7358 = vst [vmem:[#allocation2 + $0x174] sm:$0xf] %v7357_v29  ;;  %11472 = vmatprep.mubr.bf16.mxu1 %v10662_v48  ;;  %v8341_v59 = vrot.slane %v8339_v49, 1  ;;  %v8337_v57 = vshrl.u32 %v18052_v61, 16  ;;  %v7438_v15 = vld [vmem:[#allocation2 + $0x15c] sm:$0xf] }
 0x3c0   :  { %7359 = vst.msk [vmem:[#allocation2 + $0x178] sm:$0xf] %vm28_vm0, %v7012_v28  ;;  %7362 = vst [vmem:[#allocation2 + $0x17c] sm:$0x1] %v7361_v55  ;;  %v12841_v5 = vcombine.low %v6358_v63, %v6358_v63  ;;  %v12842_v10 = vcombine.high %v6358_v63, %v6358_v63  ;;  %11473 = vmatmul.mubr.bf16.gmra.mrb[108].mxu1 %v10554_v43  ;;  %v6203_v3 = vadd.f32 %v17595_v13, %v17927_v25  ;;  %v7363_v54 = vld [vmem:[#allocation2 + $0x180] sm:$0xf] }
 0x3c1   :  { %v6206_v23 = vadd.f32 %v17641_v32, %v17931_v9  ;;  %v13128_v17 = vcombine.low %v7761_v39, %v7691_v12  ;;  %v18080_v31 = vld [vmem:[#allocation2 + $0x164] ss:$0 sps:$4 sm:$0x11]   ;;  %v8346_v8 = vrot.slane %v8344_v58, 1  ;;  %v7367_v63 = vld [vmem:[#allocation2 + $0x188] sm:$0x1]  ;;  %v8342_v7 = vor.u32 %v8341_v59, %v8337_v57 }
 0x3c2   :  { %v7015_v0 = vshrl.u32 %v12841_v5, 16  ;;  %v7018_v30 = vshll.u32 %v12841_v5, 16  ;;  %v7023_v26 = vshrl.u32 %v12842_v10, 16  ;;  %v10500_v29 = vrot.slane %v14128_v47, 1  ;;  %v7439_v55 = vld [vmem:[#allocation2 + $0x160] sm:$0xf] }
 0x3c3   :  { %v6247_v49 = vpack.c.bf16 %v6206_v23, %v6203_v3  ;;  %v10499_v28 = vrot.slane %v13128_v17, 1  ;;  %v7566_v13 = vld [vmem:[#allocation2 + $0x168] sm:$0xf]  ;;  %v7026_v32 = vshll.u32 %v12842_v10, 16  ;;  %v14374_v9 = vld [vmem:[#allocation2 + $0x94] sm:$0xf]  ;;  %v8347_v16 = vsel %vm2019_vm8, %v8342_v7, %v8346_v8  ;;  %v8433_v23 = vpop.permute.xlu1 %8432  ;;  %v8849_v17 = vpop.permute.xlu0 %8848 }
 0x3c4   :  { %v7017_v25 = vrot.slane %v7015_v0, 7  ;;  %v7025_v48 = vrot.slane %v7023_v26, 7  ;;  %v12923_v12 = vcombine.low %v7492_v21, %v14374_v9  ;;  %v7567_v39 = vld [vmem:[#allocation2 + $0x16c] sm:$0xf]  ;;  %8460 = vrot.lane.b32.xlu1 %v8347_v16, %s14631_s18  ;;  %v18088_v0 = vcombine.low %v7438_v15, %v7439_v55  ;;  %v14476_v62 = vld [vmem:[#allocation2 + $0x130] sm:$0xf] }
 0x3c5   :  { %v6287_v5 = vmul.bf16 %v17062_v42, %v6247_v49  ;;  %v10501_v58 = vsel %vm2564_vm9, %v10499_v28, %v10500_v29  ;;  %v14375_v43 = vld [vmem:[#allocation2 + $0x98] ss:$0 sps:$4 sm:$0x11]   ;;  %v8356_v26 = vshll.u32 %v18080_v31, 16  ;;  %v18097_v49 = vcombine.low %v7566_v13, %v7567_v39  ;;  %v7493_v28 = vld [vmem:[#allocation2 + $0x9c] sm:$0xe] }
 0x3c6   :  { %v8605_v50 = vrot.slane %v14375_v43, 1  ;;  %v7020_v59 = vor.u32 %v7018_v30, %v7017_v25  ;;  %v7021_v57 = vrot.slane %v7017_v25, 4  ;;  %v7028_v3 = vor.u32 %v7026_v32, %v7025_v48  ;;  %13404 = vmatmul.mubr.msk.bf16.gmra.mrb[176].mxu0 %vm4517_vm10, %v10501_v58  ;;  %v7441_v25 = vld [vmem:[#allocation2 + $0x16c] sm:$0xf]  ;;  %v14376_v58 = vld [vmem:[#allocation2 + $0xa0] sm:$0xf] }
 0x3c7   :  { %v7030_v47 = vrot.slane %v7025_v48, 4  ;;  %v6327_v10 = vadd.bf16 %v17069_v45, %v6287_v5  ;;  %v8604_v21 = vrot.slane %v12923_v12, 1  ;;  %19595 = vst [vmem:[#allocation37_spill] sm:$0xff] %v18097_v49  ;;  %v10557_v29 = vsel %vm4517_vm10, %v17490_v22, %v8433_v23  ;;  %v18105_v48 = vpop.f32.mrb[132].mxu0  ;;  %8878 = vrot.lane.b32.xlu0 %v18097_v49, %s14631_s18  ;;  %v14451_v41 = vld [vmem:[#allocation2 + $0x10c] sm:$0xf] }
 0x3c8   :  { %v7029_v8 = vsel %vm14999_vm5, %v7021_v57, %v7028_v3  ;;  %v7364_v30 = vsel %vm15012_vm6, %v7020_v59, %v7363_v54  ;;  %v8351_v55 = vshll.u32 %v18088_v0, 16  ;;  %v7440_v54 = vld [vmem:[#allocation2 + $0x168] sm:$0xf]  ;;  %19596 = vst [vmem:[#allocation35_spill] sm:$0xff] %v18105_v48  ;;  %v8349_v13 = vshrl.u32 %v18088_v0, 16  ;;  %v18117_v12 = vpop.f32.mrb[133].mxu0 }
 0x3c9   :  { %v7368_v7 = vsel %vm15018_vm7, %v7030_v47, %v7367_v63  ;;  %7366 = vst.msk [vmem:[#allocation2 + $0x184] sm:$0xf] %vm28_vm0, %v7029_v8  ;;  %7365 = vst [vmem:[#allocation2 + $0x180] sm:$0xf] %v7364_v30  ;;  %v6359_v15 = vmax.bf16 %v19501_v46, %v6327_v10  ;;  %v8606_v31 = vsel %vm2564_vm9, %v8604_v21, %v8605_v50  ;;  %v8435_v50 = vpop.permute.xlu1 %8434  ;;  %v7568_v59 = vld [vmem:[#allocation2 + $0x174] sm:$0xf] }
 0x3ca   :  { %7369 = vst [vmem:[#allocation2 + $0x188] sm:$0x1] %v7368_v7  ;;  %v10666_v63 = vsel %vm4517_vm10, %v8606_v31, %v8849_v17  ;;  %v6211_v32 = vadd.f32 %v17590_v36, %v17961_v33  ;;  %v6214_v22 = vadd.f32 %v17612_v24, %v17970_v27  ;;  %v18115_v9 = vld [vmem:[#allocation2 + $0x170] ss:$0 sps:$4 sm:$0x11]   ;;  %19597 = vst [vmem:[#allocation56_spill] sm:$0xff] %v18117_v12 }
 0x3cb   :  { %v12843_v39 = vcombine.low %v6359_v15, %v6359_v15  ;;  %v12844_v16 = vcombine.high %v6359_v15, %v6359_v15  ;;  %11480 = vmatprep.mubr.bf16.mxu1 %v10666_v63  ;;  %v8353_v5 = vrot.slane %v8351_v55, 1  ;;  %v12924_v43 = vcombine.low %v7493_v28, %v14376_v58  ;;  %v7569_v57 = vld [vmem:[#allocation2 + $0x178] sm:$0xf]  ;;  %v18119_v3 = vpop.f32.mrb[134].mxu0  ;;  %v7370_v7 = vld [vmem:[#allocation2 + $0x18c] sm:$0xf] }
 0x3cc   :  { %19598 = vst [vmem:[#allocation36_spill] sm:$0xff] %v18119_v3  ;;  %11481 = vmatmul.mubr.bf16.gmra.mrb[112].mxu1 %v10557_v29  ;;  %v8358_v36 = vrot.slane %v8356_v26, 1  ;;  %v6248_v33 = vpack.c.bf16 %v6214_v22, %v6211_v32  ;;  %v14377_v47 = vld [vmem:[#allocation2 + $0xa4] ss:$0 sps:$4 sm:$0x11]   ;;  %v18121_v24 = vcombine.low %v7440_v54, %v7441_v25  ;;  %v18123_v27 = vpop.f32.mrb[135].mxu0  ;;  %v10560_v8 = vsel %vm4517_vm10, %v17523_v2, %v8435_v50  ;;  %v8851_v25 = vpop.permute.xlu0 %8850 }
 0x3cd   :  { %v8608_v23 = vrot.slane %v14377_v47, 1  ;;  %19599 = vst [vmem:[#allocation59_spill] sm:$0xff] %v18123_v27  ;;  %v7032_v10 = vshrl.u32 %v12843_v39, 16  ;;  %v7035_v17 = vshll.u32 %v12843_v39, 16  ;;  %v7040_v21 = vshrl.u32 %v12844_v16, 16  ;;  %v14177_v26 = vld [vmem:[%s19192_s2 + $0xf0] sm:$0xff]  }
 0x3ce   :  { %v7043_v30 = vshll.u32 %v12844_v16, 16  ;;  %v8354_v28 = vor.u32 %v8353_v5, %v8349_v13  ;;  %v6288_v15 = vmul.bf16 %v17062_v42, %v6248_v33  ;;  %v8607_v31 = vrot.slane %v12924_v43, 1  ;;  %v7374_v54 = vld [vmem:[#allocation2 + $0x194] sm:$0x1]  ;;  %v7494_v22 = vld [vmem:[#allocation2 + $0xa8] sm:$0xe]  ;;  %11670 = vmatpush1.bf16.msra.mxu1 %v14177_v26 }
 0x3cf   :  { %v7034_v29 = vrot.slane %v7032_v10, 7  ;;  %v7042_v55 = vrot.slane %v7040_v21, 7  ;;  %v8363_v63 = vshll.u32 %v18121_v24, 16  ;;  %v8368_v32 = vshll.u32 %v18115_v9, 16  ;;  %11671 = vmatprep.subr.bf16.mxu1 %v19501_v46  ;;  %v7652_v48 = vld [vmem:[#allocation2 + $0x60] sm:$0xf] }
 0x3d0   :  { %v8359_v2 = vsel %vm2019_vm8, %v8354_v28, %v8358_v36  ;;  %v6328_v50 = vadd.bf16 %v17069_v45, %v6288_v15  ;;  %v8609_v13 = vsel %vm2564_vm9, %v8607_v31, %v8608_v23  ;;  %v18136_v42 = vcombine.low %v7568_v59, %v7569_v57  ;;  %v14139_v39 = vld [vmem:[#allocation2 + $0x17c] ss:$0 sps:$4 sm:$0x11]   ;;  %v7442_v59 = vld [vmem:[#allocation2 + $0x174] sm:$0xf] }
 0x3d1   :  { %v7037_v16 = vor.u32 %v7035_v17, %v7034_v29  ;;  %v7038_v5 = vrot.slane %v7034_v29, 4  ;;  %v7045_v58 = vor.u32 %v7043_v30, %v7042_v55  ;;  %v7047_v43 = vrot.slane %v7042_v55, 4  ;;  %8462 = vrot.lane.b32.xlu1 %v8359_v2, %s14631_s18  ;;  %v7443_v57 = vld [vmem:[#allocation2 + $0x178] sm:$0xf]  ;;  %v7570_v26 = vld [vmem:[#allocation2 + $0x180] sm:$0xf] }
 0x3d2   :  { %19600 = vst [vmem:[#allocation39_spill] sm:$0xff] %v18136_v42  ;;  %v6360_v9 = vmax.bf16 %v19501_v46, %v6328_v50  ;;  %v10670_v36 = vsel %vm4517_vm10, %v8609_v13, %v8851_v25  ;;  %v8361_v45 = vshrl.u32 %v18121_v24, 16  ;;  %v8365_v33 = vrot.slane %v8363_v63, 1  ;;  %8880 = vrot.lane.b32.xlu0 %v18136_v42, %s14631_s18  ;;  %v14378_v46 = vld [vmem:[#allocation2 + $0xac] sm:$0xf]  ;;  %11672 = vmatpush1.bf16.msra.mxu1 %v14186_v14 }
 0x3d3   :  { %v7046_v47 = vsel %vm14999_vm5, %v7038_v5, %v7045_v58  ;;  %v7371_v23 = vsel %vm15012_vm6, %v7037_v16, %v7370_v7  ;;  %v7375_v10 = vsel %vm15018_vm7, %v7047_v43, %v7374_v54  ;;  %11488 = vmatprep.mubr.bf16.mxu1 %v10670_v36  ;;  %v12925_v17 = vcombine.low %v7494_v22, %v14378_v46  ;;  %v14379_v15 = vld [vmem:[#allocation2 + $0xb0] ss:$0 sps:$4 sm:$0x11]   ;;  %v7495_v29 = vld [vmem:[#allocation2 + $0xb4] sm:$0xe]  ;;  %v8853_v7 = vpop.permute.xlu0 %8852 }
 0x3d4   :  { %7373 = vst.msk [vmem:[#allocation2 + $0x190] sm:$0xf] %vm28_vm0, %v7046_v47  ;;  %7376 = vst [vmem:[#allocation2 + $0x194] sm:$0x1] %v7375_v10  ;;  %v12845_v21 = vcombine.low %v6360_v9, %v6360_v9  ;;  %v12846_v30 = vcombine.high %v6360_v9, %v6360_v9  ;;  %11489 = vmatmul.mubr.bf16.gmra.mrb[116].mxu1 %v10560_v8  ;;  %v8366_v28 = vor.u32 %v8365_v33, %v8361_v45  ;;  %v7571_v2 = vld [vmem:[#allocation2 + $0x184] sm:$0xf] }
 0x3d5   :  { %7372 = vst [vmem:[#allocation2 + $0x18c] sm:$0xf] %v7371_v23  ;;  %v8611_v31 = vrot.slane %v14379_v15, 1  ;;  %v8370_v55 = vrot.slane %v8368_v32, 1  ;;  %v8610_v25 = vrot.slane %v12925_v17, 1  ;;  %v18152_v63 = vcombine.low %v7442_v59, %v7443_v57 }
 0x3d6   :  { %v8380_v54 = vshll.u32 %v14139_v39, 16  ;;  %v7049_v50 = vshrl.u32 %v12845_v21, 16  ;;  %v7052_v13 = vshll.u32 %v12845_v21, 16  ;;  %v7057_v22 = vshrl.u32 %v12846_v30, 16  ;;  %v7377_v5 = vld [vmem:[#allocation2 + $0x198] sm:$0xf]  ;;  %v8437_v39 = vpop.permute.xlu1 %8436 }
 0x3d7   :  { %v7060_v16 = vshll.u32 %v12846_v30, 16  ;;  %v8371_v58 = vsel %vm2019_vm8, %v8366_v28, %v8370_v55  ;;  %v8612_v8 = vsel %vm2564_vm9, %v8610_v25, %v8611_v31  ;;  %v8373_v43 = vshrl.u32 %v18152_v63, 16  ;;  %v7444_v32 = vld [vmem:[#allocation2 + $0x180] sm:$0xf]  ;;  %v7445_v36 = vld [vmem:[#allocation2 + $0x184] sm:$0xf] }
 0x3d8   :  { %v8375_v9 = vshll.u32 %v18152_v63, 16  ;;  %v7051_v45 = vrot.slane %v7049_v50, 7  ;;  %v7059_v33 = vrot.slane %v7057_v22, 7  ;;  %8464 = vrot.lane.b32.xlu1 %v8371_v58, %s14631_s18  ;;  %v10674_v59 = vsel %vm4517_vm10, %v8612_v8, %v8853_v7  ;;  %v14142_v47 = vld [vmem:[#allocation2 + $0x188] ss:$0 sps:$4 sm:$0x11]   ;;  %v8855_v8 = vpop.permute.xlu0 %8854 }
 0x3d9   :  { %v8382_v57 = vrot.slane %v8380_v54, 1  ;;  %v7381_v23 = vld [vmem:[#allocation2 + $0x1a0] sm:$0x1]  ;;  %11496 = vmatprep.mubr.bf16.mxu1 %v10674_v59  ;;  %v18160_v46 = vcombine.low %v7570_v26, %v7571_v2  ;;  %v14380_v17 = vld [vmem:[#allocation2 + $0xb8] sm:$0xf]  ;;  %v19602_v58 = vld [vmem:[#allocation61_spill] sm:$0xff]  ;;  %v18166_v2 = vcombine.low %v7444_v32, %v7445_v36 }
 0x3da   :  { %v8377_v10 = vrot.slane %v8375_v9, 1  ;;  %v12926_v21 = vcombine.low %v7495_v29, %v14380_v17  ;;  %v14381_v30 = vld [vmem:[#allocation2 + $0xbc] ss:$0 sps:$4 sm:$0x11]   ;;  %v7640_v15 = vld [vmem:[#allocation2 + $0x18] sm:$0xf]  ;;  %v7054_v31 = vor.u32 %v7052_v13, %v7051_v45  ;;  %v7062_v25 = vor.u32 %v7060_v16, %v7059_v33  ;;  %v8439_v44 = vpop.permute.xlu1 %8438 }
 0x3db   :  { %19601 = vst [vmem:[#allocation6_spill] sm:$0xff] %v18160_v46  ;;  %v8614_v28 = vrot.slane %v14381_v30, 1  ;;  %v7055_v55 = vrot.slane %v7051_v45, 4  ;;  %v7064_v50 = vrot.slane %v7059_v33, 4  ;;  %v7496_v22 = vld [vmem:[#allocation2 + $0xd8] sm:$0xe]  ;;  %v10563_v7 = vsel %vm4517_vm10, %v19602_v58, %v8437_v39  ;;  %8882 = vrot.lane.b32.xlu0 %v18160_v46, %s14631_s18 }
 0x3dc   :  { %v8378_v54 = vor.u32 %v8377_v10, %v8373_v43  ;;  %v8613_v26 = vrot.slane %v12926_v21, 1  ;;  %v7572_v29 = vld [vmem:[#allocation2 + $0x18c] sm:$0xf]  ;;  %v7573_v9 = vld [vmem:[#allocation2 + $0x190] sm:$0xf]  ;;  %v18170_v13 = vpop.f32.mrb[136].mxu0  ;;  %v7378_v45 = vsel %vm15012_vm6, %v7054_v31, %v7377_v5  ;;  %11497 = vmatmul.mubr.bf16.gmra.mrb[120].mxu1 %v10563_v7 }
 0x3dd   :  { %v18168_v59 = vld [vmem:[#allocation2 + $0x14] ss:$0 sps:$4 sm:$0x11]   ;;  %19603 = vst [vmem:[#allocation40_spill] sm:$0xff] %v18170_v13  ;;  %v7063_v16 = vsel %vm14999_vm5, %v7055_v55, %v7062_v25  ;;  %v7382_v43 = vsel %vm15018_vm7, %v7064_v50, %v7381_v23  ;;  %v8392_v33 = vshll.u32 %v14142_v47, 16  ;;  %v18178_v36 = vpop.f32.mrb[137].mxu0  ;;  %v18193_v30 = vcombine.low %v7572_v29, %v7573_v9 }
 0x3de   :  { %v7446_v39 = vld [vmem:[#allocation2 + $0x18c] sm:$0xf]  ;;  %v7447_v32 = vld [vmem:[#allocation2 + $0x190] sm:$0xf]  ;;  %19604 = vst [vmem:[#allocation42_spill] sm:$0xff] %v18178_v36  ;;  %v8383_v10 = vsel %vm2019_vm8, %v8378_v54, %v8382_v57  ;;  %v8615_v17 = vsel %vm2564_vm9, %v8613_v26, %v8614_v28  ;;  %v8387_v51 = vshll.u32 %v18166_v2, 16  ;;  %v8441_v13 = vpop.permute.xlu1 %8440 }
 0x3df   :  { %7379 = vst [vmem:[#allocation2 + $0x198] sm:$0xf] %v7378_v45  ;;  %7380 = vst.msk [vmem:[#allocation2 + $0x19c] sm:$0xf] %vm28_vm0, %v7063_v16  ;;  %v18184_v5 = vpop.f32.mrb[138].mxu0  ;;  %8466 = vrot.lane.b32.xlu1 %v8383_v10, %s14631_s18  ;;  %v10678_v21 = vsel %vm4517_vm10, %v8615_v17, %v8855_v8  ;;  %v8385_v50 = vshrl.u32 %v18166_v2, 16  ;;  %8884 = vrot.lane.b32.xlu0 %v18193_v30, %s14631_s18 }
 0x3e0   :  { %7383 = vst [vmem:[#allocation2 + $0x1a0] sm:$0x1] %v7382_v43  ;;  %19605 = vst [vmem:[#allocation10_spill] sm:$0xff] %v18184_v5  ;;  %v14382_v47 = vld [vmem:[#allocation2 + $0x1c] sm:$0xf]  ;;  %v18195_v25 = vpop.f32.mrb[139].mxu0  ;;  %11504 = vmatprep.mubr.bf16.mxu1 %v10678_v21 }
 0x3e1   :  { %v18189_v23 = vcombine.low %v7640_v15, %v14382_v47  ;;  %19606 = vst [vmem:[#allocation45_spill] sm:$0xff] %v18193_v30  ;;  %v14383_v57 = vld [vmem:[#allocation2 + $0xdc] sm:$0xf]  ;;  %v14146_v28 = vld [vmem:[#allocation2 + $0x194] ss:$0 sps:$4 sm:$0x11]   ;;  %v18198_v15 = vcombine.low %v7446_v39, %v7447_v32 }
 0x3e2   :  { %v12927_v31 = vcombine.low %v7496_v22, %v14383_v57  ;;  %v7608_v55 = vld [vmem:[#allocation2 + $0xc] sm:$0xe]  ;;  %19607 = vst [vmem:[#allocation54_spill] sm:$0xff] %v18195_v25  ;;  %v8389_v58 = vrot.slane %v8387_v51, 1  ;;  %v19608_v26 = vld [vmem:[#allocation62_spill] sm:$0xff]  ;;  %v8394_v29 = vrot.slane %v8392_v33, 1  ;;  %v8857_v22 = vpop.permute.xlu0 %8856 }
 0x3e3   :  { %v14384_v7 = vld [vmem:[#allocation2 + $0xe0] ss:$0 sps:$4 sm:$0x11]   ;;  %v10566_v8 = vsel %vm4517_vm10, %v19608_v26, %v8439_v44  ;;  %v8404_v16 = vshll.u32 %v14146_v28, 16  ;;  %v7644_v43 = vld [vmem:[#allocation2 + $0x30] sm:$0xf] }
 0x3e4   :  { %v8617_v54 = vrot.slane %v14384_v7, 1  ;;  %v8616_v9 = vrot.slane %v12927_v31, 1  ;;  %v14385_v45 = vld [vmem:[%s19192_s2 + $0x100] sm:$0xff]   ;;  %v8390_v10 = vor.u32 %v8389_v58, %v8385_v50  ;;  %v8399_v39 = vshll.u32 %v18198_v15, 16  ;;  %v14386_v32 = vld [vmem:[#allocation2 + $0x10] sm:$0xf]  ;;  %11505 = vmatmul.mubr.bf16.gmra.mrb[124].mxu1 %v10566_v8 }
 0x3e5   :  { %13419 = vmatprep.subr.bf16.mxu1 %v14385_v45  ;;  %v13007_v17 = vcombine.low %v7608_v55, %v14386_v32  ;;  %v9465_v44 = vrot.slane %v18168_v59, 1  ;;  %v7497_v33 = vld [vmem:[#allocation2 + $0xe4] sm:$0xe]  ;;  %v8397_v14 = vshrl.u32 %v18198_v15, 16  ;;  %v9881_v47 = vshrl.u32 %v18189_v23, 16 }
 0x3e6   :  { %v8618_v51 = vsel %vm2564_vm9, %v8616_v9, %v8617_v54  ;;  %v9883_v21 = vshll.u32 %v18189_v23, 16  ;;  %v7609_v57 = vld [vmem:[#allocation2 + $0x18] sm:$0xe]  ;;  %v7646_v31 = vld [vmem:[#allocation2 + $0x3c] sm:$0xf]  ;;  %v8395_v28 = vsel %vm2019_vm8, %v8390_v10, %v8394_v29  ;;  %v8401_v58 = vrot.slane %v8399_v39, 1 }
 0x3e7   :  { %v10682_v50 = vsel %vm4517_vm10, %v8618_v51, %v8857_v22  ;;  %v8406_v7 = vrot.slane %v8404_v16, 1  ;;  %v7642_v55 = vld [vmem:[#allocation2 + $0x24] sm:$0xf]  ;;  %8468 = vrot.lane.b32.xlu1 %v8395_v28, %s14631_s18  ;;  %v7574_v59 = vld [vmem:[#allocation2 + $0x198] sm:$0xf]  ;;  %v9464_v29 = vrot.slane %v13007_v17, 1 }
 0x3e8   :  { %v7575_v54 = vld [vmem:[#allocation2 + $0x19c] sm:$0xf]  ;;  %v9885_v26 = vrot.slane %v9883_v21, 1  ;;  %v14387_v9 = vld [vmem:[#allocation2 + $0x20] ss:$0 sps:$4 sm:$0x11]   ;;  %11512 = vmatprep.mubr.bf16.mxu1 %v10682_v50  ;;  %v8402_v25 = vor.u32 %v8401_v58, %v8397_v14 }
 0x3e9   :  { %v9888_v45 = vshll.u32 %v14387_v9, 16  ;;  %v14388_v32 = vld [vmem:[#allocation2 + $0xe8] sm:$0xf]  ;;  %v18216_v36 = vcombine.low %v7574_v59, %v7575_v54  ;;  %v14389_v22 = vld [vmem:[#allocation2 + $0xec] ss:$0 sps:$4 sm:$0x11]  }
 0x3ea   :  { %v12928_v5 = vcombine.low %v7497_v33, %v14388_v32  ;;  %v8620_v10 = vrot.slane %v14389_v22, 1  ;;  %v18218_v16 = vld [vmem:[#allocation2 + $0x20] ss:$0 sps:$4 sm:$0x11]   ;;  %v14390_v8 = vld [vmem:[#allocation2 + $0x34] sm:$0xf]  ;;  %v9886_v51 = vor.u32 %v9885_v26, %v9881_v47  ;;  %v8407_v21 = vsel %vm2019_vm8, %v8402_v25, %v8406_v7  ;;  %v8859_v33 = vpop.permute.xlu0 %8858 }
 0x3eb   :  { %19609 = vst [vmem:[#allocation7_spill] sm:$0xff] %v18216_v36  ;;  %v18220_v39 = vcombine.low %v7644_v43, %v14390_v8  ;;  %8886 = vrot.lane.b32.xlu0 %v18216_v36, %s14631_s18  ;;  %v14391_v50 = vld [vmem:[#allocation2 + $0x1c] sm:$0xf]  ;;  %v14392_v58 = vld [vmem:[#allocation2 + $0x28] sm:$0xf]  ;;  %v10569_v43 = vsel %vm4517_vm10, %v17675_v60, %v8441_v13  ;;  %8470 = vrot.lane.b32.xlu1 %v8407_v21, %s14631_s18 }
 0x3ec   :  { %v8619_v28 = vrot.slane %v12928_v5, 1  ;;  %v13008_v14 = vcombine.low %v7609_v57, %v14391_v50  ;;  %v18225_v59 = vcombine.low %v7642_v55, %v14392_v58  ;;  %v7610_v17 = vld [vmem:[#allocation2 + $0x24] sm:$0xe]  ;;  %v14393_v54 = vld [vmem:[#allocation2 + $0x40] sm:$0xf]  ;;  %v9890_v5 = vrot.slane %v9888_v45, 1  ;;  %11513 = vmatmul.mubr.bf16.gmra.mrb[128].mxu1 %v10569_v43  ;;  %v8443_v43 = vpop.permute.xlu1 %8442 }
 0x3ed   :  { %v18227_v9 = vcombine.low %v7646_v31, %v14393_v54  ;;  %v14394_v25 = vld [vmem:[#allocation2 + $0x2c] ss:$0 sps:$4 sm:$0x11]   ;;  %v7498_v7 = vld [vmem:[#allocation2 + $0xf0] sm:$0xe]  ;;  %v9466_v26 = vsel %vm2564_vm9, %v9464_v29, %v9465_v44  ;;  %v9468_v55 = vrot.slane %v18218_v16, 1 }
 0x3ee   :  { %v9900_v47 = vshll.u32 %v14394_v25, 16  ;;  %v8621_v57 = vsel %vm2564_vm9, %v8619_v28, %v8620_v10  ;;  %v9895_v32 = vshll.u32 %v18225_v59, 16  ;;  %v9891_v31 = vsel %vm2019_vm8, %v9886_v51, %v9890_v5  ;;  %v18238_v8 = vld [vmem:[#allocation2 + $0x2c] ss:$0 sps:$4 sm:$0x11]   ;;  %v18243_v50 = vpop.f32.mrb[140].mxu0 }
 0x3ef   :  { %v10686_v22 = vsel %vm4517_vm10, %v8621_v57, %v8859_v33  ;;  %v14395_v60 = vld [vmem:[#allocation2 + $0x28] sm:$0xf]  ;;  %v9907_v45 = vshll.u32 %v18220_v39, 16  ;;  %10264 = vrot.lane.b32.xlu0 %v9891_v31, %s14631_s18  ;;  %v9467_v44 = vrot.slane %v13008_v14, 1  ;;  %v9893_v29 = vshrl.u32 %v18225_v59, 16  ;;  %19610 = vst [vmem:[#allocation8_spill] sm:$0xff] %v18243_v50  ;;  %9560 = vrot.lane.b32.xlu1 %v9466_v26, %s14631_s18 }
 0x3f0   :  { %v13009_v13 = vcombine.low %v7610_v17, %v14395_v60  ;;  %v7648_v21 = vld [vmem:[#allocation2 + $0x48] sm:$0xf]  ;;  %v9897_v10 = vrot.slane %v9895_v32, 1  ;;  %v14396_v16 = vld [vmem:[#allocation2 + $0xf4] sm:$0xf]  ;;  %v9902_v51 = vrot.slane %v9900_v47, 1  ;;  %11520 = vmatprep.mubr.bf16.mxu1 %v10686_v22 }
 0x3f1   :  { %v12929_v28 = vcombine.low %v7498_v7, %v14396_v16  ;;  %v9909_v33 = vrot.slane %v9907_v45, 1  ;;  %v7611_v58 = vld [vmem:[#allocation2 + $0x30] sm:$0xe]  ;;  %v18246_v17 = vpop.f32.mrb[141].mxu0  ;;  %v7650_v54 = vld [vmem:[#allocation2 + $0x54] sm:$0xf]  ;;  %v9469_v22 = vsel %vm2564_vm9, %v9467_v44, %v9468_v55  ;;  %v10572_v55 = vsel %vm4517_vm10, %v17688_v34, %v8443_v43 }
 0x3f2   :  { %19611 = vst [vmem:[#allocation9_spill] sm:$0xff] %v18246_v17  ;;  %v9898_v5 = vor.u32 %v9897_v10, %v9893_v29  ;;  %v14397_v25 = vld [vmem:[#allocation2 + $0x38] ss:$0 sps:$4 sm:$0x11]   ;;  %v18248_v60 = vpop.f32.mrb[142].mxu0  ;;  %v9471_v47 = vrot.slane %v18238_v8, 1  ;;  %v8861_v10 = vpop.permute.xlu0 %8860 }
 0x3f3   :  { %v9912_v14 = vshll.u32 %v14397_v25, 16  ;;  %v8622_v57 = vrot.slane %v12929_v28, 1  ;;  %v14398_v31 = vld [vmem:[#allocation2 + $0xf8] ss:$0 sps:$4 sm:$0x11]   ;;  %19612 = vst [vmem:[#allocation38_spill] sm:$0xff] %v18248_v60  ;;  %9562 = vrot.lane.b32.xlu1 %v9469_v22, %s14631_s18 }
 0x3f4   :  { %v8623_v32 = vrot.slane %v14398_v31, 1  ;;  %v14399_v7 = vld [vmem:[#allocation2 + $0x4c] sm:$0xf]  ;;  %v9905_v26 = vshrl.u32 %v18220_v39, 16  ;;  %v9919_v45 = vshll.u32 %v18227_v9, 16  ;;  %v18255_v50 = vpop.f32.mrb[143].mxu0  ;;  %v9903_v29 = vsel %vm2019_vm8, %v9898_v5, %v9902_v51  ;;  %11521 = vmatmul.mubr.bf16.gmra.mrb[132].mxu1 %v10572_v55  ;;  %v8445_v55 = vpop.permute.xlu1 %8444 }
 0x3f5   :  { %v18250_v16 = vcombine.low %v7648_v21, %v14399_v7  ;;  %19613 = vst [vmem:[#allocation57_spill] sm:$0xff] %v18255_v50  ;;  %v9470_v28 = vrot.slane %v13009_v13, 1  ;;  %v14152_v25 = vld [vmem:[#allocation2 + $0x38] ss:$0 sps:$4 sm:$0x11]   ;;  %10266 = vrot.lane.b32.xlu0 %v9903_v29, %s14631_s18  ;;  %v9914_v44 = vrot.slane %v9912_v14, 1 }
 0x3f6   :  { %v14400_v31 = vld [vmem:[#allocation2 + $0x34] sm:$0xf]  ;;  %v7499_v21 = vld [vmem:[#allocation2 + $0xfc] sm:$0xe]  ;;  %v14401_v7 = vld [vmem:[#allocation2 + $0x58] sm:$0xf]  ;;  %v9910_v8 = vor.u32 %v9909_v33, %v9905_v26  ;;  %v8624_v13 = vsel %vm2564_vm9, %v8622_v57, %v8623_v32 }
 0x3f7   :  { %v13010_v60 = vcombine.low %v7611_v58, %v14400_v31  ;;  %v18259_v17 = vcombine.low %v7650_v54, %v14401_v7  ;;  %v9921_v3 = vrot.slane %v9919_v45, 1  ;;  %v7612_v50 = vld [vmem:[#allocation2 + $0x3c] sm:$0xe]  ;;  %v9917_v51 = vshrl.u32 %v18227_v9, 16  ;;  %v14403_v29 = vld [vmem:[#allocation2 + $0x100] sm:$0xf] }
 0x3f8   :  { %v10690_v58 = vsel %vm4517_vm10, %v8624_v13, %v8861_v10  ;;  %v14402_v54 = vld [vmem:[#allocation2 + $0x44] ss:$0 sps:$4 sm:$0x11]   ;;  %v9931_v22 = vshll.u32 %v18250_v16, 16  ;;  %v12930_v33 = vcombine.low %v7499_v21, %v14403_v29  ;;  %v7654_v26 = vld [vmem:[#allocation2 + $0x6c] sm:$0xf]  ;;  %v9472_v45 = vsel %vm2564_vm9, %v9470_v28, %v9471_v47 }
 0x3f9   :  { %v9924_v5 = vshll.u32 %v14402_v54, 16  ;;  %v14153_v31 = vld [vmem:[#allocation2 + $0x44] ss:$0 sps:$4 sm:$0x11]   ;;  %v9473_v7 = vrot.slane %v13010_v60, 1  ;;  %v9474_v36 = vrot.slane %v14152_v25, 1  ;;  %9564 = vrot.lane.b32.xlu1 %v9472_v45, %s14631_s18  ;;  %v9915_v57 = vsel %vm2019_vm8, %v9910_v8, %v9914_v44  ;;  %11528 = vmatprep.mubr.bf16.mxu1 %v10690_v58 }
 0x3fa   :  { %v14404_v34 = vld [vmem:[#allocation2 + $0x40] sm:$0xf]  ;;  %v7656_v43 = vld [vmem:[#allocation2 + $0x78] sm:$0xf]  ;;  %v9922_v32 = vor.u32 %v9921_v3, %v9917_v51  ;;  %v9933_v10 = vrot.slane %v9931_v22, 1  ;;  %10268 = vrot.lane.b32.xlu0 %v9915_v57, %s14631_s18  ;;  %v8625_v47 = vrot.slane %v12930_v33, 1  ;;  %v8863_v22 = vpop.permute.xlu0 %8862 }
 0x3fb   :  { %v13011_v14 = vcombine.low %v7612_v50, %v14404_v34  ;;  %v7613_v13 = vld [vmem:[#allocation2 + $0x48] sm:$0xe]  ;;  %v14405_v54 = vld [vmem:[#allocation2 + $0x64] sm:$0xf]  ;;  %v9943_v50 = vshll.u32 %v18259_v17, 16  ;;  %v9926_v29 = vrot.slane %v9924_v5, 1 }
 0x3fc   :  { %v18272_v27 = vcombine.low %v7652_v48, %v14405_v54  ;;  %v14406_v60 = vld [vmem:[#allocation2 + $0x104] ss:$0 sps:$4 sm:$0x11]   ;;  %v14407_v25 = vld [vmem:[#allocation2 + $0x70] sm:$0xf]  ;;  %v9929_v3 = vshrl.u32 %v18250_v16, 16  ;;  %v9475_v48 = vsel %vm2564_vm9, %v9473_v7, %v9474_v36  ;;  %v10575_v36 = vsel %vm4517_vm10, %v17751_v6, %v8445_v55 }
 0x3fd   :  { %v8626_v28 = vrot.slane %v14406_v60, 1  ;;  %v18276_v21 = vcombine.low %v7654_v26, %v14407_v25  ;;  %v14408_v8 = vld [vmem:[#allocation2 + $0x50] ss:$0 sps:$4 sm:$0x11]   ;;  %v7500_v51 = vld [vmem:[#allocation2 + $0x108] sm:$0xe]  ;;  %9566 = vrot.lane.b32.xlu1 %v9475_v48, %s14631_s18  ;;  %v9927_v5 = vsel %vm2019_vm8, %v9922_v32, %v9926_v29  ;;  %11529 = vmatmul.mubr.bf16.gmra.mrb[136].mxu1 %v10575_v36 }
 0x3fe   :  { %v9936_v44 = vshll.u32 %v14408_v8, 16  ;;  %v9476_v45 = vrot.slane %v13011_v14, 1  ;;  %v9477_v58 = vrot.slane %v14153_v31, 1  ;;  %v14154_v33 = vld [vmem:[#allocation2 + $0x50] ss:$0 sps:$4 sm:$0x11]   ;;  %v9934_v26 = vor.u32 %v9933_v10, %v9929_v3  ;;  %10270 = vrot.lane.b32.xlu0 %v9927_v5, %s14631_s18 }
 0x3ff   :  { %v14409_v34 = vld [vmem:[#allocation2 + $0x4c] sm:$0xf]  ;;  %v14410_v54 = vld [vmem:[#allocation2 + $0x7c] sm:$0xf]  ;;  %v9945_v25 = vrot.slane %v9943_v50, 1  ;;  %v8627_v31 = vsel %vm2564_vm9, %v8625_v47, %v8626_v28  ;;  %v9955_v7 = vshll.u32 %v18272_v27, 16 }
 0x400   :  { %v13012_v57 = vcombine.low %v7613_v13, %v14409_v34  ;;  %v18280_v60 = vcombine.low %v7656_v43, %v14410_v54  ;;  %v7614_v12 = vld [vmem:[#allocation2 + $0x54] sm:$0xe]  ;;  %v7658_v8 = vld [vmem:[#allocation2 + $0x84] sm:$0xf]  ;;  %v14411_v14 = vld [vmem:[#allocation2 + $0x10c] sm:$0xf]  ;;  %v10694_v48 = vsel %vm4517_vm10, %v8627_v31, %v8863_v22  ;;  %v9478_v29 = vsel %vm2564_vm9, %v9476_v45, %v9477_v58 }
 0x401   :  { %v12931_v43 = vcombine.low %v7500_v51, %v14411_v14  ;;  %v9938_v13 = vrot.slane %v9936_v44, 1  ;;  %v9941_v32 = vshrl.u32 %v18259_v17, 16  ;;  %v14412_v10 = vld [vmem:[#allocation2 + $0x5c] ss:$0 sps:$4 sm:$0x11]   ;;  %v9480_v34 = vrot.slane %v14154_v33, 1  ;;  %9568 = vrot.lane.b32.xlu1 %v9478_v29, %s14631_s18  ;;  %11536 = vmatprep.mubr.bf16.mxu1 %v10694_v48  ;;  %v8865_v48 = vpop.permute.xlu0 %8864 }
 0x402   :  { %v9948_v50 = vshll.u32 %v14412_v10, 16  ;;  %v9479_v3 = vrot.slane %v13012_v57, 1  ;;  %v14155_v6 = vld [vmem:[#allocation2 + $0x5c] ss:$0 sps:$4 sm:$0x11]   ;;  %v9957_v44 = vrot.slane %v9955_v7, 1 }
 0x403   :  { %v14413_v55 = vld [vmem:[#allocation2 + $0x58] sm:$0xf]  ;;  %v7660_v5 = vld [vmem:[#allocation2 + $0x90] sm:$0xf]  ;;  %v9939_v47 = vsel %vm2019_vm8, %v9934_v26, %v9938_v13  ;;  %v9946_v28 = vor.u32 %v9945_v25, %v9941_v32  ;;  %v7615_v51 = vld [vmem:[#allocation2 + $0x60] sm:$0xe]  ;;  %v8447_v26 = vpop.permute.xlu1 %8446 }
 0x404   :  { %v13013_v54 = vcombine.low %v7614_v12, %v14413_v55  ;;  %v9967_v22 = vshll.u32 %v18276_v21, 16  ;;  %10272 = vrot.lane.b32.xlu0 %v9939_v47, %s14631_s18  ;;  %v8628_v45 = vrot.slane %v12931_v43, 1  ;;  %v14414_v58 = vld [vmem:[#allocation2 + $0x110] ss:$0 sps:$4 sm:$0x11]   ;;  %v18298_v31 = vpop.f32.mrb[144].mxu0  ;;  %v9481_v43 = vsel %vm2564_vm9, %v9479_v3, %v9480_v34 }
 0x405   :  { %v8629_v33 = vrot.slane %v14414_v58, 1  ;;  %v18296_v57 = vld [vmem:[#allocation2 + $0x68] ss:$0 sps:$4 sm:$0x11]   ;;  %v7501_v12 = vld [vmem:[#allocation2 + $0x114] sm:$0xe]  ;;  %9570 = vrot.lane.b32.xlu1 %v9481_v43, %s14631_s18  ;;  %v10578_v34 = vsel %vm4517_vm10, %v17788_v35, %v8447_v26 }
 0x406   :  { %19614 = vst [vmem:[#allocation11_spill] sm:$0xff] %v18298_v31  ;;  %v14415_v36 = vld [vmem:[#allocation2 + $0x88] sm:$0xf]  ;;  %v9950_v25 = vrot.slane %v9948_v50, 1  ;;  %v9953_v7 = vshrl.u32 %v18272_v27, 16  ;;  %v18303_v10 = vpop.f32.mrb[145].mxu0  ;;  %11537 = vmatmul.mubr.bf16.gmra.mrb[140].mxu1 %v10578_v34 }
 0x407   :  { %v18300_v14 = vcombine.low %v7658_v8, %v14415_v36  ;;  %v14416_v13 = vld [vmem:[#allocation2 + $0x68] ss:$0 sps:$4 sm:$0x11]   ;;  %19615 = vst [vmem:[#allocation46_spill] sm:$0xff] %v18303_v10  ;;  %v9482_v29 = vrot.slane %v13013_v54, 1  ;;  %v9483_v55 = vrot.slane %v14155_v6, 1  ;;  %v8630_v6 = vsel %vm2564_vm9, %v8628_v45, %v8629_v33 }
 0x408   :  { %v9960_v32 = vshll.u32 %v14416_v13, 16  ;;  %v14417_v47 = vld [vmem:[#allocation2 + $0x64] sm:$0xf]  ;;  %v18306_v30 = vpop.f32.mrb[146].mxu0  ;;  %v9951_v8 = vsel %vm2019_vm8, %v9946_v28, %v9950_v25  ;;  %v9958_v50 = vor.u32 %v9957_v44, %v9953_v7  ;;  %v9969_v36 = vrot.slane %v9967_v22, 1 }
 0x409   :  { %v13014_v58 = vcombine.low %v7615_v51, %v14417_v47  ;;  %19616 = vst [vmem:[#allocation48_spill] sm:$0xff] %v18306_v30  ;;  %v7616_v31 = vld [vmem:[#allocation2 + $0x6c] sm:$0xe]  ;;  %v9979_v13 = vshll.u32 %v18280_v60, 16  ;;  %v18311_v20 = vpop.f32.mrb[147].mxu0  ;;  %10274 = vrot.lane.b32.xlu0 %v9951_v8, %s14631_s18  ;;  %v10698_v22 = vsel %vm4517_vm10, %v8630_v6, %v8865_v48  ;;  %v9965_v25 = vshrl.u32 %v18276_v21, 16 }
 0x40a   :  { %19617 = vst [vmem:[#allocation47_spill] sm:$0xff] %v18311_v20  ;;  %v14418_v10 = vld [vmem:[#allocation2 + $0x94] sm:$0xf]  ;;  %v14419_v54 = vld [vmem:[#allocation2 + $0x118] sm:$0xf]  ;;  %v9962_v44 = vrot.slane %v9960_v32, 1  ;;  %11544 = vmatprep.mubr.bf16.mxu1 %v10698_v22 }
 0x40b   :  { %v18313_v3 = vcombine.low %v7660_v5, %v14418_v10  ;;  %v12932_v51 = vcombine.low %v7501_v12, %v14419_v54  ;;  %v7662_v28 = vld [vmem:[#allocation2 + $0x9c] sm:$0xf]  ;;  %v14420_v7 = vld [vmem:[#allocation2 + $0x74] ss:$0 sps:$4 sm:$0x11]   ;;  %v9484_v5 = vsel %vm2564_vm9, %v9482_v29, %v9483_v55  ;;  %v9485_v10 = vrot.slane %v13014_v58, 1 }
 0x40c   :  { %v9972_v43 = vshll.u32 %v14420_v7, 16  ;;  %v9486_v47 = vrot.slane %v18296_v57, 1  ;;  %v14158_v35 = vld [vmem:[#allocation2 + $0x74] ss:$0 sps:$4 sm:$0x11]   ;;  %9572 = vrot.lane.b32.xlu1 %v9484_v5, %s14631_s18  ;;  %v9963_v45 = vsel %vm2019_vm8, %v9958_v50, %v9962_v44  ;;  %v9970_v33 = vor.u32 %v9969_v36, %v9965_v25  ;;  %v8867_v25 = vpop.permute.xlu0 %8866 }
 0x40d   :  { %v14421_v26 = vld [vmem:[#allocation2 + $0x70] sm:$0xf]  ;;  %v9981_v12 = vrot.slane %v9979_v13, 1  ;;  %v7617_v32 = vld [vmem:[#allocation2 + $0x78] sm:$0xe]  ;;  %v9991_v48 = vshll.u32 %v18300_v14, 16  ;;  %10276 = vrot.lane.b32.xlu0 %v9963_v45, %s14631_s18 }
 0x40e   :  { %v13015_v8 = vcombine.low %v7616_v31, %v14421_v26  ;;  %v7664_v6 = vld [vmem:[#allocation2 + $0xa8] sm:$0xf]  ;;  %v8631_v29 = vrot.slane %v12932_v51, 1  ;;  %v14422_v55 = vld [vmem:[#allocation2 + $0x11c] ss:$0 sps:$4 sm:$0x11]   ;;  %v8449_v31 = vpop.permute.xlu1 %8448  ;;  %v9487_v44 = vsel %vm2564_vm9, %v9485_v10, %v9486_v47 }
 0x40f   :  { %v8632_v57 = vrot.slane %v14422_v55, 1  ;;  %v14423_v58 = vld [vmem:[#allocation2 + $0xa0] sm:$0xf]  ;;  %v9974_v34 = vrot.slane %v9972_v43, 1  ;;  %v9977_v7 = vshrl.u32 %v18280_v60, 16  ;;  %v9489_v26 = vrot.slane %v14158_v35, 1 }
 0x410   :  { %v18327_v54 = vcombine.low %v7662_v28, %v14423_v58  ;;  %v14424_v50 = vld [vmem:[#allocation2 + $0x80] ss:$0 sps:$4 sm:$0x11]   ;;  %v7502_v13 = vld [vmem:[#allocation2 + $0x120] sm:$0xe]  ;;  %v9488_v5 = vrot.slane %v13015_v8, 1  ;;  %9574 = vrot.lane.b32.xlu1 %v9487_v44, %s14631_s18  ;;  %v10581_v10 = vsel %vm4517_vm10, %v17826_v56, %v8449_v31 }
 0x411   :  { %v9984_v36 = vshll.u32 %v14424_v50, 16  ;;  %v14159_v45 = vld [vmem:[#allocation2 + $0x80] ss:$0 sps:$4 sm:$0x11]   ;;  %v14425_v22 = vld [vmem:[#allocation2 + $0x7c] sm:$0xf]  ;;  %v9975_v28 = vsel %vm2019_vm8, %v9970_v33, %v9974_v34  ;;  %v9982_v55 = vor.u32 %v9981_v12, %v9977_v7  ;;  %v8633_v47 = vsel %vm2564_vm9, %v8631_v29, %v8632_v57  ;;  %11545 = vmatmul.mubr.bf16.gmra.mrb[144].mxu1 %v10581_v10 }
 0x412   :  { %v13016_v51 = vcombine.low %v7617_v32, %v14425_v22  ;;  %v9993_v58 = vrot.slane %v9991_v48, 1  ;;  %v7618_v43 = vld [vmem:[#allocation2 + $0x84] sm:$0xe]  ;;  %v10003_v30 = vshll.u32 %v18313_v3, 16  ;;  %v14426_v20 = vld [vmem:[#allocation2 + $0xac] sm:$0xf]  ;;  %10278 = vrot.lane.b32.xlu0 %v9975_v28, %s14631_s18  ;;  %v10702_v33 = vsel %vm4517_vm10, %v8633_v47, %v8867_v25 }
 0x413   :  { %v18334_v50 = vcombine.low %v7664_v6, %v14426_v20  ;;  %v14427_v35 = vld [vmem:[#allocation2 + $0x124] sm:$0xf]  ;;  %v7666_v32 = vld [vmem:[#allocation2 + $0xb4] sm:$0xf]  ;;  %v9986_v44 = vrot.slane %v9984_v36, 1  ;;  %v9989_v12 = vshrl.u32 %v18300_v14, 16  ;;  %v9490_v20 = vsel %vm2564_vm9, %v9488_v5, %v9489_v26  ;;  %11552 = vmatprep.mubr.bf16.mxu1 %v10702_v33  ;;  %v8869_v33 = vpop.permute.xlu0 %8868 }
 0x414   :  { %v12933_v8 = vcombine.low %v7502_v13, %v14427_v35  ;;  %v14428_v48 = vld [vmem:[#allocation2 + $0x8c] ss:$0 sps:$4 sm:$0x11]   ;;  %v9491_v6 = vrot.slane %v13016_v51, 1  ;;  %v9492_v7 = vrot.slane %v14159_v45, 1  ;;  %9576 = vrot.lane.b32.xlu1 %v9490_v20, %s14631_s18  ;;  %v10005_v36 = vrot.slane %v10003_v30, 1 }
 0x415   :  { %v9996_v34 = vshll.u32 %v14428_v48, 16  ;;  %v14160_v22 = vld [vmem:[#allocation2 + $0x8c] ss:$0 sps:$4 sm:$0x11]   ;;  %v14429_v56 = vld [vmem:[#allocation2 + $0x88] sm:$0xf]  ;;  %v9987_v29 = vsel %vm2019_vm8, %v9982_v55, %v9986_v44  ;;  %v9994_v57 = vor.u32 %v9993_v58, %v9989_v12 }
 0x416   :  { %v13017_v31 = vcombine.low %v7618_v43, %v14429_v56  ;;  %v7668_v28 = vld [vmem:[#allocation2 + $0xc0] sm:$0xf]  ;;  %v7619_v13 = vld [vmem:[#allocation2 + $0x90] sm:$0xe]  ;;  %v10015_v25 = vshll.u32 %v18327_v54, 16  ;;  %10280 = vrot.lane.b32.xlu0 %v9987_v29, %s14631_s18  ;;  %v8634_v5 = vrot.slane %v12933_v8, 1  ;;  %v9493_v48 = vsel %vm2564_vm9, %v9491_v6, %v9492_v7 }
 0x417   :  { %v14430_v26 = vld [vmem:[#allocation2 + $0x128] ss:$0 sps:$4 sm:$0x11]   ;;  %v7620_v51 = vld [vmem:[#allocation2 + $0x9c] sm:$0xe]  ;;  %v18347_v47 = vpop.f32.mrb[148].mxu0 }
 0x418   :  { %v8635_v45 = vrot.slane %v14430_v26, 1  ;;  %19618 = vst [vmem:[#allocation14_spill] sm:$0xff] %v18347_v47  ;;  %v14431_v43 = vld [vmem:[#allocation2 + $0xb8] sm:$0xf]  ;;  %v9998_v35 = vrot.slane %v9996_v34, 1  ;;  %v10001_v55 = vshrl.u32 %v18313_v3, 16  ;;  %9578 = vrot.lane.b32.xlu1 %v9493_v48, %s14631_s18 }
 0x419   :  { %v18349_v10 = vcombine.low %v7666_v32, %v14431_v43  ;;  %v14432_v58 = vld [vmem:[#allocation2 + $0x98] ss:$0 sps:$4 sm:$0x11]   ;;  %v7503_v44 = vld [vmem:[#allocation2 + $0x12c] sm:$0xe]  ;;  %v18352_v12 = vpop.f32.mrb[149].mxu0  ;;  %v8451_v32 = vpop.permute.xlu1 %8450 }
 0x41a   :  { %v10008_v30 = vshll.u32 %v14432_v58, 16  ;;  %19619 = vst [vmem:[#allocation15_spill] sm:$0xff] %v18352_v12  ;;  %v9494_v8 = vrot.slane %v13017_v31, 1  ;;  %v9495_v20 = vrot.slane %v14160_v22, 1  ;;  %v14433_v29 = vld [vmem:[#allocation2 + $0x94] sm:$0xf]  ;;  %v9999_v34 = vsel %vm2019_vm8, %v9994_v57, %v9998_v35 }
 0x41b   :  { %v14162_v56 = vld [vmem:[#allocation2 + $0x98] ss:$0 sps:$4 sm:$0x11]   ;;  %v13018_v26 = vcombine.low %v7619_v13, %v14433_v29  ;;  %v18355_v47 = vpop.f32.mrb[150].mxu0  ;;  %v10006_v43 = vor.u32 %v10005_v36, %v10001_v55  ;;  %v10017_v58 = vrot.slane %v10015_v25, 1  ;;  %v10027_v46 = vshll.u32 %v18334_v50, 16  ;;  %10282 = vrot.lane.b32.xlu0 %v9999_v34, %s14631_s18 }
 0x41c   :  { %19620 = vst [vmem:[#allocation16_spill] sm:$0xff] %v18355_v47  ;;  %v18360_v12 = vpop.f32.mrb[151].mxu0  ;;  %v14434_v6 = vld [vmem:[#allocation2 + $0xc4] sm:$0xf]  ;;  %v8636_v22 = vsel %vm2564_vm9, %v8634_v5, %v8635_v45  ;;  %v14435_v13 = vld [vmem:[#allocation2 + $0xa0] sm:$0xf]  ;;  %v9496_v34 = vsel %vm2564_vm9, %v9494_v8, %v9495_v20 }
 0x41d   :  { %19621 = vst [vmem:[#allocation17_spill] sm:$0xff] %v18360_v12  ;;  %v18362_v7 = vcombine.low %v7668_v28, %v14434_v6  ;;  %v14163_v31 = vld [vmem:[#allocation2 + $0xa4] ss:$0 sps:$4 sm:$0x11]   ;;  %v13019_v29 = vcombine.low %v7620_v51, %v14435_v13  ;;  %v14436_v47 = vld [vmem:[#allocation2 + $0x130] sm:$0xf]  ;;  %v10706_v57 = vsel %vm4517_vm10, %v8636_v22, %v8869_v33  ;;  %v10584_v28 = vsel %vm4517_vm10, %v17871_v52, %v8451_v32 }
 0x41e   :  { %v12934_v48 = vcombine.low %v7503_v44, %v14436_v47  ;;  %v10010_v19 = vrot.slane %v10008_v30, 1  ;;  %v10013_v36 = vshrl.u32 %v18327_v54, 16  ;;  %v14437_v25 = vld [vmem:[#allocation2 + $0xa4] ss:$0 sps:$4 sm:$0x11]   ;;  %v9497_v6 = vrot.slane %v13018_v26, 1  ;;  %11553 = vmatmul.mubr.bf16.gmra.mrb[148].mxu1 %v10584_v28  ;;  %9580 = vrot.lane.b32.xlu1 %v9496_v34, %s14631_s18 }
 0x41f   :  { %v10020_v35 = vshll.u32 %v14437_v25, 16  ;;  %v7670_v55 = vld [vmem:[#allocation2 + $0xcc] sm:$0xf]  ;;  %v9498_v5 = vrot.slane %v14162_v56, 1  ;;  %v10029_v47 = vrot.slane %v10027_v46, 1  ;;  %v10039_v44 = vshll.u32 %v18349_v10, 16  ;;  %11560 = vmatprep.mubr.bf16.mxu1 %v10706_v57 }
 0x420   :  { %v10011_v45 = vsel %vm2019_vm8, %v10006_v43, %v10010_v19  ;;  %v10018_v51 = vor.u32 %v10017_v58, %v10013_v36  ;;  %v7621_v30 = vld [vmem:[#allocation2 + $0xa8] sm:$0xe]  ;;  %v9500_v33 = vrot.slane %v13019_v29, 1  ;;  %v9501_v22 = vrot.slane %v14163_v31, 1  ;;  %v14439_v20 = vld [vmem:[#allocation2 + $0xd0] sm:$0xf]  ;;  %v8871_v36 = vpop.permute.xlu0 %8870  ;;  %v8453_v29 = vpop.permute.xlu1 %8452 }
 0x421   :  { %10284 = vrot.lane.b32.xlu0 %v10011_v45, %s14631_s18  ;;  %v8637_v52 = vrot.slane %v12934_v48, 1  ;;  %v14438_v32 = vld [vmem:[#allocation2 + $0x134] ss:$0 sps:$4 sm:$0x11]   ;;  %v18375_v56 = vcombine.low %v7670_v55, %v14439_v20  ;;  %v10022_v26 = vrot.slane %v10020_v35, 1  ;;  %v10025_v13 = vshrl.u32 %v18334_v50, 16 }
 0x422   :  { %v8638_v8 = vrot.slane %v14438_v32, 1  ;;  %v14440_v19 = vld [vmem:[#allocation2 + $0xb0] ss:$0 sps:$4 sm:$0x11]   ;;  %v7504_v46 = vld [vmem:[#allocation2 + $0x138] sm:$0xe]  ;;  %v9499_v58 = vsel %vm2564_vm9, %v9497_v6, %v9498_v5  ;;  %v9502_v32 = vsel %vm2564_vm9, %v9500_v33, %v9501_v22 }
 0x423   :  { %v10032_v43 = vshll.u32 %v14440_v19, 16  ;;  %v14164_v25 = vld [vmem:[#allocation2 + $0xb0] ss:$0 sps:$4 sm:$0x11]   ;;  %v14441_v28 = vld [vmem:[#allocation2 + $0xac] sm:$0xf]  ;;  %9582 = vrot.lane.b32.xlu1 %v9499_v58, %s14631_s18  ;;  %v10023_v31 = vsel %vm2019_vm8, %v10018_v51, %v10022_v26  ;;  %v10030_v48 = vor.u32 %v10029_v47, %v10025_v13  ;;  %v10587_v26 = vsel %vm4517_vm10, %v17906_v38, %v8453_v29 }
 0x424   :  { %v13020_v57 = vcombine.low %v7621_v30, %v14441_v28  ;;  %v10041_v55 = vrot.slane %v10039_v44, 1  ;;  %v7622_v34 = vld [vmem:[#allocation2 + $0xb4] sm:$0xe]  ;;  %v10051_v35 = vshll.u32 %v18362_v7, 16  ;;  %v7672_v45 = vld [vmem:[#allocation2 + $0xf0] sm:$0xf]  ;;  %v8639_v6 = vsel %vm2564_vm9, %v8637_v52, %v8638_v8 }
 0x425   :  { %10286 = vrot.lane.b32.xlu0 %v10023_v31, %s14631_s18  ;;  %v14442_v5 = vld [vmem:[#allocation2 + $0xbc] ss:$0 sps:$4 sm:$0x11]   ;;  %v10034_v28 = vrot.slane %v10032_v43, 1  ;;  %v10710_v58 = vsel %vm4517_vm10, %v8639_v6, %v8871_v36  ;;  %v10037_v51 = vshrl.u32 %v18349_v10, 16  ;;  %v10063_v47 = vshll.u32 %v18375_v56, 16 }
 0x426   :  { %v10044_v20 = vshll.u32 %v14442_v5, 16  ;;  %v14443_v30 = vld [vmem:[#allocation2 + $0x13c] sm:$0xf]  ;;  %v9503_v13 = vrot.slane %v13020_v57, 1  ;;  %v9504_v31 = vrot.slane %v14164_v25, 1  ;;  %11561 = vmatmul.mubr.bf16.gmra.mrb[152].mxu1 %v10587_v26  ;;  %v10053_v6 = vrot.slane %v10051_v35, 1 }
 0x427   :  { %v12935_v19 = vcombine.low %v7504_v46, %v14443_v30  ;;  %v7674_v44 = vld [vmem:[#allocation2 + $0xfc] sm:$0xf]  ;;  %v14444_v22 = vld [vmem:[#allocation2 + $0xb8] sm:$0xf]  ;;  %v14445_v8 = vld [vmem:[#allocation2 + $0xf4] sm:$0xf]  ;;  %9584 = vrot.lane.b32.xlu1 %v9502_v32, %s14631_s18  ;;  %v10035_v43 = vsel %vm2019_vm8, %v10030_v48, %v10034_v28  ;;  %v10042_v36 = vor.u32 %v10041_v55, %v10037_v51  ;;  %11568 = vmatprep.mubr.bf16.mxu1 %v10710_v58  ;;  %v8873_v28 = vpop.permute.xlu0 %8872 }
 0x428   :  { %v14165_v33 = vld [vmem:[#allocation2 + $0xbc] ss:$0 sps:$4 sm:$0x11]   ;;  %v13021_v52 = vcombine.low %v7622_v34, %v14444_v22  ;;  %v18390_v5 = vcombine.low %v7672_v45, %v14445_v8  ;;  %v7676_v46 = vld [vmem:[#allocation2 + $0x108] sm:$0xf]  ;;  %v10046_v38 = vrot.slane %v10044_v20, 1  ;;  %v9505_v35 = vsel %vm2564_vm9, %v9503_v13, %v9504_v31 }
 0x429   :  { %v7623_v30 = vld [vmem:[#allocation2 + $0xc0] sm:$0xe]  ;;  %10288 = vrot.lane.b32.xlu0 %v10035_v43, %s14631_s18  ;;  %v10049_v25 = vshrl.u32 %v18362_v7, 16  ;;  %v8640_v57 = vrot.slane %v12935_v19, 1  ;;  %v7624_v45 = vld [vmem:[#allocation2 + $0xe4] sm:$0xe]  ;;  %v18403_v13 = vcombine.low %v7676_v46, %v14451_v41 }
 0x42a   :  { %v14446_v29 = vld [vmem:[#allocation2 + $0x140] ss:$0 sps:$4 sm:$0x11]   ;;  %v14447_v22 = vld [vmem:[#allocation2 + $0xc8] ss:$0 sps:$4 sm:$0x11]  }
 0x42b   :  { %v8641_v34 = vrot.slane %v14446_v29, 1  ;;  %v10056_v8 = vshll.u32 %v14447_v22, 16  ;;  %v10061_v26 = vshrl.u32 %v18375_v56, 16  ;;  %v10065_v32 = vrot.slane %v10063_v47, 1  ;;  %v7505_v55 = vld [vmem:[#allocation2 + $0x144] sm:$0xe]  ;;  %v8455_v29 = vpop.permute.xlu1 %8454  ;;  %9586 = vrot.lane.b32.xlu1 %v9505_v35, %s14631_s18 }
 0x42c   :  { %v14448_v12 = vld [vmem:[#allocation2 + $0xd4] ss:$0 sps:$4 sm:$0x11]   ;;  %v9506_v51 = vrot.slane %v13021_v52, 1  ;;  %v9507_v58 = vrot.slane %v14165_v33, 1  ;;  %v10047_v22 = vsel %vm2019_vm8, %v10042_v36, %v10046_v38  ;;  %v10054_v47 = vor.u32 %v10053_v6, %v10049_v25 }
 0x42d   :  { %v10068_v48 = vshll.u32 %v14448_v12, 16  ;;  %v14167_v20 = vld [vmem:[#allocation2 + $0xc8] ss:$0 sps:$4 sm:$0x11]   ;;  %v14449_v43 = vld [vmem:[#allocation2 + $0xc4] sm:$0xf]  ;;  %10290 = vrot.lane.b32.xlu0 %v10047_v22, %s14631_s18  ;;  %v8642_v31 = vsel %vm2564_vm9, %v8640_v57, %v8641_v34  ;;  %v10066_v6 = vor.u32 %v10065_v32, %v10061_v26  ;;  %v10590_v41 = vsel %vm4517_vm10, %v17934_v18, %v8455_v29 }
 0x42e   :  { %v13022_v4 = vcombine.low %v7623_v30, %v14449_v43  ;;  %v14450_v19 = vld [vmem:[#allocation2 + $0x100] sm:$0xf]  ;;  %v14168_v49 = vld [vmem:[#allocation2 + $0xec] ss:$0 sps:$4 sm:$0x11]   ;;  %v10075_v12 = vshll.u32 %v18390_v5, 16  ;;  %v10714_v36 = vsel %vm4517_vm10, %v8642_v31, %v8873_v28  ;;  %v9508_v46 = vsel %vm2564_vm9, %v9506_v51, %v9507_v58  ;;  %11569 = vmatmul.mubr.bf16.gmra.mrb[156].mxu1 %v10590_v41 }
 0x42f   :  { %v18398_v42 = vcombine.low %v7674_v44, %v14450_v19  ;;  %v14452_v33 = vld [vmem:[#allocation2 + $0xe8] sm:$0xf]  ;;  %v18407_v43 = vpop.f32.mrb[152].mxu0  ;;  %v10058_v35 = vrot.slane %v10056_v8, 1  ;;  %v10070_v38 = vrot.slane %v10068_v48, 1  ;;  %v9510_v57 = vrot.slane %v14167_v20, 1  ;;  %9588 = vrot.lane.b32.xlu1 %v9508_v46, %s14631_s18  ;;  %11576 = vmatprep.mubr.bf16.mxu1 %v10714_v36  ;;  %v8457_v46 = vpop.permute.xlu1 %8456 }
 0x430   :  { %v13023_v52 = vcombine.low %v7624_v45, %v14452_v33  ;;  %v14453_v44 = vld [vmem:[#allocation2 + $0x148] sm:$0xf]  ;;  %19622 = vst [vmem:[#allocation18_spill] sm:$0xff] %v18407_v43  ;;  %v18410_v25 = vpop.f32.mrb[153].mxu0  ;;  %v9509_v19 = vrot.slane %v13022_v4, 1  ;;  %v9513_v8 = vrot.slane %v14168_v49, 1 }
 0x431   :  { %v12936_v30 = vcombine.low %v7505_v55, %v14453_v44  ;;  %19623 = vst [vmem:[#allocation21_spill] sm:$0xff] %v18410_v25  ;;  %v18415_v34 = vpop.f32.mrb[154].mxu0  ;;  %v10059_v45 = vsel %vm2019_vm8, %v10054_v47, %v10058_v35  ;;  %v10077_v55 = vrot.slane %v10075_v12, 1  ;;  %v7625_v26 = vld [vmem:[#allocation2 + $0xf0] sm:$0xe]  ;;  %v10087_v32 = vshll.u32 %v18398_v42, 16 }
 0x432   :  { %19624 = vst [vmem:[#allocation23_spill] sm:$0xff] %v18415_v34  ;;  %v18420_v48 = vpop.f32.mrb[155].mxu0  ;;  %v7678_v28 = vld [vmem:[#allocation2 + $0x114] sm:$0xf]  ;;  %10292 = vrot.lane.b32.xlu0 %v10059_v45, %s14631_s18  ;;  %v9512_v18 = vrot.slane %v13023_v52, 1  ;;  %v10071_v22 = vsel %vm2019_vm8, %v10066_v6, %v10070_v38  ;;  %v10073_v49 = vshrl.u32 %v18390_v5, 16  ;;  %v9511_v12 = vsel %vm2564_vm9, %v9509_v19, %v9510_v57  ;;  %v8875_v38 = vpop.permute.xlu0 %8874 }
 0x433   :  { %19625 = vst [vmem:[#allocation19_spill] sm:$0xff] %v18420_v48  ;;  %v14454_v4 = vld [vmem:[#allocation2 + $0xf8] ss:$0 sps:$4 sm:$0x11]   ;;  %v8643_v58 = vrot.slane %v12936_v30, 1  ;;  %v10099_v41 = vshll.u32 %v18403_v13, 16  ;;  %9590 = vrot.lane.b32.xlu1 %v9511_v12, %s14631_s18 }
 0x434   :  { %v10080_v51 = vshll.u32 %v14454_v4, 16  ;;  %v14455_v20 = vld [vmem:[#allocation2 + $0x14c] ss:$0 sps:$4 sm:$0x11]   ;;  %v7506_v47 = vld [vmem:[#allocation2 + $0x150] sm:$0xe]  ;;  %v10078_v30 = vor.u32 %v10077_v55, %v10073_v49  ;;  %v9514_v19 = vsel %vm2564_vm9, %v9512_v18, %v9513_v8 }
 0x435   :  { %v8644_v29 = vrot.slane %v14455_v20, 1  ;;  %v14169_v31 = vld [vmem:[#allocation2 + $0xf8] ss:$0 sps:$4 sm:$0x11]   ;;  %v14456_v33 = vld [vmem:[#allocation2 + $0xf4] sm:$0xf] }
 0x436   :  { %v13024_v44 = vcombine.low %v7625_v26, %v14456_v33  ;;  %v7626_v35 = vld [vmem:[#allocation2 + $0xfc] sm:$0xe]  ;;  %v14457_v36 = vld [vmem:[#allocation2 + $0x118] sm:$0xf]  ;;  %v10089_v45 = vrot.slane %v10087_v32, 1  ;;  %10294 = vrot.lane.b32.xlu0 %v10071_v22, %s14631_s18  ;;  %v10082_v57 = vrot.slane %v10080_v51, 1  ;;  %v10593_v22 = vsel %vm4517_vm10, %v17978_v53, %v8457_v46 }
 0x437   :  { %v18427_v52 = vcombine.low %v7678_v28, %v14457_v36  ;;  %v7680_v6 = vld [vmem:[#allocation2 + $0x120] sm:$0xf]  ;;  %v8645_v26 = vsel %vm2564_vm9, %v8643_v58, %v8644_v29  ;;  %v14458_v4 = vld [vmem:[#allocation2 + $0x154] sm:$0xf]  ;;  %v10085_v28 = vshrl.u32 %v18398_v42, 16  ;;  %v9516_v43 = vrot.slane %v14169_v31, 1  ;;  %11577 = vmatmul.mubr.bf16.gmra.mrb[160].mxu1 %v10593_v22  ;;  %9592 = vrot.lane.b32.xlu1 %v9514_v19, %s14631_s18 }
 0x438   :  { %v12937_v20 = vcombine.low %v7506_v47, %v14458_v4  ;;  %v10718_v33 = vsel %vm4517_vm10, %v8645_v26, %v8875_v38  ;;  %v14459_v36 = vld [vmem:[#allocation2 + $0x104] ss:$0 sps:$4 sm:$0x11]   ;;  %v14460_v55 = vld [vmem:[#allocation2 + $0x100] sm:$0xf]  ;;  %v9515_v49 = vrot.slane %v13024_v44, 1  ;;  %v10083_v29 = vsel %vm2019_vm8, %v10078_v30, %v10082_v57 }
 0x439   :  { %v10092_v34 = vshll.u32 %v14459_v36, 16  ;;  %v14170_v12 = vld [vmem:[#allocation2 + $0x104] ss:$0 sps:$4 sm:$0x11]   ;;  %v13025_v32 = vcombine.low %v7626_v35, %v14460_v55  ;;  %v10101_v8 = vrot.slane %v10099_v41, 1  ;;  %v10090_v47 = vor.u32 %v10089_v45, %v10085_v28  ;;  %11584 = vmatprep.mubr.bf16.mxu1 %v10718_v33  ;;  %v8459_v33 = vpop.permute.xlu1 %8458 }
 0x43a   :  { %v14461_v18 = vld [vmem:[#allocation2 + $0x124] sm:$0xf]  ;;  %v7682_v58 = vld [vmem:[#allocation2 + $0x12c] sm:$0xf]  ;;  %v7627_v38 = vld [vmem:[#allocation2 + $0x108] sm:$0xe]  ;;  %10296 = vrot.lane.b32.xlu0 %v10083_v29, %s14631_s18  ;;  %v9517_v30 = vsel %vm2564_vm9, %v9515_v49, %v9516_v43 }
 0x43b   :  { %v18437_v51 = vcombine.low %v7680_v6, %v14461_v18  ;;  %v10111_v26 = vshll.u32 %v18427_v52, 16  ;;  %v7684_v35 = vld [vmem:[#allocation2 + $0x138] sm:$0xf]  ;;  %v10097_v53 = vshrl.u32 %v18403_v13, 16  ;;  %v8646_v41 = vrot.slane %v12937_v20, 1  ;;  %9594 = vrot.lane.b32.xlu1 %v9517_v30, %s14631_s18 }
 0x43c   :  { %v14462_v31 = vld [vmem:[#allocation2 + $0x110] ss:$0 sps:$4 sm:$0x11]   ;;  %v14463_v46 = vld [vmem:[#allocation2 + $0x158] ss:$0 sps:$4 sm:$0x11]  }
 0x43d   :  { %v10104_v44 = vshll.u32 %v14462_v31, 16  ;;  %v8647_v6 = vrot.slane %v14463_v46, 1  ;;  %v10094_v4 = vrot.slane %v10092_v34, 1  ;;  %v9518_v36 = vrot.slane %v13025_v32, 1  ;;  %v7628_v55 = vld [vmem:[#allocation2 + $0x114] sm:$0xe]  ;;  %v8877_v31 = vpop.permute.xlu0 %8876 }
 0x43e   :  { %v9519_v19 = vrot.slane %v14170_v12, 1  ;;  %v10102_v45 = vor.u32 %v10101_v8, %v10097_v53  ;;  %v14172_v57 = vld [vmem:[#allocation2 + $0x110] ss:$0 sps:$4 sm:$0x11]   ;;  %v14464_v28 = vld [vmem:[#allocation2 + $0x10c] sm:$0xf] }
 0x43f   :  { %v13026_v22 = vcombine.low %v7627_v38, %v14464_v28  ;;  %v14465_v18 = vld [vmem:[#allocation2 + $0x130] sm:$0xf]  ;;  %v10095_v20 = vsel %vm2019_vm8, %v10090_v47, %v10094_v4  ;;  %v10113_v46 = vrot.slane %v10111_v26, 1  ;;  %v10123_v34 = vshll.u32 %v18437_v51, 16  ;;  %v14466_v12 = vld [vmem:[#allocation2 + $0x13c] sm:$0xf] }
 0x440   :  { %v18445_v29 = vcombine.low %v7682_v58, %v14465_v18  ;;  %v18450_v32 = vcombine.low %v7684_v35, %v14466_v12  ;;  %10298 = vrot.lane.b32.xlu0 %v10095_v20, %s14631_s18  ;;  %v10106_v43 = vrot.slane %v10104_v44, 1  ;;  %v8648_v49 = vsel %vm2564_vm9, %v8646_v41, %v8647_v6  ;;  %v14173_v8 = vld [vmem:[#allocation2 + $0x11c] ss:$0 sps:$4 sm:$0x11]   ;;  %v14467_v58 = vld [vmem:[#allocation2 + $0x118] sm:$0xf] }
 0x441   :  { %v13027_v38 = vcombine.low %v7628_v55, %v14467_v58  ;;  %v7507_v53 = vld [vmem:[#allocation2 + $0x15c] sm:$0xe]  ;;  %v9520_v30 = vsel %vm2564_vm9, %v9518_v36, %v9519_v19  ;;  %v10722_v47 = vsel %vm4517_vm10, %v8648_v49, %v8877_v31  ;;  %v10109_v26 = vshrl.u32 %v18427_v52, 16  ;;  %v14468_v4 = vld [vmem:[#allocation2 + $0x11c] ss:$0 sps:$4 sm:$0x11]  }
 0x442   :  { %v10116_v28 = vshll.u32 %v14468_v4, 16  ;;  %v7686_v18 = vld [vmem:[#allocation2 + $0x144] sm:$0xf]  ;;  %v10596_v35 = vsel %vm4517_vm10, %v18013_v1, %v8459_v33  ;;  %v10107_v44 = vsel %vm2019_vm8, %v10102_v45, %v10106_v43  ;;  %v9521_v20 = vrot.slane %v13026_v22, 1  ;;  %9596 = vrot.lane.b32.xlu1 %v9520_v30, %s14631_s18  ;;  %v14469_v36 = vld [vmem:[#allocation2 + $0x160] sm:$0xf] }
 0x443   :  { %v9522_v41 = vrot.slane %v14172_v57, 1  ;;  %11585 = vmatmul.mubr.bf16.gmra.mrb[164].mxu1 %v10596_v35  ;;  %v10114_v6 = vor.u32 %v10113_v46, %v10109_v26  ;;  %v10125_v55 = vrot.slane %v10123_v34, 1  ;;  %v12938_v19 = vcombine.low %v7507_v53, %v14469_v36  ;;  %v7629_v31 = vld [vmem:[#allocation2 + $0x120] sm:$0xe]  ;;  %v7688_v49 = vld [vmem:[#allocation2 + $0x150] sm:$0xf] }
 0x444   :  { %v10135_v12 = vshll.u32 %v18445_v29, 16  ;;  %10300 = vrot.lane.b32.xlu0 %v10107_v44, %s14631_s18  ;;  %11592 = vmatprep.mubr.bf16.mxu1 %v10722_v47  ;;  %v9524_v58 = vrot.slane %v13027_v38, 1  ;;  %v9525_v1 = vrot.slane %v14173_v8, 1  ;;  %v14470_v33 = vld [vmem:[#allocation2 + $0x128] ss:$0 sps:$4 sm:$0x11]   ;;  %v8461_v38 = vpop.permute.xlu1 %8460 }
 0x445   :  { %v10128_v45 = vshll.u32 %v14470_v33, 16  ;;  %v14471_v22 = vld [vmem:[#allocation2 + $0x148] sm:$0xf]  ;;  %v10118_v43 = vrot.slane %v10116_v28, 1  ;;  %v10121_v46 = vshrl.u32 %v18437_v51, 16  ;;  %v9523_v53 = vsel %vm2564_vm9, %v9521_v20, %v9522_v41 }
 0x446   :  { %v18463_v57 = vcombine.low %v7686_v18, %v14471_v22  ;;  %v14174_v34 = vld [vmem:[#allocation2 + $0x128] ss:$0 sps:$4 sm:$0x11]   ;;  %v14472_v30 = vld [vmem:[#allocation2 + $0x164] ss:$0 sps:$4 sm:$0x11]   ;;  %9598 = vrot.lane.b32.xlu1 %v9523_v53, %s14631_s18  ;;  %v9526_v20 = vsel %vm2564_vm9, %v9524_v58, %v9525_v1  ;;  %v8879_v58 = vpop.permute.xlu0 %8878 }
 0x447   :  { %v8650_v26 = vrot.slane %v14472_v30, 1  ;;  %v14473_v4 = vld [vmem:[#allocation2 + $0x124] sm:$0xf]  ;;  %v7630_v36 = vld [vmem:[#allocation2 + $0x12c] sm:$0xe]  ;;  %v10147_v47 = vshll.u32 %v18450_v32, 16  ;;  %v10119_v8 = vsel %vm2019_vm8, %v10114_v6, %v10118_v43  ;;  %v10126_v18 = vor.u32 %v10125_v55, %v10121_v46 }
 0x448   :  { %v13028_v35 = vcombine.low %v7629_v31, %v14473_v4  ;;  %v8649_v44 = vrot.slane %v12938_v19, 1  ;;  %v10137_v28 = vrot.slane %v10135_v12, 1  ;;  %v7508_v33 = vld [vmem:[#allocation2 + $0x168] sm:$0xe]  ;;  %v14474_v22 = vld [vmem:[#allocation2 + $0x154] sm:$0xf]  ;;  %10302 = vrot.lane.b32.xlu0 %v10119_v8, %s14631_s18  ;;  %v13029_v6 = vcombine.low %v7630_v36, %v14476_v62 }
 0x449   :  { %v18470_v48 = vcombine.low %v7688_v49, %v14474_v22  ;;  %v10130_v41 = vrot.slane %v10128_v45, 1  ;;  %v14175_v31 = vld [vmem:[#allocation2 + $0x134] ss:$0 sps:$4 sm:$0x11]   ;;  %v9528_v30 = vrot.slane %v14174_v34, 1  ;;  %v10133_v4 = vshrl.u32 %v18445_v29, 16 }
 0x44a   :  { %v14475_v25 = vld [vmem:[#allocation2 + $0x134] ss:$0 sps:$4 sm:$0x11]   ;;  %v7631_v55 = vld [vmem:[#allocation2 + $0x138] sm:$0xe]  ;;  %v10599_v19 = vsel %vm4517_vm10, %v18052_v61, %v8461_v38  ;;  %v9527_v12 = vrot.slane %v13028_v35, 1  ;;  %9600 = vrot.lane.b32.xlu1 %v9526_v20, %s14631_s18  ;;  %v8651_v45 = vsel %vm2564_vm9, %v8649_v44, %v8650_v26 }
 0x44b   :  { %19626 = vst [vmem:[#allocation20_spill] sm:$0xff] %v18470_v48  ;;  %v10140_v53 = vshll.u32 %v14475_v25, 16  ;;  %v10149_v49 = vrot.slane %v10147_v47, 1  ;;  %v14477_v43 = vld [vmem:[#allocation2 + $0x16c] sm:$0xf]  ;;  %11593 = vmatmul.mubr.bf16.gmra.mrb[168].mxu1 %v10599_v19  ;;  %v10131_v1 = vsel %vm2019_vm8, %v10126_v18, %v10130_v41  ;;  %v10138_v25 = vor.u32 %v10137_v28, %v10133_v4  ;;  %v18481_v34 = vpop.f32.mrb[156].mxu0 }
 0x44c   :  { %v12939_v46 = vcombine.low %v7508_v33, %v14477_v43  ;;  %v7690_v8 = vld [vmem:[#allocation2 + $0x15c] sm:$0xf]  ;;  %v10159_v62 = vshll.u32 %v18463_v57, 16  ;;  %19627 = vst [vmem:[#allocation22_spill] sm:$0xff] %v18481_v34  ;;  %10304 = vrot.lane.b32.xlu0 %v10131_v1, %s14631_s18  ;;  %v10726_v61 = vsel %vm4517_vm10, %v8651_v45, %v8879_v58  ;;  %v10145_v35 = vshrl.u32 %v18450_v32, 16  ;;  %v18486_v20 = vpop.f32.mrb[157].mxu0 }
 0x44d   :  { %v14478_v36 = vld [vmem:[#allocation2 + $0x140] ss:$0 sps:$4 sm:$0x11]   ;;  %v14479_v33 = vld [vmem:[#allocation2 + $0x13c] sm:$0xf]  ;;  %19628 = vst [vmem:[#allocation61_spill] sm:$0xff] %v18486_v20  ;;  %11600 = vmatprep.mubr.bf16.mxu1 %v10726_v61  ;;  %v9529_v4 = vsel %vm2564_vm9, %v9527_v12, %v9528_v30 }
 0x44e   :  { %v10152_v47 = vshll.u32 %v14478_v36, 16  ;;  %v14178_v38 = vld [vmem:[#allocation2 + $0x140] ss:$0 sps:$4 sm:$0x11]   ;;  %v13030_v22 = vcombine.low %v7631_v55, %v14479_v33  ;;  %v10142_v26 = vrot.slane %v10140_v53, 1  ;;  %v9530_v18 = vrot.slane %v13029_v6, 1  ;;  %9602 = vrot.lane.b32.xlu1 %v9529_v4, %s14631_s18 }
 0x44f   :  { %v9531_v44 = vrot.slane %v14175_v31, 1  ;;  %v7632_v28 = vld [vmem:[#allocation2 + $0x144] sm:$0xe]  ;;  %v18488_v41 = vpop.f32.mrb[158].mxu0  ;;  %v10150_v19 = vor.u32 %v10149_v49, %v10145_v35  ;;  %v8652_v43 = vrot.slane %v12939_v46, 1  ;;  %v10161_v31 = vrot.slane %v10159_v62, 1 }
 0x450   :  { %19629 = vst [vmem:[#allocation62_spill] sm:$0xff] %v18488_v41  ;;  %v14480_v58 = vld [vmem:[#allocation2 + $0x170] ss:$0 sps:$4 sm:$0x11]   ;;  %v7509_v45 = vld [vmem:[#allocation2 + $0x174] sm:$0xe]  ;;  %v10143_v53 = vsel %vm2019_vm8, %v10138_v25, %v10142_v26  ;;  %v8463_v25 = vpop.permute.xlu1 %8462 }
 0x451   :  { %v8653_v1 = vrot.slane %v14480_v58, 1  ;;  %v18491_v36 = vpop.f32.mrb[159].mxu0  ;;  %v14481_v34 = vld [vmem:[#allocation2 + $0x160] sm:$0xf]  ;;  %v10171_v6 = vshll.u32 %v18470_v48, 16  ;;  %10306 = vrot.lane.b32.xlu0 %v10143_v53, %s14631_s18  ;;  %v10154_v30 = vrot.slane %v10152_v47, 1 }
 0x452   :  { %19630 = vst [vmem:[#allocation67_spill] sm:$0xff] %v18491_v36  ;;  %v18493_v55 = vcombine.low %v7690_v8, %v14481_v34  ;;  %v7692_v61 = vld [vmem:[#allocation2 + $0x168] sm:$0xf]  ;;  %v7693_v33 = vld [vmem:[#allocation2 + $0x16c] sm:$0xf]  ;;  %v9533_v12 = vrot.slane %v13030_v22, 1  ;;  %v9532_v8 = vsel %vm2564_vm9, %v9530_v18, %v9531_v44  ;;  %v8881_v22 = vpop.permute.xlu0 %8880 }
 0x453   :  { %v9534_v49 = vrot.slane %v14178_v38, 1  ;;  %v14179_v46 = vld [vmem:[#allocation2 + $0x14c] ss:$0 sps:$4 sm:$0x11]   ;;  %v14482_v35 = vld [vmem:[#allocation2 + $0x148] sm:$0xf]  ;;  %v10155_v62 = vsel %vm2019_vm8, %v10150_v19, %v10154_v30  ;;  %v8654_v26 = vsel %vm2564_vm9, %v8652_v43, %v8653_v1  ;;  %v18503_v47 = vcombine.low %v7692_v61, %v7693_v33  ;;  %9604 = vrot.lane.b32.xlu1 %v9532_v8, %s14631_s18 }
 0x454   :  { %19631 = vst [vmem:[#allocation68_spill] sm:$0xff] %v18493_v55  ;;  %v13031_v58 = vcombine.low %v7632_v28, %v14482_v35  ;;  %v10157_v34 = vshrl.u32 %v18463_v57, 16  ;;  %v14483_v4 = vld [vmem:[#allocation2 + $0x14c] ss:$0 sps:$4 sm:$0x11]   ;;  %v10602_v38 = vsel %vm4517_vm10, %v18088_v0, %v8463_v25  ;;  %v10173_v44 = vrot.slane %v10171_v6, 1 }
 0x455   :  { %v10164_v41 = vshll.u32 %v14483_v4, 16  ;;  %v14484_v36 = vld [vmem:[#allocation2 + $0x178] sm:$0xf]  ;;  %v7633_v53 = vld [vmem:[#allocation2 + $0x150] sm:$0xe]  ;;  %19632 = vst [vmem:[#allocation69_spill] sm:$0xff] %v18503_v47  ;;  %11601 = vmatmul.mubr.bf16.gmra.mrb[172].mxu1 %v10602_v38  ;;  %10308 = vrot.lane.b32.xlu0 %v10155_v62, %s14631_s18  ;;  %v10730_v19 = vsel %vm4517_vm10, %v8654_v26, %v8881_v22  ;;  %v9535_v43 = vsel %vm2564_vm9, %v9533_v12, %v9534_v49 }
 0x456   :  { %v12940_v20 = vcombine.low %v7509_v45, %v14484_v36  ;;  %v10162_v18 = vor.u32 %v10161_v31, %v10157_v34  ;;  %v10183_v28 = vshll.u32 %v18493_v55, 16  ;;  %v7694_v35 = vld [vmem:[#allocation2 + $0x174] sm:$0xf]  ;;  %v7695_v4 = vld [vmem:[#allocation2 + $0x178] sm:$0xf]  ;;  %v9536_v1 = vrot.slane %v13031_v58, 1  ;;  %11608 = vmatprep.mubr.bf16.mxu1 %v10730_v19 }
 0x457   :  { %v9537_v45 = vrot.slane %v14179_v46, 1  ;;  %v18512_v36 = vld [vmem:[#allocation2 + $0x158] ss:$0 sps:$4 sm:$0x11]   ;;  %v10166_v0 = vrot.slane %v10164_v41, 1  ;;  %v10169_v31 = vshrl.u32 %v18470_v48, 16  ;;  %v18522_v41 = vcombine.low %v7694_v35, %v7695_v4  ;;  %9606 = vrot.lane.b32.xlu1 %v9535_v43, %s14631_s18  ;;  %v8465_v4 = vpop.permute.xlu1 %8464 }
 0x458   :  { %v14485_v6 = vld [vmem:[#allocation2 + $0x158] ss:$0 sps:$4 sm:$0x11]   ;;  %v14486_v33 = vld [vmem:[#allocation2 + $0x17c] ss:$0 sps:$4 sm:$0x11]  }
 0x459   :  { %v10176_v61 = vshll.u32 %v14485_v6, 16  ;;  %v8656_v30 = vrot.slane %v14486_v33, 1  ;;  %v7634_v8 = vld [vmem:[#allocation2 + $0x15c] sm:$0xe]  ;;  %v8655_v34 = vrot.slane %v12940_v20, 1  ;;  %v10195_v12 = vshll.u32 %v18503_v47, 16 }
 0x45a   :  { %v14487_v25 = vld [vmem:[#allocation2 + $0x154] sm:$0xf]  ;;  %v18515_v38 = vld [vmem:[#allocation2 + $0x164] ss:$0 sps:$4 sm:$0x11]   ;;  %v18520_v46 = vpop.f32.mrb[160].mxu0  ;;  %v10167_v58 = vsel %vm2019_vm8, %v10162_v18, %v10166_v0  ;;  %v10174_v22 = vor.u32 %v10173_v44, %v10169_v31  ;;  %v9538_v6 = vsel %vm2564_vm9, %v9536_v1, %v9537_v45 }
 0x45b   :  { %v13032_v62 = vcombine.low %v7633_v53, %v14487_v25  ;;  %v18517_v26 = vld [vmem:[#allocation2 + $0x170] ss:$0 sps:$4 sm:$0x11]   ;;  %v7510_v49 = vld [vmem:[#allocation2 + $0x180] sm:$0xe]  ;;  %19633 = vst [vmem:[#allocation70_spill] sm:$0xff] %v18520_v46  ;;  %10310 = vrot.lane.b32.xlu0 %v10167_v58, %s14631_s18  ;;  %v8657_v58 = vsel %vm2564_vm9, %v8655_v34, %v8656_v30  ;;  %9608 = vrot.lane.b32.xlu1 %v9538_v6, %s14631_s18  ;;  %v8883_v30 = vpop.permute.xlu0 %8882 }
 0x45c   :  { %19634 = vst [vmem:[#allocation71_spill] sm:$0xff] %v18522_v41  ;;  %v10185_v19 = vrot.slane %v10183_v28, 1  ;;  %v18526_v20 = vpop.f32.mrb[161].mxu0  ;;  %v7696_v53 = vld [vmem:[#allocation2 + $0x180] sm:$0xf]  ;;  %v9540_v33 = vrot.slane %v18512_v36, 1 }
 0x45d   :  { %19635 = vst [vmem:[#allocation72_spill] sm:$0xff] %v18526_v20  ;;  %v14488_v25 = vld [vmem:[#allocation2 + $0x164] ss:$0 sps:$4 sm:$0x11]   ;;  %v18531_v46 = vpop.f32.mrb[162].mxu0  ;;  %v10178_v43 = vrot.slane %v10176_v61, 1 }
 0x45e   :  { %v10188_v48 = vshll.u32 %v14488_v25, 16  ;;  %19636 = vst [vmem:[#allocation73_spill] sm:$0xff] %v18531_v46  ;;  %v7697_v35 = vld [vmem:[#allocation2 + $0x184] sm:$0xf]  ;;  %v10181_v18 = vshrl.u32 %v18493_v55, 16  ;;  %v18534_v20 = vpop.f32.mrb[163].mxu0  ;;  %v10605_v46 = vsel %vm4517_vm10, %v18121_v24, %v8465_v4 }
 0x45f   :  { %v14489_v44 = vld [vmem:[#allocation2 + $0x160] sm:$0xf]  ;;  %v14490_v0 = vld [vmem:[#allocation2 + $0x184] sm:$0xf]  ;;  %19637 = vst [vmem:[#allocation74_spill] sm:$0xff] %v18534_v20  ;;  %v9539_v1 = vrot.slane %v13032_v62, 1  ;;  %v10179_v61 = vsel %vm2019_vm8, %v10174_v22, %v10178_v43  ;;  %11609 = vmatmul.mubr.bf16.gmra.mrb[176].mxu1 %v10605_v46  ;;  %v10734_v22 = vsel %vm4517_vm10, %v8657_v58, %v8883_v30  ;;  %v8467_v30 = vpop.permute.xlu1 %8466 }
 0x460   :  { %v13033_v28 = vcombine.low %v7634_v8, %v14489_v44  ;;  %v12941_v31 = vcombine.low %v7510_v49, %v14490_v0  ;;  %v10197_v45 = vrot.slane %v10195_v12, 1  ;;  %v7635_v36 = vld [vmem:[#allocation2 + $0x168] sm:$0xe]  ;;  %v10207_v25 = vshll.u32 %v18522_v41, 16  ;;  %v7698_v0 = vld [vmem:[#allocation2 + $0x18c] sm:$0xf]  ;;  %10312 = vrot.lane.b32.xlu0 %v10179_v61, %s14631_s18  ;;  %11616 = vmatprep.mubr.bf16.mxu1 %v10734_v22  ;;  %v8885_v22 = vpop.permute.xlu0 %8884 }
 0x461   :  { %v10186_v55 = vor.u32 %v10185_v19, %v10181_v18  ;;  %v18542_v8 = vld [vmem:[#allocation2 + $0x170] ss:$0 sps:$4 sm:$0x11]   ;;  %v14189_v49 = vld [vmem:[#allocation2 + $0x17c] ss:$0 sps:$4 sm:$0x11]   ;;  %v18544_v44 = vcombine.low %v7696_v53, %v7697_v35  ;;  %v9541_v46 = vsel %vm2564_vm9, %v9539_v1, %v9540_v33 }
 0x462   :  { %v10190_v34 = vrot.slane %v10188_v48, 1  ;;  %v9543_v62 = vrot.slane %v18515_v38, 1  ;;  %v10193_v24 = vshrl.u32 %v18503_v47, 16  ;;  %v10200_v12 = vshll.u32 %v18517_v26, 16  ;;  %v7699_v6 = vld [vmem:[#allocation2 + $0x190] sm:$0xf]  ;;  %9610 = vrot.lane.b32.xlu1 %v9541_v46, %s14631_s18 }
 0x463   :  { %v9542_v19 = vrot.slane %v13033_v28, 1  ;;  %v8658_v4 = vrot.slane %v12941_v31, 1  ;;  %v14491_v43 = vld [vmem:[#allocation2 + $0x188] ss:$0 sps:$4 sm:$0x11]   ;;  %v10209_v20 = vrot.slane %v10207_v25, 1  ;;  %v18557_v31 = vcombine.low %v7698_v0, %v7699_v6 }
 0x464   :  { %v8659_v53 = vrot.slane %v14491_v43, 1  ;;  %v7636_v35 = vld [vmem:[#allocation2 + $0x174] sm:$0xe]  ;;  %v10198_v18 = vor.u32 %v10197_v45, %v10193_v24  ;;  %v14492_v61 = vld [vmem:[#allocation2 + $0x16c] sm:$0xf]  ;;  %v10191_v26 = vsel %vm2019_vm8, %v10186_v55, %v10190_v34  ;;  %v10219_v28 = vshll.u32 %v18544_v44, 16 }
 0x465   :  { %v13034_v48 = vcombine.low %v7635_v36, %v14492_v61  ;;  %v7511_v38 = vld [vmem:[#allocation2 + $0x18c] sm:$0xe]  ;;  %v18554_v47 = vld [vmem:[#allocation2 + $0x17c] ss:$0 sps:$4 sm:$0x11]   ;;  %10314 = vrot.lane.b32.xlu0 %v10191_v26, %s14631_s18  ;;  %v10202_v33 = vrot.slane %v10200_v12, 1  ;;  %v9544_v55 = vsel %vm2564_vm9, %v9542_v19, %v9543_v62 }
 0x466   :  { %v7700_v58 = vld [vmem:[#allocation2 + $0x198] sm:$0xf]  ;;  %v10205_v1 = vshrl.u32 %v18522_v41, 16  ;;  %v10212_v45 = vshll.u32 %v14189_v49, 16  ;;  %v7701_v24 = vld [vmem:[#allocation2 + $0x19c] sm:$0xf]  ;;  %v8660_v34 = vsel %vm2564_vm9, %v8658_v4, %v8659_v53  ;;  %v10608_v49 = vsel %vm4517_vm10, %v18152_v63, %v8467_v30  ;;  %9612 = vrot.lane.b32.xlu1 %v9544_v55, %s14631_s18 }
 0x467   :  { %v14493_v36 = vld [vmem:[#allocation2 + $0x178] sm:$0xf]  ;;  %v9546_v43 = vrot.slane %v18542_v8, 1  ;;  %v14193_v0 = vld [vmem:[#allocation2 + $0x188] ss:$0 sps:$4 sm:$0x11]   ;;  %v10203_v61 = vsel %vm2019_vm8, %v10198_v18, %v10202_v33  ;;  %v10738_v12 = vsel %vm4517_vm10, %v8660_v34, %v8885_v22  ;;  %v18570_v4 = vcombine.low %v7700_v58, %v7701_v24  ;;  %11617 = vmatmul.mubr.bf16.gmra.mrb[180].mxu1 %v10608_v49 }
 0x468   :  { %v13035_v25 = vcombine.low %v7636_v35, %v14493_v36  ;;  %v14494_v6 = vld [vmem:[#allocation2 + $0x190] sm:$0xf]  ;;  %v9545_v26 = vrot.slane %v13034_v48, 1  ;;  %v10210_v41 = vor.u32 %v10209_v20, %v10205_v1  ;;  %v10221_v35 = vrot.slane %v10219_v28, 1  ;;  %v7637_v62 = vld [vmem:[#allocation2 + $0x180] sm:$0xe]  ;;  %11624 = vmatprep.mubr.bf16.mxu1 %v10738_v12 }
 0x469   :  { %v12942_v46 = vcombine.low %v7511_v38, %v14494_v6  ;;  %v10231_v19 = vshll.u32 %v18557_v31, 16  ;;  %10316 = vrot.lane.b32.xlu0 %v10203_v61, %s14631_s18  ;;  %v10214_v53 = vrot.slane %v10212_v45, 1  ;;  %v9549_v38 = vrot.slane %v18554_v47, 1  ;;  %v14198_v48 = vld [vmem:[#allocation2 + $0x194] ss:$0 sps:$4 sm:$0x11]   ;;  %v8469_v6 = vpop.permute.xlu1 %8468 }
 0x46a   :  { %v9548_v18 = vrot.slane %v13035_v25, 1  ;;  %v10217_v20 = vshrl.u32 %v18544_v44, 16  ;;  %v10224_v63 = vshll.u32 %v14193_v0, 16  ;;  %v14495_v33 = vld [vmem:[#allocation2 + $0x194] ss:$0 sps:$4 sm:$0x11]   ;;  %v9547_v1 = vsel %vm2564_vm9, %v9545_v26, %v9546_v43  ;;  %v8887_v0 = vpop.permute.xlu0 %8886 }
 0x46b   :  { %v8661_v30 = vrot.slane %v12942_v46, 1  ;;  %v8662_v28 = vrot.slane %v14495_v33, 1  ;;  %v18576_v36 = vld [vmem:[#allocation2 + $0x188] ss:$0 sps:$4 sm:$0x11]   ;;  %9614 = vrot.lane.b32.xlu1 %v9547_v1, %s14631_s18  ;;  %v10215_v45 = vsel %vm2019_vm8, %v10210_v41, %v10214_v53  ;;  %v10233_v22 = vrot.slane %v10231_v19, 1 }
 0x46c   :  { %v14496_v58 = vld [vmem:[#allocation2 + $0x184] sm:$0xf]  ;;  %v10222_v25 = vor.u32 %v10221_v35, %v10217_v20  ;;  %v7638_v55 = vld [vmem:[#allocation2 + $0x18c] sm:$0xe]  ;;  %v10243_v34 = vshll.u32 %v18570_v4, 16  ;;  %v9550_v46 = vsel %vm2564_vm9, %v9548_v18, %v9549_v38  ;;  %v10226_v43 = vrot.slane %v10224_v63, 1 }
 0x46d   :  { %v13036_v24 = vcombine.low %v7637_v62, %v14496_v58  ;;  %10318 = vrot.lane.b32.xlu0 %v10215_v45, %s14631_s18  ;;  %v8663_v61 = vsel %vm2564_vm9, %v8661_v30, %v8662_v28  ;;  %v10229_v12 = vshrl.u32 %v18557_v31, 16  ;;  %v10236_v26 = vshll.u32 %v14198_v48, 16  ;;  %v14202_v49 = vld [vmem:[#allocation2 + $0x1a0] ss:$0 sps:$4 sm:$0x11]   ;;  %v18594_v30 = vpop.f32.mrb[164].mxu0 }
 0x46e   :  { %v10742_v41 = vsel %vm4517_vm10, %v8663_v61, %v8887_v0  ;;  %v9552_v62 = vrot.slane %v18576_v36, 1  ;;  %v18587_v19 = vld [vmem:[#allocation2 + $0x194] ss:$0 sps:$4 sm:$0x11]   ;;  %v14497_v53 = vld [vmem:[#allocation2 + $0x190] sm:$0xf]  ;;  %v10611_v33 = vsel %vm4517_vm10, %v18166_v2, %v8469_v6  ;;  %v10227_v18 = vsel %vm2019_vm8, %v10222_v25, %v10226_v43  ;;  %v10265_v43 = vpop.permute.xlu0 %10264 }
 0x46f   :  { %v9551_v35 = vrot.slane %v13036_v24, 1  ;;  %v13037_v20 = vcombine.low %v7638_v55, %v14497_v53  ;;  %9616 = vrot.lane.b32.xlu1 %v9550_v46, %s14631_s18  ;;  %v10234_v38 = vor.u32 %v10233_v22, %v10229_v12  ;;  %v10245_v63 = vrot.slane %v10243_v34, 1  ;;  %v7639_v48 = vld [vmem:[#allocation2 + $0x198] sm:$0xe]  ;;  %11625 = vmatmul.mubr.bf16.gmra.mrb[184].mxu1 %v10611_v33  ;;  %v18598_v2 = vpop.f32.mrb[165].mxu0 }
 0x470   :  { %11632 = vmatprep.mubr.bf16.mxu1 %v10742_v41  ;;  %v19638_v28 = vld [vmem:[#allocation43_spill] sm:$0xff]  ;;  %v10238_v58 = vrot.slane %v10236_v26, 1  ;;  %v10241_v24 = vshrl.u32 %v18570_v4, 16  ;;  %v10248_v45 = vshll.u32 %v14202_v49, 16  ;;  %v9555_v22 = vrot.slane %v18587_v19, 1  ;;  %v18604_v46 = vpop.f32.mrb[166].mxu0  ;;  %v8471_v49 = vpop.permute.xlu1 %8470 }
 0x471   :  { %10320 = vrot.lane.b32.xlu0 %v10227_v18, %s14631_s18  ;;  %v8987_v1 = vshll.u32 %v19638_v28, 16  ;;  %v9553_v55 = vsel %vm2564_vm9, %v9551_v35, %v9552_v62  ;;  %v9554_v25 = vrot.slane %v13037_v20, 1  ;;  %v18602_v34 = vld [vmem:[#allocation2 + $0x1a0] ss:$0 sps:$4 sm:$0x11]   ;;  %v18608_v26 = vpop.f32.mrb[167].mxu0  ;;  %v10873_v62 = vsel %vm4517_vm10, %v18189_v23, %v10265_v43 }
 0x472   :  { %v14498_v6 = vld [vmem:[#allocation2 + $0x19c] sm:$0xf]  ;;  %v10239_v61 = vsel %vm2019_vm8, %v10234_v38, %v10238_v58  ;;  %v10246_v12 = vor.u32 %v10245_v63, %v10241_v24  ;;  %v10250_v35 = vrot.slane %v10248_v45, 1  ;;  %v9558_v33 = vrot.slane %v18602_v34, 1  ;;  %v19639_v24 = vld [vmem:[#allocation44_spill] sm:$0xff] }
 0x473   :  { %v13038_v0 = vcombine.low %v7639_v48, %v14498_v6  ;;  %9618 = vrot.lane.b32.xlu1 %v9553_v55, %s14631_s18  ;;  %v8989_v41 = vrot.slane %v8987_v1, 1  ;;  %v9556_v53 = vsel %vm2564_vm9, %v9554_v25, %v9555_v22  ;;  %v10614_v18 = vsel %vm4517_vm10, %v18198_v15, %v8471_v49  ;;  %v14499_v48 = vld [vmem:[#allocation2 + $0x14] ss:$0 sps:$4 sm:$0x11]   ;;  %v10267_v25 = vpop.permute.xlu0 %10266  ;;  %v14501_v49 = vld [vmem:[%s19192_s2 + $0x100] sm:$0xff]  }
 0x474   :  { %v10251_v38 = vsel %vm2019_vm8, %v10246_v12, %v10250_v35  ;;  %v8985_v63 = vshrl.u32 %v19638_v28, 16  ;;  %v8992_v1 = vshll.u32 %v14499_v48, 16  ;;  %v8999_v45 = vshll.u32 %v19639_v24, 16  ;;  %v9561_v55 = vpop.permute.xlu1 %9560 }
 0x475   :  { %10322 = vrot.lane.b32.xlu0 %v10239_v61, %s14631_s18  ;;  %v9557_v20 = vrot.slane %v13038_v0, 1  ;;  %v10876_v0 = vsel %vm4517_vm10, %v18225_v59, %v10267_v25  ;;  %v8997_v43 = vshrl.u32 %v19639_v24, 16  ;;  %v14500_v61 = vld [vmem:[#allocation2 + $0x20] ss:$0 sps:$4 sm:$0x11]  }
 0x476   :  { %v8990_v23 = vor.u32 %v8989_v41, %v8985_v63  ;;  %v8994_v15 = vrot.slane %v8992_v1, 1  ;;  %v9001_v6 = vrot.slane %v8999_v45, 1  ;;  %v9004_v12 = vshll.u32 %v14500_v61, 16  ;;  %v7702_v41 = vld [vmem:[#allocation2 + $0x1a4] sm:$0xf]  ;;  %v18636_v63 = vpop.f32.mrb[168].mxu0 }
 0x477   :  { %9620 = vrot.lane.b32.xlu1 %v9556_v53, %s14631_s18  ;;  %11633 = vmatmul.mubr.bf16.gmra.mrb[188].mxu1 %v10614_v18  ;;  %v9559_v58 = vsel %vm2564_vm9, %v9557_v20, %v9558_v33  ;;  %v14502_v20 = vld [vmem:[%s19192_s2 + $0x108] sm:$0xff]   ;;  %v10269_v1 = vpop.permute.xlu0 %10268 }
 0x478   :  { %11673 = vmatprep.mubr.bf16.mxu1 %v10873_v62  ;;  %v8995_v22 = vsel %vm2019_vm8, %v8990_v23, %v8994_v15  ;;  %v9002_v35 = vor.u32 %v9001_v6, %v8997_v43  ;;  %v19640_v62 = vld [vmem:[#allocation12_spill] sm:$0xff]  ;;  %v7703_v59 = vld [vmem:[#allocation2 + $0x1a8] sm:$0xf]  ;;  %v14206_v33 = vld [vmem:[#allocation2 + $0x1ac] ss:$0 sps:$4 sm:$0x11]   ;;  %v9563_v18 = vpop.permute.xlu1 %9562  ;;  %v10879_v43 = vsel %vm4517_vm10, %v18220_v39, %v10269_v1 }
 0x479   :  { %10324 = vrot.lane.b32.xlu0 %v10251_v38, %s14631_s18  ;;  %v10746_v28 = vsel %vm4517_vm10, %v8995_v22, %v9561_v55  ;;  %v9011_v53 = vshll.u32 %v19640_v62, 16  ;;  %v9006_v38 = vrot.slane %v9004_v12, 1  ;;  %v18638_v48 = vcombine.low %v7702_v41, %v7703_v59  ;;  %v18640_v23 = vpop.f32.mrb[169].mxu0  ;;  %v14503_v55 = vld [vmem:[%s19192_s2 + $0x110] sm:$0xff]  }
 0x47a   :  { %v18643_v15 = vpop.f32.mrb[170].mxu0  ;;  %v14504_v61 = vld [vmem:[#allocation2 + $0x2c] ss:$0 sps:$4 sm:$0x11]  }
 0x47b   :  { %9622 = vrot.lane.b32.xlu1 %v9559_v58, %s14631_s18  ;;  %v10260_v58 = vshll.u32 %v14206_v33, 16  ;;  %v9007_v24 = vsel %vm2019_vm8, %v9002_v35, %v9006_v38  ;;  %v9013_v45 = vrot.slane %v9011_v53, 1  ;;  %v10253_v25 = vshrl.u32 %v18638_v48, 16  ;;  %v19641_v53 = vld [vmem:[#allocation13_spill] sm:$0xff]  ;;  %v10271_v39 = vpop.permute.xlu0 %10270 }
 0x47c   :  { %v10255_v22 = vshll.u32 %v18638_v48, 16  ;;  %v10750_v6 = vsel %vm4517_vm10, %v9007_v24, %v9563_v18  ;;  %v9016_v12 = vshll.u32 %v14504_v61, 16  ;;  %v9565_v33 = vpop.permute.xlu1 %9564 }
 0x47d   :  { %v10262_v41 = vrot.slane %v10260_v58, 1 }
 0x47e   :  { %v9018_v18 = vrot.slane %v9016_v12, 1 }
 0x47f   :  { %11674 = vmatmul.mubr.bf16.vlgmr.msra.gmra.mrb[64].mxu1 %v10746_v28  ;;  %v9009_v28 = vshrl.u32 %v19640_v62, 16  ;;  %v14505_v62 = vld [vmem:[%s19192_s2 + $0x118] sm:$0xff]  }
 0x480   :  { %13423 = vmatpush3.bf16.msra.mxu1 %v14501_v49  ;;  %11681 = vmatprep.mubr.bf16.mxu1 %v10876_v0  ;;  %v18652_v0 = vpop.f32.mrb[171].mxu0  ;;  %v10257_v49 = vrot.slane %v10255_v22, 1  ;;  %v9567_v61 = vpop.permute.xlu1 %9566 }
 0x481   :  { %13420 = vmatprep.subr.bf16.mxu1 %v14502_v20  ;;  %v9014_v35 = vor.u32 %v9013_v45, %v9009_v28  ;;  %v10882_v45 = vsel %vm4517_vm10, %v18227_v9, %v10271_v39  ;;  %v19642_v28 = vld [vmem:[#allocation49_spill] sm:$0xff] }
 0x482   :  { %v10258_v59 = vor.u32 %v10257_v49, %v10253_v25  ;;  %v14506_v25 = vld [vmem:[#allocation2 + $0x38] ss:$0 sps:$4 sm:$0x11]   ;;  %v10273_v49 = vpop.permute.xlu0 %10272 }
 0x483   :  { %v9019_v1 = vsel %vm2019_vm8, %v9014_v35, %v9018_v18  ;;  %v9028_v22 = vshll.u32 %v14506_v25, 16  ;;  %v10885_v9 = vsel %vm4517_vm10, %v18250_v16, %v10273_v49 }
 0x484   :  { %13424 = vmatpush3.bf16.msra.mxu1 %v14502_v20  ;;  %v9023_v20 = vshll.u32 %v19641_v53, 16  ;;  %v10263_v38 = vsel %vm2019_vm8, %v10258_v59, %v10262_v41  ;;  %v10754_v24 = vsel %vm4517_vm10, %v9019_v1, %v9565_v33  ;;  %v14507_v59 = vld [vmem:[#allocation2 + $0x44] ss:$0 sps:$4 sm:$0x11]   ;;  %v19643_v1 = vld [vmem:[#allocation50_spill] sm:$0xff] }
 0x485   :  { %13421 = vmatprep.subr.bf16.mxu1 %v14503_v55  ;;  %10326 = vrot.lane.b32.xlu0 %v10263_v38, %s14631_s18  ;;  %v9030_v12 = vrot.slane %v9028_v22, 1  ;;  %v18673_v33 = vpop.f32.mrb[172].mxu0 }
 0x486   :  { %v9025_v58 = vrot.slane %v9023_v20, 1  ;;  %v18675_v18 = vpop.f32.mrb[173].mxu0  ;;  %v10275_v25 = vpop.permute.xlu0 %10274 }
 0x487   :  { %11682 = vmatmul.mubr.bf16.gmra.mrb[68].mxu1 %v10750_v6  ;;  %v18677_v39 = vpop.f32.mrb[174].mxu0 }
 0x488   :  { %11689 = vmatprep.mubr.bf16.mxu1 %v10879_v43  ;;  %13425 = vmatpush3.bf16.msra.mxu1 %v14503_v55  ;;  %v9021_v55 = vshrl.u32 %v19641_v53, 16  ;;  %v9035_v43 = vshll.u32 %v19642_v28, 16  ;;  %v9033_v53 = vshrl.u32 %v19642_v28, 16  ;;  %v10888_v28 = vsel %vm4517_vm10, %v18259_v17, %v10275_v25  ;;  %v19645_v25 = vld [vmem:[#allocation52_spill] sm:$0xff] }
 0x489   :  { %13422 = vmatprep.subr.bf16.mxu1 %v14505_v62 }
 0x48a   :  { %v9026_v6 = vor.u32 %v9025_v58, %v9021_v55  ;;  %v9037_v35 = vrot.slane %v9035_v43, 1  ;;  %v9047_v58 = vshll.u32 %v19643_v1, 16  ;;  %v9045_v43 = vshrl.u32 %v19643_v1, 16 }
 0x48c   :  { %13426 = vmatpush3.bf16.msra.mxu1 %v14505_v62  ;;  %v9031_v41 = vsel %vm2019_vm8, %v9026_v6, %v9030_v12  ;;  %v9040_v62 = vshll.u32 %v14507_v59, 16  ;;  %v9038_v38 = vor.u32 %v9037_v35, %v9033_v53  ;;  %v9049_v22 = vrot.slane %v9047_v58, 1  ;;  %v10277_v53 = vpop.permute.xlu0 %10276  ;;  %v14509_v58 = vld [vmem:[#allocation2 + $0x5c] ss:$0 sps:$4 sm:$0x11]  }
 0x48d   :  { %v10758_v20 = vsel %vm4517_vm10, %v9031_v41, %v9567_v61  ;;  %v14508_v61 = vld [vmem:[#allocation2 + $0x50] ss:$0 sps:$4 sm:$0x11]   ;;  %v19644_v41 = vld [vmem:[#allocation51_spill] sm:$0xff]  ;;  %v10891_v17 = vsel %vm4517_vm10, %v18272_v27, %v10277_v53 }
 0x48e   :  { %v9042_v55 = vrot.slane %v9040_v62, 1  ;;  %v9052_v12 = vshll.u32 %v14508_v61, 16  ;;  %v9050_v49 = vor.u32 %v9049_v22, %v9045_v43  ;;  %v9059_v35 = vshll.u32 %v19644_v41, 16  ;;  %v14510_v53 = vld [vmem:[#allocation2 + $0x68] ss:$0 sps:$4 sm:$0x11]  }
 0x48f   :  { %11690 = vmatmul.mubr.bf16.gmra.mrb[72].mxu1 %v10754_v24  ;;  %v18680_v24 = vpop.f32.mrb[175].mxu0  ;;  %v9057_v1 = vshrl.u32 %v19644_v41, 16 }
 0x490   :  { %11697 = vmatprep.mubr.bf16.mxu1 %v10882_v45  ;;  %v9569_v45 = vpop.permute.xlu1 %9568  ;;  %v9043_v16 = vsel %vm2019_vm8, %v9038_v38, %v9042_v55  ;;  %v9061_v62 = vrot.slane %v9059_v35, 1  ;;  %v10279_v43 = vpop.permute.xlu0 %10278 }
 0x491   :  { %v10762_v6 = vsel %vm4517_vm10, %v9043_v16, %v9569_v45  ;;  %v9064_v45 = vshll.u32 %v14509_v58, 16  ;;  %v9071_v16 = vshll.u32 %v19645_v25, 16 }
 0x492   :  { %v9062_v55 = vor.u32 %v9061_v62, %v9057_v1 }
 0x493   :  { %v9073_v27 = vrot.slane %v9071_v16, 1 }
 0x497   :  { %11698 = vmatmul.mubr.bf16.gmra.mrb[76].mxu1 %v10758_v20  ;;  %v9571_v20 = vpop.permute.xlu1 %9570 }
 0x498   :  { %11705 = vmatprep.mubr.bf16.mxu1 %v10885_v9  ;;  %v9054_v9 = vrot.slane %v9052_v12, 1 }
 0x49a   :  { %v9055_v59 = vsel %vm2019_vm8, %v9050_v49, %v9054_v9  ;;  %v9069_v9 = vshrl.u32 %v19645_v25, 16 }
 0x49b   :  { %v10766_v38 = vsel %vm4517_vm10, %v9055_v59, %v9571_v20  ;;  %v9573_v22 = vpop.permute.xlu1 %9572  ;;  %v10894_v20 = vsel %vm4517_vm10, %v18276_v21, %v10279_v43  ;;  %v9076_v59 = vshll.u32 %v14510_v53, 16 }
 0x49c   :  { %v9074_v62 = vor.u32 %v9073_v27, %v9069_v9  ;;  %v19647_v27 = vld [vmem:[#allocation58_spill] sm:$0xff] }
 0x49d   :  { %v9078_v58 = vrot.slane %v9076_v59, 1 }
 0x49f   :  { %11706 = vmatmul.mubr.bf16.gmra.mrb[80].mxu1 %v10762_v6  ;;  %v9066_v6 = vrot.slane %v9064_v45, 1  ;;  %v9575_v1 = vpop.permute.xlu1 %9574  ;;  %v10281_v45 = vpop.permute.xlu0 %10280 }
 0x4a0   :  { %11713 = vmatprep.mubr.bf16.mxu1 %v10888_v28  ;;  %v18694_v28 = vpop.f32.mrb[176].mxu0  ;;  %v10897_v21 = vsel %vm4517_vm10, %v18280_v60, %v10281_v45 }
 0x4a1   :  { %v18696_v61 = vpop.f32.mrb[177].mxu0  ;;  %v9067_v12 = vsel %vm2019_vm8, %v9062_v55, %v9066_v6  ;;  %v9079_v55 = vsel %vm2019_vm8, %v9074_v62, %v9078_v58  ;;  %v14511_v6 = vld [vmem:[#allocation2 + $0x74] ss:$0 sps:$4 sm:$0x11]  }
 0x4a2   :  { %v18699_v49 = vpop.f32.mrb[178].mxu0  ;;  %v10770_v41 = vsel %vm4517_vm10, %v9067_v12, %v9573_v22  ;;  %v10774_v22 = vsel %vm4517_vm10, %v9079_v55, %v9575_v1  ;;  %v9088_v43 = vshll.u32 %v14511_v6, 16  ;;  %v14512_v1 = vld [vmem:[#allocation2 + $0x80] ss:$0 sps:$4 sm:$0x11]  }
 0x4a3   :  { %v18702_v35 = vpop.f32.mrb[179].mxu0  ;;  %v10283_v53 = vpop.permute.xlu0 %10282  ;;  %v9100_v58 = vshll.u32 %v14512_v1, 16  ;;  %v19648_v55 = vld [vmem:[#allocation60_spill] sm:$0xff] }
 0x4a4   :  { %v9090_v9 = vrot.slane %v9088_v43, 1  ;;  %v10900_v60 = vsel %vm4517_vm10, %v18300_v14, %v10283_v53  ;;  %v19649_v53 = vld [vmem:[#allocation24_spill] sm:$0xff] }
 0x4a7   :  { %11714 = vmatmul.mubr.bf16.gmra.mrb[84].mxu1 %v10766_v38  ;;  %v19646_v38 = vld [vmem:[#allocation55_spill] sm:$0xff] }
 0x4a8   :  { %11721 = vmatprep.mubr.bf16.mxu1 %v10891_v17  ;;  %v9083_v17 = vshll.u32 %v19646_v38, 16  ;;  %v9081_v25 = vshrl.u32 %v19646_v38, 16  ;;  %v9093_v38 = vshrl.u32 %v19647_v27, 16 }
 0x4aa   :  { %v9085_v16 = vrot.slane %v9083_v17, 1 }
 0x4ac   :  { %v9086_v12 = vor.u32 %v9085_v16, %v9081_v25  ;;  %v9107_v16 = vshll.u32 %v19648_v55, 16  ;;  %v10285_v25 = vpop.permute.xlu0 %10284 }
 0x4ad   :  { %v10903_v14 = vsel %vm4517_vm10, %v18313_v3, %v10285_v25 }
 0x4ae   :  { %v9091_v59 = vsel %vm2019_vm8, %v9086_v12, %v9090_v9  ;;  %v9109_v43 = vrot.slane %v9107_v16, 1 }
 0x4af   :  { %11722 = vmatmul.mubr.bf16.gmra.mrb[88].mxu1 %v10770_v41  ;;  %v9095_v41 = vshll.u32 %v19647_v27, 16  ;;  %v9105_v27 = vshrl.u32 %v19648_v55, 16  ;;  %v14514_v55 = vld [vmem:[#allocation2 + $0x98] ss:$0 sps:$4 sm:$0x11]  }
 0x4b0   :  { %11729 = vmatprep.mubr.bf16.mxu1 %v10894_v20  ;;  %v9577_v20 = vpop.permute.xlu1 %9576  ;;  %v9124_v16 = vshll.u32 %v14514_v55, 16 }
 0x4b1   :  { %v9097_v62 = vrot.slane %v9095_v41, 1  ;;  %v10778_v17 = vsel %vm4517_vm10, %v9091_v59, %v9577_v20  ;;  %v14513_v41 = vld [vmem:[#allocation2 + $0x8c] ss:$0 sps:$4 sm:$0x11]   ;;  %v9110_v9 = vor.u32 %v9109_v43, %v9105_v27  ;;  %v9119_v59 = vshll.u32 %v19649_v53, 16 }
 0x4b2   :  { %v9112_v20 = vshll.u32 %v14513_v41, 16  ;;  %v9126_v43 = vrot.slane %v9124_v16, 1  ;;  %v14516_v16 = vld [vmem:[#allocation2 + $0xb0] ss:$0 sps:$4 sm:$0x11]  }
 0x4b3   :  { %v9098_v45 = vor.u32 %v9097_v62, %v9093_v38  ;;  %v9121_v1 = vrot.slane %v9119_v59, 1 }
 0x4b7   :  { %11730 = vmatmul.mubr.bf16.gmra.mrb[92].mxu1 %v10774_v22  ;;  %v9579_v22 = vpop.permute.xlu1 %9578 }
 0x4b8   :  { %11737 = vmatprep.mubr.bf16.mxu1 %v10897_v21  ;;  %v9102_v21 = vrot.slane %v9100_v58, 1 }
 0x4ba   :  { %v9103_v6 = vsel %vm2019_vm8, %v9098_v45, %v9102_v21  ;;  %v9117_v45 = vshrl.u32 %v19649_v53, 16  ;;  %v19650_v21 = vld [vmem:[#allocation25_spill] sm:$0xff] }
 0x4bb   :  { %v10782_v12 = vsel %vm4517_vm10, %v9103_v6, %v9579_v22  ;;  %v9581_v62 = vpop.permute.xlu1 %9580  ;;  %v9131_v25 = vshll.u32 %v19650_v21, 16 }
 0x4bc   :  { %v9122_v22 = vor.u32 %v9121_v1, %v9117_v45 }
 0x4bd   :  { %v9133_v27 = vrot.slane %v9131_v25, 1  ;;  %v19652_v25 = vld [vmem:[#allocation27_spill] sm:$0xff] }
 0x4bf   :  { %11738 = vmatmul.mubr.bf16.gmra.mrb[96].mxu1 %v10778_v17  ;;  %v9114_v17 = vrot.slane %v9112_v20, 1  ;;  %v9583_v6 = vpop.permute.xlu1 %9582  ;;  %v9129_v20 = vshrl.u32 %v19650_v21, 16 }
 0x4c0   :  { %11745 = vmatprep.mubr.bf16.mxu1 %v10900_v60  ;;  %v10287_v60 = vpop.permute.xlu0 %10286 }
 0x4c1   :  { %v9115_v38 = vsel %vm2019_vm8, %v9110_v9, %v9114_v17  ;;  %v10906_v3 = vsel %vm4517_vm10, %v18327_v54, %v10287_v60  ;;  %v14515_v9 = vld [vmem:[#allocation2 + $0xa4] ss:$0 sps:$4 sm:$0x11]   ;;  %v9134_v59 = vor.u32 %v9133_v27, %v9129_v20  ;;  %v9153_v20 = vshrl.u32 %v19652_v25, 16 }
 0x4c2   :  { %v10786_v58 = vsel %vm4517_vm10, %v9115_v38, %v9581_v62  ;;  %v9136_v53 = vshll.u32 %v14515_v9, 16  ;;  %v19651_v62 = vld [vmem:[#allocation26_spill] sm:$0xff]  ;;  %v14517_v9 = vld [vmem:[#allocation2 + $0xbc] ss:$0 sps:$4 sm:$0x11]  }
 0x4c3   :  { %v9143_v17 = vshll.u32 %v19651_v62, 16  ;;  %v9585_v60 = vpop.permute.xlu1 %9584  ;;  %v9141_v55 = vshrl.u32 %v19651_v62, 16  ;;  %v19653_v62 = vld [vmem:[#allocation28_spill] sm:$0xff] }
 0x4c4   :  { %v9138_v38 = vrot.slane %v9136_v53, 1  ;;  %v9160_v53 = vshll.u32 %v14517_v9, 16  ;;  %v19654_v9 = vld [vmem:[#allocation63_spill] sm:$0xff] }
 0x4c7   :  { %11746 = vmatmul.mubr.bf16.gmra.mrb[100].mxu1 %v10782_v12  ;;  %v10289_v12 = vpop.permute.xlu0 %10288 }
 0x4c8   :  { %11753 = vmatprep.mubr.bf16.mxu1 %v10903_v14  ;;  %v9127_v14 = vsel %vm2019_vm8, %v9122_v22, %v9126_v43  ;;  %v10909_v54 = vsel %vm4517_vm10, %v18334_v50, %v10289_v12  ;;  %v9148_v22 = vshll.u32 %v14516_v16, 16  ;;  %v9587_v43 = vpop.permute.xlu1 %9586 }
 0x4c9   :  { %v10790_v41 = vsel %vm4517_vm10, %v9127_v14, %v9583_v6  ;;  %v9155_v6 = vshll.u32 %v19652_v25, 16 }
 0x4ca   :  { %v9150_v12 = vrot.slane %v9148_v22, 1 }
 0x4cb   :  { %v10291_v1 = vpop.permute.xlu0 %10290 }
 0x4cc   :  { %v10912_v50 = vsel %vm4517_vm10, %v18349_v10, %v10291_v1 }
 0x4cf   :  { %11754 = vmatmul.mubr.bf16.gmra.mrb[104].mxu1 %v10786_v58  ;;  %v9139_v58 = vsel %vm2019_vm8, %v9134_v59, %v9138_v38  ;;  %v10293_v14 = vpop.permute.xlu0 %10292  ;;  %v9162_v38 = vrot.slane %v9160_v53, 1  ;;  %v9191_v53 = vshll.u32 %v19654_v9, 16 }
 0x4d0   :  { %11761 = vmatprep.mubr.bf16.mxu1 %v10906_v3  ;;  %v9145_v3 = vrot.slane %v9143_v17, 1  ;;  %v10794_v45 = vsel %vm4517_vm10, %v9139_v58, %v9585_v60  ;;  %v10915_v10 = vsel %vm4517_vm10, %v18362_v7, %v10293_v14  ;;  %v9167_v17 = vshll.u32 %v19653_v62, 16  ;;  %v9589_v60 = vpop.permute.xlu1 %9588 }
 0x4d1   :  { %v9165_v7 = vshrl.u32 %v19653_v62, 16 }
 0x4d2   :  { %v9146_v21 = vor.u32 %v9145_v3, %v9141_v55  ;;  %v14518_v55 = vld [vmem:[#allocation2 + $0xc8] ss:$0 sps:$4 sm:$0x11]  }
 0x4d3   :  { %v10295_v1 = vpop.permute.xlu0 %10294  ;;  %v9172_v16 = vshll.u32 %v14518_v55, 16 }
 0x4d4   :  { %v9151_v27 = vsel %vm2019_vm8, %v9146_v21, %v9150_v12  ;;  %v10918_v3 = vsel %vm4517_vm10, %v18375_v56, %v10295_v1  ;;  %v9179_v21 = vshll.u32 %v17666_v37, 16  ;;  %v9591_v25 = vpop.permute.xlu1 %9590 }
 0x4d6   :  { %v9181_v14 = vrot.slane %v9179_v21, 1 }
 0x4d7   :  { %11762 = vmatmul.mubr.bf16.gmra.mrb[108].mxu1 %v10790_v41  ;;  %v9157_v41 = vrot.slane %v9155_v6, 1  ;;  %v9174_v6 = vrot.slane %v9172_v16, 1 }
 0x4d8   :  { %11769 = vmatprep.mubr.bf16.mxu1 %v10909_v54  ;;  %v10798_v54 = vsel %vm4517_vm10, %v9151_v27, %v9587_v43  ;;  %v10297_v43 = vpop.permute.xlu0 %10296 }
 0x4d9   :  { %v9158_v59 = vor.u32 %v9157_v41, %v9153_v20  ;;  %v10921_v27 = vsel %vm4517_vm10, %v18390_v5, %v10297_v43  ;;  %v9177_v41 = vshrl.u32 %v17666_v37, 16  ;;  %v9189_v37 = vshrl.u32 %v19654_v9, 16 }
 0x4db   :  { %v9163_v58 = vsel %vm2019_vm8, %v9158_v59, %v9162_v38  ;;  %v9182_v20 = vor.u32 %v9181_v14, %v9177_v41  ;;  %v9593_v59 = vpop.permute.xlu1 %9592  ;;  %v9193_v38 = vrot.slane %v9191_v53, 1 }
 0x4df   :  { %11770 = vmatmul.mubr.bf16.gmra.mrb[112].mxu1 %v10794_v45  ;;  %v9169_v45 = vrot.slane %v9167_v17, 1  ;;  %v10299_v17 = vpop.permute.xlu0 %10298  ;;  %v9595_v55 = vpop.permute.xlu1 %9594 }
 0x4e0   :  { %11777 = vmatprep.mubr.bf16.mxu1 %v10912_v50  ;;  %v10802_v50 = vsel %vm4517_vm10, %v9163_v58, %v9589_v60  ;;  %v10924_v5 = vsel %vm4517_vm10, %v18398_v42, %v10299_v17  ;;  %v14520_v58 = vld [vmem:[#allocation2 + $0xf8] ss:$0 sps:$4 sm:$0x11]   ;;  %v14522_v17 = vld [vmem:[#allocation2 + $0x110] ss:$0 sps:$4 sm:$0x11]  }
 0x4e1   :  { %v9170_v22 = vor.u32 %v9169_v45, %v9165_v7  ;;  %v9194_v45 = vor.u32 %v9193_v38, %v9189_v37 }
 0x4e3   :  { %v9175_v12 = vsel %vm2019_vm8, %v9170_v22, %v9174_v6  ;;  %v10301_v22 = vpop.permute.xlu0 %10300 }
 0x4e4   :  { %v10806_v56 = vsel %vm4517_vm10, %v9175_v12, %v9591_v25  ;;  %v10927_v42 = vsel %vm4517_vm10, %v18403_v13, %v10301_v22  ;;  %v14521_v12 = vld [vmem:[#allocation2 + $0x104] ss:$0 sps:$4 sm:$0x11]  }
 0x4e5   :  { %v9208_v14 = vshll.u32 %v14521_v12, 16 }
 0x4e7   :  { %11778 = vmatmul.mubr.bf16.gmra.mrb[116].mxu1 %v10798_v54  ;;  %v14519_v54 = vld [vmem:[#allocation2 + $0xec] ss:$0 sps:$4 sm:$0x11]  }
 0x4e8   :  { %11785 = vmatprep.mubr.bf16.mxu1 %v10915_v10  ;;  %v9184_v10 = vshll.u32 %v14519_v54, 16  ;;  %v9597_v54 = vpop.permute.xlu1 %9596 }
 0x4ea   :  { %v9186_v62 = vrot.slane %v9184_v10, 1  ;;  %v9210_v10 = vrot.slane %v9208_v14, 1 }
 0x4ec   :  { %v9187_v60 = vsel %vm2019_vm8, %v9182_v20, %v9186_v62  ;;  %v10303_v20 = vpop.permute.xlu0 %10302  ;;  %v9599_v37 = vpop.permute.xlu1 %9598 }
 0x4ed   :  { %v10810_v1 = vsel %vm4517_vm10, %v9187_v60, %v9593_v59  ;;  %v10930_v13 = vsel %vm4517_vm10, %v18427_v52, %v10303_v20  ;;  %v9220_v60 = vshll.u32 %v14522_v17, 16  ;;  %v19658_v20 = vld [vmem:[#allocation65_spill] sm:$0xff] }
 0x4ef   :  { %11786 = vmatmul.mubr.bf16.gmra.mrb[120].mxu1 %v10802_v50  ;;  %v19655_v50 = vld [vmem:[#allocation29_spill] sm:$0xff] }
 0x4f0   :  { %11793 = vmatprep.mubr.bf16.mxu1 %v10918_v3  ;;  %v9196_v3 = vshll.u32 %v14520_v58, 16  ;;  %v9203_v7 = vshll.u32 %v19655_v50, 16  ;;  %v9201_v43 = vshrl.u32 %v19655_v50, 16  ;;  %v9222_v58 = vrot.slane %v9220_v60, 1 }
 0x4f2   :  { %v9198_v16 = vrot.slane %v9196_v3, 1  ;;  %v9205_v25 = vrot.slane %v9203_v7, 1  ;;  %v10305_v3 = vpop.permute.xlu0 %10304 }
 0x4f3   :  { %v10933_v52 = vsel %vm4517_vm10, %v18437_v51, %v10305_v3 }
 0x4f4   :  { %v9199_v21 = vsel %vm2019_vm8, %v9194_v45, %v9198_v16  ;;  %v14523_v16 = vld [vmem:[#allocation2 + $0x11c] ss:$0 sps:$4 sm:$0x11]  }
 0x4f5   :  { %v10814_v6 = vsel %vm4517_vm10, %v9199_v21, %v9595_v55  ;;  %v9232_v22 = vshll.u32 %v14523_v16, 16 }
 0x4f7   :  { %11794 = vmatmul.mubr.bf16.gmra.mrb[124].mxu1 %v10806_v56  ;;  %v9206_v56 = vor.u32 %v9205_v25, %v9201_v43  ;;  %v9239_v25 = vshll.u32 %v17876_v11, 16  ;;  %v10307_v43 = vpop.permute.xlu0 %10306 }
 0x4f8   :  { %11801 = vmatprep.mubr.bf16.mxu1 %v10921_v27  ;;  %v19656_v27 = vld [vmem:[#allocation64_spill] sm:$0xff]  ;;  %v10936_v51 = vsel %vm4517_vm10, %v18445_v29, %v10307_v43 }
 0x4f9   :  { %v9215_v41 = vshll.u32 %v19656_v27, 16  ;;  %v9211_v9 = vsel %vm2019_vm8, %v9206_v56, %v9210_v10  ;;  %v9213_v62 = vshrl.u32 %v19656_v27, 16  ;;  %v9241_v14 = vrot.slane %v9239_v25, 1 }
 0x4fa   :  { %v10818_v59 = vsel %vm4517_vm10, %v9211_v9, %v9597_v54  ;;  %v9237_v27 = vshrl.u32 %v17876_v11, 16  ;;  %v9251_v9 = vshll.u32 %v19658_v20, 16  ;;  %v9249_v11 = vshrl.u32 %v19658_v20, 16 }
 0x4fb   :  { %v9217_v53 = vrot.slane %v9215_v41, 1  ;;  %v14524_v41 = vld [vmem:[#allocation2 + $0x128] ss:$0 sps:$4 sm:$0x11]  }
 0x4fc   :  { %v9244_v54 = vshll.u32 %v14524_v41, 16  ;;  %v9242_v10 = vor.u32 %v9241_v14, %v9237_v27  ;;  %v9253_v17 = vrot.slane %v9251_v9, 1  ;;  %v19660_v27 = vld [vmem:[#allocation20_spill] sm:$0xff]  ;;  %v9273_v41 = vshrl.u32 %v17996_v40, 16  ;;  %v19661_v9 = vld [vmem:[#allocation66_spill] sm:$0xff] }
 0x4fd   :  { %v9218_v38 = vor.u32 %v9217_v53, %v9213_v62 }
 0x4ff   :  { %11802 = vmatmul.mubr.bf16.gmra.mrb[128].mxu1 %v10810_v1  ;;  %v19657_v1 = vld [vmem:[#allocation30_spill] sm:$0xff]  ;;  %v9223_v45 = vsel %vm2019_vm8, %v9218_v38, %v9222_v58 }
 0x500   :  { %11809 = vmatprep.mubr.bf16.mxu1 %v10924_v5  ;;  %v9227_v5 = vshll.u32 %v19657_v1, 16  ;;  %v10822_v7 = vsel %vm4517_vm10, %v9223_v45, %v9599_v37  ;;  %v9225_v55 = vshrl.u32 %v19657_v1, 16  ;;  %v14525_v38 = vld [vmem:[#allocation2 + $0x134] ss:$0 sps:$4 sm:$0x11]   ;;  %v19659_v37 = vld [vmem:[#allocation31_spill] sm:$0xff] }
 0x501   :  { %v9256_v1 = vshll.u32 %v14525_v38, 16  ;;  %v9263_v58 = vshll.u32 %v19659_v37, 16  ;;  %v9261_v16 = vshrl.u32 %v19659_v37, 16 }
 0x502   :  { %v9229_v50 = vrot.slane %v9227_v5, 1  ;;  %v9254_v5 = vor.u32 %v9253_v17, %v9249_v11  ;;  %v19662_v11 = vld [vmem:[#allocation68_spill] sm:$0xff] }
 0x503   :  { %v9258_v45 = vrot.slane %v9256_v1, 1  ;;  %v14528_v1 = vld [vmem:[#allocation2 + $0x158] ss:$0 sps:$4 sm:$0x11]  }
 0x504   :  { %v9230_v21 = vor.u32 %v9229_v50, %v9225_v55 }
 0x507   :  { %11810 = vmatmul.mubr.bf16.gmra.mrb[132].mxu1 %v10814_v6  ;;  %v9601_v6 = vpop.permute.xlu1 %9600 }
 0x508   :  { %11817 = vmatprep.mubr.bf16.mxu1 %v10927_v42  ;;  %v9234_v42 = vrot.slane %v9232_v22, 1  ;;  %v14526_v22 = vld [vmem:[#allocation2 + $0x140] ss:$0 sps:$4 sm:$0x11]  }
 0x50a   :  { %v9235_v12 = vsel %vm2019_vm8, %v9230_v21, %v9234_v42  ;;  %v9268_v21 = vshll.u32 %v14526_v22, 16 }
 0x50b   :  { %v10826_v56 = vsel %vm4517_vm10, %v9235_v12, %v9601_v6  ;;  %v9603_v53 = vpop.permute.xlu1 %9602  ;;  %v9275_v6 = vshll.u32 %v17996_v40, 16  ;;  %v9285_v40 = vshrl.u32 %v19661_v9, 16 }
 0x50c   :  { %v9270_v43 = vrot.slane %v9268_v21, 1 }
 0x50f   :  { %11818 = vmatmul.mubr.bf16.gmra.mrb[136].mxu1 %v10818_v59  ;;  %v9246_v59 = vrot.slane %v9244_v54, 1  ;;  %v9605_v3 = vpop.permute.xlu1 %9604  ;;  %v14527_v54 = vld [vmem:[#allocation2 + $0x14c] ss:$0 sps:$4 sm:$0x11]  }
 0x510   :  { %11825 = vmatprep.mubr.bf16.mxu1 %v10930_v13  ;;  %v10309_v13 = vpop.permute.xlu0 %10308 }
 0x511   :  { %v9247_v62 = vsel %vm2019_vm8, %v9242_v10, %v9246_v59  ;;  %v10939_v29 = vsel %vm4517_vm10, %v18450_v32, %v10309_v13  ;;  %v9280_v10 = vshll.u32 %v14527_v54, 16  ;;  %v19666_v54 = vld [vmem:[#allocation71_spill] sm:$0xff] }
 0x512   :  { %v10830_v60 = vsel %vm4517_vm10, %v9247_v62, %v9603_v53  ;;  %v9287_v53 = vshll.u32 %v19661_v9, 16  ;;  %v9316_v9 = vshll.u32 %v18542_v8, 16 }
 0x513   :  { %v9607_v42 = vpop.permute.xlu1 %9606  ;;  %v9282_v13 = vrot.slane %v9280_v10, 1 }
 0x514   :  { %v10311_v50 = vpop.permute.xlu0 %10310 }
 0x515   :  { %v10942_v32 = vsel %vm4517_vm10, %v18463_v57, %v10311_v50 }
 0x517   :  { %11826 = vmatmul.mubr.bf16.gmra.mrb[140].mxu1 %v10822_v7  ;;  %v9259_v7 = vsel %vm2019_vm8, %v9254_v5, %v9258_v45  ;;  %v9609_v59 = vpop.permute.xlu1 %9608  ;;  %v9292_v5 = vshll.u32 %v14528_v1, 16 }
 0x518   :  { %11833 = vmatprep.mubr.bf16.mxu1 %v10933_v52  ;;  %v9265_v52 = vrot.slane %v9263_v58, 1  ;;  %v10834_v55 = vsel %vm4517_vm10, %v9259_v7, %v9605_v3  ;;  %v10313_v12 = vpop.permute.xlu0 %10312  ;;  %v19663_v58 = vld [vmem:[#allocation34_spill] sm:$0xff] }
 0x519   :  { %v10945_v57 = vsel %vm4517_vm10, %v19660_v27, %v10313_v12  ;;  %v9299_v3 = vshll.u32 %v19663_v58, 16  ;;  %v9294_v50 = vrot.slane %v9292_v5, 1  ;;  %v9297_v21 = vshrl.u32 %v19663_v58, 16  ;;  %v14530_v5 = vld [vmem:[%s19190_s0] sm:$0xff]  ;;  %v19669_v58 = vld [vmem:[#allocation41_spill] sm:$0xff] }
 0x51a   :  { %v9266_v25 = vor.u32 %v9265_v52, %v9261_v16  ;;  %v19664_v16 = vld [vmem:[#allocation69_spill] sm:$0xff] }
 0x51b   :  { %v9611_v45 = vpop.permute.xlu1 %9610 }
 0x51c   :  { %v9271_v14 = vsel %vm2019_vm8, %v9266_v25, %v9270_v43  ;;  %v10315_v62 = vpop.permute.xlu0 %10314  ;;  %v14529_v25 = vld [vmem:[#allocation2 + $0x164] ss:$0 sps:$4 sm:$0x11]   ;;  %v19665_v43 = vld [vmem:[#allocation37_spill] sm:$0xff] }
 0x51d   :  { %v10948_v38 = vsel %vm4517_vm10, %v19662_v11, %v10315_v62  ;;  %v9311_v12 = vshll.u32 %v19665_v43, 16 }
 0x51f   :  { %11834 = vmatmul.mubr.bf16.gmra.mrb[144].mxu1 %v10826_v56  ;;  %v9277_v56 = vrot.slane %v9275_v6, 1  ;;  %v9304_v6 = vshll.u32 %v14529_v25, 16  ;;  %v19670_v25 = vld [vmem:[#allocation6_spill] sm:$0xff] }
 0x520   :  { %11841 = vmatprep.mubr.bf16.mxu1 %v10936_v51  ;;  %v10838_v51 = vsel %vm4517_vm10, %v9271_v14, %v9607_v42  ;;  %v10317_v7 = vpop.permute.xlu0 %10316  ;;  %v9613_v14 = vpop.permute.xlu1 %9612 }
 0x521   :  { %v9278_v20 = vor.u32 %v9277_v56, %v9273_v41  ;;  %v10951_v22 = vsel %vm4517_vm10, %v19664_v16, %v10317_v7  ;;  %v9306_v56 = vrot.slane %v9304_v6, 1  ;;  %v9335_v6 = vshll.u32 %v19670_v25, 16 }
 0x523   :  { %v9283_v17 = vsel %vm2019_vm8, %v9278_v20, %v9282_v13  ;;  %v9309_v20 = vshrl.u32 %v19665_v43, 16 }
 0x527   :  { %11842 = vmatmul.mubr.bf16.gmra.mrb[148].mxu1 %v10830_v60  ;;  %v9289_v60 = vrot.slane %v9287_v53, 1 }
 0x528   :  { %11849 = vmatprep.mubr.bf16.mxu1 %v10939_v29  ;;  %v10842_v29 = vsel %vm4517_vm10, %v9283_v17, %v9609_v59  ;;  %v19667_v59 = vld [vmem:[#allocation39_spill] sm:$0xff]  ;;  %v9615_v17 = vpop.permute.xlu1 %9614 }
 0x529   :  { %v9290_v37 = vor.u32 %v9289_v60, %v9285_v40  ;;  %v9323_v13 = vshll.u32 %v19667_v59, 16  ;;  %v19668_v60 = vld [vmem:[#allocation53_spill] sm:$0xff]  ;;  %v9321_v16 = vshrl.u32 %v19667_v59, 16  ;;  %v14533_v59 = vld [vmem:[%s19190_s0 + $0x18] sm:$0xff] }
 0x52b   :  { %v9295_v52 = vsel %vm2019_vm8, %v9290_v37, %v9294_v50  ;;  %v9325_v50 = vrot.slane %v9323_v13, 1 }
 0x52c   :  { %v9617_v43 = vpop.permute.xlu1 %9616 }
 0x52f   :  { %11850 = vmatmul.mubr.bf16.gmra.mrb[152].mxu1 %v10834_v55  ;;  %v9301_v55 = vrot.slane %v9299_v3, 1 }
 0x530   :  { %11857 = vmatprep.mubr.bf16.mxu1 %v10942_v32  ;;  %v10846_v32 = vsel %vm4517_vm10, %v9295_v52, %v9611_v45  ;;  %v14531_v52 = vld [vmem:[%s19190_s0 + $0x8] sm:$0xff] }
 0x531   :  { %v9302_v42 = vor.u32 %v9301_v55, %v9297_v21  ;;  %v9326_v21 = vor.u32 %v9325_v50, %v9321_v16 }
 0x533   :  { %v9307_v27 = vsel %vm2019_vm8, %v9302_v42, %v9306_v56 }
 0x534   :  { %v10850_v41 = vsel %vm4517_vm10, %v9307_v27, %v9613_v14 }
 0x537   :  { %11858 = vmatmul.mubr.bf16.gmra.mrb[156].mxu1 %v10838_v51  ;;  %v10319_v51 = vpop.permute.xlu0 %10318 }
 0x538   :  { %11865 = vmatprep.mubr.bf16.mxu1 %v10945_v57  ;;  %v9313_v57 = vrot.slane %v9311_v12, 1  ;;  %v10954_v10 = vsel %vm4517_vm10, %v19666_v54, %v10319_v51  ;;  %v19671_v12 = vld [vmem:[#allocation32_spill] sm:$0xff] }
 0x53a   :  { %v9314_v53 = vor.u32 %v9313_v57, %v9309_v20 }
 0x53b   :  { %v10321_v40 = vpop.permute.xlu0 %10320 }
 0x53f   :  { %11866 = vmatmul.mubr.bf16.gmra.mrb[160].mxu1 %v10842_v29  ;;  %v10323_v27 = vpop.permute.xlu0 %10322 }
 0x540   :  { %11873 = vmatprep.mubr.bf16.mxu1 %v10948_v38  ;;  %v9318_v38 = vrot.slane %v9316_v9, 1  ;;  %v9337_v9 = vrot.slane %v9335_v6, 1 }
 0x542   :  { %v9319_v45 = vsel %vm2019_vm8, %v9314_v53, %v9318_v38 }
 0x543   :  { %v10854_v7 = vsel %vm4517_vm10, %v9319_v45, %v9615_v17  ;;  %v9333_v17 = vshrl.u32 %v19670_v25, 16  ;;  %v14535_v25 = vld [vmem:[%s19190_s0 + $0x28] sm:$0xff] }
 0x545   :  { %v9338_v38 = vor.u32 %v9337_v9, %v9333_v17  ;;  %v19678_v9 = vld [vmem:[#allocation36_spill] sm:$0xff] }
 0x547   :  { %11874 = vmatmul.mubr.bf16.gmra.mrb[164].mxu1 %v10846_v32  ;;  %v10957_v32 = vsel %vm4517_vm10, %v18544_v44, %v10321_v40  ;;  %v14532_v44 = vld [vmem:[%s19190_s0 + $0x10] sm:$0xff] }
 0x548   :  { %11881 = vmatprep.mubr.bf16.mxu1 %v10951_v22  ;;  %v9328_v22 = vshll.u32 %v18554_v47, 16  ;;  %v19672_v47 = vld [vmem:[#allocation33_spill] sm:$0xff] }
 0x54a   :  { %v9330_v51 = vrot.slane %v9328_v22, 1 }
 0x54c   :  { %v9331_v20 = vsel %vm2019_vm8, %v9326_v21, %v9330_v51  ;;  %v9352_v21 = vshll.u32 %v18587_v19, 16 }
 0x54d   :  { %v10858_v53 = vsel %vm4517_vm10, %v9331_v20, %v9617_v43 }
 0x54e   :  { %v9354_v51 = vrot.slane %v9352_v21, 1 }
 0x54f   :  { %11882 = vmatmul.mubr.bf16.gmra.mrb[168].mxu1 %v10850_v41 }
 0x550   :  { %11889 = vmatprep.mubr.bf16.mxu1 %v10954_v10 }
 0x552   :  { %v11675_v62 = vpop.f32.mrb[64].mxu1 }
 0x553   :  { %v11965_v29 = vadd.f32 %v19668_v60, %v11675_v62  ;;  %v11677_v11 = vpop.f32.mrb[65].mxu1  ;;  %v10960_v62 = vsel %vm4517_vm10, %v18557_v31, %v10323_v27  ;;  %v9340_v60 = vshll.u32 %v18576_v36, 16  ;;  %v14534_v31 = vld [vmem:[%s19190_s0 + $0x20] sm:$0xff] }
 0x554   :  { %v11678_v1 = vpop.f32.mrb[66].mxu1 }
 0x555   :  { %v12219_v37 = vadd.f32 %v14530_v5, %v11965_v29  ;;  %v11968_v3 = vadd.f32 %v19669_v58, %v11678_v1  ;;  %v11680_v8 = vpop.f32.mrb[67].mxu1  ;;  %v19673_v29 = vld [vmem:[#allocation45_spill] sm:$0xff]  ;;  %v9619_v1 = vpop.permute.xlu1 %9618  ;;  %v19674_v5 = vld [vmem:[#allocation56_spill] sm:$0xff] }
 0x556   :  { %v9347_v11 = vshll.u32 %v19673_v29, 16  ;;  %v10325_v8 = vpop.permute.xlu0 %10324  ;;  %v9345_v22 = vshrl.u32 %v19673_v29, 16 }
 0x557   :  { %12283 = vst.msk [vmem:[#allocation3] sm:$0xff] %vm4517_vm10, %v12219_v37  ;;  %v12220_v55 = vadd.f32 %v14531_v52, %v11968_v3  ;;  %11890 = vmatmul.mubr.bf16.gmra.mrb[172].mxu1 %v10854_v7  ;;  %v9342_v3 = vrot.slane %v9340_v60, 1  ;;  %v19675_v7 = vld [vmem:[#allocation59_spill] sm:$0xff] }
 0x558   :  { %11897 = vmatprep.mubr.bf16.mxu1 %v10957_v32  ;;  %v9349_v50 = vrot.slane %v9347_v11, 1  ;;  %v14537_v60 = vld [vmem:[%s19190_s0 + $0x38] sm:$0xff] }
 0x559   :  { %12284 = vst.msk [vmem:[#allocation3 + $0x8] sm:$0xff] %vm4517_vm10, %v12220_v55  ;;  %v9343_v32 = vsel %vm2019_vm8, %v9338_v38, %v9342_v3  ;;  %v9621_v27 = vpop.permute.xlu1 %9620  ;;  %v9364_v38 = vshll.u32 %v18602_v34, 16  ;;  %v14540_v34 = vld [vmem:[%s19190_s0 + $0x40] sm:$0xff] }
 0x55a   :  { %v11683_v42 = vpop.f32.mrb[68].mxu1  ;;  %v10862_v16 = vsel %vm4517_vm10, %v9343_v32, %v9619_v1  ;;  %v9350_v43 = vor.u32 %v9349_v50, %v9345_v22  ;;  %v10327_v19 = vpop.permute.xlu0 %10326 }
 0x55b   :  { %v11973_v14 = vadd.f32 %v19671_v12, %v11683_v42  ;;  %v11685_v56 = vpop.f32.mrb[69].mxu1  ;;  %v10963_v42 = vsel %vm4517_vm10, %v18570_v4, %v10325_v8  ;;  %v19676_v12 = vld [vmem:[#allocation7_spill] sm:$0xff]  ;;  %v14536_v4 = vld [vmem:[%s19190_s0 + $0x30] sm:$0xff] }
 0x55c   :  { %v11686_v57 = vpop.f32.mrb[70].mxu1  ;;  %v9357_v11 = vshrl.u32 %v19676_v12, 16 }
 0x55d   :  { %v12221_v41 = vadd.f32 %v14532_v44, %v11973_v14  ;;  %v11976_v54 = vadd.f32 %v19672_v47, %v11686_v57  ;;  %v11688_v10 = vpop.f32.mrb[71].mxu1  ;;  %v9359_v14 = vshll.u32 %v19676_v12, 16  ;;  %v19677_v57 = vld [vmem:[#allocation35_spill] sm:$0xff]  ;;  %v14542_v12 = vld [vmem:[%s19190_s0 + $0x48] sm:$0xff] }
 0x55e   :  { %v7762_v10 = vld [vmem:[#allocation2 + $0x168] sm:$0xe] }
 0x55f   :  { %12285 = vst.msk [vmem:[#allocation3 + $0x10] sm:$0xff] %vm4517_vm10, %v12221_v41  ;;  %v12222_v13 = vadd.f32 %v14533_v59, %v11976_v54  ;;  %11898 = vmatmul.mubr.bf16.gmra.mrb[176].mxu1 %v10858_v53  ;;  %v9355_v54 = vsel %vm2019_vm8, %v9350_v43, %v9354_v51  ;;  %v14543_v51 = vld [vmem:[#allocation2 + $0x184] sm:$0xf] }
 0x560   :  { %11905 = vmatprep.mubr.bf16.mxu1 %v10960_v62  ;;  %v9361_v62 = vrot.slane %v9359_v14, 1  ;;  %v10866_v17 = vsel %vm4517_vm10, %v9355_v54, %v9621_v27  ;;  %v14544_v27 = vld [vmem:[#allocation2 + $0x17c] ss:$0 sps:$4 sm:$0x11]  }
 0x561   :  { %12286 = vst.msk [vmem:[#allocation3 + $0x18] sm:$0xff] %vm4517_vm10, %v12222_v13  ;;  %v10966_v13 = vsel %vm4517_vm10, %v18638_v48, %v10327_v19 }
 0x562   :  { %v11691_v40 = vpop.f32.mrb[72].mxu1  ;;  %v9362_v48 = vor.u32 %v9361_v62, %v9357_v11  ;;  %v14546_v62 = vld [vmem:[%s19190_s0 + $0x50] sm:$0xff] }
 0x563   :  { %v11981_v37 = vadd.f32 %v19674_v5, %v11691_v40  ;;  %v11693_v58 = vpop.f32.mrb[73].mxu1  ;;  %v14538_v40 = vld [vmem:[#allocation2 + $0x16c] sm:$0xf] }
 0x564   :  { %v11694_v45 = vpop.f32.mrb[74].mxu1  ;;  %v13129_v1 = vcombine.low %v7762_v10, %v14538_v40  ;;  %v19679_v58 = vld [vmem:[#allocation42_spill] sm:$0xff] }
 0x565   :  { %v12223_v36 = vadd.f32 %v14534_v31, %v11981_v37  ;;  %v11984_v52 = vadd.f32 %v19675_v7, %v11694_v45  ;;  %v11696_v55 = vpop.f32.mrb[75].mxu1  ;;  %v9623_v37 = vpop.permute.xlu1 %9622  ;;  %v9366_v45 = vrot.slane %v9364_v38, 1  ;;  %v14539_v31 = vld [vmem:[#allocation2 + $0x170] ss:$0 sps:$4 sm:$0x11]  }
 0x566   :  { %v10502_v50 = vrot.slane %v13129_v1, 1  ;;  %v7763_v7 = vld [vmem:[#allocation2 + $0x174] sm:$0xe]  ;;  %v7764_v55 = vld [vmem:[#allocation2 + $0x180] sm:$0xe] }
 0x567   :  { %12287 = vst.msk [vmem:[#allocation3 + $0x20] sm:$0xff] %vm4517_vm10, %v12223_v36  ;;  %v12224_v6 = vadd.f32 %v14535_v25, %v11984_v52  ;;  %11906 = vmatmul.mubr.bf16.gmra.mrb[180].mxu1 %v10862_v16  ;;  %v10503_v36 = vrot.slane %v14539_v31, 1  ;;  %v19680_v16 = vld [vmem:[#allocation54_spill] sm:$0xff]  ;;  %v9367_v25 = vsel %vm2019_vm8, %v9362_v48, %v9366_v45  ;;  %v13131_v19 = vcombine.low %v7764_v55, %v14543_v51  ;;  %v14548_v48 = vld [vmem:[%s19190_s0 + $0x58] sm:$0xff]  ;;  %v14554_v51 = vld [vmem:[%s19190_s0 + $0x68] sm:$0xff] }
 0x568   :  { %11913 = vmatprep.mubr.bf16.mxu1 %v10963_v42  ;;  %v14541_v42 = vld [vmem:[#allocation2 + $0x178] sm:$0xf]  ;;  %v14547_v40 = vld [vmem:[#allocation2 + $0x190] sm:$0xf] }
 0x569   :  { %12288 = vst.msk [vmem:[#allocation3 + $0x28] sm:$0xff] %vm4517_vm10, %v12224_v6  ;;  %v10870_v6 = vsel %vm4517_vm10, %v9367_v25, %v9623_v37  ;;  %v13130_v43 = vcombine.low %v7763_v7, %v14541_v42  ;;  %v14550_v31 = vld [vmem:[#allocation2 + $0x194] ss:$0 sps:$4 sm:$0x11]   ;;  %v19683_v7 = vld [vmem:[#allocation9_spill] sm:$0xff] }
 0x56a   :  { %v11699_v56 = vpop.f32.mrb[76].mxu1 }
 0x56b   :  { %v11989_v44 = vadd.f32 %v19677_v57, %v11699_v56  ;;  %v11701_v41 = vpop.f32.mrb[77].mxu1  ;;  %v10504_v56 = vsel %vm2564_vm9, %v10502_v50, %v10503_v36  ;;  %v10506_v57 = vrot.slane %v14544_v27, 1  ;;  %v10512_v36 = vrot.slane %v14550_v31, 1 }
 0x56c   :  { %v11702_v47 = vpop.f32.mrb[78].mxu1  ;;  %v10505_v41 = vrot.slane %v13130_v43, 1  ;;  %v19684_v43 = vld [vmem:[#allocation57_spill] sm:$0xff] }
 0x56d   :  { %v12225_v20 = vadd.f32 %v14536_v4, %v11989_v44  ;;  %v11992_v53 = vadd.f32 %v19678_v9, %v11702_v47  ;;  %v11704_v59 = vpop.f32.mrb[79].mxu1  ;;  %v19681_v47 = vld [vmem:[#allocation40_spill] sm:$0xff]  ;;  %v10508_v4 = vrot.slane %v13131_v19, 1 }
 0x56e   :  { %v10507_v38 = vsel %vm2564_vm9, %v10505_v41, %v10506_v57 }
 0x56f   :  { %12289 = vst.msk [vmem:[#allocation3 + $0x30] sm:$0xff] %vm4517_vm10, %v12225_v20  ;;  %v12226_v29 = vadd.f32 %v14537_v60, %v11992_v53  ;;  %11914 = vmatmul.mubr.bf16.gmra.mrb[184].mxu1 %v10866_v17  ;;  %v14545_v20 = vld [vmem:[#allocation2 + $0x188] ss:$0 sps:$4 sm:$0x11]   ;;  %v7765_v53 = vld [vmem:[#allocation2 + $0x18c] sm:$0xe] }
 0x570   :  { %11921 = vmatprep.mubr.bf16.mxu1 %v10966_v13  ;;  %v10509_v9 = vrot.slane %v14545_v20, 1  ;;  %v7766_v13 = vld [vmem:[#allocation2 + $0x198] sm:$0xe]  ;;  %v19682_v60 = vld [vmem:[#allocation10_spill] sm:$0xff]  ;;  %v13132_v1 = vcombine.low %v7765_v53, %v14547_v40 }
 0x571   :  { %12290 = vst.msk [vmem:[#allocation3 + $0x38] sm:$0xff] %vm4517_vm10, %v12226_v29  ;;  %v14556_v53 = vld [vmem:[%s19190_s0 + $0x70] sm:$0xff] }
 0x572   :  { %v11707_v5 = vpop.f32.mrb[80].mxu1  ;;  %v10510_v37 = vsel %vm2564_vm9, %v10508_v4, %v10509_v9  ;;  %v10511_v50 = vrot.slane %v13132_v1, 1 }
 0x573   :  { %v11997_v3 = vadd.f32 %v19679_v58, %v11707_v5  ;;  %v11709_v8 = vpop.f32.mrb[81].mxu1  ;;  %v14549_v58 = vld [vmem:[#allocation2 + $0x19c] sm:$0xf] }
 0x574   :  { %v11710_v52 = vpop.f32.mrb[82].mxu1  ;;  %v7767_v8 = vld [vmem:[#allocation2 + $0x1a4] sm:$0xe] }
 0x575   :  { %v12227_v32 = vadd.f32 %v14540_v34, %v11997_v3  ;;  %v12000_v22 = vadd.f32 %v19680_v16, %v11710_v52  ;;  %v11712_v21 = vpop.f32.mrb[83].mxu1  ;;  %v13133_v3 = vcombine.low %v7766_v13, %v14549_v58  ;;  %v19686_v13 = vld [vmem:[#allocation38_spill] sm:$0xff]  ;;  %v19688_v58 = vld [vmem:[#allocation47_spill] sm:$0xff] }
 0x576   :  { %v14552_v21 = vld [vmem:[#allocation2 + $0x1a8] sm:$0xf] }
 0x577   :  { %12291 = vst.msk [vmem:[#allocation3 + $0x40] sm:$0xff] %vm4517_vm10, %v12227_v32  ;;  %v12228_v14 = vadd.f32 %v14542_v12, %v12000_v22  ;;  %11922 = vmatmul.mubr.bf16.gmra.mrb[188].mxu1 %v10870_v6  ;;  %v10514_v34 = vrot.slane %v13133_v3, 1  ;;  %v14551_v32 = vld [vmem:[#allocation2 + $0x1a0] ss:$0 sps:$4 sm:$0x11]   ;;  %v13134_v25 = vcombine.low %v7767_v8, %v14552_v21 }
 0x578   :  { %13407 = vmatprep.mubr.msk.bf16.mxu1 %vm4517_vm10, %v10504_v56  ;;  %v10515_v16 = vrot.slane %v14551_v32, 1  ;;  %v14553_v6 = vld [vmem:[%s19190_s0 + $0x60] sm:$0xff]  ;;  %v10513_v56 = vsel %vm2564_vm9, %v10511_v50, %v10512_v36  ;;  %v19689_v36 = vld [vmem:[#allocation11_spill] sm:$0xff] }
 0x579   :  { %12292 = vst.msk [vmem:[#allocation3 + $0x48] sm:$0xff] %vm4517_vm10, %v12228_v14  ;;  %v10517_v57 = vrot.slane %v13134_v25, 1  ;;  %v14561_v25 = vld [vmem:[%s19190_s0 + $0x98] sm:$0xff] }
 0x57a   :  { %v11715_v44 = vpop.f32.mrb[84].mxu1  ;;  %v10516_v27 = vsel %vm2564_vm9, %v10514_v34, %v10515_v16  ;;  %v14560_v34 = vld [vmem:[%s19190_s0 + $0x90] sm:$0xff]  ;;  %v19690_v16 = vld [vmem:[#allocation48_spill] sm:$0xff] }
 0x57b   :  { %v12005_v54 = vadd.f32 %v19681_v47, %v11715_v44  ;;  %v11717_v10 = vpop.f32.mrb[85].mxu1  ;;  %v14555_v44 = vld [vmem:[#allocation2 + $0x1ac] ss:$0 sps:$4 sm:$0x11]  }
 0x57c   :  { %v11718_v59 = vpop.f32.mrb[86].mxu1  ;;  %v10518_v41 = vrot.slane %v14555_v44, 1 }
 0x57d   :  { %v12229_v17 = vadd.f32 %v14546_v62, %v12005_v54  ;;  %v12008_v29 = vadd.f32 %v19682_v60, %v11718_v59  ;;  %v11720_v11 = vpop.f32.mrb[87].mxu1  ;;  %v19685_v54 = vld [vmem:[#allocation8_spill] sm:$0xff]  ;;  %v14557_v60 = vld [vmem:[%s19190_s0 + $0x78] sm:$0xff] }
 0x57e   :  { %v10519_v9 = vsel %vm2564_vm9, %v10517_v57, %v10518_v41  ;;  %v14563_v41 = vld [vmem:[%s19190_s0 + $0xa8] sm:$0xff] }
 0x57f   :  { %12293 = vst.msk [vmem:[#allocation3 + $0x50] sm:$0xff] %vm4517_vm10, %v12229_v17  ;;  %v12230_v5 = vadd.f32 %v14548_v48, %v12008_v29  ;;  %13408 = vmatmul.mubr.msk.bf16.vlgmr.msra.gmra.mrb[192].mxu1 %vm4517_vm10, %v10507_v38  ;;  %v19687_v38 = vld [vmem:[#allocation46_spill] sm:$0xff] }
 0x580   :  { %13411 = vmatprep.mubr.msk.bf16.mxu1 %vm4517_vm10, %v10510_v37 }
 0x581   :  { %12294 = vst.msk [vmem:[#allocation3 + $0x58] sm:$0xff] %vm4517_vm10, %v12230_v5  ;;  %v14558_v5 = vld [vmem:[%s19190_s0 + $0x80] sm:$0xff] }
 0x582   :  { %v11723_v45 = vpop.f32.mrb[88].mxu1 }
 0x583   :  { %v12013_v52 = vadd.f32 %v19683_v7, %v11723_v45  ;;  %v11725_v55 = vpop.f32.mrb[89].mxu1  ;;  %v14559_v45 = vld [vmem:[%s19190_s0 + $0x88] sm:$0xff] }
 0x584   :  { %v11726_v22 = vpop.f32.mrb[90].mxu1 }
 0x585   :  { %v12231_v42 = vadd.f32 %v14553_v6, %v12013_v52  ;;  %v12016_v12 = vadd.f32 %v19684_v43, %v11726_v22  ;;  %v11728_v14 = vpop.f32.mrb[91].mxu1  ;;  %v19691_v43 = vld [vmem:[#allocation15_spill] sm:$0xff] }
 0x587   :  { %12295 = vst.msk [vmem:[#allocation3 + $0x60] sm:$0xff] %vm4517_vm10, %v12231_v42  ;;  %v12232_v19 = vadd.f32 %v14554_v51, %v12016_v12  ;;  %13412 = vmatmul.mubr.msk.bf16.gmra.mrb[196].mxu1 %vm4517_vm10, %v10513_v56  ;;  %v14562_v51 = vld [vmem:[%s19190_s0 + $0xa0] sm:$0xff] }
 0x588   :  { %13415 = vmatprep.mubr.msk.bf16.mxu1 %vm4517_vm10, %v10516_v27  ;;  %v19692_v27 = vld [vmem:[#allocation17_spill] sm:$0xff] }
 0x589   :  { %12296 = vst.msk [vmem:[#allocation3 + $0x68] sm:$0xff] %vm4517_vm10, %v12232_v19 }
 0x58a   :  { %v11731_v47 = vpop.f32.mrb[92].mxu1 }
 0x58b   :  { %v12021_v10 = vadd.f32 %v19685_v54, %v11731_v47  ;;  %v11733_v4 = vpop.f32.mrb[93].mxu1 }
 0x58c   :  { %v11734_v20 = vpop.f32.mrb[94].mxu1 }
 0x58d   :  { %v12233_v59 = vadd.f32 %v14556_v53, %v12021_v10  ;;  %v12024_v62 = vadd.f32 %v19686_v13, %v11734_v20  ;;  %v11736_v17 = vpop.f32.mrb[95].mxu1  ;;  %v19693_v10 = vld [vmem:[#allocation14_spill] sm:$0xff]  ;;  %v19694_v13 = vld [vmem:[#allocation16_spill] sm:$0xff] }
 0x58e   :  { %v14564_v53 = vld [vmem:[%s19190_s0 + $0xb0] sm:$0xff] }
 0x58f   :  { %12297 = vst.msk [vmem:[#allocation3 + $0x70] sm:$0xff] %vm4517_vm10, %v12233_v59  ;;  %v12234_v29 = vadd.f32 %v14557_v60, %v12024_v62  ;;  %13416 = vmatmul.mubr.msk.bf16.gmra.mrb[200].mxu1 %vm4517_vm10, %v10519_v9  ;;  %v14565_v60 = vld [vmem:[%s19190_s0 + $0xb8] sm:$0xff] }
 0x591   :  { %12298 = vst.msk [vmem:[#allocation3 + $0x78] sm:$0xff] %vm4517_vm10, %v12234_v29 }
 0x592   :  { %v11739_v11 = vpop.f32.mrb[96].mxu1 }
 0x593   :  { %v12029_v40 = vadd.f32 %v19687_v38, %v11739_v11  ;;  %v11741_v1 = vpop.f32.mrb[97].mxu1  ;;  %v19695_v38 = vld [vmem:[#allocation21_spill] sm:$0xff] }
 0x594   :  { %v11742_v48 = vpop.f32.mrb[98].mxu1 }
 0x595   :  { %v12235_v37 = vadd.f32 %v14558_v5, %v12029_v40  ;;  %v12032_v3 = vadd.f32 %v19688_v58, %v11742_v48  ;;  %v11744_v8 = vpop.f32.mrb[99].mxu1  ;;  %v14566_v5 = vld [vmem:[%s19190_s0 + $0xc0] sm:$0xff]  ;;  %v19696_v58 = vld [vmem:[#allocation19_spill] sm:$0xff] }
 0x597   :  { %12299 = vst.msk [vmem:[#allocation3 + $0x80] sm:$0xff] %vm4517_vm10, %v12235_v37  ;;  %v12236_v50 = vadd.f32 %v14559_v45, %v12032_v3  ;;  %v14567_v45 = vld [vmem:[%s19190_s0 + $0xc8] sm:$0xff] }
 0x599   :  { %12300 = vst.msk [vmem:[#allocation3 + $0x88] sm:$0xff] %vm4517_vm10, %v12236_v50 }
 0x59a   :  { %v11747_v31 = vpop.f32.mrb[100].mxu1 }
 0x59b   :  { %v12037_v7 = vadd.f32 %v19689_v36, %v11747_v31  ;;  %v11749_v52 = vpop.f32.mrb[101].mxu1  ;;  %v19697_v36 = vld [vmem:[#allocation18_spill] sm:$0xff] }
 0x59c   :  { %v11750_v55 = vpop.f32.mrb[102].mxu1 }
 0x59d   :  { %v12237_v32 = vadd.f32 %v14560_v34, %v12037_v7  ;;  %v12040_v22 = vadd.f32 %v19690_v16, %v11750_v55  ;;  %v11752_v21 = vpop.f32.mrb[103].mxu1  ;;  %v14568_v34 = vld [vmem:[%s19190_s0 + $0xd0] sm:$0xff]  ;;  %v19698_v16 = vld [vmem:[#allocation23_spill] sm:$0xff] }
 0x59f   :  { %12301 = vst.msk [vmem:[#allocation3 + $0x90] sm:$0xff] %vm4517_vm10, %v12237_v32  ;;  %v12238_v6 = vadd.f32 %v14561_v25, %v12040_v22  ;;  %v14569_v25 = vld [vmem:[%s19190_s0 + $0xd8] sm:$0xff] }
 0x5a1   :  { %12302 = vst.msk [vmem:[#allocation3 + $0x98] sm:$0xff] %vm4517_vm10, %v12238_v6 }
 0x5a2   :  { %v11755_v42 = vpop.f32.mrb[104].mxu1 }
 0x5a3   :  { %v12045_v12 = vadd.f32 %v19691_v43, %v11755_v42  ;;  %v11757_v14 = vpop.f32.mrb[105].mxu1  ;;  %v19699_v43 = vld [vmem:[#allocation61_spill] sm:$0xff] }
 0x5a4   :  { %v11758_v56 = vpop.f32.mrb[106].mxu1 }
 0x5a5   :  { %v12239_v19 = vadd.f32 %v14562_v51, %v12045_v12  ;;  %v12048_v57 = vadd.f32 %v19692_v27, %v11758_v56  ;;  %v11760_v44 = vpop.f32.mrb[107].mxu1  ;;  %v14570_v51 = vld [vmem:[%s19190_s0 + $0xe0] sm:$0xff]  ;;  %v19700_v27 = vld [vmem:[#allocation67_spill] sm:$0xff] }
 0x5a7   :  { %12303 = vst.msk [vmem:[#allocation3 + $0xa0] sm:$0xff] %vm4517_vm10, %v12239_v19  ;;  %v12240_v47 = vadd.f32 %v14563_v41, %v12048_v57  ;;  %v14571_v41 = vld [vmem:[%s19190_s0 + $0xe8] sm:$0xff] }
 0x5a9   :  { %12304 = vst.msk [vmem:[#allocation3 + $0xa8] sm:$0xff] %vm4517_vm10, %v12240_v47 }
 0x5aa   :  { %v11763_v54 = vpop.f32.mrb[108].mxu1 }
 0x5ab   :  { %v12053_v4 = vadd.f32 %v19693_v10, %v11763_v54  ;;  %v11765_v20 = vpop.f32.mrb[109].mxu1  ;;  %v19701_v10 = vld [vmem:[#allocation22_spill] sm:$0xff] }
 0x5ac   :  { %v11766_v9 = vpop.f32.mrb[110].mxu1 }
 0x5ad   :  { %v12241_v59 = vadd.f32 %v14564_v53, %v12053_v4  ;;  %v12056_v62 = vadd.f32 %v19694_v13, %v11766_v9  ;;  %v11768_v17 = vpop.f32.mrb[111].mxu1  ;;  %v14572_v53 = vld [vmem:[%s19190_s0 + $0xf0] sm:$0xff] }
 0x5ae   :  { %v19702_v13 = vld [vmem:[#allocation62_spill] sm:$0xff] }
 0x5af   :  { %12305 = vst.msk [vmem:[#allocation3 + $0xb0] sm:$0xff] %vm4517_vm10, %v12241_v59  ;;  %v12242_v29 = vadd.f32 %v14565_v60, %v12056_v62  ;;  %v14573_v60 = vld [vmem:[%s19190_s0 + $0xf8] sm:$0xff] }
 0x5b1   :  { %12306 = vst.msk [vmem:[#allocation3 + $0xb8] sm:$0xff] %vm4517_vm10, %v12242_v29 }
 0x5b2   :  { %v11771_v11 = vpop.f32.mrb[112].mxu1 }
 0x5b3   :  { %v12061_v40 = vadd.f32 %v19695_v38, %v11771_v11  ;;  %v11773_v1 = vpop.f32.mrb[113].mxu1  ;;  %v19703_v38 = vld [vmem:[#allocation72_spill] sm:$0xff] }
 0x5b4   :  { %v11774_v48 = vpop.f32.mrb[114].mxu1 }
 0x5b5   :  { %v12243_v37 = vadd.f32 %v14566_v5, %v12061_v40  ;;  %v12064_v3 = vadd.f32 %v19696_v58, %v11774_v48  ;;  %v11776_v8 = vpop.f32.mrb[115].mxu1  ;;  %v14574_v5 = vld [vmem:[%s19190_s0 + $0x100] sm:$0xff]  ;;  %v19704_v58 = vld [vmem:[#allocation74_spill] sm:$0xff] }
 0x5b7   :  { %12307 = vst.msk [vmem:[#allocation3 + $0xc0] sm:$0xff] %vm4517_vm10, %v12243_v37  ;;  %v12244_v50 = vadd.f32 %v14567_v45, %v12064_v3  ;;  %v14575_v45 = vld [vmem:[%s19190_s0 + $0x108] sm:$0xff] }
 0x5b9   :  { %12308 = vst.msk [vmem:[#allocation3 + $0xc8] sm:$0xff] %vm4517_vm10, %v12244_v50 }
 0x5ba   :  { %v11779_v31 = vpop.f32.mrb[116].mxu1 }
 0x5bb   :  { %v12069_v7 = vadd.f32 %v19697_v36, %v11779_v31  ;;  %v11781_v52 = vpop.f32.mrb[117].mxu1  ;;  %v19705_v36 = vld [vmem:[#allocation70_spill] sm:$0xff] }
 0x5bc   :  { %v11782_v55 = vpop.f32.mrb[118].mxu1 }
 0x5bd   :  { %v12245_v32 = vadd.f32 %v14568_v34, %v12069_v7  ;;  %v12072_v22 = vadd.f32 %v19698_v16, %v11782_v55  ;;  %v11784_v21 = vpop.f32.mrb[119].mxu1  ;;  %v14576_v34 = vld [vmem:[%s19190_s0 + $0x110] sm:$0xff]  ;;  %v19706_v16 = vld [vmem:[#allocation73_spill] sm:$0xff] }
 0x5bf   :  { %12309 = vst.msk [vmem:[#allocation3 + $0xd0] sm:$0xff] %vm4517_vm10, %v12245_v32  ;;  %v12246_v6 = vadd.f32 %v14569_v25, %v12072_v22  ;;  %v14577_v25 = vld [vmem:[%s19190_s0 + $0x118] sm:$0xff] }
 0x5c1   :  { %12310 = vst.msk [vmem:[#allocation3 + $0xd8] sm:$0xff] %vm4517_vm10, %v12246_v6 }
 0x5c2   :  { %v11787_v42 = vpop.f32.mrb[120].mxu1 }
 0x5c3   :  { %v12077_v12 = vadd.f32 %v19699_v43, %v11787_v42  ;;  %v11789_v14 = vpop.f32.mrb[121].mxu1 }
 0x5c4   :  { %v11790_v56 = vpop.f32.mrb[122].mxu1 }
 0x5c5   :  { %v12247_v19 = vadd.f32 %v14570_v51, %v12077_v12  ;;  %v12080_v57 = vadd.f32 %v19700_v27, %v11790_v56  ;;  %v11792_v44 = vpop.f32.mrb[123].mxu1  ;;  %v14578_v56 = vld [vmem:[%s19190_s0 + $0x120] sm:$0xff] }
 0x5c7   :  { %12311 = vst.msk [vmem:[#allocation3 + $0xe0] sm:$0xff] %vm4517_vm10, %v12247_v19  ;;  %v12248_v47 = vadd.f32 %v14571_v41, %v12080_v57  ;;  %v14579_v57 = vld [vmem:[%s19190_s0 + $0x128] sm:$0xff] }
 0x5c9   :  { %12312 = vst.msk [vmem:[#allocation3 + $0xe8] sm:$0xff] %vm4517_vm10, %v12248_v47 }
 0x5ca   :  { %v11795_v54 = vpop.f32.mrb[124].mxu1 }
 0x5cb   :  { %v12085_v4 = vadd.f32 %v19701_v10, %v11795_v54  ;;  %v11797_v20 = vpop.f32.mrb[125].mxu1  ;;  %v14580_v10 = vld [vmem:[%s19190_s0 + $0x130] sm:$0xff] }
 0x5cc   :  { %v11798_v9 = vpop.f32.mrb[126].mxu1 }
 0x5cd   :  { %v12249_v59 = vadd.f32 %v14572_v53, %v12085_v4  ;;  %v12088_v62 = vadd.f32 %v19702_v13, %v11798_v9  ;;  %v11800_v17 = vpop.f32.mrb[127].mxu1  ;;  %v14581_v9 = vld [vmem:[%s19190_s0 + $0x138] sm:$0xff] }
 0x5ce   :  { %v14582_v17 = vld [vmem:[%s19190_s0 + $0x140] sm:$0xff] }
 0x5cf   :  { %12313 = vst.msk [vmem:[#allocation3 + $0xf0] sm:$0xff] %vm4517_vm10, %v12249_v59  ;;  %v12250_v29 = vadd.f32 %v14573_v60, %v12088_v62 }
 0x5d1   :  { %12314 = vst.msk [vmem:[#allocation3 + $0xf8] sm:$0xff] %vm4517_vm10, %v12250_v29 }
 0x5d2   :  { %v11803_v11 = vpop.f32.mrb[128].mxu1 }
 0x5d3   :  { %v12093_v40 = vadd.f32 %v19703_v38, %v11803_v11  ;;  %v11805_v1 = vpop.f32.mrb[129].mxu1  ;;  %v14583_v11 = vld [vmem:[%s19190_s0 + $0x148] sm:$0xff] }
 0x5d4   :  { %v11806_v48 = vpop.f32.mrb[130].mxu1 }
 0x5d5   :  { %v12251_v37 = vadd.f32 %v14574_v5, %v12093_v40  ;;  %v12096_v3 = vadd.f32 %v19704_v58, %v11806_v48  ;;  %v11808_v8 = vpop.f32.mrb[131].mxu1  ;;  %v14584_v5 = vld [vmem:[%s19190_s0 + $0x150] sm:$0xff] }
 0x5d7   :  { %12315 = vst.msk [vmem:[#allocation3 + $0x100] sm:$0xff] %vm4517_vm10, %v12251_v37  ;;  %v12252_v50 = vadd.f32 %v14575_v45, %v12096_v3  ;;  %v14585_v3 = vld [vmem:[%s19190_s0 + $0x158] sm:$0xff] }
 0x5d9   :  { %12316 = vst.msk [vmem:[#allocation3 + $0x108] sm:$0xff] %vm4517_vm10, %v12252_v50 }
 0x5da   :  { %v11811_v31 = vpop.f32.mrb[132].mxu1 }
 0x5db   :  { %v12101_v7 = vadd.f32 %v19705_v36, %v11811_v31  ;;  %v11813_v52 = vpop.f32.mrb[133].mxu1  ;;  %v14586_v36 = vld [vmem:[%s19190_s0 + $0x160] sm:$0xff] }
 0x5dc   :  { %v11814_v55 = vpop.f32.mrb[134].mxu1 }
 0x5dd   :  { %v12253_v32 = vadd.f32 %v14576_v34, %v12101_v7  ;;  %v12104_v22 = vadd.f32 %v19706_v16, %v11814_v55  ;;  %v11816_v21 = vpop.f32.mrb[135].mxu1  ;;  %v14587_v55 = vld [vmem:[%s19190_s0 + $0x168] sm:$0xff] }
 0x5de   :  { %v14588_v21 = vld [vmem:[%s19190_s0 + $0x170] sm:$0xff] }
 0x5df   :  { %12317 = vst.msk [vmem:[#allocation3 + $0x110] sm:$0xff] %vm4517_vm10, %v12253_v32  ;;  %v12254_v6 = vadd.f32 %v14577_v25, %v12104_v22 }
 0x5e1   :  { %12318 = vst.msk [vmem:[#allocation3 + $0x118] sm:$0xff] %vm4517_vm10, %v12254_v6 }
 0x5e2   :  { %v11819_v42 = vpop.f32.mrb[136].mxu1 }
 0x5e3   :  { %v12109_v43 = vadd.f32 %v18598_v2, %v11819_v42  ;;  %v11821_v12 = vpop.f32.mrb[137].mxu1  ;;  %v14589_v42 = vld [vmem:[%s19190_s0 + $0x178] sm:$0xff] }
 0x5e4   :  { %v11822_v14 = vpop.f32.mrb[138].mxu1 }
 0x5e5   :  { %v12255_v51 = vadd.f32 %v14578_v56, %v12109_v43  ;;  %v12112_v19 = vadd.f32 %v18608_v26, %v11822_v14  ;;  %v11824_v27 = vpop.f32.mrb[139].mxu1 }
 0x5e7   :  { %12319 = vst.msk [vmem:[#allocation3 + $0x120] sm:$0xff] %vm4517_vm10, %v12255_v51  ;;  %v12256_v44 = vadd.f32 %v14579_v57, %v12112_v19  ;;  %v14590_v51 = vld [vmem:[%s19190_s0 + $0x180] sm:$0xff]  ;;  %v14591_v57 = vld [vmem:[%s19190_s0 + $0x188] sm:$0xff] }
 0x5e9   :  { %12320 = vst.msk [vmem:[#allocation3 + $0x128] sm:$0xff] %vm4517_vm10, %v12256_v44 }
 0x5ea   :  { %v11827_v2 = vpop.f32.mrb[140].mxu1 }
 0x5eb   :  { %v12117_v41 = vadd.f32 %v18594_v30, %v11827_v2  ;;  %v11829_v47 = vpop.f32.mrb[141].mxu1 }
 0x5ec   :  { %v11830_v54 = vpop.f32.mrb[142].mxu1 }
 0x5ed   :  { %v12257_v26 = vadd.f32 %v14580_v10, %v12117_v41  ;;  %v12120_v4 = vadd.f32 %v18604_v46, %v11830_v54  ;;  %v11832_v20 = vpop.f32.mrb[143].mxu1  ;;  %v14592_v54 = vld [vmem:[%s19190_s0 + $0x190] sm:$0xff] }
 0x5ef   :  { %12321 = vst.msk [vmem:[#allocation3 + $0x130] sm:$0xff] %vm4517_vm10, %v12257_v26  ;;  %v12258_v53 = vadd.f32 %v14581_v9, %v12120_v4  ;;  %v14593_v4 = vld [vmem:[%s19190_s0 + $0x198] sm:$0xff] }
 0x5f1   :  { %12322 = vst.msk [vmem:[#allocation3 + $0x138] sm:$0xff] %vm4517_vm10, %v12258_v53 }
 0x5f2   :  { %v11835_v30 = vpop.f32.mrb[144].mxu1 }
 0x5f3   :  { %v12125_v59 = vadd.f32 %v18640_v23, %v11835_v30  ;;  %v11837_v13 = vpop.f32.mrb[145].mxu1 }
 0x5f4   :  { %v11838_v62 = vpop.f32.mrb[146].mxu1 }
 0x5f5   :  { %v12259_v46 = vadd.f32 %v14582_v17, %v12125_v59  ;;  %v12128_v60 = vadd.f32 %v18652_v0, %v11838_v62  ;;  %v11840_v29 = vpop.f32.mrb[147].mxu1 }
 0x5f7   :  { %12323 = vst.msk [vmem:[#allocation3 + $0x140] sm:$0xff] %vm4517_vm10, %v12259_v46  ;;  %v12260_v38 = vadd.f32 %v14583_v11, %v12128_v60 }
 0x5f9   :  { %12324 = vst.msk [vmem:[#allocation3 + $0x148] sm:$0xff] %vm4517_vm10, %v12260_v38 }
 0x5fa   :  { %v11843_v23 = vpop.f32.mrb[148].mxu1 }
 0x5fb   :  { %v12133_v40 = vadd.f32 %v18636_v63, %v11843_v23  ;;  %v11845_v1 = vpop.f32.mrb[149].mxu1 }
 0x5fc   :  { %v11846_v48 = vpop.f32.mrb[150].mxu1 }
 0x5fd   :  { %v12261_v0 = vadd.f32 %v14584_v5, %v12133_v40  ;;  %v12136_v37 = vadd.f32 %v18643_v15, %v11846_v48  ;;  %v11848_v58 = vpop.f32.mrb[151].mxu1 }
 0x5ff   :  { %12325 = vst.msk [vmem:[#allocation3 + $0x150] sm:$0xff] %vm4517_vm10, %v12261_v0  ;;  %v12262_v8 = vadd.f32 %v14585_v3, %v12136_v37 }
 0x601   :  { %12326 = vst.msk [vmem:[#allocation3 + $0x158] sm:$0xff] %vm4517_vm10, %v12262_v8 }
 0x602   :  { %v11851_v63 = vpop.f32.mrb[152].mxu1 }
 0x603   :  { %v12141_v45 = vadd.f32 %v18675_v18, %v11851_v63  ;;  %v11853_v50 = vpop.f32.mrb[153].mxu1 }
 0x604   :  { %v11854_v31 = vpop.f32.mrb[154].mxu1 }
 0x605   :  { %v12263_v15 = vadd.f32 %v14586_v36, %v12141_v45  ;;  %v12144_v7 = vadd.f32 %v18680_v24, %v11854_v31  ;;  %v11856_v52 = vpop.f32.mrb[155].mxu1 }
 0x607   :  { %12327 = vst.msk [vmem:[#allocation3 + $0x160] sm:$0xff] %vm4517_vm10, %v12263_v15  ;;  %v12264_v34 = vadd.f32 %v14587_v55, %v12144_v7  ;;  %v14594_v15 = vld [vmem:[%s19190_s0 + $0x1b0] sm:$0xff] }
 0x609   :  { %12328 = vst.msk [vmem:[#allocation3 + $0x168] sm:$0xff] %vm4517_vm10, %v12264_v34  ;;  %v14595_v34 = vld [vmem:[%s19190_s0 + $0x1a0] sm:$0xff] }
 0x60a   :  { %v11859_v18 = vpop.f32.mrb[156].mxu1 }
 0x60b   :  { %v12149_v32 = vadd.f32 %v18673_v33, %v11859_v18  ;;  %v11861_v16 = vpop.f32.mrb[157].mxu1 }
 0x60c   :  { %v11862_v22 = vpop.f32.mrb[158].mxu1  ;;  %v14596_v16 = vld [vmem:[%s19190_s0 + $0x1b8] sm:$0xff] }
 0x60d   :  { %v12265_v24 = vadd.f32 %v14588_v21, %v12149_v32  ;;  %v12152_v25 = vadd.f32 %v18677_v39, %v11862_v22  ;;  %v11864_v6 = vpop.f32.mrb[159].mxu1  ;;  %v14597_v21 = vld [vmem:[%s19190_s0 + $0x1a8] sm:$0xff] }
 0x60f   :  { %12329 = vst.msk [vmem:[#allocation3 + $0x170] sm:$0xff] %vm4517_vm10, %v12265_v24  ;;  %v12266_v43 = vadd.f32 %v14589_v42, %v12152_v25 }
 0x611   :  { %12330 = vst.msk [vmem:[#allocation3 + $0x178] sm:$0xff] %vm4517_vm10, %v12266_v43 }
 0x612   :  { %v11867_v33 = vpop.f32.mrb[160].mxu1 }
 0x613   :  { %v12157_v12 = vadd.f32 %v18696_v61, %v11867_v33  ;;  %v11869_v14 = vpop.f32.mrb[161].mxu1 }
 0x614   :  { %v11870_v56 = vpop.f32.mrb[162].mxu1 }
 0x615   :  { %v12267_v39 = vadd.f32 %v14590_v51, %v12157_v12  ;;  %v12160_v19 = vadd.f32 %v18702_v35, %v11870_v56  ;;  %v11872_v27 = vpop.f32.mrb[163].mxu1  ;;  %v14598_v12 = vld [vmem:[%s19190_s0 + $0x1d0] sm:$0xff] }
 0x617   :  { %12331 = vst.msk [vmem:[#allocation3 + $0x180] sm:$0xff] %vm4517_vm10, %v12267_v39  ;;  %v12268_v44 = vadd.f32 %v14591_v57, %v12160_v19  ;;  %v14599_v39 = vld [vmem:[%s19190_s0 + $0x1c0] sm:$0xff]  ;;  %v14600_v57 = vld [vmem:[%s19190_s0 + $0x1d8] sm:$0xff] }
 0x619   :  { %12332 = vst.msk [vmem:[#allocation3 + $0x188] sm:$0xff] %vm4517_vm10, %v12268_v44 }
 0x61a   :  { %v11875_v61 = vpop.f32.mrb[164].mxu1 }
 0x61b   :  { %v12165_v2 = vadd.f32 %v18694_v28, %v11875_v61  ;;  %v11877_v41 = vpop.f32.mrb[165].mxu1  ;;  %v14601_v61 = vld [vmem:[%s19190_s0 + $0x1c8] sm:$0xff] }
 0x61c   :  { %v11878_v47 = vpop.f32.mrb[166].mxu1 }
 0x61d   :  { %v12269_v35 = vadd.f32 %v14592_v54, %v12165_v2  ;;  %v12168_v10 = vadd.f32 %v18699_v49, %v11878_v47  ;;  %v11880_v26 = vpop.f32.mrb[167].mxu1 }
 0x61e   :  { %v14602_v26 = vld [vmem:[%s19190_s0 + $0x1f0] sm:$0xff] }
 0x61f   :  { %12333 = vst.msk [vmem:[#allocation3 + $0x190] sm:$0xff] %vm4517_vm10, %v12269_v35  ;;  %v12270_v20 = vadd.f32 %v14593_v4, %v12168_v10 }
 0x621   :  { %12334 = vst.msk [vmem:[#allocation3 + $0x198] sm:$0xff] %vm4517_vm10, %v12270_v20 }
 0x622   :  { %v11883_v28 = vpop.f32.mrb[168].mxu1 }
 0x623   :  { %v11885_v9 = vpop.f32.mrb[169].mxu1 }
 0x624   :  { %v11886_v53 = vpop.f32.mrb[170].mxu1  ;;  %v14603_v9 = vld [vmem:[%s19190_s0 + $0x1e0] sm:$0xff] }
 0x625   :  { %v11888_v30 = vpop.f32.mrb[171].mxu1 }
 0x62a   :  { %v11891_v59 = vpop.f32.mrb[172].mxu1 }
 0x62b   :  { %v11893_v13 = vpop.f32.mrb[173].mxu1 }
 0x62c   :  { %v11894_v62 = vpop.f32.mrb[174].mxu1 }
 0x62d   :  { %v11896_v17 = vpop.f32.mrb[175].mxu1 }
 0x632   :  { %v11899_v46 = vpop.f32.mrb[176].mxu1 }
 0x633   :  { %v11901_v49 = vpop.f32.mrb[177].mxu1 }
 0x634   :  { %v11902_v60 = vpop.f32.mrb[178].mxu1 }
 0x635   :  { %v11904_v29 = vpop.f32.mrb[179].mxu1 }
 0x63a   :  { %v11907_v11 = vpop.f32.mrb[180].mxu1 }
 0x63b   :  { %v11909_v38 = vpop.f32.mrb[181].mxu1 }
 0x63c   :  { %v11910_v23 = vpop.f32.mrb[182].mxu1 }
 0x63d   :  { %v11912_v40 = vpop.f32.mrb[183].mxu1 }
 0x642   :  { %v11915_v1 = vpop.f32.mrb[184].mxu1 }
 0x643   :  { %v11917_v48 = vpop.f32.mrb[185].mxu1 }
 0x644   :  { %v11918_v5 = vpop.f32.mrb[186].mxu1 }
 0x645   :  { %v11920_v0 = vpop.f32.mrb[187].mxu1 }
 0x64a   :  { %v11923_v37 = vpop.f32.mrb[188].mxu1 }
 0x64b   :  { %v11925_v58 = vpop.f32.mrb[189].mxu1 }
 0x64c   :  { %v11926_v3 = vpop.f32.mrb[190].mxu1 }
 0x64d   :  { %v11928_v8 = vpop.f32.mrb[191].mxu1 }
 0x652   :  { %v13409_v63 = vpop.f32.mrb[192].mxu1 }
 0x653   :  { %v12181_v45 = vadd.f32 %v13409_v63, %v11891_v59  ;;  %v12172_v50 = vpop.f32.mrb[193].mxu1  ;;  %v14604_v59 = vld [vmem:[%s19190_s0 + $0x1f8] sm:$0xff] }
 0x654   :  { %v12173_v31 = vadd.f32 %v12172_v50, %v11883_v28  ;;  %v13410_v36 = vpop.f32.mrb[194].mxu1 }
 0x655   :  { %v12273_v7 = vadd.f32 %v14594_v15, %v12181_v45  ;;  %v12184_v52 = vadd.f32 %v13410_v36, %v11894_v62  ;;  %v12175_v55 = vpop.f32.mrb[195].mxu1  ;;  %v14605_v62 = vld [vmem:[%s19190_s0 + $0x1e8] sm:$0xff] }
 0x656   :  { %v12271_v18 = vadd.f32 %v14595_v34, %v12173_v31  ;;  %v12176_v32 = vadd.f32 %v12175_v55, %v11886_v53 }
 0x657   :  { %12337 = vst.msk [vmem:[#allocation3 + $0x1b0] sm:$0xff] %vm4517_vm10, %v12273_v7  ;;  %v12274_v22 = vadd.f32 %v14596_v16, %v12184_v52 }
 0x658   :  { %12335 = vst.msk [vmem:[#allocation3 + $0x1a0] sm:$0xff] %vm4517_vm10, %v12271_v18  ;;  %v12272_v24 = vadd.f32 %v14597_v21, %v12176_v32 }
 0x659   :  { %12338 = vst.msk [vmem:[#allocation3 + $0x1b8] sm:$0xff] %vm4517_vm10, %v12274_v22 }
 0x65a   :  { %12336 = vst.msk [vmem:[#allocation3 + $0x1a8] sm:$0xff] %vm4517_vm10, %v12272_v24  ;;  %v13413_v25 = vpop.f32.mrb[196].mxu1 }
 0x65b   :  { %v12197_v6 = vadd.f32 %v13413_v25, %v11907_v11  ;;  %v12188_v42 = vpop.f32.mrb[197].mxu1 }
 0x65c   :  { %v12189_v43 = vadd.f32 %v12188_v42, %v11899_v46  ;;  %v13414_v33 = vpop.f32.mrb[198].mxu1 }
 0x65d   :  { %v12277_v14 = vadd.f32 %v14598_v12, %v12197_v6  ;;  %v12200_v56 = vadd.f32 %v13414_v33, %v11910_v23  ;;  %v12191_v51 = vpop.f32.mrb[199].mxu1 }
 0x65e   :  { %v12275_v19 = vadd.f32 %v14599_v39, %v12189_v43  ;;  %v12192_v27 = vadd.f32 %v12191_v51, %v11902_v60 }
 0x65f   :  { %12341 = vst.msk [vmem:[#allocation3 + $0x1d0] sm:$0xff] %vm4517_vm10, %v12277_v14  ;;  %v12278_v44 = vadd.f32 %v14600_v57, %v12200_v56 }
 0x660   :  { %12339 = vst.msk [vmem:[#allocation3 + $0x1c0] sm:$0xff] %vm4517_vm10, %v12275_v19  ;;  %v12276_v2 = vadd.f32 %v14601_v61, %v12192_v27 }
 0x661   :  { %12342 = vst.msk [vmem:[#allocation3 + $0x1d8] sm:$0xff] %vm4517_vm10, %v12278_v44 }
 0x662   :  { %12340 = vst.msk [vmem:[#allocation3 + $0x1c8] sm:$0xff] %vm4517_vm10, %v12276_v2  ;;  %v13417_v41 = vpop.f32.mrb[200].mxu1 }
 0x663   :  { %v12213_v47 = vadd.f32 %v13417_v41, %v11923_v37  ;;  %v12204_v54 = vpop.f32.mrb[201].mxu1 }
 0x664   :  { %v12205_v35 = vadd.f32 %v12204_v54, %v11915_v1  ;;  %v13418_v10 = vpop.f32.mrb[202].mxu1 }
 0x665   :  { %v12281_v4 = vadd.f32 %v14602_v26, %v12213_v47  ;;  %v12216_v20 = vadd.f32 %v13418_v10, %v11926_v3  ;;  %v12207_v28 = vpop.f32.mrb[203].mxu1 }
 0x666   :  { %v12279_v53 = vadd.f32 %v14603_v9, %v12205_v35  ;;  %v12208_v30 = vadd.f32 %v12207_v28, %v11918_v5 }
 0x667   :  { %12345 = vst.msk [vmem:[#allocation3 + $0x1f0] sm:$0xff] %vm4517_vm10, %v12281_v4  ;;  %v12282_v13 = vadd.f32 %v14604_v59, %v12216_v20 }
 0x668   :  { %12343 = vst.msk [vmem:[#allocation3 + $0x1e0] sm:$0xff] %vm4517_vm10, %v12279_v53  ;;  %v12280_v17 = vadd.f32 %v14605_v62, %v12208_v30 }
 0x669   :  { %12346 = vst.msk [vmem:[#allocation3 + $0x1f8] sm:$0xff] %vm4517_vm10, %v12282_v13 }
 0x66a   :  { %12344 = vst.msk [vmem:[#allocation3 + $0x1e8] sm:$0xff] %vm4517_vm10, %v12280_v17 }
 0x66b   :  { %14617 = shalt.err (!%p14614_p4)
}
 0x66c   :  { %s14618_s3 = scalar_lea.hbm %s19197_s7, 8192 }
 0x66d   :  { %p14619_p5 = scmp.ne.s32.totalorder %s19197_s7, %s14618_s3  ;;  %p14622_p6 = scmp.lt.u32.totalorder %s14618_s3, %s19197_s7 }
 0x66f   :  { %p14624_p7 = pnand %p14622_p6, %p14619_p5 }
 0x671   :  { %14627 = shalt.err (!%p14624_p7)
}
 0x672   :  { %s14633_s9 = smov 128   ;;  %s14634_s1 = smov 8  }
 0x673   :  { %12358 = dma.vmem_to_hbm [thread:$0]  %s12353_s20, 8192, %s19197_s7, [#allocation4], %s14633_s9, %s14633_s9, %s14634_s1  }
 0x674   :  { %14628 = dma.done.wait [#allocation4], 8192  }
 0x675   :  { %14629 = vsyncadd [#allocation4], 4294959104 }
 0x676   :  { %12362 = vsyncpa [#allocation4], 1 }

</bundles_post_ra>
